<compile_context>
chip_gen: v5e
topology: v5e:2x2
jax: 0.10.0
libtpu: 0.0.40
codegen_flags: <defaults>
</compile_context>

<pallas_src>
import functools
import numpy as np
import jax
import jax.numpy as jnp
from jax.experimental import pallas as pl
from jax.experimental.pallas import tpu as pltpu


# Set to jnp.bfloat16 on v6e/v7x for higher MXU throughput; f32 keeps exact reference semantics.
MATMUL_INPUT_DTYPE = jnp.float32


# ----------------------------------------------------------------------------
# In-kernel math helpers
# ----------------------------------------------------------------------------
def _erf_f32(x):
  # Cephes-style f32 erf rational approximation (matches nn.GELU's erf-based GELU at f32).
  ka = (0.00022905065861350646, 0.0034082910107109506, 0.050955695062380861,
        0.18520832239976145, 1.128379143519084)
  kb = (-1.1791602954361697e-7, 0.000023547966471313185, 0.0010179625278914885,
        0.014070470171167667, 0.11098505178285362, 0.49746925110067538, 1.0)
  x = jnp.clip(x, -4.0, 4.0)
  x2 = x * x
  p = jnp.full_like(x2, ka[0])
  for c in ka[1:]:
    p = p * x2 + c
  q = jnp.full_like(x2, kb[0])
  for c in kb[1:]:
    q = q * x2 + c
  return x * p / q


def _gelu_exact(x):
  return 0.5 * x * (1.0 + _erf_f32(x * 0.7071067811865476))


def _softmax_last(a):
  m = jnp.max(a, axis=-1, keepdims=True)
  e = jnp.exp(a - m)
  return e / jnp.sum(e, axis=-1, keepdims=True)


def _layernorm(x, g, b):
  mu = jnp.mean(x, axis=-1, keepdims=True)
  xc = x - mu
  var = jnp.mean(xc * xc, axis=-1, keepdims=True)
  return xc * jax.lax.rsqrt(var + 1e-5) * g + b


def _mm(a, b):
  # f32 accumulation always; operand dtype is a perf knob (bf16 on v6e/v7x).
  return jnp.dot(a.astype(MATMUL_INPUT_DTYPE), b.astype(MATMUL_INPUT_DTYPE),
                 preferred_element_type=jnp.float32)


# ----------------------------------------------------------------------------
# Fused Swin-block Pallas kernels (window layout, W_BLK windows per grid step)
# ----------------------------------------------------------------------------
def _self_block_kernel(x_ref, g1_ref, b1_ref, wqkv_ref, bqkv_ref, wproj_ref,
                       bproj_ref, bias_ref, g2_ref, b2_ref, w1_ref, b1m_ref,
                       w2_ref, b2m_ref, o_ref, *, num_heads, win_n, scale):
  M, C = x_ref.shape                       # M = W_BLK * N tokens
  wb = M // win_n
  hd = C // num_heads

  x = x_ref[...].astype(jnp.float32)       # raw tokens (residual source)
  xn = _layernorm(x, g1_ref[...], b1_ref[...])                       # LN1

  # ---- windowed multi-head self-attention ----
  qkv = _mm(xn, wqkv_ref[...]) + bqkv_ref[...]                       # (M, 3C)
  heads = []
  for h in range(num_heads):
    qh = (qkv[:, h * hd:(h + 1) * hd] * scale).reshape(wb, win_n, hd)
    kh = qkv[:, C + h * hd:C + (h + 1) * hd].reshape(wb, win_n, hd)
    vh = qkv[:, 2 * C + h * hd:2 * C + (h + 1) * hd].reshape(wb, win_n, hd)
    a = jnp.einsum('bqd,bkd->bqk', qh, kh,
                   preferred_element_type=jnp.float32)               # (wb, N, N)
    a = _softmax_last(a + bias_ref[h])
    heads.append(jnp.einsum('bqk,bkd->bqd', a, vh,
                            preferred_element_type=jnp.float32))     # (wb, N, hd)
  ctx = jnp.concatenate(heads, axis=-1).reshape(M, C)
  y = x + _mm(ctx, wproj_ref[...]) + bproj_ref[...]                  # attn residual

  # ---- LN2 + MLP + residual ----
  yn = _layernorm(y, g2_ref[...], b2_ref[...])
  hmid = _gelu_exact(_mm(yn, w1_ref[...]) + b1m_ref[...])
  o_ref[...] = (y + _mm(hmid, w2_ref[...]) + b2m_ref[...]).astype(o_ref.dtype)


def _cross_block_kernel(x_ref, ref_ref, g1_ref, b1_ref, wq_ref, bq_ref,
                        wkv_ref, bkv_ref, wproj_ref, bproj_ref, bias_ref,
                        g2_ref, b2_ref, w1_ref, b1m_ref, w2_ref, b2m_ref,
                        o_ref, *, num_heads, win_n, scale):
  M, C = x_ref.shape
  R = ref_ref.shape[0]
  wb = M // win_n
  hd = C // num_heads

  x = x_ref[...].astype(jnp.float32)
  xn = _layernorm(x, g1_ref[...], b1_ref[...])                       # LN1 (x only)

  q = _mm(xn, wq_ref[...]) + bq_ref[...]                             # (M, C)
  # Refs are NOT normalized in the reference module.
  kvs = [_mm(ref_ref[r].astype(jnp.float32), wkv_ref[...]) + bkv_ref[...]
         for r in range(R)]                                          # R x (M, 2C)

  heads = []
  for h in range(num_heads):
    qh = (q[:, h * hd:(h + 1) * hd] * scale).reshape(wb, win_n, hd)
    kh = jnp.concatenate(
        [kvs[r][:, h * hd:(h + 1) * hd].reshape(wb, win_n, hd) for r in range(R)],
        axis=1)                                                      # (wb, R*N, hd)
    vh = jnp.concatenate(
        [kvs[r][:, C + h * hd:C + (h + 1) * hd].reshape(wb, win_n, hd)
         for r in range(R)], axis=1)
    a = jnp.einsum('bqd,bkd->bqk', qh, kh,
                   preferred_element_type=jnp.float32)               # (wb, N, R*N)
    a = _softmax_last(a + bias_ref[h])                               # bias pre-tiled to (N, R*N)
    heads.append(jnp.einsum('bqk,bkd->bqd', a, vh,
                            preferred_element_type=jnp.float32))
  ctx = jnp.concatenate(heads, axis=-1).reshape(M, C)
  y = x + _mm(ctx, wproj_ref[...]) + bproj_ref[...]

  yn = _layernorm(y, g2_ref[...], b2_ref[...])
  hmid = _gelu_exact(_mm(yn, w1_ref[...]) + b1m_ref[...])
  o_ref[...] = (y + _mm(hmid, w2_ref[...]) + b2m_ref[...]).astype(o_ref.dtype)


# ----------------------------------------------------------------------------
# pallas_call wrappers (window-layout token matrices)
# ----------------------------------------------------------------------------
def _pick_window_block(num_windows, win_n, target_rows=512):
  """Largest divisor of num_windows with <= target_rows tokens per step, preferring >=2 steps."""
  best = 1
  for d in range(1, num_windows + 1):
    if num_windows % d == 0 and d * win_n <= target_rows:
      best = d
  if num_windows // best < 2:            # keep >= 2 grid steps for v7x megacore when possible
    for d in range(best - 1, 0, -1):
      if num_windows % d == 0 and num_windows // d >= 2:
        best = d
        break
  return best


def swin_self_block_windows(xw, p, num_heads, win_n, w_blk):
  Btok, C = xw.shape
  M = w_blk * win_n
  hidden = p['w1'].shape[1]
  scale = (C // num_heads) ** -0.5
  const2 = lambda i: (0, 0)
  kernel = functools.partial(_self_block_kernel, num_heads=num_heads,
                             win_n=win_n, scale=scale)
  return pl.pallas_call(
      kernel,
      out_shape=jax.ShapeDtypeStruct((Btok, C), xw.dtype),
      grid=(Btok // M,),
      in_specs=[
          pl.BlockSpec((M, C), lambda i: (i, 0)),                    # x (window tokens)
          pl.BlockSpec((1, C), const2),                              # norm1 gamma
          pl.BlockSpec((1, C), const2),                              # norm1 beta
          pl.BlockSpec((C, 3 * C), const2),                          # wqkv
          pl.BlockSpec((1, 3 * C), const2),                          # bqkv
          pl.BlockSpec((C, C), const2),                              # wproj
          pl.BlockSpec((1, C), const2),                              # bproj
          pl.BlockSpec((num_heads, win_n, win_n), lambda i: (0, 0, 0)),  # rel-pos bias
          pl.BlockSpec((1, C), const2),                              # norm2 gamma
          pl.BlockSpec((1, C), const2),                              # norm2 beta
          pl.BlockSpec((C, hidden), const2),                         # mlp w1
          pl.BlockSpec((1, hidden), const2),                         # mlp b1
          pl.BlockSpec((hidden, C), const2),                         # mlp w2
          pl.BlockSpec((1, C), const2),                              # mlp b2
      ],
      out_specs=pl.BlockSpec((M, C), lambda i: (i, 0)),
      compiler_params=pltpu.CompilerParams(dimension_semantics=("parallel",)),
  )(xw, p['norm1_g'], p['norm1_b'], p['wqkv'], p['bqkv'], p['wproj'], p['bproj'],
    p['rel_bias'], p['norm2_g'], p['norm2_b'], p['w1'], p['b1'], p['w2'], p['b2'])


def swin_cross_block_windows(xw, refw, p, num_heads, win_n, w_blk):
  Btok, C = xw.shape
  R = refw.shape[0]
  M = w_blk * win_n
  hidden = p['w1'].shape[1]
  scale = (C // num_heads) ** -0.5
  # Pre-tile the relative-position bias along the key axis (host side) so the kernel
  # never concatenates bias blocks along lanes.
  bias_cat = jnp.tile(p['rel_bias'], (1, 1, R))                      # (nH, N, R*N)
  const2 = lambda i: (0, 0)
  kernel = functools.partial(_cross_block_kernel, num_heads=num_heads,
                             win_n=win_n, scale=scale)
  return pl.pallas_call(
      kernel,
      out_shape=jax.ShapeDtypeStruct((Btok, C), xw.dtype),
      grid=(Btok // M,),
      in_specs=[
          pl.BlockSpec((M, C), lambda i: (i, 0)),                    # x (window tokens)
          pl.BlockSpec((R, M, C), lambda i: (0, i, 0)),              # ref window tokens
          pl.BlockSpec((1, C), const2),                              # norm1 gamma
          pl.BlockSpec((1, C), const2),                              # norm1 beta
          pl.BlockSpec((C, C), const2),                              # wq
          pl.BlockSpec((1, C), const2),                              # bq
          pl.BlockSpec((C, 2 * C), const2),                          # wkv
          pl.BlockSpec((1, 2 * C), const2),                          # bkv
          pl.BlockSpec((C, C), const2),                              # wproj
          pl.BlockSpec((1, C), const2),                              # bproj
          pl.BlockSpec((num_heads, win_n, R * win_n), lambda i: (0, 0, 0)),  # tiled bias
          pl.BlockSpec((1, C), const2),                              # norm2 gamma
          pl.BlockSpec((1, C), const2),                              # norm2 beta
          pl.BlockSpec((C, hidden), const2),                         # mlp w1
          pl.BlockSpec((1, hidden), const2),                         # mlp b1
          pl.BlockSpec((hidden, C), const2),                         # mlp w2
          pl.BlockSpec((1, C), const2),                              # mlp b2
      ],
      out_specs=pl.BlockSpec((M, C), lambda i: (i, 0)),
      compiler_params=pltpu.CompilerParams(dimension_semantics=("parallel",)),
  )(xw, refw, p['norm1_g'], p['norm1_b'], p['wq'], p['bq'], p['wkv'], p['bkv'],
    p['wproj'], p['bproj'], bias_cat, p['norm2_g'], p['norm2_b'],
    p['w1'], p['b1'], p['w2'], p['b2'])


# ----------------------------------------------------------------------------
# Plain-JAX glue: window partition / reverse (once per decoder block)
# ----------------------------------------------------------------------------
def window_partition(x, ws):
  B, H, W, C = x.shape
  x = x.reshape(B, H // ws, ws, W // ws, ws, C)
  return x.transpose(0, 1, 3, 2, 4, 5).reshape(-1, ws, ws, C)


def window_reverse(windows, ws, H, W):
  B = windows.shape[0] // ((H // ws) * (W // ws))
  x = windows.reshape(B, H // ws, W // ws, ws, ws, -1)
  return x.transpose(0, 1, 3, 2, 4, 5).reshape(B, H, W, -1)


def _relative_position_index(ws):
  coords = np.stack(np.meshgrid(np.arange(ws), np.arange(ws), indexing='ij'))
  coords_flatten = coords.reshape(2, -1)
  rel = coords_flatten[:, :, None] - coords_flatten[:, None, :]
  rel = rel.transpose(1, 2, 0).astype(np.int64)
  rel[:, :, 0] += ws - 1
  rel[:, :, 1] += ws - 1
  rel[:, :, 0] *= 2 * ws - 1
  return rel.sum(-1)                                                 # (ws*ws, ws*ws)


def swin_decoder_block(x, refs, x_size, sp, cp, num_heads, ws):
  H, W = x_size
  B, L, C = x.shape
  assert L == H * W, 'input feature has wrong size'
  N = ws * ws
  # Window-partition once; both sub-blocks run in window layout (shift_size == 0 so the
  # partitions coincide and LN / MLP / residuals commute with the token permutation).
  xw = window_partition(x.reshape(B, H, W, C), ws).reshape(-1, C)    # (B_*N, C)
  nw = xw.shape[0] // N
  refw = jnp.stack(
      [window_partition(r.reshape(B, H, W, C), ws).reshape(-1, C) for r in refs],
      axis=0)                                                        # (R, B_*N, C)
  w_blk = _pick_window_block(nw, N)
  xw = swin_self_block_windows(xw, sp, num_heads, N, w_blk)
  xw = swin_cross_block_windows(xw, refw, cp, num_heads, N, w_blk)
  out = window_reverse(xw.reshape(-1, ws, ws, C), ws, H, W).reshape(B, L, C)
  return out


# ----------------------------------------------------------------------------
# Pure-JAX reference (straight transcription of the PyTorch forward, eval mode)
# ----------------------------------------------------------------------------
def _reference_decoder_block(x, refs, x_size, sp, cp, num_heads, ws):
  def ln(t, g, b):
    mu = t.mean(-1, keepdims=True)
    v = ((t - mu) ** 2).mean(-1, keepdims=True)
    return (t - mu) * jax.lax.rsqrt(v + 1e-5) * g[0] + b[0]

  def mha_self(xw, p):
    B_, N, C = xw.shape
    hd = C // num_heads
    sc = hd ** -0.5
    qkv = xw @ p['wqkv'] + p['bqkv'][0]
    qkv = qkv.reshape(B_, N, 3, num_heads, hd).transpose(2, 0, 3, 1, 4)
    q, k, v = qkv[0] * sc, qkv[1], qkv[2]
    a = q @ k.transpose(0, 1, 3, 2) + p['rel_bias'][None]
    a = jax.nn.softmax(a, -1)
    o = (a @ v).transpose(0, 2, 1, 3).reshape(B_, N, C)
    return o @ p['wproj'] + p['bproj'][0]

  def mha_cross(xw, refws, p):
    B_, N, C = xw.shape
    hd = C // num_heads
    sc = hd ** -0.5
    q = (xw @ p['wq'] + p['bq'][0]).reshape(B_, N, num_heads, hd).transpose(0, 2, 1, 3) * sc
    ks, vs = [], []
    for rw in refws:
      kv = (rw @ p['wkv'] + p['bkv'][0]).reshape(B_, N, 2, num_heads, hd).transpose(2, 0, 3, 1, 4)
      ks.append(kv[0]); vs.append(kv[1])
    attns = [q @ k.transpose(0, 1, 3, 2) + p['rel_bias'][None] for k in ks]
    a = jax.nn.softmax(jnp.concatenate(attns, -1), -1)
    v = jnp.concatenate(vs, 2)
    o = (a @ v).transpose(0, 2, 1, 3).reshape(B_, N, C)
    return o @ p['wproj'] + p['bproj'][0]

  def mlp(t, p):
    return _gelu_exact(t @ p['w1'] + p['b1'][0]) @ p['w2'] + p['b2'][0]

  H, W = x_size
  B, L, C = x.shape
  N = ws * ws
  # self block
  sc_ = x
  xn = ln(x, sp['norm1_g'], sp['norm1_b']).reshape(B, H, W, C)
  xw = window_partition(xn, ws).reshape(-1, N, C)
  aw = mha_self(xw, sp).reshape(-1, ws, ws, C)
  x = sc_ + window_reverse(aw, ws, H, W).reshape(B, L, C)
  x = x + mlp(ln(x, sp['norm2_g'], sp['norm2_b']), sp)
  # cross block
  sc_ = x
  xn = ln(x, cp['norm1_g'], cp['norm1_b']).reshape(B, H, W, C)
  xw = window_partition(xn, ws).reshape(-1, N, C)
  refws = [window_partition(r.reshape(B, H, W, C), ws).reshape(-1, N, C) for r in refs]
  aw = mha_cross(xw, refws, cp).reshape(-1, ws, ws, C)
  x = sc_ + window_reverse(aw, ws, H, W).reshape(B, L, C)
  x = x + mlp(ln(x, cp['norm2_g'], cp['norm2_b']), cp)
  return x


# ----------------------------------------------------------------------------
# Deterministic parameter init
# ----------------------------------------------------------------------------
def _linear(key, fan_in, fan_out):
  w = 0.02 * jax.random.normal(key, (fan_in, fan_out), jnp.float32)
  b = jnp.zeros((1, fan_out), jnp.float32)
  return w, b


def init_block_params(key, C, num_heads, ws, hidden, cross):
  N = ws * ws
  ks = jax.random.split(key, 6)
  p = {'norm1_g': jnp.ones((1, C), jnp.float32), 'norm1_b': jnp.zeros((1, C), jnp.float32),
       'norm2_g': jnp.ones((1, C), jnp.float32), 'norm2_b': jnp.zeros((1, C), jnp.float32)}
  if cross:
    p['wq'], p['bq'] = _linear(ks[0], C, C)
    p['wkv'], p['bkv'] = _linear(ks[1], C, 2 * C)
  else:
    p['wqkv'], p['bqkv'] = _linear(ks[0], C, 3 * C)
  p['wproj'], p['bproj'] = _linear(ks[2], C, C)
  table = 0.02 * jax.random.normal(ks[3], ((2 * ws - 1) * (2 * ws - 1), num_heads),
                                   jnp.float32)
  idx = _relative_position_index(ws)
  bias = table[idx.reshape(-1)].reshape(N, N, num_heads).transpose(2, 0, 1)
  p['rel_bias'] = jnp.asarray(bias, jnp.float32)
  p['w1'], p['b1'] = _linear(ks[4], C, hidden)
  p['w2'], p['b2'] = _linear(ks[5], hidden, C)
  return p


# ----------------------------------------------------------------------------
if __name__ == "__main__":
  B, H, W, C = 2, 8, 8, 32
  num_heads, ws, num_ref, mlp_ratio = 4, 4, 2, 4
  L = H * W
  hidden = C * mlp_ratio

  key = jax.random.PRNGKey(0)
  kx, kr, ksf, kcr = jax.random.split(key, 4)
  x = jax.random.normal(kx, (B, L, C), jnp.float32)
  refs = tuple(jax.random.normal(k, (B, L, C), jnp.float32)
               for k in jax.random.split(kr, num_ref))

  s_params = init_block_params(ksf, C, num_heads, ws, hidden, cross=False)
  c_params = init_block_params(kcr, C, num_heads, ws, hidden, cross=True)

  fwd = jax.jit(functools.partial(swin_decoder_block, x_size=(H, W),
                                  sp=s_params, cp=c_params,
                                  num_heads=num_heads, ws=ws))
  out = jax.block_until_ready(fwd(x, refs))
  assert out.shape == (B, L, C), out.shape
  assert bool(jnp.all(jnp.isfinite(out)))

  # Sanity check against a pure-JAX transcription of the PyTorch forward.
  ref_out = _reference_decoder_block(x, refs, (H, W), s_params, c_params, num_heads, ws)
  err = float(jnp.max(jnp.abs(out - ref_out)))
  assert err < 5e-2, f"mismatch vs reference: max abs err = {err}"

  print("KERNEL_OK")
</pallas_src>

<mosaic_0001>
module attributes {stable_mosaic.version = 11 : i64} {
  func.func @_self_block_kernel(%arg0: i32, %arg1: memref<64x32xf32, #tpu.memory_space<vmem>>, %arg2: memref<1x32xf32, #tpu.memory_space<vmem>>, %arg3: memref<1x32xf32, #tpu.memory_space<vmem>>, %arg4: memref<32x96xf32, #tpu.memory_space<vmem>>, %arg5: memref<1x96xf32, #tpu.memory_space<vmem>>, %arg6: memref<32x32xf32, #tpu.memory_space<vmem>>, %arg7: memref<1x32xf32, #tpu.memory_space<vmem>>, %arg8: memref<4x16x16xf32, #tpu.memory_space<vmem>>, %arg9: memref<1x32xf32, #tpu.memory_space<vmem>>, %arg10: memref<1x32xf32, #tpu.memory_space<vmem>>, %arg11: memref<32x128xf32, #tpu.memory_space<vmem>>, %arg12: memref<1x128xf32, #tpu.memory_space<vmem>>, %arg13: memref<128x32xf32, #tpu.memory_space<vmem>>, %arg14: memref<1x32xf32, #tpu.memory_space<vmem>>, %arg15: memref<64x32xf32, #tpu.memory_space<vmem>>) attributes {dimension_semantics = [#tpu.dimension_semantics<parallel>], iteration_bounds = array<i64: 2>, scalar_prefetch = 0 : i64, scratch_operands = 0 : i64, tpu.core_type = #tpu.core_type<tc>, window_params = [{transform_indices = @transform_0, window_bounds = array<i64: 64, 32>}, {pipeline_mode = #tpu.pipeline_mode<synchronous>, transform_indices = @transform_1, window_bounds = array<i64: 1, 32>}, {pipeline_mode = #tpu.pipeline_mode<synchronous>, transform_indices = @transform_2, window_bounds = array<i64: 1, 32>}, {pipeline_mode = #tpu.pipeline_mode<synchronous>, transform_indices = @transform_3, window_bounds = array<i64: 32, 96>}, {pipeline_mode = #tpu.pipeline_mode<synchronous>, transform_indices = @transform_4, window_bounds = array<i64: 1, 96>}, {pipeline_mode = #tpu.pipeline_mode<synchronous>, transform_indices = @transform_5, window_bounds = array<i64: 32, 32>}, {pipeline_mode = #tpu.pipeline_mode<synchronous>, transform_indices = @transform_6, window_bounds = array<i64: 1, 32>}, {pipeline_mode = #tpu.pipeline_mode<synchronous>, transform_indices = @transform_7, window_bounds = array<i64: 4, 16, 16>}, {pipeline_mode = #tpu.pipeline_mode<synchronous>, transform_indices = @transform_8, window_bounds = array<i64: 1, 32>}, {pipeline_mode = #tpu.pipeline_mode<synchronous>, transform_indices = @transform_9, window_bounds = array<i64: 1, 32>}, {pipeline_mode = #tpu.pipeline_mode<synchronous>, transform_indices = @transform_10, window_bounds = array<i64: 32, 128>}, {pipeline_mode = #tpu.pipeline_mode<synchronous>, transform_indices = @transform_11, window_bounds = array<i64: 1, 128>}, {pipeline_mode = #tpu.pipeline_mode<synchronous>, transform_indices = @transform_12, window_bounds = array<i64: 128, 32>}, {pipeline_mode = #tpu.pipeline_mode<synchronous>, transform_indices = @transform_13, window_bounds = array<i64: 1, 32>}, {transform_indices = @transform_14, window_bounds = array<i64: 64, 32>}]} {
    %c0 = arith.constant 0 : index
    %c0_0 = arith.constant 0 : index
    %0 = vector.load %arg1[%c0, %c0_0] : memref<64x32xf32, #tpu.memory_space<vmem>>, vector<64x32xf32>
    %c0_1 = arith.constant 0 : index
    %c0_2 = arith.constant 0 : index
    %1 = vector.load %arg2[%c0_1, %c0_2] : memref<1x32xf32, #tpu.memory_space<vmem>>, vector<1x32xf32>
    %c0_3 = arith.constant 0 : index
    %c0_4 = arith.constant 0 : index
    %2 = vector.load %arg3[%c0_3, %c0_4] : memref<1x32xf32, #tpu.memory_space<vmem>>, vector<1x32xf32>
    %cst = arith.constant dense<0.000000e+00> : vector<64xf32>
    %3 = vector.multi_reduction <add>, %0, %cst [1] : vector<64x32xf32> to vector<64xf32>
    %4 = vector.shape_cast %3 : vector<64xf32> to vector<64x1xf32>
    %cst_5 = arith.constant 3.200000e+01 : f32
    %5 = vector.broadcast %cst_5 : f32 to vector<64x1xf32>
    %6 = arith.divf %4, %5 : vector<64x1xf32>
    %7 = vector.broadcast %6 : vector<64x1xf32> to vector<64x32xf32>
    %8 = arith.subf %0, %7 : vector<64x32xf32>
    %9 = arith.mulf %8, %8 : vector<64x32xf32>
    %cst_6 = arith.constant dense<0.000000e+00> : vector<64xf32>
    %10 = vector.multi_reduction <add>, %9, %cst_6 [1] : vector<64x32xf32> to vector<64xf32>
    %11 = vector.shape_cast %10 : vector<64xf32> to vector<64x1xf32>
    %cst_7 = arith.constant 3.200000e+01 : f32
    %12 = vector.broadcast %cst_7 : f32 to vector<64x1xf32>
    %13 = arith.divf %11, %12 : vector<64x1xf32>
    %cst_8 = arith.constant 9.99999974E-6 : f32
    %14 = vector.broadcast %cst_8 : f32 to vector<64x1xf32>
    %15 = arith.addf %13, %14 : vector<64x1xf32>
    %16 = math.rsqrt %15 : vector<64x1xf32>
    %17 = vector.broadcast %16 : vector<64x1xf32> to vector<64x32xf32>
    %18 = arith.mulf %8, %17 : vector<64x32xf32>
    %19 = vector.broadcast %1 : vector<1x32xf32> to vector<64x32xf32>
    %20 = arith.mulf %18, %19 : vector<64x32xf32>
    %21 = vector.broadcast %2 : vector<1x32xf32> to vector<64x32xf32>
    %22 = arith.addf %20, %21 : vector<64x32xf32>
    %c0_9 = arith.constant 0 : index
    %c0_10 = arith.constant 0 : index
    %23 = vector.load %arg4[%c0_9, %c0_10] : memref<32x96xf32, #tpu.memory_space<vmem>>, vector<32x96xf32>
    %cst_11 = arith.constant dense<0.000000e+00> : vector<64x96xf32>
    %24 = tpu.matmul %22, %23, %cst_11 {dimension_numbers = #tpu.dot_dimension_numbers<[1], [0], [0], [1], [0, 0, 1, 1], [], []>} : vector<64x32xf32>, vector<32x96xf32>, vector<64x96xf32> -> vector<64x96xf32>
    %c0_12 = arith.constant 0 : index
    %c0_13 = arith.constant 0 : index
    %25 = vector.load %arg5[%c0_12, %c0_13] : memref<1x96xf32, #tpu.memory_space<vmem>>, vector<1x96xf32>
    %26 = vector.broadcast %25 : vector<1x96xf32> to vector<64x96xf32>
    %27 = arith.addf %24, %26 : vector<64x96xf32>
    %28 = vector.extract_strided_slice %27 {offsets = [0, 0], sizes = [64, 8], strides = [1, 1]} : vector<64x96xf32> to vector<64x8xf32>
    %cst_14 = arith.constant 0.353553385 : f32
    %29 = vector.broadcast %cst_14 : f32 to vector<64x8xf32>
    %30 = arith.mulf %28, %29 : vector<64x8xf32>
    %31 = vector.shape_cast %30 : vector<64x8xf32> to vector<4x16x8xf32>
    %32 = vector.extract_strided_slice %27 {offsets = [0, 32], sizes = [64, 8], strides = [1, 1]} : vector<64x96xf32> to vector<64x8xf32>
    %33 = vector.shape_cast %32 : vector<64x8xf32> to vector<4x16x8xf32>
    %34 = vector.extract_strided_slice %27 {offsets = [0, 64], sizes = [64, 8], strides = [1, 1]} : vector<64x96xf32> to vector<64x8xf32>
    %35 = vector.shape_cast %34 : vector<64x8xf32> to vector<4x16x8xf32>
    "tpu.trace_start"() <{level = 10 : i32, message = "bqd,bkd->bqk"}> : () -> ()
    %cst_15 = arith.constant dense<0.000000e+00> : vector<4x16x16xf32>
    %36 = tpu.matmul %31, %33, %cst_15 {dimension_numbers = #tpu.dot_dimension_numbers<[2], [2], [1], [1], [0, 0, 0, 1, 1, 1], [0], [0]>} : vector<4x16x8xf32>, vector<4x16x8xf32>, vector<4x16x16xf32> -> vector<4x16x16xf32>
    "tpu.trace_stop"() : () -> ()
    %c0_16 = arith.constant 0 : index
    %c0_17 = arith.constant 0 : index
    %c0_18 = arith.constant 0 : index
    %37 = vector.load %arg8[%c0_16, %c0_17, %c0_18] : memref<4x16x16xf32, #tpu.memory_space<vmem>>, vector<1x16x16xf32>
    %38 = vector.shape_cast %37 : vector<1x16x16xf32> to vector<16x16xf32>
    %39 = vector.shape_cast %38 : vector<16x16xf32> to vector<1x16x16xf32>
    %40 = vector.broadcast %39 : vector<1x16x16xf32> to vector<4x16x16xf32>
    %41 = arith.addf %36, %40 : vector<4x16x16xf32>
    %cst_19 = arith.constant dense<0xFF800000> : vector<4x16xf32>
    %42 = vector.multi_reduction <maximumf>, %41, %cst_19 [2] : vector<4x16x16xf32> to vector<4x16xf32>
    %43 = vector.shape_cast %42 : vector<4x16xf32> to vector<4x16x1xf32>
    %44 = vector.broadcast %43 : vector<4x16x1xf32> to vector<4x16x16xf32>
    %45 = arith.subf %41, %44 : vector<4x16x16xf32>
    %46 = math.exp %45 : vector<4x16x16xf32>
    %cst_20 = arith.constant dense<0.000000e+00> : vector<4x16xf32>
    %47 = vector.multi_reduction <add>, %46, %cst_20 [2] : vector<4x16x16xf32> to vector<4x16xf32>
    %48 = vector.shape_cast %47 : vector<4x16xf32> to vector<4x16x1xf32>
    %49 = vector.broadcast %48 : vector<4x16x1xf32> to vector<4x16x16xf32>
    %50 = arith.divf %46, %49 : vector<4x16x16xf32>
    "tpu.trace_start"() <{level = 10 : i32, message = "bqk,bkd->bqd"}> : () -> ()
    %cst_21 = arith.constant dense<0.000000e+00> : vector<4x16x8xf32>
    %51 = tpu.matmul %50, %35, %cst_21 {dimension_numbers = #tpu.dot_dimension_numbers<[2], [1], [1], [2], [0, 0, 0, 1, 1, 2], [0], [0]>} : vector<4x16x16xf32>, vector<4x16x8xf32>, vector<4x16x8xf32> -> vector<4x16x8xf32>
    "tpu.trace_stop"() : () -> ()
    %52 = vector.extract_strided_slice %27 {offsets = [0, 8], sizes = [64, 8], strides = [1, 1]} : vector<64x96xf32> to vector<64x8xf32>
    %cst_22 = arith.constant 0.353553385 : f32
    %53 = vector.broadcast %cst_22 : f32 to vector<64x8xf32>
    %54 = arith.mulf %52, %53 : vector<64x8xf32>
    %55 = vector.shape_cast %54 : vector<64x8xf32> to vector<4x16x8xf32>
    %56 = vector.extract_strided_slice %27 {offsets = [0, 40], sizes = [64, 8], strides = [1, 1]} : vector<64x96xf32> to vector<64x8xf32>
    %57 = vector.shape_cast %56 : vector<64x8xf32> to vector<4x16x8xf32>
    %58 = vector.extract_strided_slice %27 {offsets = [0, 72], sizes = [64, 8], strides = [1, 1]} : vector<64x96xf32> to vector<64x8xf32>
    %59 = vector.shape_cast %58 : vector<64x8xf32> to vector<4x16x8xf32>
    "tpu.trace_start"() <{level = 10 : i32, message = "bqd,bkd->bqk"}> : () -> ()
    %cst_23 = arith.constant dense<0.000000e+00> : vector<4x16x16xf32>
    %60 = tpu.matmul %55, %57, %cst_23 {dimension_numbers = #tpu.dot_dimension_numbers<[2], [2], [1], [1], [0, 0, 0, 1, 1, 1], [0], [0]>} : vector<4x16x8xf32>, vector<4x16x8xf32>, vector<4x16x16xf32> -> vector<4x16x16xf32>
    "tpu.trace_stop"() : () -> ()
    %c1 = arith.constant 1 : index
    %c0_24 = arith.constant 0 : index
    %c0_25 = arith.constant 0 : index
    %61 = vector.load %arg8[%c1, %c0_24, %c0_25] : memref<4x16x16xf32, #tpu.memory_space<vmem>>, vector<1x16x16xf32>
    %62 = vector.shape_cast %61 : vector<1x16x16xf32> to vector<16x16xf32>
    %63 = vector.shape_cast %62 : vector<16x16xf32> to vector<1x16x16xf32>
    %64 = vector.broadcast %63 : vector<1x16x16xf32> to vector<4x16x16xf32>
    %65 = arith.addf %60, %64 : vector<4x16x16xf32>
    %cst_26 = arith.constant dense<0xFF800000> : vector<4x16xf32>
    %66 = vector.multi_reduction <maximumf>, %65, %cst_26 [2] : vector<4x16x16xf32> to vector<4x16xf32>
    %67 = vector.shape_cast %66 : vector<4x16xf32> to vector<4x16x1xf32>
    %68 = vector.broadcast %67 : vector<4x16x1xf32> to vector<4x16x16xf32>
    %69 = arith.subf %65, %68 : vector<4x16x16xf32>
    %70 = math.exp %69 : vector<4x16x16xf32>
    %cst_27 = arith.constant dense<0.000000e+00> : vector<4x16xf32>
    %71 = vector.multi_reduction <add>, %70, %cst_27 [2] : vector<4x16x16xf32> to vector<4x16xf32>
    %72 = vector.shape_cast %71 : vector<4x16xf32> to vector<4x16x1xf32>
    %73 = vector.broadcast %72 : vector<4x16x1xf32> to vector<4x16x16xf32>
    %74 = arith.divf %70, %73 : vector<4x16x16xf32>
    "tpu.trace_start"() <{level = 10 : i32, message = "bqk,bkd->bqd"}> : () -> ()
    %cst_28 = arith.constant dense<0.000000e+00> : vector<4x16x8xf32>
    %75 = tpu.matmul %74, %59, %cst_28 {dimension_numbers = #tpu.dot_dimension_numbers<[2], [1], [1], [2], [0, 0, 0, 1, 1, 2], [0], [0]>} : vector<4x16x16xf32>, vector<4x16x8xf32>, vector<4x16x8xf32> -> vector<4x16x8xf32>
    "tpu.trace_stop"() : () -> ()
    %76 = vector.extract_strided_slice %27 {offsets = [0, 16], sizes = [64, 8], strides = [1, 1]} : vector<64x96xf32> to vector<64x8xf32>
    %cst_29 = arith.constant 0.353553385 : f32
    %77 = vector.broadcast %cst_29 : f32 to vector<64x8xf32>
    %78 = arith.mulf %76, %77 : vector<64x8xf32>
    %79 = vector.shape_cast %78 : vector<64x8xf32> to vector<4x16x8xf32>
    %80 = vector.extract_strided_slice %27 {offsets = [0, 48], sizes = [64, 8], strides = [1, 1]} : vector<64x96xf32> to vector<64x8xf32>
    %81 = vector.shape_cast %80 : vector<64x8xf32> to vector<4x16x8xf32>
    %82 = vector.extract_strided_slice %27 {offsets = [0, 80], sizes = [64, 8], strides = [1, 1]} : vector<64x96xf32> to vector<64x8xf32>
    %83 = vector.shape_cast %82 : vector<64x8xf32> to vector<4x16x8xf32>
    "tpu.trace_start"() <{level = 10 : i32, message = "bqd,bkd->bqk"}> : () -> ()
    %cst_30 = arith.constant dense<0.000000e+00> : vector<4x16x16xf32>
    %84 = tpu.matmul %79, %81, %cst_30 {dimension_numbers = #tpu.dot_dimension_numbers<[2], [2], [1], [1], [0, 0, 0, 1, 1, 1], [0], [0]>} : vector<4x16x8xf32>, vector<4x16x8xf32>, vector<4x16x16xf32> -> vector<4x16x16xf32>
    "tpu.trace_stop"() : () -> ()
    %c2 = arith.constant 2 : index
    %c0_31 = arith.constant 0 : index
    %c0_32 = arith.constant 0 : index
    %85 = vector.load %arg8[%c2, %c0_31, %c0_32] : memref<4x16x16xf32, #tpu.memory_space<vmem>>, vector<1x16x16xf32>
    %86 = vector.shape_cast %85 : vector<1x16x16xf32> to vector<16x16xf32>
    %87 = vector.shape_cast %86 : vector<16x16xf32> to vector<1x16x16xf32>
    %88 = vector.broadcast %87 : vector<1x16x16xf32> to vector<4x16x16xf32>
    %89 = arith.addf %84, %88 : vector<4x16x16xf32>
    %cst_33 = arith.constant dense<0xFF800000> : vector<4x16xf32>
    %90 = vector.multi_reduction <maximumf>, %89, %cst_33 [2] : vector<4x16x16xf32> to vector<4x16xf32>
    %91 = vector.shape_cast %90 : vector<4x16xf32> to vector<4x16x1xf32>
    %92 = vector.broadcast %91 : vector<4x16x1xf32> to vector<4x16x16xf32>
    %93 = arith.subf %89, %92 : vector<4x16x16xf32>
    %94 = math.exp %93 : vector<4x16x16xf32>
    %cst_34 = arith.constant dense<0.000000e+00> : vector<4x16xf32>
    %95 = vector.multi_reduction <add>, %94, %cst_34 [2] : vector<4x16x16xf32> to vector<4x16xf32>
    %96 = vector.shape_cast %95 : vector<4x16xf32> to vector<4x16x1xf32>
    %97 = vector.broadcast %96 : vector<4x16x1xf32> to vector<4x16x16xf32>
    %98 = arith.divf %94, %97 : vector<4x16x16xf32>
    "tpu.trace_start"() <{level = 10 : i32, message = "bqk,bkd->bqd"}> : () -> ()
    %cst_35 = arith.constant dense<0.000000e+00> : vector<4x16x8xf32>
    %99 = tpu.matmul %98, %83, %cst_35 {dimension_numbers = #tpu.dot_dimension_numbers<[2], [1], [1], [2], [0, 0, 0, 1, 1, 2], [0], [0]>} : vector<4x16x16xf32>, vector<4x16x8xf32>, vector<4x16x8xf32> -> vector<4x16x8xf32>
    "tpu.trace_stop"() : () -> ()
    %100 = vector.extract_strided_slice %27 {offsets = [0, 24], sizes = [64, 8], strides = [1, 1]} : vector<64x96xf32> to vector<64x8xf32>
    %cst_36 = arith.constant 0.353553385 : f32
    %101 = vector.broadcast %cst_36 : f32 to vector<64x8xf32>
    %102 = arith.mulf %100, %101 : vector<64x8xf32>
    %103 = vector.shape_cast %102 : vector<64x8xf32> to vector<4x16x8xf32>
    %104 = vector.extract_strided_slice %27 {offsets = [0, 56], sizes = [64, 8], strides = [1, 1]} : vector<64x96xf32> to vector<64x8xf32>
    %105 = vector.shape_cast %104 : vector<64x8xf32> to vector<4x16x8xf32>
    %106 = vector.extract_strided_slice %27 {offsets = [0, 88], sizes = [64, 8], strides = [1, 1]} : vector<64x96xf32> to vector<64x8xf32>
    %107 = vector.shape_cast %106 : vector<64x8xf32> to vector<4x16x8xf32>
    "tpu.trace_start"() <{level = 10 : i32, message = "bqd,bkd->bqk"}> : () -> ()
    %cst_37 = arith.constant dense<0.000000e+00> : vector<4x16x16xf32>
    %108 = tpu.matmul %103, %105, %cst_37 {dimension_numbers = #tpu.dot_dimension_numbers<[2], [2], [1], [1], [0, 0, 0, 1, 1, 1], [0], [0]>} : vector<4x16x8xf32>, vector<4x16x8xf32>, vector<4x16x16xf32> -> vector<4x16x16xf32>
    "tpu.trace_stop"() : () -> ()
    %c3 = arith.constant 3 : index
    %c0_38 = arith.constant 0 : index
    %c0_39 = arith.constant 0 : index
    %109 = vector.load %arg8[%c3, %c0_38, %c0_39] : memref<4x16x16xf32, #tpu.memory_space<vmem>>, vector<1x16x16xf32>
    %110 = vector.shape_cast %109 : vector<1x16x16xf32> to vector<16x16xf32>
    %111 = vector.shape_cast %110 : vector<16x16xf32> to vector<1x16x16xf32>
    %112 = vector.broadcast %111 : vector<1x16x16xf32> to vector<4x16x16xf32>
    %113 = arith.addf %108, %112 : vector<4x16x16xf32>
    %cst_40 = arith.constant dense<0xFF800000> : vector<4x16xf32>
    %114 = vector.multi_reduction <maximumf>, %113, %cst_40 [2] : vector<4x16x16xf32> to vector<4x16xf32>
    %115 = vector.shape_cast %114 : vector<4x16xf32> to vector<4x16x1xf32>
    %116 = vector.broadcast %115 : vector<4x16x1xf32> to vector<4x16x16xf32>
    %117 = arith.subf %113, %116 : vector<4x16x16xf32>
    %118 = math.exp %117 : vector<4x16x16xf32>
    %cst_41 = arith.constant dense<0.000000e+00> : vector<4x16xf32>
    %119 = vector.multi_reduction <add>, %118, %cst_41 [2] : vector<4x16x16xf32> to vector<4x16xf32>
    %120 = vector.shape_cast %119 : vector<4x16xf32> to vector<4x16x1xf32>
    %121 = vector.broadcast %120 : vector<4x16x1xf32> to vector<4x16x16xf32>
    %122 = arith.divf %118, %121 : vector<4x16x16xf32>
    "tpu.trace_start"() <{level = 10 : i32, message = "bqk,bkd->bqd"}> : () -> ()
    %cst_42 = arith.constant dense<0.000000e+00> : vector<4x16x8xf32>
    %123 = tpu.matmul %122, %107, %cst_42 {dimension_numbers = #tpu.dot_dimension_numbers<[2], [1], [1], [2], [0, 0, 0, 1, 1, 2], [0], [0]>} : vector<4x16x16xf32>, vector<4x16x8xf32>, vector<4x16x8xf32> -> vector<4x16x8xf32>
    "tpu.trace_stop"() : () -> ()
    %124 = tpu.concatenate %51, %75, %99, %123 in 2 : vector<4x16x8xf32>, vector<4x16x8xf32>, vector<4x16x8xf32>, vector<4x16x8xf32> -> vector<4x16x32xf32>
    %125 = vector.shape_cast %124 : vector<4x16x32xf32> to vector<64x32xf32>
    %c0_43 = arith.constant 0 : index
    %c0_44 = arith.constant 0 : index
    %126 = vector.load %arg6[%c0_43, %c0_44] : memref<32x32xf32, #tpu.memory_space<vmem>>, vector<32x32xf32>
    %cst_45 = arith.constant dense<0.000000e+00> : vector<64x32xf32>
    %127 = tpu.matmul %125, %126, %cst_45 {dimension_numbers = #tpu.dot_dimension_numbers<[1], [0], [0], [1], [0, 0, 1, 1], [], []>} : vector<64x32xf32>, vector<32x32xf32>, vector<64x32xf32> -> vector<64x32xf32>
    %128 = arith.addf %0, %127 : vector<64x32xf32>
    %c0_46 = arith.constant 0 : index
    %c0_47 = arith.constant 0 : index
    %129 = vector.load %arg7[%c0_46, %c0_47] : memref<1x32xf32, #tpu.memory_space<vmem>>, vector<1x32xf32>
    %130 = vector.broadcast %129 : vector<1x32xf32> to vector<64x32xf32>
    %131 = arith.addf %128, %130 : vector<64x32xf32>
    %c0_48 = arith.constant 0 : index
    %c0_49 = arith.constant 0 : index
    %132 = vector.load %arg9[%c0_48, %c0_49] : memref<1x32xf32, #tpu.memory_space<vmem>>, vector<1x32xf32>
    %c0_50 = arith.constant 0 : index
    %c0_51 = arith.constant 0 : index
    %133 = vector.load %arg10[%c0_50, %c0_51] : memref<1x32xf32, #tpu.memory_space<vmem>>, vector<1x32xf32>
    %cst_52 = arith.constant dense<0.000000e+00> : vector<64xf32>
    %134 = vector.multi_reduction <add>, %131, %cst_52 [1] : vector<64x32xf32> to vector<64xf32>
    %135 = vector.shape_cast %134 : vector<64xf32> to vector<64x1xf32>
    %cst_53 = arith.constant 3.200000e+01 : f32
    %136 = vector.broadcast %cst_53 : f32 to vector<64x1xf32>
    %137 = arith.divf %135, %136 : vector<64x1xf32>
    %138 = vector.broadcast %137 : vector<64x1xf32> to vector<64x32xf32>
    %139 = arith.subf %131, %138 : vector<64x32xf32>
    %140 = arith.mulf %139, %139 : vector<64x32xf32>
    %cst_54 = arith.constant dense<0.000000e+00> : vector<64xf32>
    %141 = vector.multi_reduction <add>, %140, %cst_54 [1] : vector<64x32xf32> to vector<64xf32>
    %142 = vector.shape_cast %141 : vector<64xf32> to vector<64x1xf32>
    %cst_55 = arith.constant 3.200000e+01 : f32
    %143 = vector.broadcast %cst_55 : f32 to vector<64x1xf32>
    %144 = arith.divf %142, %143 : vector<64x1xf32>
    %cst_56 = arith.constant 9.99999974E-6 : f32
    %145 = vector.broadcast %cst_56 : f32 to vector<64x1xf32>
    %146 = arith.addf %144, %145 : vector<64x1xf32>
    %147 = math.rsqrt %146 : vector<64x1xf32>
    %148 = vector.broadcast %147 : vector<64x1xf32> to vector<64x32xf32>
    %149 = arith.mulf %139, %148 : vector<64x32xf32>
    %150 = vector.broadcast %132 : vector<1x32xf32> to vector<64x32xf32>
    %151 = arith.mulf %149, %150 : vector<64x32xf32>
    %152 = vector.broadcast %133 : vector<1x32xf32> to vector<64x32xf32>
    %153 = arith.addf %151, %152 : vector<64x32xf32>
    %c0_57 = arith.constant 0 : index
    %c0_58 = arith.constant 0 : index
    %154 = vector.load %arg11[%c0_57, %c0_58] : memref<32x128xf32, #tpu.memory_space<vmem>>, vector<32x128xf32>
    %cst_59 = arith.constant dense<0.000000e+00> : vector<64x128xf32>
    %155 = tpu.matmul %153, %154, %cst_59 {dimension_numbers = #tpu.dot_dimension_numbers<[1], [0], [0], [1], [0, 0, 1, 1], [], []>} : vector<64x32xf32>, vector<32x128xf32>, vector<64x128xf32> -> vector<64x128xf32>
    %c0_60 = arith.constant 0 : index
    %c0_61 = arith.constant 0 : index
    %156 = vector.load %arg12[%c0_60, %c0_61] : memref<1x128xf32, #tpu.memory_space<vmem>>, vector<1x128xf32>
    %157 = vector.broadcast %156 : vector<1x128xf32> to vector<64x128xf32>
    %158 = arith.addf %155, %157 : vector<64x128xf32>
    %cst_62 = arith.constant 5.000000e-01 : f32
    %159 = vector.broadcast %cst_62 : f32 to vector<64x128xf32>
    %160 = arith.mulf %159, %158 : vector<64x128xf32>
    %cst_63 = arith.constant 0.707106769 : f32
    %161 = vector.broadcast %cst_63 : f32 to vector<64x128xf32>
    %162 = arith.mulf %158, %161 : vector<64x128xf32>
    %cst_64 = arith.constant -4.000000e+00 : f32
    %cst_65 = arith.constant 4.000000e+00 : f32
    %163 = vector.broadcast %cst_64 : f32 to vector<64x128xf32>
    %164 = arith.maximumf %163, %162 : vector<64x128xf32>
    %165 = vector.broadcast %cst_65 : f32 to vector<64x128xf32>
    %166 = arith.minimumf %165, %164 : vector<64x128xf32>
    %167 = arith.mulf %166, %166 : vector<64x128xf32>
    %cst_66 = arith.constant 2.29050653E-4 : f32
    %168 = vector.broadcast %cst_66 : f32 to vector<64x128xf32>
    %169 = arith.mulf %168, %167 : vector<64x128xf32>
    %cst_67 = arith.constant 0.00340829091 : f32
    %170 = vector.broadcast %cst_67 : f32 to vector<64x128xf32>
    %171 = arith.addf %169, %170 : vector<64x128xf32>
    %172 = arith.mulf %171, %167 : vector<64x128xf32>
    %cst_68 = arith.constant 0.0509556942 : f32
    %173 = vector.broadcast %cst_68 : f32 to vector<64x128xf32>
    %174 = arith.addf %172, %173 : vector<64x128xf32>
    %175 = arith.mulf %174, %167 : vector<64x128xf32>
    %cst_69 = arith.constant 0.185208321 : f32
    %176 = vector.broadcast %cst_69 : f32 to vector<64x128xf32>
    %177 = arith.addf %175, %176 : vector<64x128xf32>
    %178 = arith.mulf %177, %167 : vector<64x128xf32>
    %cst_70 = arith.constant 1.12837911 : f32
    %179 = vector.broadcast %cst_70 : f32 to vector<64x128xf32>
    %180 = arith.addf %178, %179 : vector<64x128xf32>
    %cst_71 = arith.constant -1.17916031E-7 : f32
    %181 = vector.broadcast %cst_71 : f32 to vector<64x128xf32>
    %182 = arith.mulf %181, %167 : vector<64x128xf32>
    %cst_72 = arith.constant 2.35479656E-5 : f32
    %183 = vector.broadcast %cst_72 : f32 to vector<64x128xf32>
    %184 = arith.addf %182, %183 : vector<64x128xf32>
    %185 = arith.mulf %184, %167 : vector<64x128xf32>
    %cst_73 = arith.constant 0.00101796258 : f32
    %186 = vector.broadcast %cst_73 : f32 to vector<64x128xf32>
    %187 = arith.addf %185, %186 : vector<64x128xf32>
    %188 = arith.mulf %187, %167 : vector<64x128xf32>
    %cst_74 = arith.constant 0.0140704699 : f32
    %189 = vector.broadcast %cst_74 : f32 to vector<64x128xf32>
    %190 = arith.addf %188, %189 : vector<64x128xf32>
    %191 = arith.mulf %190, %167 : vector<64x128xf32>
    %cst_75 = arith.constant 0.110985048 : f32
    %192 = vector.broadcast %cst_75 : f32 to vector<64x128xf32>
    %193 = arith.addf %191, %192 : vector<64x128xf32>
    %194 = arith.mulf %193, %167 : vector<64x128xf32>
    %cst_76 = arith.constant 0.497469246 : f32
    %195 = vector.broadcast %cst_76 : f32 to vector<64x128xf32>
    %196 = arith.addf %194, %195 : vector<64x128xf32>
    %197 = arith.mulf %196, %167 : vector<64x128xf32>
    %cst_77 = arith.constant 1.000000e+00 : f32
    %198 = vector.broadcast %cst_77 : f32 to vector<64x128xf32>
    %199 = arith.addf %197, %198 : vector<64x128xf32>
    %200 = arith.mulf %166, %180 : vector<64x128xf32>
    %201 = arith.divf %200, %199 : vector<64x128xf32>
    %cst_78 = arith.constant 1.000000e+00 : f32
    %202 = vector.broadcast %cst_78 : f32 to vector<64x128xf32>
    %203 = arith.addf %202, %201 : vector<64x128xf32>
    %204 = arith.mulf %160, %203 : vector<64x128xf32>
    %c0_79 = arith.constant 0 : index
    %c0_80 = arith.constant 0 : index
    %205 = vector.load %arg13[%c0_79, %c0_80] : memref<128x32xf32, #tpu.memory_space<vmem>>, vector<128x32xf32>
    %cst_81 = arith.constant dense<0.000000e+00> : vector<64x32xf32>
    %206 = tpu.matmul %204, %205, %cst_81 {dimension_numbers = #tpu.dot_dimension_numbers<[1], [0], [0], [1], [0, 0, 1, 1], [], []>} : vector<64x128xf32>, vector<128x32xf32>, vector<64x32xf32> -> vector<64x32xf32>
    %207 = arith.addf %131, %206 : vector<64x32xf32>
    %c0_82 = arith.constant 0 : index
    %c0_83 = arith.constant 0 : index
    %208 = vector.load %arg14[%c0_82, %c0_83] : memref<1x32xf32, #tpu.memory_space<vmem>>, vector<1x32xf32>
    %209 = vector.broadcast %208 : vector<1x32xf32> to vector<64x32xf32>
    %210 = arith.addf %207, %209 : vector<64x32xf32>
    %c0_84 = arith.constant 0 : index
    %c0_85 = arith.constant 0 : index
    %211 = vector.load %arg15[%c0_84, %c0_85] : memref<64x32xf32, #tpu.memory_space<vmem>>, vector<64x32xf32>
    tpu.vector_store %arg15[%c0_84, %c0_85], %210 {strides = array<i32>} : memref<64x32xf32, #tpu.memory_space<vmem>>, vector<64x32xf32>,
    return
  }
  func.func @transform_0(%arg0: i32) -> (i32, i32) {
    %c0_i32 = arith.constant 0 : i32
    %c0_i32_0 = arith.constant 0 : i32
    return %arg0, %c0_i32 : i32, i32
  }
  func.func @transform_1(%arg0: i32) -> (i32, i32) {
    %c0_i32 = arith.constant 0 : i32
    %c0_i32_0 = arith.constant 0 : i32
    %c0_i32_1 = arith.constant 0 : i32
    return %c0_i32, %c0_i32_0 : i32, i32
  }
  func.func @transform_2(%arg0: i32) -> (i32, i32) {
    %c0_i32 = arith.constant 0 : i32
    %c0_i32_0 = arith.constant 0 : i32
    %c0_i32_1 = arith.constant 0 : i32
    return %c0_i32, %c0_i32_0 : i32, i32
  }
  func.func @transform_3(%arg0: i32) -> (i32, i32) {
    %c0_i32 = arith.constant 0 : i32
    %c0_i32_0 = arith.constant 0 : i32
    %c0_i32_1 = arith.constant 0 : i32
    return %c0_i32, %c0_i32_0 : i32, i32
  }
  func.func @transform_4(%arg0: i32) -> (i32, i32) {
    %c0_i32 = arith.constant 0 : i32
    %c0_i32_0 = arith.constant 0 : i32
    %c0_i32_1 = arith.constant 0 : i32
    return %c0_i32, %c0_i32_0 : i32, i32
  }
  func.func @transform_5(%arg0: i32) -> (i32, i32) {
    %c0_i32 = arith.constant 0 : i32
    %c0_i32_0 = arith.constant 0 : i32
    %c0_i32_1 = arith.constant 0 : i32
    return %c0_i32, %c0_i32_0 : i32, i32
  }
  func.func @transform_6(%arg0: i32) -> (i32, i32) {
    %c0_i32 = arith.constant 0 : i32
    %c0_i32_0 = arith.constant 0 : i32
    %c0_i32_1 = arith.constant 0 : i32
    return %c0_i32, %c0_i32_0 : i32, i32
  }
  func.func @transform_7(%arg0: i32) -> (i32, i32, i32) {
    %c0_i32 = arith.constant 0 : i32
    %c0_i32_0 = arith.constant 0 : i32
    %c0_i32_1 = arith.constant 0 : i32
    %c0_i32_2 = arith.constant 0 : i32
    return %c0_i32, %c0_i32_0, %c0_i32_1 : i32, i32, i32
  }
  func.func @transform_8(%arg0: i32) -> (i32, i32) {
    %c0_i32 = arith.constant 0 : i32
    %c0_i32_0 = arith.constant 0 : i32
    %c0_i32_1 = arith.constant 0 : i32
    return %c0_i32, %c0_i32_0 : i32, i32
  }
  func.func @transform_9(%arg0: i32) -> (i32, i32) {
    %c0_i32 = arith.constant 0 : i32
    %c0_i32_0 = arith.constant 0 : i32
    %c0_i32_1 = arith.constant 0 : i32
    return %c0_i32, %c0_i32_0 : i32, i32
  }
  func.func @transform_10(%arg0: i32) -> (i32, i32) {
    %c0_i32 = arith.constant 0 : i32
    %c0_i32_0 = arith.constant 0 : i32
    %c0_i32_1 = arith.constant 0 : i32
    return %c0_i32, %c0_i32_0 : i32, i32
  }
  func.func @transform_11(%arg0: i32) -> (i32, i32) {
    %c0_i32 = arith.constant 0 : i32
    %c0_i32_0 = arith.constant 0 : i32
    %c0_i32_1 = arith.constant 0 : i32
    return %c0_i32, %c0_i32_0 : i32, i32
  }
  func.func @transform_12(%arg0: i32) -> (i32, i32) {
    %c0_i32 = arith.constant 0 : i32
    %c0_i32_0 = arith.constant 0 : i32
    %c0_i32_1 = arith.constant 0 : i32
    return %c0_i32, %c0_i32_0 : i32, i32
  }
  func.func @transform_13(%arg0: i32) -> (i32, i32) {
    %c0_i32 = arith.constant 0 : i32
    %c0_i32_0 = arith.constant 0 : i32
    %c0_i32_1 = arith.constant 0 : i32
    return %c0_i32, %c0_i32_0 : i32, i32
  }
  func.func @transform_14(%arg0: i32) -> (i32, i32) {
    %c0_i32 = arith.constant 0 : i32
    %c0_i32_0 = arith.constant 0 : i32
    return %arg0, %c0_i32 : i32, i32
  }
}

module attributes {stable_mosaic.version = 11 : i64} {
  func.func @_cross_block_kernel(%arg0: i32, %arg1: memref<64x32xf32, #tpu.memory_space<vmem>>, %arg2: memref<2x64x32xf32, #tpu.memory_space<vmem>>, %arg3: memref<1x32xf32, #tpu.memory_space<vmem>>, %arg4: memref<1x32xf32, #tpu.memory_space<vmem>>, %arg5: memref<32x32xf32, #tpu.memory_space<vmem>>, %arg6: memref<1x32xf32, #tpu.memory_space<vmem>>, %arg7: memref<32x64xf32, #tpu.memory_space<vmem>>, %arg8: memref<1x64xf32, #tpu.memory_space<vmem>>, %arg9: memref<32x32xf32, #tpu.memory_space<vmem>>, %arg10: memref<1x32xf32, #tpu.memory_space<vmem>>, %arg11: memref<4x16x32xf32, #tpu.memory_space<vmem>>, %arg12: memref<1x32xf32, #tpu.memory_space<vmem>>, %arg13: memref<1x32xf32, #tpu.memory_space<vmem>>, %arg14: memref<32x128xf32, #tpu.memory_space<vmem>>, %arg15: memref<1x128xf32, #tpu.memory_space<vmem>>, %arg16: memref<128x32xf32, #tpu.memory_space<vmem>>, %arg17: memref<1x32xf32, #tpu.memory_space<vmem>>, %arg18: memref<64x32xf32, #tpu.memory_space<vmem>>) attributes {dimension_semantics = [#tpu.dimension_semantics<parallel>], iteration_bounds = array<i64: 2>, scalar_prefetch = 0 : i64, scratch_operands = 0 : i64, tpu.core_type = #tpu.core_type<tc>, window_params = [{transform_indices = @transform_0, window_bounds = array<i64: 64, 32>}, {transform_indices = @transform_1, window_bounds = array<i64: 2, 64, 32>}, {pipeline_mode = #tpu.pipeline_mode<synchronous>, transform_indices = @transform_2, window_bounds = array<i64: 1, 32>}, {pipeline_mode = #tpu.pipeline_mode<synchronous>, transform_indices = @transform_3, window_bounds = array<i64: 1, 32>}, {pipeline_mode = #tpu.pipeline_mode<synchronous>, transform_indices = @transform_4, window_bounds = array<i64: 32, 32>}, {pipeline_mode = #tpu.pipeline_mode<synchronous>, transform_indices = @transform_5, window_bounds = array<i64: 1, 32>}, {pipeline_mode = #tpu.pipeline_mode<synchronous>, transform_indices = @transform_6, window_bounds = array<i64: 32, 64>}, {pipeline_mode = #tpu.pipeline_mode<synchronous>, transform_indices = @transform_7, window_bounds = array<i64: 1, 64>}, {pipeline_mode = #tpu.pipeline_mode<synchronous>, transform_indices = @transform_8, window_bounds = array<i64: 32, 32>}, {pipeline_mode = #tpu.pipeline_mode<synchronous>, transform_indices = @transform_9, window_bounds = array<i64: 1, 32>}, {pipeline_mode = #tpu.pipeline_mode<synchronous>, transform_indices = @transform_10, window_bounds = array<i64: 4, 16, 32>}, {pipeline_mode = #tpu.pipeline_mode<synchronous>, transform_indices = @transform_11, window_bounds = array<i64: 1, 32>}, {pipeline_mode = #tpu.pipeline_mode<synchronous>, transform_indices = @transform_12, window_bounds = array<i64: 1, 32>}, {pipeline_mode = #tpu.pipeline_mode<synchronous>, transform_indices = @transform_13, window_bounds = array<i64: 32, 128>}, {pipeline_mode = #tpu.pipeline_mode<synchronous>, transform_indices = @transform_14, window_bounds = array<i64: 1, 128>}, {pipeline_mode = #tpu.pipeline_mode<synchronous>, transform_indices = @transform_15, window_bounds = array<i64: 128, 32>}, {pipeline_mode = #tpu.pipeline_mode<synchronous>, transform_indices = @transform_16, window_bounds = array<i64: 1, 32>}, {transform_indices = @transform_17, window_bounds = array<i64: 64, 32>}]} {
    %c0 = arith.constant 0 : index
    %c0_0 = arith.constant 0 : index
    %0 = vector.load %arg1[%c0, %c0_0] : memref<64x32xf32, #tpu.memory_space<vmem>>, vector<64x32xf32>
    %c0_1 = arith.constant 0 : index
    %c0_2 = arith.constant 0 : index
    %1 = vector.load %arg3[%c0_1, %c0_2] : memref<1x32xf32, #tpu.memory_space<vmem>>, vector<1x32xf32>
    %c0_3 = arith.constant 0 : index
    %c0_4 = arith.constant 0 : index
    %2 = vector.load %arg4[%c0_3, %c0_4] : memref<1x32xf32, #tpu.memory_space<vmem>>, vector<1x32xf32>
    %cst = arith.constant dense<0.000000e+00> : vector<64xf32>
    %3 = vector.multi_reduction <add>, %0, %cst [1] : vector<64x32xf32> to vector<64xf32>
    %4 = vector.shape_cast %3 : vector<64xf32> to vector<64x1xf32>
    %cst_5 = arith.constant 3.200000e+01 : f32
    %5 = vector.broadcast %cst_5 : f32 to vector<64x1xf32>
    %6 = arith.divf %4, %5 : vector<64x1xf32>
    %7 = vector.broadcast %6 : vector<64x1xf32> to vector<64x32xf32>
    %8 = arith.subf %0, %7 : vector<64x32xf32>
    %9 = arith.mulf %8, %8 : vector<64x32xf32>
    %cst_6 = arith.constant dense<0.000000e+00> : vector<64xf32>
    %10 = vector.multi_reduction <add>, %9, %cst_6 [1] : vector<64x32xf32> to vector<64xf32>
    %11 = vector.shape_cast %10 : vector<64xf32> to vector<64x1xf32>
    %cst_7 = arith.constant 3.200000e+01 : f32
    %12 = vector.broadcast %cst_7 : f32 to vector<64x1xf32>
    %13 = arith.divf %11, %12 : vector<64x1xf32>
    %cst_8 = arith.constant 9.99999974E-6 : f32
    %14 = vector.broadcast %cst_8 : f32 to vector<64x1xf32>
    %15 = arith.addf %13, %14 : vector<64x1xf32>
    %16 = math.rsqrt %15 : vector<64x1xf32>
    %17 = vector.broadcast %16 : vector<64x1xf32> to vector<64x32xf32>
    %18 = arith.mulf %8, %17 : vector<64x32xf32>
    %19 = vector.broadcast %1 : vector<1x32xf32> to vector<64x32xf32>
    %20 = arith.mulf %18, %19 : vector<64x32xf32>
    %21 = vector.broadcast %2 : vector<1x32xf32> to vector<64x32xf32>
    %22 = arith.addf %20, %21 : vector<64x32xf32>
    %c0_9 = arith.constant 0 : index
    %c0_10 = arith.constant 0 : index
    %23 = vector.load %arg5[%c0_9, %c0_10] : memref<32x32xf32, #tpu.memory_space<vmem>>, vector<32x32xf32>
    %cst_11 = arith.constant dense<0.000000e+00> : vector<64x32xf32>
    %24 = tpu.matmul %22, %23, %cst_11 {dimension_numbers = #tpu.dot_dimension_numbers<[1], [0], [0], [1], [0, 0, 1, 1], [], []>} : vector<64x32xf32>, vector<32x32xf32>, vector<64x32xf32> -> vector<64x32xf32>
    %c0_12 = arith.constant 0 : index
    %c0_13 = arith.constant 0 : index
    %25 = vector.load %arg6[%c0_12, %c0_13] : memref<1x32xf32, #tpu.memory_space<vmem>>, vector<1x32xf32>
    %26 = vector.broadcast %25 : vector<1x32xf32> to vector<64x32xf32>
    %27 = arith.addf %24, %26 : vector<64x32xf32>
    %c0_14 = arith.constant 0 : index
    %c0_15 = arith.constant 0 : index
    %c0_16 = arith.constant 0 : index
    %28 = vector.load %arg2[%c0_14, %c0_15, %c0_16] : memref<2x64x32xf32, #tpu.memory_space<vmem>>, vector<1x64x32xf32>
    %29 = vector.shape_cast %28 : vector<1x64x32xf32> to vector<64x32xf32>
    %c0_17 = arith.constant 0 : index
    %c0_18 = arith.constant 0 : index
    %30 = vector.load %arg7[%c0_17, %c0_18] : memref<32x64xf32, #tpu.memory_space<vmem>>, vector<32x64xf32>
    %cst_19 = arith.constant dense<0.000000e+00> : vector<64x64xf32>
    %31 = tpu.matmul %29, %30, %cst_19 {dimension_numbers = #tpu.dot_dimension_numbers<[1], [0], [0], [1], [0, 0, 1, 1], [], []>} : vector<64x32xf32>, vector<32x64xf32>, vector<64x64xf32> -> vector<64x64xf32>
    %c0_20 = arith.constant 0 : index
    %c0_21 = arith.constant 0 : index
    %32 = vector.load %arg8[%c0_20, %c0_21] : memref<1x64xf32, #tpu.memory_space<vmem>>, vector<1x64xf32>
    %33 = vector.broadcast %32 : vector<1x64xf32> to vector<64x64xf32>
    %34 = arith.addf %31, %33 : vector<64x64xf32>
    %c1 = arith.constant 1 : index
    %c0_22 = arith.constant 0 : index
    %c0_23 = arith.constant 0 : index
    %35 = vector.load %arg2[%c1, %c0_22, %c0_23] : memref<2x64x32xf32, #tpu.memory_space<vmem>>, vector<1x64x32xf32>
    %36 = vector.shape_cast %35 : vector<1x64x32xf32> to vector<64x32xf32>
    %c0_24 = arith.constant 0 : index
    %c0_25 = arith.constant 0 : index
    %37 = vector.load %arg7[%c0_24, %c0_25] : memref<32x64xf32, #tpu.memory_space<vmem>>, vector<32x64xf32>
    %cst_26 = arith.constant dense<0.000000e+00> : vector<64x64xf32>
    %38 = tpu.matmul %36, %37, %cst_26 {dimension_numbers = #tpu.dot_dimension_numbers<[1], [0], [0], [1], [0, 0, 1, 1], [], []>} : vector<64x32xf32>, vector<32x64xf32>, vector<64x64xf32> -> vector<64x64xf32>
    %c0_27 = arith.constant 0 : index
    %c0_28 = arith.constant 0 : index
    %39 = vector.load %arg8[%c0_27, %c0_28] : memref<1x64xf32, #tpu.memory_space<vmem>>, vector<1x64xf32>
    %40 = vector.broadcast %39 : vector<1x64xf32> to vector<64x64xf32>
    %41 = arith.addf %38, %40 : vector<64x64xf32>
    %42 = vector.extract_strided_slice %27 {offsets = [0, 0], sizes = [64, 8], strides = [1, 1]} : vector<64x32xf32> to vector<64x8xf32>
    %cst_29 = arith.constant 0.353553385 : f32
    %43 = vector.broadcast %cst_29 : f32 to vector<64x8xf32>
    %44 = arith.mulf %42, %43 : vector<64x8xf32>
    %45 = vector.shape_cast %44 : vector<64x8xf32> to vector<4x16x8xf32>
    %46 = vector.extract_strided_slice %34 {offsets = [0, 0], sizes = [64, 8], strides = [1, 1]} : vector<64x64xf32> to vector<64x8xf32>
    %47 = vector.shape_cast %46 : vector<64x8xf32> to vector<4x16x8xf32>
    %48 = vector.extract_strided_slice %41 {offsets = [0, 0], sizes = [64, 8], strides = [1, 1]} : vector<64x64xf32> to vector<64x8xf32>
    %49 = vector.shape_cast %48 : vector<64x8xf32> to vector<4x16x8xf32>
    %50 = tpu.concatenate %47, %49 in 1 : vector<4x16x8xf32>, vector<4x16x8xf32> -> vector<4x32x8xf32>
    %51 = vector.extract_strided_slice %34 {offsets = [0, 32], sizes = [64, 8], strides = [1, 1]} : vector<64x64xf32> to vector<64x8xf32>
    %52 = vector.shape_cast %51 : vector<64x8xf32> to vector<4x16x8xf32>
    %53 = vector.extract_strided_slice %41 {offsets = [0, 32], sizes = [64, 8], strides = [1, 1]} : vector<64x64xf32> to vector<64x8xf32>
    %54 = vector.shape_cast %53 : vector<64x8xf32> to vector<4x16x8xf32>
    %55 = tpu.concatenate %52, %54 in 1 : vector<4x16x8xf32>, vector<4x16x8xf32> -> vector<4x32x8xf32>
    "tpu.trace_start"() <{level = 10 : i32, message = "bqd,bkd->bqk"}> : () -> ()
    %cst_30 = arith.constant dense<0.000000e+00> : vector<4x16x32xf32>
    %56 = tpu.matmul %45, %50, %cst_30 {dimension_numbers = #tpu.dot_dimension_numbers<[2], [2], [1], [1], [0, 0, 0, 1, 1, 1], [0], [0]>} : vector<4x16x8xf32>, vector<4x32x8xf32>, vector<4x16x32xf32> -> vector<4x16x32xf32>
    "tpu.trace_stop"() : () -> ()
    %c0_31 = arith.constant 0 : index
    %c0_32 = arith.constant 0 : index
    %c0_33 = arith.constant 0 : index
    %57 = vector.load %arg11[%c0_31, %c0_32, %c0_33] : memref<4x16x32xf32, #tpu.memory_space<vmem>>, vector<1x16x32xf32>
    %58 = vector.shape_cast %57 : vector<1x16x32xf32> to vector<16x32xf32>
    %59 = vector.shape_cast %58 : vector<16x32xf32> to vector<1x16x32xf32>
    %60 = vector.broadcast %59 : vector<1x16x32xf32> to vector<4x16x32xf32>
    %61 = arith.addf %56, %60 : vector<4x16x32xf32>
    %cst_34 = arith.constant dense<0xFF800000> : vector<4x16xf32>
    %62 = vector.multi_reduction <maximumf>, %61, %cst_34 [2] : vector<4x16x32xf32> to vector<4x16xf32>
    %63 = vector.shape_cast %62 : vector<4x16xf32> to vector<4x16x1xf32>
    %64 = vector.broadcast %63 : vector<4x16x1xf32> to vector<4x16x32xf32>
    %65 = arith.subf %61, %64 : vector<4x16x32xf32>
    %66 = math.exp %65 : vector<4x16x32xf32>
    %cst_35 = arith.constant dense<0.000000e+00> : vector<4x16xf32>
    %67 = vector.multi_reduction <add>, %66, %cst_35 [2] : vector<4x16x32xf32> to vector<4x16xf32>
    %68 = vector.shape_cast %67 : vector<4x16xf32> to vector<4x16x1xf32>
    %69 = vector.broadcast %68 : vector<4x16x1xf32> to vector<4x16x32xf32>
    %70 = arith.divf %66, %69 : vector<4x16x32xf32>
    "tpu.trace_start"() <{level = 10 : i32, message = "bqk,bkd->bqd"}> : () -> ()
    %cst_36 = arith.constant dense<0.000000e+00> : vector<4x16x8xf32>
    %71 = tpu.matmul %70, %55, %cst_36 {dimension_numbers = #tpu.dot_dimension_numbers<[2], [1], [1], [2], [0, 0, 0, 1, 1, 2], [0], [0]>} : vector<4x16x32xf32>, vector<4x32x8xf32>, vector<4x16x8xf32> -> vector<4x16x8xf32>
    "tpu.trace_stop"() : () -> ()
    %72 = vector.extract_strided_slice %27 {offsets = [0, 8], sizes = [64, 8], strides = [1, 1]} : vector<64x32xf32> to vector<64x8xf32>
    %cst_37 = arith.constant 0.353553385 : f32
    %73 = vector.broadcast %cst_37 : f32 to vector<64x8xf32>
    %74 = arith.mulf %72, %73 : vector<64x8xf32>
    %75 = vector.shape_cast %74 : vector<64x8xf32> to vector<4x16x8xf32>
    %76 = vector.extract_strided_slice %34 {offsets = [0, 8], sizes = [64, 8], strides = [1, 1]} : vector<64x64xf32> to vector<64x8xf32>
    %77 = vector.shape_cast %76 : vector<64x8xf32> to vector<4x16x8xf32>
    %78 = vector.extract_strided_slice %41 {offsets = [0, 8], sizes = [64, 8], strides = [1, 1]} : vector<64x64xf32> to vector<64x8xf32>
    %79 = vector.shape_cast %78 : vector<64x8xf32> to vector<4x16x8xf32>
    %80 = tpu.concatenate %77, %79 in 1 : vector<4x16x8xf32>, vector<4x16x8xf32> -> vector<4x32x8xf32>
    %81 = vector.extract_strided_slice %34 {offsets = [0, 40], sizes = [64, 8], strides = [1, 1]} : vector<64x64xf32> to vector<64x8xf32>
    %82 = vector.shape_cast %81 : vector<64x8xf32> to vector<4x16x8xf32>
    %83 = vector.extract_strided_slice %41 {offsets = [0, 40], sizes = [64, 8], strides = [1, 1]} : vector<64x64xf32> to vector<64x8xf32>
    %84 = vector.shape_cast %83 : vector<64x8xf32> to vector<4x16x8xf32>
    %85 = tpu.concatenate %82, %84 in 1 : vector<4x16x8xf32>, vector<4x16x8xf32> -> vector<4x32x8xf32>
    "tpu.trace_start"() <{level = 10 : i32, message = "bqd,bkd->bqk"}> : () -> ()
    %cst_38 = arith.constant dense<0.000000e+00> : vector<4x16x32xf32>
    %86 = tpu.matmul %75, %80, %cst_38 {dimension_numbers = #tpu.dot_dimension_numbers<[2], [2], [1], [1], [0, 0, 0, 1, 1, 1], [0], [0]>} : vector<4x16x8xf32>, vector<4x32x8xf32>, vector<4x16x32xf32> -> vector<4x16x32xf32>
    "tpu.trace_stop"() : () -> ()
    %c1_39 = arith.constant 1 : index
    %c0_40 = arith.constant 0 : index
    %c0_41 = arith.constant 0 : index
    %87 = vector.load %arg11[%c1_39, %c0_40, %c0_41] : memref<4x16x32xf32, #tpu.memory_space<vmem>>, vector<1x16x32xf32>
    %88 = vector.shape_cast %87 : vector<1x16x32xf32> to vector<16x32xf32>
    %89 = vector.shape_cast %88 : vector<16x32xf32> to vector<1x16x32xf32>
    %90 = vector.broadcast %89 : vector<1x16x32xf32> to vector<4x16x32xf32>
    %91 = arith.addf %86, %90 : vector<4x16x32xf32>
    %cst_42 = arith.constant dense<0xFF800000> : vector<4x16xf32>
    %92 = vector.multi_reduction <maximumf>, %91, %cst_42 [2] : vector<4x16x32xf32> to vector<4x16xf32>
    %93 = vector.shape_cast %92 : vector<4x16xf32> to vector<4x16x1xf32>
    %94 = vector.broadcast %93 : vector<4x16x1xf32> to vector<4x16x32xf32>
    %95 = arith.subf %91, %94 : vector<4x16x32xf32>
    %96 = math.exp %95 : vector<4x16x32xf32>
    %cst_43 = arith.constant dense<0.000000e+00> : vector<4x16xf32>
    %97 = vector.multi_reduction <add>, %96, %cst_43 [2] : vector<4x16x32xf32> to vector<4x16xf32>
    %98 = vector.shape_cast %97 : vector<4x16xf32> to vector<4x16x1xf32>
    %99 = vector.broadcast %98 : vector<4x16x1xf32> to vector<4x16x32xf32>
    %100 = arith.divf %96, %99 : vector<4x16x32xf32>
    "tpu.trace_start"() <{level = 10 : i32, message = "bqk,bkd->bqd"}> : () -> ()
    %cst_44 = arith.constant dense<0.000000e+00> : vector<4x16x8xf32>
    %101 = tpu.matmul %100, %85, %cst_44 {dimension_numbers = #tpu.dot_dimension_numbers<[2], [1], [1], [2], [0, 0, 0, 1, 1, 2], [0], [0]>} : vector<4x16x32xf32>, vector<4x32x8xf32>, vector<4x16x8xf32> -> vector<4x16x8xf32>
    "tpu.trace_stop"() : () -> ()
    %102 = vector.extract_strided_slice %27 {offsets = [0, 16], sizes = [64, 8], strides = [1, 1]} : vector<64x32xf32> to vector<64x8xf32>
    %cst_45 = arith.constant 0.353553385 : f32
    %103 = vector.broadcast %cst_45 : f32 to vector<64x8xf32>
    %104 = arith.mulf %102, %103 : vector<64x8xf32>
    %105 = vector.shape_cast %104 : vector<64x8xf32> to vector<4x16x8xf32>
    %106 = vector.extract_strided_slice %34 {offsets = [0, 16], sizes = [64, 8], strides = [1, 1]} : vector<64x64xf32> to vector<64x8xf32>
    %107 = vector.shape_cast %106 : vector<64x8xf32> to vector<4x16x8xf32>
    %108 = vector.extract_strided_slice %41 {offsets = [0, 16], sizes = [64, 8], strides = [1, 1]} : vector<64x64xf32> to vector<64x8xf32>
    %109 = vector.shape_cast %108 : vector<64x8xf32> to vector<4x16x8xf32>
    %110 = tpu.concatenate %107, %109 in 1 : vector<4x16x8xf32>, vector<4x16x8xf32> -> vector<4x32x8xf32>
    %111 = vector.extract_strided_slice %34 {offsets = [0, 48], sizes = [64, 8], strides = [1, 1]} : vector<64x64xf32> to vector<64x8xf32>
    %112 = vector.shape_cast %111 : vector<64x8xf32> to vector<4x16x8xf32>
    %113 = vector.extract_strided_slice %41 {offsets = [0, 48], sizes = [64, 8], strides = [1, 1]} : vector<64x64xf32> to vector<64x8xf32>
    %114 = vector.shape_cast %113 : vector<64x8xf32> to vector<4x16x8xf32>
    %115 = tpu.concatenate %112, %114 in 1 : vector<4x16x8xf32>, vector<4x16x8xf32> -> vector<4x32x8xf32>
    "tpu.trace_start"() <{level = 10 : i32, message = "bqd,bkd->bqk"}> : () -> ()
    %cst_46 = arith.constant dense<0.000000e+00> : vector<4x16x32xf32>
    %116 = tpu.matmul %105, %110, %cst_46 {dimension_numbers = #tpu.dot_dimension_numbers<[2], [2], [1], [1], [0, 0, 0, 1, 1, 1], [0], [0]>} : vector<4x16x8xf32>, vector<4x32x8xf32>, vector<4x16x32xf32> -> vector<4x16x32xf32>
    "tpu.trace_stop"() : () -> ()
    %c2 = arith.constant 2 : index
    %c0_47 = arith.constant 0 : index
    %c0_48 = arith.constant 0 : index
    %117 = vector.load %arg11[%c2, %c0_47, %c0_48] : memref<4x16x32xf32, #tpu.memory_space<vmem>>, vector<1x16x32xf32>
    %118 = vector.shape_cast %117 : vector<1x16x32xf32> to vector<16x32xf32>
    %119 = vector.shape_cast %118 : vector<16x32xf32> to vector<1x16x32xf32>
    %120 = vector.broadcast %119 : vector<1x16x32xf32> to vector<4x16x32xf32>
    %121 = arith.addf %116, %120 : vector<4x16x32xf32>
    %cst_49 = arith.constant dense<0xFF800000> : vector<4x16xf32>
    %122 = vector.multi_reduction <maximumf>, %121, %cst_49 [2] : vector<4x16x32xf32> to vector<4x16xf32>
    %123 = vector.shape_cast %122 : vector<4x16xf32> to vector<4x16x1xf32>
    %124 = vector.broadcast %123 : vector<4x16x1xf32> to vector<4x16x32xf32>
    %125 = arith.subf %121, %124 : vector<4x16x32xf32>
    %126 = math.exp %125 : vector<4x16x32xf32>
    %cst_50 = arith.constant dense<0.000000e+00> : vector<4x16xf32>
    %127 = vector.multi_reduction <add>, %126, %cst_50 [2] : vector<4x16x32xf32> to vector<4x16xf32>
    %128 = vector.shape_cast %127 : vector<4x16xf32> to vector<4x16x1xf32>
    %129 = vector.broadcast %128 : vector<4x16x1xf32> to vector<4x16x32xf32>
    %130 = arith.divf %126, %129 : vector<4x16x32xf32>
    "tpu.trace_start"() <{level = 10 : i32, message = "bqk,bkd->bqd"}> : () -> ()
    %cst_51 = arith.constant dense<0.000000e+00> : vector<4x16x8xf32>
    %131 = tpu.matmul %130, %115, %cst_51 {dimension_numbers = #tpu.dot_dimension_numbers<[2], [1], [1], [2], [0, 0, 0, 1, 1, 2], [0], [0]>} : vector<4x16x32xf32>, vector<4x32x8xf32>, vector<4x16x8xf32> -> vector<4x16x8xf32>
    "tpu.trace_stop"() : () -> ()
    %132 = vector.extract_strided_slice %27 {offsets = [0, 24], sizes = [64, 8], strides = [1, 1]} : vector<64x32xf32> to vector<64x8xf32>
    %cst_52 = arith.constant 0.353553385 : f32
    %133 = vector.broadcast %cst_52 : f32 to vector<64x8xf32>
    %134 = arith.mulf %132, %133 : vector<64x8xf32>
    %135 = vector.shape_cast %134 : vector<64x8xf32> to vector<4x16x8xf32>
    %136 = vector.extract_strided_slice %34 {offsets = [0, 24], sizes = [64, 8], strides = [1, 1]} : vector<64x64xf32> to vector<64x8xf32>
    %137 = vector.shape_cast %136 : vector<64x8xf32> to vector<4x16x8xf32>
    %138 = vector.extract_strided_slice %41 {offsets = [0, 24], sizes = [64, 8], strides = [1, 1]} : vector<64x64xf32> to vector<64x8xf32>
    %139 = vector.shape_cast %138 : vector<64x8xf32> to vector<4x16x8xf32>
    %140 = tpu.concatenate %137, %139 in 1 : vector<4x16x8xf32>, vector<4x16x8xf32> -> vector<4x32x8xf32>
    %141 = vector.extract_strided_slice %34 {offsets = [0, 56], sizes = [64, 8], strides = [1, 1]} : vector<64x64xf32> to vector<64x8xf32>
    %142 = vector.shape_cast %141 : vector<64x8xf32> to vector<4x16x8xf32>
    %143 = vector.extract_strided_slice %41 {offsets = [0, 56], sizes = [64, 8], strides = [1, 1]} : vector<64x64xf32> to vector<64x8xf32>
    %144 = vector.shape_cast %143 : vector<64x8xf32> to vector<4x16x8xf32>
    %145 = tpu.concatenate %142, %144 in 1 : vector<4x16x8xf32>, vector<4x16x8xf32> -> vector<4x32x8xf32>
    "tpu.trace_start"() <{level = 10 : i32, message = "bqd,bkd->bqk"}> : () -> ()
    %cst_53 = arith.constant dense<0.000000e+00> : vector<4x16x32xf32>
    %146 = tpu.matmul %135, %140, %cst_53 {dimension_numbers = #tpu.dot_dimension_numbers<[2], [2], [1], [1], [0, 0, 0, 1, 1, 1], [0], [0]>} : vector<4x16x8xf32>, vector<4x32x8xf32>, vector<4x16x32xf32> -> vector<4x16x32xf32>
    "tpu.trace_stop"() : () -> ()
    %c3 = arith.constant 3 : index
    %c0_54 = arith.constant 0 : index
    %c0_55 = arith.constant 0 : index
    %147 = vector.load %arg11[%c3, %c0_54, %c0_55] : memref<4x16x32xf32, #tpu.memory_space<vmem>>, vector<1x16x32xf32>
    %148 = vector.shape_cast %147 : vector<1x16x32xf32> to vector<16x32xf32>
    %149 = vector.shape_cast %148 : vector<16x32xf32> to vector<1x16x32xf32>
    %150 = vector.broadcast %149 : vector<1x16x32xf32> to vector<4x16x32xf32>
    %151 = arith.addf %146, %150 : vector<4x16x32xf32>
    %cst_56 = arith.constant dense<0xFF800000> : vector<4x16xf32>
    %152 = vector.multi_reduction <maximumf>, %151, %cst_56 [2] : vector<4x16x32xf32> to vector<4x16xf32>
    %153 = vector.shape_cast %152 : vector<4x16xf32> to vector<4x16x1xf32>
    %154 = vector.broadcast %153 : vector<4x16x1xf32> to vector<4x16x32xf32>
    %155 = arith.subf %151, %154 : vector<4x16x32xf32>
    %156 = math.exp %155 : vector<4x16x32xf32>
    %cst_57 = arith.constant dense<0.000000e+00> : vector<4x16xf32>
    %157 = vector.multi_reduction <add>, %156, %cst_57 [2] : vector<4x16x32xf32> to vector<4x16xf32>
    %158 = vector.shape_cast %157 : vector<4x16xf32> to vector<4x16x1xf32>
    %159 = vector.broadcast %158 : vector<4x16x1xf32> to vector<4x16x32xf32>
    %160 = arith.divf %156, %159 : vector<4x16x32xf32>
    "tpu.trace_start"() <{level = 10 : i32, message = "bqk,bkd->bqd"}> : () -> ()
    %cst_58 = arith.constant dense<0.000000e+00> : vector<4x16x8xf32>
    %161 = tpu.matmul %160, %145, %cst_58 {dimension_numbers = #tpu.dot_dimension_numbers<[2], [1], [1], [2], [0, 0, 0, 1, 1, 2], [0], [0]>} : vector<4x16x32xf32>, vector<4x32x8xf32>, vector<4x16x8xf32> -> vector<4x16x8xf32>
    "tpu.trace_stop"() : () -> ()
    %162 = tpu.concatenate %71, %101, %131, %161 in 2 : vector<4x16x8xf32>, vector<4x16x8xf32>, vector<4x16x8xf32>, vector<4x16x8xf32> -> vector<4x16x32xf32>
    %163 = vector.shape_cast %162 : vector<4x16x32xf32> to vector<64x32xf32>
    %c0_59 = arith.constant 0 : index
    %c0_60 = arith.constant 0 : index
    %164 = vector.load %arg9[%c0_59, %c0_60] : memref<32x32xf32, #tpu.memory_space<vmem>>, vector<32x32xf32>
    %cst_61 = arith.constant dense<0.000000e+00> : vector<64x32xf32>
    %165 = tpu.matmul %163, %164, %cst_61 {dimension_numbers = #tpu.dot_dimension_numbers<[1], [0], [0], [1], [0, 0, 1, 1], [], []>} : vector<64x32xf32>, vector<32x32xf32>, vector<64x32xf32> -> vector<64x32xf32>
    %166 = arith.addf %0, %165 : vector<64x32xf32>
    %c0_62 = arith.constant 0 : index
    %c0_63 = arith.constant 0 : index
    %167 = vector.load %arg10[%c0_62, %c0_63] : memref<1x32xf32, #tpu.memory_space<vmem>>, vector<1x32xf32>
    %168 = vector.broadcast %167 : vector<1x32xf32> to vector<64x32xf32>
    %169 = arith.addf %166, %168 : vector<64x32xf32>
    %c0_64 = arith.constant 0 : index
    %c0_65 = arith.constant 0 : index
    %170 = vector.load %arg12[%c0_64, %c0_65] : memref<1x32xf32, #tpu.memory_space<vmem>>, vector<1x32xf32>
    %c0_66 = arith.constant 0 : index
    %c0_67 = arith.constant 0 : index
    %171 = vector.load %arg13[%c0_66, %c0_67] : memref<1x32xf32, #tpu.memory_space<vmem>>, vector<1x32xf32>
    %cst_68 = arith.constant dense<0.000000e+00> : vector<64xf32>
    %172 = vector.multi_reduction <add>, %169, %cst_68 [1] : vector<64x32xf32> to vector<64xf32>
    %173 = vector.shape_cast %172 : vector<64xf32> to vector<64x1xf32>
    %cst_69 = arith.constant 3.200000e+01 : f32
    %174 = vector.broadcast %cst_69 : f32 to vector<64x1xf32>
    %175 = arith.divf %173, %174 : vector<64x1xf32>
    %176 = vector.broadcast %175 : vector<64x1xf32> to vector<64x32xf32>
    %177 = arith.subf %169, %176 : vector<64x32xf32>
    %178 = arith.mulf %177, %177 : vector<64x32xf32>
    %cst_70 = arith.constant dense<0.000000e+00> : vector<64xf32>
    %179 = vector.multi_reduction <add>, %178, %cst_70 [1] : vector<64x32xf32> to vector<64xf32>
    %180 = vector.shape_cast %179 : vector<64xf32> to vector<64x1xf32>
    %cst_71 = arith.constant 3.200000e+01 : f32
    %181 = vector.broadcast %cst_71 : f32 to vector<64x1xf32>
    %182 = arith.divf %180, %181 : vector<64x1xf32>
    %cst_72 = arith.constant 9.99999974E-6 : f32
    %183 = vector.broadcast %cst_72 : f32 to vector<64x1xf32>
    %184 = arith.addf %182, %183 : vector<64x1xf32>
    %185 = math.rsqrt %184 : vector<64x1xf32>
    %186 = vector.broadcast %185 : vector<64x1xf32> to vector<64x32xf32>
    %187 = arith.mulf %177, %186 : vector<64x32xf32>
    %188 = vector.broadcast %170 : vector<1x32xf32> to vector<64x32xf32>
    %189 = arith.mulf %187, %188 : vector<64x32xf32>
    %190 = vector.broadcast %171 : vector<1x32xf32> to vector<64x32xf32>
    %191 = arith.addf %189, %190 : vector<64x32xf32>
    %c0_73 = arith.constant 0 : index
    %c0_74 = arith.constant 0 : index
    %192 = vector.load %arg14[%c0_73, %c0_74] : memref<32x128xf32, #tpu.memory_space<vmem>>, vector<32x128xf32>
    %cst_75 = arith.constant dense<0.000000e+00> : vector<64x128xf32>
    %193 = tpu.matmul %191, %192, %cst_75 {dimension_numbers = #tpu.dot_dimension_numbers<[1], [0], [0], [1], [0, 0, 1, 1], [], []>} : vector<64x32xf32>, vector<32x128xf32>, vector<64x128xf32> -> vector<64x128xf32>
    %c0_76 = arith.constant 0 : index
    %c0_77 = arith.constant 0 : index
    %194 = vector.load %arg15[%c0_76, %c0_77] : memref<1x128xf32, #tpu.memory_space<vmem>>, vector<1x128xf32>
    %195 = vector.broadcast %194 : vector<1x128xf32> to vector<64x128xf32>
    %196 = arith.addf %193, %195 : vector<64x128xf32>
    %cst_78 = arith.constant 5.000000e-01 : f32
    %197 = vector.broadcast %cst_78 : f32 to vector<64x128xf32>
    %198 = arith.mulf %197, %196 : vector<64x128xf32>
    %cst_79 = arith.constant 0.707106769 : f32
    %199 = vector.broadcast %cst_79 : f32 to vector<64x128xf32>
    %200 = arith.mulf %196, %199 : vector<64x128xf32>
    %cst_80 = arith.constant -4.000000e+00 : f32
    %cst_81 = arith.constant 4.000000e+00 : f32
    %201 = vector.broadcast %cst_80 : f32 to vector<64x128xf32>
    %202 = arith.maximumf %201, %200 : vector<64x128xf32>
    %203 = vector.broadcast %cst_81 : f32 to vector<64x128xf32>
    %204 = arith.minimumf %203, %202 : vector<64x128xf32>
    %205 = arith.mulf %204, %204 : vector<64x128xf32>
    %cst_82 = arith.constant 2.29050653E-4 : f32
    %206 = vector.broadcast %cst_82 : f32 to vector<64x128xf32>
    %207 = arith.mulf %206, %205 : vector<64x128xf32>
    %cst_83 = arith.constant 0.00340829091 : f32
    %208 = vector.broadcast %cst_83 : f32 to vector<64x128xf32>
    %209 = arith.addf %207, %208 : vector<64x128xf32>
    %210 = arith.mulf %209, %205 : vector<64x128xf32>
    %cst_84 = arith.constant 0.0509556942 : f32
    %211 = vector.broadcast %cst_84 : f32 to vector<64x128xf32>
    %212 = arith.addf %210, %211 : vector<64x128xf32>
    %213 = arith.mulf %212, %205 : vector<64x128xf32>
    %cst_85 = arith.constant 0.185208321 : f32
    %214 = vector.broadcast %cst_85 : f32 to vector<64x128xf32>
    %215 = arith.addf %213, %214 : vector<64x128xf32>
    %216 = arith.mulf %215, %205 : vector<64x128xf32>
    %cst_86 = arith.constant 1.12837911 : f32
    %217 = vector.broadcast %cst_86 : f32 to vector<64x128xf32>
    %218 = arith.addf %216, %217 : vector<64x128xf32>
    %cst_87 = arith.constant -1.17916031E-7 : f32
    %219 = vector.broadcast %cst_87 : f32 to vector<64x128xf32>
    %220 = arith.mulf %219, %205 : vector<64x128xf32>
    %cst_88 = arith.constant 2.35479656E-5 : f32
    %221 = vector.broadcast %cst_88 : f32 to vector<64x128xf32>
    %222 = arith.addf %220, %221 : vector<64x128xf32>
    %223 = arith.mulf %222, %205 : vector<64x128xf32>
    %cst_89 = arith.constant 0.00101796258 : f32
    %224 = vector.broadcast %cst_89 : f32 to vector<64x128xf32>
    %225 = arith.addf %223, %224 : vector<64x128xf32>
    %226 = arith.mulf %225, %205 : vector<64x128xf32>
    %cst_90 = arith.constant 0.0140704699 : f32
    %227 = vector.broadcast %cst_90 : f32 to vector<64x128xf32>
    %228 = arith.addf %226, %227 : vector<64x128xf32>
    %229 = arith.mulf %228, %205 : vector<64x128xf32>
    %cst_91 = arith.constant 0.110985048 : f32
    %230 = vector.broadcast %cst_91 : f32 to vector<64x128xf32>
    %231 = arith.addf %229, %230 : vector<64x128xf32>
    %232 = arith.mulf %231, %205 : vector<64x128xf32>
    %cst_92 = arith.constant 0.497469246 : f32
    %233 = vector.broadcast %cst_92 : f32 to vector<64x128xf32>
    %234 = arith.addf %232, %233 : vector<64x128xf32>
    %235 = arith.mulf %234, %205 : vector<64x128xf32>
    %cst_93 = arith.constant 1.000000e+00 : f32
    %236 = vector.broadcast %cst_93 : f32 to vector<64x128xf32>
    %237 = arith.addf %235, %236 : vector<64x128xf32>
    %238 = arith.mulf %204, %218 : vector<64x128xf32>
    %239 = arith.divf %238, %237 : vector<64x128xf32>
    %cst_94 = arith.constant 1.000000e+00 : f32
    %240 = vector.broadcast %cst_94 : f32 to vector<64x128xf32>
    %241 = arith.addf %240, %239 : vector<64x128xf32>
    %242 = arith.mulf %198, %241 : vector<64x128xf32>
    %c0_95 = arith.constant 0 : index
    %c0_96 = arith.constant 0 : index
    %243 = vector.load %arg16[%c0_95, %c0_96] : memref<128x32xf32, #tpu.memory_space<vmem>>, vector<128x32xf32>
    %cst_97 = arith.constant dense<0.000000e+00> : vector<64x32xf32>
    %244 = tpu.matmul %242, %243, %cst_97 {dimension_numbers = #tpu.dot_dimension_numbers<[1], [0], [0], [1], [0, 0, 1, 1], [], []>} : vector<64x128xf32>, vector<128x32xf32>, vector<64x32xf32> -> vector<64x32xf32>
    %245 = arith.addf %169, %244 : vector<64x32xf32>
    %c0_98 = arith.constant 0 : index
    %c0_99 = arith.constant 0 : index
    %246 = vector.load %arg17[%c0_98, %c0_99] : memref<1x32xf32, #tpu.memory_space<vmem>>, vector<1x32xf32>
    %247 = vector.broadcast %246 : vector<1x32xf32> to vector<64x32xf32>
    %248 = arith.addf %245, %247 : vector<64x32xf32>
    %c0_100 = arith.constant 0 : index
    %c0_101 = arith.constant 0 : index
    %249 = vector.load %arg18[%c0_100, %c0_101] : memref<64x32xf32, #tpu.memory_space<vmem>>, vector<64x32xf32>
    tpu.vector_store %arg18[%c0_100, %c0_101], %248 {strides = array<i32>} : memref<64x32xf32, #tpu.memory_space<vmem>>, vector<64x32xf32>,
    return
  }
  func.func @transform_0(%arg0: i32) -> (i32, i32) {
    %c0_i32 = arith.constant 0 : i32
    %c0_i32_0 = arith.constant 0 : i32
    return %arg0, %c0_i32 : i32, i32
  }
  func.func @transform_1(%arg0: i32) -> (i32, i32, i32) {
    %c0_i32 = arith.constant 0 : i32
    %c0_i32_0 = arith.constant 0 : i32
    %c0_i32_1 = arith.constant 0 : i32
    return %c0_i32, %arg0, %c0_i32_0 : i32, i32, i32
  }
  func.func @transform_2(%arg0: i32) -> (i32, i32) {
    %c0_i32 = arith.constant 0 : i32
    %c0_i32_0 = arith.constant 0 : i32
    %c0_i32_1 = arith.constant 0 : i32
    return %c0_i32, %c0_i32_0 : i32, i32
  }
  func.func @transform_3(%arg0: i32) -> (i32, i32) {
    %c0_i32 = arith.constant 0 : i32
    %c0_i32_0 = arith.constant 0 : i32
    %c0_i32_1 = arith.constant 0 : i32
    return %c0_i32, %c0_i32_0 : i32, i32
  }
  func.func @transform_4(%arg0: i32) -> (i32, i32) {
    %c0_i32 = arith.constant 0 : i32
    %c0_i32_0 = arith.constant 0 : i32
    %c0_i32_1 = arith.constant 0 : i32
    return %c0_i32, %c0_i32_0 : i32, i32
  }
  func.func @transform_5(%arg0: i32) -> (i32, i32) {
    %c0_i32 = arith.constant 0 : i32
    %c0_i32_0 = arith.constant 0 : i32
    %c0_i32_1 = arith.constant 0 : i32
    return %c0_i32, %c0_i32_0 : i32, i32
  }
  func.func @transform_6(%arg0: i32) -> (i32, i32) {
    %c0_i32 = arith.constant 0 : i32
    %c0_i32_0 = arith.constant 0 : i32
    %c0_i32_1 = arith.constant 0 : i32
    return %c0_i32, %c0_i32_0 : i32, i32
  }
  func.func @transform_7(%arg0: i32) -> (i32, i32) {
    %c0_i32 = arith.constant 0 : i32
    %c0_i32_0 = arith.constant 0 : i32
    %c0_i32_1 = arith.constant 0 : i32
    return %c0_i32, %c0_i32_0 : i32, i32
  }
  func.func @transform_8(%arg0: i32) -> (i32, i32) {
    %c0_i32 = arith.constant 0 : i32
    %c0_i32_0 = arith.constant 0 : i32
    %c0_i32_1 = arith.constant 0 : i32
    return %c0_i32, %c0_i32_0 : i32, i32
  }
  func.func @transform_9(%arg0: i32) -> (i32, i32) {
    %c0_i32 = arith.constant 0 : i32
    %c0_i32_0 = arith.constant 0 : i32
    %c0_i32_1 = arith.constant 0 : i32
    return %c0_i32, %c0_i32_0 : i32, i32
  }
  func.func @transform_10(%arg0: i32) -> (i32, i32, i32) {
    %c0_i32 = arith.constant 0 : i32
    %c0_i32_0 = arith.constant 0 : i32
    %c0_i32_1 = arith.constant 0 : i32
    %c0_i32_2 = arith.constant 0 : i32
    return %c0_i32, %c0_i32_0, %c0_i32_1 : i32, i32, i32
  }
  func.func @transform_11(%arg0: i32) -> (i32, i32) {
    %c0_i32 = arith.constant 0 : i32
    %c0_i32_0 = arith.constant 0 : i32
    %c0_i32_1 = arith.constant 0 : i32
    return %c0_i32, %c0_i32_0 : i32, i32
  }
  func.func @transform_12(%arg0: i32) -> (i32, i32) {
    %c0_i32 = arith.constant 0 : i32
    %c0_i32_0 = arith.constant 0 : i32
    %c0_i32_1 = arith.constant 0 : i32
    return %c0_i32, %c0_i32_0 : i32, i32
  }
  func.func @transform_13(%arg0: i32) -> (i32, i32) {
    %c0_i32 = arith.constant 0 : i32
    %c0_i32_0 = arith.constant 0 : i32
    %c0_i32_1 = arith.constant 0 : i32
    return %c0_i32, %c0_i32_0 : i32, i32
  }
  func.func @transform_14(%arg0: i32) -> (i32, i32) {
    %c0_i32 = arith.constant 0 : i32
    %c0_i32_0 = arith.constant 0 : i32
    %c0_i32_1 = arith.constant 0 : i32
    return %c0_i32, %c0_i32_0 : i32, i32
  }
  func.func @transform_15(%arg0: i32) -> (i32, i32) {
    %c0_i32 = arith.constant 0 : i32
    %c0_i32_0 = arith.constant 0 : i32
    %c0_i32_1 = arith.constant 0 : i32
    return %c0_i32, %c0_i32_0 : i32, i32
  }
  func.func @transform_16(%arg0: i32) -> (i32, i32) {
    %c0_i32 = arith.constant 0 : i32
    %c0_i32_0 = arith.constant 0 : i32
    %c0_i32_1 = arith.constant 0 : i32
    return %c0_i32, %c0_i32_0 : i32, i32
  }
  func.func @transform_17(%arg0: i32) -> (i32, i32) {
    %c0_i32 = arith.constant 0 : i32
    %c0_i32_0 = arith.constant 0 : i32
    return %arg0, %c0_i32 : i32, i32
  }
}

</mosaic_0001>

<bundles_post_ra>
// kernel: tile.7
= control target key start
LH: loop header
LB: loop body
LE: loop exit
PB: predicated region body
PF: predicated region fallthrough
CT: control target
= control target key end

     0   :  { %vm260_vm0 = vcmask 1047556   ;;  %s492_s15 = smov 16   ;;  %vm262_vm1 = vcmask 130048   ;;  %vm335_vm2 = vcmask 261248   ;;  %s783_s0 = inlined_call_operand.vmem [shape: f32[4,16,2,16], index: 0, kind: input, shape index: {}]   ;;  %s784_s1 = inlined_call_operand.vmem [shape: f32[4,16,32], index: 1, kind: output, shape index: {}]  }
   0x1   :  { %v470_v0 = vld [vmem:[%s783_s0 + $0xe] sm:$0x3]  ;;  %v471_v1 = vld [vmem:[%s783_s0 + $0xc] sm:$0x3]  ;;  %v472_v2 = vld [vmem:[%s783_s0 + $0xa] sm:$0x3] }
   0x2   :  { %231 = vst [vmem:[#allocation0 + $0x38] sm:$0x3] %v470_v0  ;;  %v473_v3 = vld [vmem:[%s783_s0 + $0x8] sm:$0x3]  ;;  %v474_v4 = vld [vmem:[%s783_s0 + $0x6] sm:$0x3] }
   0x3   :  { %235 = vst [vmem:[#allocation0 + $0x30] sm:$0x3] %v471_v1  ;;  %v475_v5 = vld [vmem:[%s783_s0 + $0x4] sm:$0x3]  ;;  %v476_v6 = vld [vmem:[%s783_s0 + $0x2] sm:$0x3] }
   0x4   :  { %239 = vst [vmem:[#allocation0 + $0x28] sm:$0x3] %v472_v2  ;;  %v256_v7 = vld [vmem:[%s783_s0] sm:$0x3]  ;;  %v462_v8 = vld [vmem:[%s783_s0 + $0x1e] sm:$0x3] }
   0x5   :  { %243 = vst [vmem:[#allocation0 + $0x20] sm:$0x3] %v473_v3  ;;  %v463_v9 = vld [vmem:[%s783_s0 + $0x1c] sm:$0x3]  ;;  %v464_v10 = vld [vmem:[%s783_s0 + $0x1a] sm:$0x3] }
   0x6   :  { %247 = vst [vmem:[#allocation0 + $0x18] sm:$0x3] %v474_v4  ;;  %v465_v11 = vld [vmem:[%s783_s0 + $0x18] sm:$0x3]  ;;  %v466_v12 = vld [vmem:[%s783_s0 + $0x16] sm:$0x3] }
   0x7   :  { %251 = vst [vmem:[#allocation0 + $0x10] sm:$0x3] %v475_v5  ;;  %v467_v13 = vld [vmem:[%s783_s0 + $0x14] sm:$0x3]  ;;  %v468_v14 = vld [vmem:[%s783_s0 + $0x12] sm:$0x3] }
   0x8   :  { %255 = vst [vmem:[#allocation0 + $0x8] sm:$0x3] %v476_v6  ;;  %v469_v15 = vld [vmem:[%s783_s0 + $0x10] sm:$0x3]  ;;  %v438_v17 = vld [vmem:[%s783_s0 + $0x4e] sm:$0x3] }
   0x9   :  { %257 = vst [vmem:[#allocation0] sm:$0x3] %v256_v7  ;;  %v439_v18 = vld [vmem:[%s783_s0 + $0x4c] sm:$0x3]  ;;  %v440_v21 = vld [vmem:[%s783_s0 + $0x4a] sm:$0x3] }
   0xa   :  { %199 = vst [vmem:[#allocation0 + $0x78] sm:$0x3] %v462_v8  ;;  %v441_v22 = vld [vmem:[%s783_s0 + $0x48] sm:$0x3]  ;;  %v442_v23 = vld [vmem:[%s783_s0 + $0x46] sm:$0x3] }
   0xb   :  { %203 = vst [vmem:[#allocation0 + $0x70] sm:$0x3] %v463_v9  ;;  %v443_v24 = vld [vmem:[%s783_s0 + $0x44] sm:$0x3]  ;;  %v444_v25 = vld [vmem:[%s783_s0 + $0x42] sm:$0x3] }
   0xc   :  { %207 = vst [vmem:[#allocation0 + $0x68] sm:$0x3] %v464_v10  ;;  %v330_v16 = vld [vmem:[#allocation0 + $0x1] ss:$8 sm:$0xf0]  }
   0xd   :  { %211 = vst [vmem:[#allocation0 + $0x60] sm:$0x3] %v465_v11  ;;  %v445_v26 = vld [vmem:[%s783_s0 + $0x40] sm:$0x3]  ;;  %v430_v28 = vld [vmem:[%s783_s0 + $0x5e] sm:$0x3] }
   0xe   :  { %215 = vst [vmem:[#allocation0 + $0x58] sm:$0x3] %v466_v12  ;;  %v431_v29 = vld [vmem:[%s783_s0 + $0x5c] sm:$0x3]  ;;  %v432_v32 = vld [vmem:[%s783_s0 + $0x5a] sm:$0x3] }
   0xf   :  { %219 = vst [vmem:[#allocation0 + $0x50] sm:$0x3] %v467_v13  ;;  %v433_v33 = vld [vmem:[%s783_s0 + $0x58] sm:$0x3]  ;;  %v434_v34 = vld [vmem:[%s783_s0 + $0x56] sm:$0x3] }
  0x10   :  { %v328_v19 = vld [vmem:[#allocation0 + $0x1] ss:$8 sm:$0xf]   ;;  %223 = vst [vmem:[#allocation0 + $0x48] sm:$0x3] %v468_v14 }
  0x11   :  { %v332_v20 = vsel %vm260_vm0, %v330_v16, %v328_v19  ;;  %227 = vst [vmem:[#allocation0 + $0x40] sm:$0x3] %v469_v15  ;;  %v435_v35 = vld [vmem:[%s783_s0 + $0x54] sm:$0x3]  ;;  %v436_v36 = vld [vmem:[%s783_s0 + $0x52] sm:$0x3] }
  0x12   :  { %333 = vrot.lane.b32.xlu0 %v332_v20, %s492_s15  ;;  %103 = vst [vmem:[#allocation0 + $0x138] sm:$0x3] %v438_v17  ;;  %v437_v37 = vld [vmem:[%s783_s0 + $0x50] sm:$0x3]  ;;  %v446_v39 = vld [vmem:[%s783_s0 + $0x3e] sm:$0x3] }
  0x13   :  { %107 = vst [vmem:[#allocation0 + $0x130] sm:$0x3] %v439_v18  ;;  %v447_v40 = vld [vmem:[%s783_s0 + $0x3c] sm:$0x3]  ;;  %v448_v43 = vld [vmem:[%s783_s0 + $0x3a] sm:$0x3] }
  0x14   :  { %111 = vst [vmem:[#allocation0 + $0x128] sm:$0x3] %v440_v21  ;;  %v351_v27 = vld [vmem:[#allocation0 + $0x41] ss:$8 sm:$0xf0]  }
  0x15   :  { %115 = vst [vmem:[#allocation0 + $0x120] sm:$0x3] %v441_v22  ;;  %v449_v44 = vld [vmem:[%s783_s0 + $0x38] sm:$0x3]  ;;  %v450_v45 = vld [vmem:[%s783_s0 + $0x36] sm:$0x3] }
  0x16   :  { %119 = vst [vmem:[#allocation0 + $0x118] sm:$0x3] %v442_v23  ;;  %v451_v46 = vld [vmem:[%s783_s0 + $0x34] sm:$0x3]  ;;  %v452_v47 = vld [vmem:[%s783_s0 + $0x32] sm:$0x3] }
  0x17   :  { %123 = vst [vmem:[#allocation0 + $0x110] sm:$0x3] %v443_v24  ;;  %v453_v48 = vld [vmem:[%s783_s0 + $0x30] sm:$0x3]  ;;  %v414_v50 = vld [vmem:[%s783_s0 + $0x7e] sm:$0x3] }
  0x18   :  { %v349_v30 = vld [vmem:[#allocation0 + $0x41] ss:$8 sm:$0xf]   ;;  %127 = vst [vmem:[#allocation0 + $0x108] sm:$0x3] %v444_v25 }
  0x19   :  { %v353_v31 = vsel %vm260_vm0, %v351_v27, %v349_v30  ;;  %131 = vst [vmem:[#allocation0 + $0x100] sm:$0x3] %v445_v26  ;;  %v415_v51 = vld [vmem:[%s783_s0 + $0x7c] sm:$0x3]  ;;  %v416_v54 = vld [vmem:[%s783_s0 + $0x7a] sm:$0x3] }
  0x1a   :  { %354 = vrot.lane.b32.xlu1 %v353_v31, %s492_s15  ;;  %71 = vst [vmem:[#allocation0 + $0x178] sm:$0x3] %v430_v28  ;;  %v417_v55 = vld [vmem:[%s783_s0 + $0x78] sm:$0x3]  ;;  %v418_v56 = vld [vmem:[%s783_s0 + $0x76] sm:$0x3] }
  0x1b   :  { %75 = vst [vmem:[#allocation0 + $0x170] sm:$0x3] %v431_v29  ;;  %v419_v57 = vld [vmem:[%s783_s0 + $0x74] sm:$0x3]  ;;  %v420_v58 = vld [vmem:[%s783_s0 + $0x72] sm:$0x3] }
  0x1c   :  { %79 = vst [vmem:[#allocation0 + $0x168] sm:$0x3] %v432_v32  ;;  %v340_v38 = vld [vmem:[#allocation0 + $0x101] ss:$8 sm:$0xf0]  }
  0x1d   :  { %83 = vst [vmem:[#allocation0 + $0x160] sm:$0x3] %v433_v33  ;;  %v421_v59 = vld [vmem:[%s783_s0 + $0x70] sm:$0x3]  ;;  %v454_v61 = vld [vmem:[%s783_s0 + $0x2e] sm:$0x3] }
  0x1e   :  { %87 = vst [vmem:[#allocation0 + $0x158] sm:$0x3] %v434_v34  ;;  %v455_v62 = vld [vmem:[%s783_s0 + $0x2c] sm:$0x3]  ;;  %v456_v1 = vld [vmem:[%s783_s0 + $0x2a] sm:$0x3] }
  0x1f   :  { %91 = vst [vmem:[#allocation0 + $0x150] sm:$0x3] %v435_v35  ;;  %v457_v2 = vld [vmem:[%s783_s0 + $0x28] sm:$0x3]  ;;  %v458_v3 = vld [vmem:[%s783_s0 + $0x26] sm:$0x3] }
  0x20   :  { %v338_v41 = vld [vmem:[#allocation0 + $0x101] ss:$8 sm:$0xf]   ;;  %95 = vst [vmem:[#allocation0 + $0x148] sm:$0x3] %v436_v36 }
  0x21   :  { %v342_v42 = vsel %vm260_vm0, %v340_v38, %v338_v41  ;;  %99 = vst [vmem:[#allocation0 + $0x140] sm:$0x3] %v437_v37  ;;  %v459_v4 = vld [vmem:[%s783_s0 + $0x24] sm:$0x3]  ;;  %v460_v5 = vld [vmem:[%s783_s0 + $0x22] sm:$0x3] }
  0x22   :  { %343 = vrot.lane.b32.xlu0 %v342_v42, %s492_s15  ;;  %135 = vst [vmem:[#allocation0 + $0xf8] sm:$0x3] %v446_v39  ;;  %v461_v6 = vld [vmem:[%s783_s0 + $0x20] sm:$0x3]  ;;  %v422_v8 = vld [vmem:[%s783_s0 + $0x6e] sm:$0x3] }
  0x23   :  { %139 = vst [vmem:[#allocation0 + $0xf0] sm:$0x3] %v447_v40  ;;  %v423_v9 = vld [vmem:[%s783_s0 + $0x6c] sm:$0x3]  ;;  %v424_v12 = vld [vmem:[%s783_s0 + $0x6a] sm:$0x3] }
  0x24   :  { %143 = vst [vmem:[#allocation0 + $0xe8] sm:$0x3] %v448_v43  ;;  %v362_v49 = vld [vmem:[#allocation0 + $0x141] ss:$8 sm:$0xf0]  }
  0x25   :  { %147 = vst [vmem:[#allocation0 + $0xe0] sm:$0x3] %v449_v44  ;;  %v425_v13 = vld [vmem:[%s783_s0 + $0x68] sm:$0x3]  ;;  %v426_v14 = vld [vmem:[%s783_s0 + $0x66] sm:$0x3] }
  0x26   :  { %151 = vst [vmem:[#allocation0 + $0xd8] sm:$0x3] %v450_v45  ;;  %v427_v15 = vld [vmem:[%s783_s0 + $0x64] sm:$0x3]  ;;  %v428_v16 = vld [vmem:[%s783_s0 + $0x62] sm:$0x3] }
  0x27   :  { %155 = vst [vmem:[#allocation0 + $0xd0] sm:$0x3] %v451_v46  ;;  %v429_v17 = vld [vmem:[%s783_s0 + $0x60] sm:$0x3] }
  0x28   :  { %v360_v52 = vld [vmem:[#allocation0 + $0x141] ss:$8 sm:$0xf]   ;;  %159 = vst [vmem:[#allocation0 + $0xc8] sm:$0x3] %v452_v47 }
  0x29   :  { %v364_v53 = vsel %vm260_vm0, %v362_v49, %v360_v52  ;;  %163 = vst [vmem:[#allocation0 + $0xc0] sm:$0x3] %v453_v48  ;;  %v258_v24 = vld [vmem:[#allocation0] ss:$8 sm:$0xf]  }
  0x2a   :  { %365 = vrot.lane.b32.xlu1 %v364_v53, %s492_s15  ;;  %7 = vst [vmem:[#allocation0 + $0x1f8] sm:$0x3] %v414_v50  ;;  %v259_v25 = vld [vmem:[#allocation0] ss:$8 sm:$0xf0]  }
  0x2b   :  { %11 = vst [vmem:[#allocation0 + $0x1f0] sm:$0x3] %v415_v51  ;;  %v261_v26 = vsel %vm260_vm0, %v259_v25, %v258_v24  ;;  %v265_v27 = vld [vmem:[#allocation0 + $0x40] ss:$8 sm:$0xf]  }
  0x2c   :  { %15 = vst [vmem:[#allocation0 + $0x1e8] sm:$0x3] %v416_v54  ;;  %v395_v60 = vld [vmem:[#allocation0 + $0xc1] ss:$8 sm:$0xf0]  }
  0x2d   :  { %19 = vst [vmem:[#allocation0 + $0x1e0] sm:$0x3] %v417_v55  ;;  %v267_v28 = vld [vmem:[#allocation0 + $0x40] ss:$8 sm:$0xf0]  }
  0x2e   :  { %23 = vst [vmem:[#allocation0 + $0x1d8] sm:$0x3] %v418_v56  ;;  %v269_v29 = vsel %vm260_vm0, %v267_v28, %v265_v27  ;;  %v292_v33 = vld [vmem:[#allocation0 + $0x100] ss:$8 sm:$0xf]  }
  0x2f   :  { %27 = vst [vmem:[#allocation0 + $0x1d0] sm:$0x3] %v419_v57  ;;  %v294_v34 = vld [vmem:[#allocation0 + $0x100] ss:$8 sm:$0xf0]  }
  0x30   :  { %v393_v63 = vld [vmem:[#allocation0 + $0xc1] ss:$8 sm:$0xf]   ;;  %31 = vst [vmem:[#allocation0 + $0x1c8] sm:$0x3] %v420_v58  ;;  %v296_v35 = vsel %vm260_vm0, %v294_v34, %v292_v33 }
  0x31   :  { %v397_v0 = vsel %vm260_vm0, %v395_v60, %v393_v63  ;;  %35 = vst [vmem:[#allocation0 + $0x1c0] sm:$0x3] %v421_v59  ;;  %v301_v36 = vld [vmem:[#allocation0 + $0x140] ss:$8 sm:$0xf]  }
  0x32   :  { %398 = vrot.lane.b32.xlu0 %v397_v0, %s492_s15  ;;  %167 = vst [vmem:[#allocation0 + $0xb8] sm:$0x3] %v454_v61  ;;  %v303_v37 = vld [vmem:[#allocation0 + $0x140] ss:$8 sm:$0xf0]  }
  0x33   :  { %171 = vst [vmem:[#allocation0 + $0xb0] sm:$0x3] %v455_v62  ;;  %v305_v38 = vsel %vm260_vm0, %v303_v37, %v301_v36  ;;  %v283_v39 = vld [vmem:[#allocation0 + $0xc0] ss:$8 sm:$0xf]  }
  0x34   :  { %175 = vst [vmem:[#allocation0 + $0xa8] sm:$0x3] %v456_v1  ;;  %v406_v7 = vld [vmem:[#allocation0 + $0x1c1] ss:$8 sm:$0xf0]  }
  0x35   :  { %179 = vst [vmem:[#allocation0 + $0xa0] sm:$0x3] %v457_v2  ;;  %v285_v40 = vld [vmem:[#allocation0 + $0xc0] ss:$8 sm:$0xf0]  }
  0x36   :  { %183 = vst [vmem:[#allocation0 + $0x98] sm:$0x3] %v458_v3  ;;  %v287_v41 = vsel %vm260_vm0, %v285_v40, %v283_v39  ;;  %v321_v47 = vld [vmem:[#allocation0 + $0x1c0] ss:$8 sm:$0xf0]  }
  0x37   :  { %187 = vst [vmem:[#allocation0 + $0x90] sm:$0x3] %v459_v4 }
  0x38   :  { %v404_v10 = vld [vmem:[#allocation0 + $0x1c1] ss:$8 sm:$0xf]   ;;  %191 = vst [vmem:[#allocation0 + $0x88] sm:$0x3] %v460_v5 }
  0x39   :  { %v408_v11 = vsel %vm260_vm0, %v406_v7, %v404_v10  ;;  %195 = vst [vmem:[#allocation0 + $0x80] sm:$0x3] %v461_v6  ;;  %v319_v46 = vld [vmem:[#allocation0 + $0x1c0] ss:$8 sm:$0xf]  }
  0x3a   :  { %409 = vrot.lane.b32.xlu1 %v408_v11, %s492_s15  ;;  %39 = vst [vmem:[#allocation0 + $0x1b8] sm:$0x3] %v422_v8  ;;  %v323_v48 = vsel %vm260_vm0, %v321_v47, %v319_v46 }
  0x3b   :  { %43 = vst [vmem:[#allocation0 + $0x1b0] sm:$0x3] %v423_v9 }
  0x3c   :  { %47 = vst [vmem:[#allocation0 + $0x1a8] sm:$0x3] %v424_v12  ;;  %v373_v18 = vld [vmem:[#allocation0 + $0x81] ss:$8 sm:$0xf0]  }
  0x3d   :  { %51 = vst [vmem:[#allocation0 + $0x1a0] sm:$0x3] %v425_v13  ;;  %v276_v31 = vld [vmem:[#allocation0 + $0x80] ss:$8 sm:$0xf0]  }
  0x3e   :  { %55 = vst [vmem:[#allocation0 + $0x198] sm:$0x3] %v426_v14 }
  0x3f   :  { %59 = vst [vmem:[#allocation0 + $0x190] sm:$0x3] %v427_v15 }
  0x40   :  { %v371_v19 = vld [vmem:[#allocation0 + $0x81] ss:$8 sm:$0xf]   ;;  %63 = vst [vmem:[#allocation0 + $0x188] sm:$0x3] %v428_v16 }
  0x41   :  { %v375_v20 = vsel %vm260_vm0, %v373_v18, %v371_v19  ;;  %67 = vst [vmem:[#allocation0 + $0x180] sm:$0x3] %v429_v17  ;;  %v274_v30 = vld [vmem:[#allocation0 + $0x80] ss:$8 sm:$0xf]  }
  0x42   :  { %376 = vrot.lane.b32.xlu2 %v375_v20, %s492_s15  ;;  %263 = vst.msk [vmem:[%s784_s1] sm:$0xff] %vm262_vm1, %v261_v26   ;;  %v278_v32 = vsel %vm260_vm0, %v276_v31, %v274_v30 }
  0x43   :  { %477 = vst.msk [vmem:[%s784_s1 + $0x8] sm:$0xff] %vm262_vm1, %v269_v29  }
  0x44   :  { %v384_v21 = vld [vmem:[#allocation0 + $0x181] ss:$8 sm:$0xf0]   ;;  %478 = vst.msk [vmem:[%s784_s1 + $0x10] sm:$0xff] %vm262_vm1, %v278_v32  }
  0x45   :  { %480 = vst.msk [vmem:[%s784_s1 + $0x20] sm:$0xff] %vm262_vm1, %v296_v35   ;;  %v312_v44 = vld [vmem:[#allocation0 + $0x180] ss:$8 sm:$0xf0]  }
  0x46   :  { %481 = vst.msk [vmem:[%s784_s1 + $0x28] sm:$0xff] %vm262_vm1, %v305_v38  }
  0x47   :  { %479 = vst.msk [vmem:[%s784_s1 + $0x18] sm:$0xff] %vm262_vm1, %v287_v41  }
  0x48   :  { %v382_v22 = vld [vmem:[#allocation0 + $0x181] ss:$8 sm:$0xf]   ;;  %v310_v43 = vld [vmem:[#allocation0 + $0x180] ss:$8 sm:$0xf]  }
  0x49   :  { %v386_v23 = vsel %vm260_vm0, %v384_v21, %v382_v22  ;;  %v314_v45 = vsel %vm260_vm0, %v312_v44, %v310_v43  ;;  %483 = vst.msk [vmem:[%s784_s1 + $0x38] sm:$0xff] %vm262_vm1, %v323_v48  }
  0x4a   :  { %387 = vrot.lane.b32.xlu2 %v386_v23, %s492_s15  ;;  %482 = vst.msk [vmem:[%s784_s1 + $0x30] sm:$0xff] %vm262_vm1, %v314_v45  }
  0x84   :  { %v334_v42 = vpop.permute.xlu0 %333  }
  0x85   :  { %336 = vst.msk [vmem:[%s784_s1] sm:$0xff] %vm335_vm2, %v334_v42  }
  0x8c   :  { %v355_v49 = vpop.permute.xlu1 %354  }
  0x8d   :  { %485 = vst.msk [vmem:[%s784_s1 + $0x8] sm:$0xff] %vm335_vm2, %v355_v49  }
  0x94   :  { %v344_v50 = vpop.permute.xlu0 %343  }
  0x95   :  { %484 = vst.msk [vmem:[%s784_s1 + $0x20] sm:$0xff] %vm335_vm2, %v344_v50  }
  0x9c   :  { %v377_v51 = vpop.permute.xlu2 %376   ;;  %v366_v52 = vpop.permute.xlu1 %365  }
  0x9d   :  { %487 = vst.msk [vmem:[%s784_s1 + $0x10] sm:$0xff] %vm335_vm2, %v377_v51  }
  0x9e   :  { %486 = vst.msk [vmem:[%s784_s1 + $0x28] sm:$0xff] %vm335_vm2, %v366_v52  }
  0xa4   :  { %v399_v53 = vpop.permute.xlu0 %398   ;;  %v388_v54 = vpop.permute.xlu2 %387  }
  0xa5   :  { %489 = vst.msk [vmem:[%s784_s1 + $0x18] sm:$0xff] %vm335_vm2, %v399_v53  }
  0xa6   :  { %488 = vst.msk [vmem:[%s784_s1 + $0x30] sm:$0xff] %vm335_vm2, %v388_v54  }
  0xac   :  { %v410_v55 = vpop.permute.xlu1 %409  }
  0xad   :  { %490 = vst.msk [vmem:[%s784_s1 + $0x38] sm:$0xff] %vm335_vm2, %v410_v55  }

// kernel: swin_decoder_block.3
= control target key start
LH: loop header
LB: loop body
LE: loop exit
PB: predicated region body
PF: predicated region fallthrough
CT: control target
= control target key end

     0   :  { %s6795_s0 = inlined_call_operand.vmem [shape: f32[128,32], index: 0, kind: input, shape index: {}]   ;;  %s6796_s1 = inlined_call_operand.vmem [shape: f32[2,128,32], index: 1, kind: input, shape index: {}]   ;;  %s6797_s2 = inlined_call_operand.vmem [shape: f32[1,32], index: 2, kind: input, shape index: {}, may-alias: {2,11}]   ;;  %s6798_s3 = inlined_call_operand.vmem [shape: f32[1,32], index: 3, kind: input, shape index: {}, may-alias: {3,5,9,12,16}]   ;;  %s6799_s4 = inlined_call_operand.vmem [shape: f32[32,32], index: 4, kind: input, shape index: {}]   ;;  %s6800_s5 = inlined_call_operand.vmem [shape: f32[1,32], index: 5, kind: input, shape index: {}, may-alias: {3,5,9,12,16}]   ;;  %s6801_s6 = inlined_call_operand.vmem [shape: f32[32,64], index: 6, kind: input, shape index: {}]   ;;  %s6802_s7 = inlined_call_operand.vmem [shape: f32[1,64], index: 7, kind: input, shape index: {}]   ;;  %s6803_s8 = inlined_call_operand.vmem [shape: f32[32,32], index: 8, kind: input, shape index: {}]   ;;  %s6804_s9 = inlined_call_operand.vmem [shape: f32[1,32], index: 9, kind: input, shape index: {}, may-alias: {3,5,9,12,16}]   ;;  %s6805_s10 = inlined_call_operand.vmem [shape: f32[4,16,32], index: 10, kind: input, shape index: {}]   ;;  %s6806_s11 = inlined_call_operand.vmem [shape: f32[1,32], index: 11, kind: input, shape index: {}, may-alias: {2,11}]   ;;  %s6807_s12 = inlined_call_operand.vmem [shape: f32[1,32], index: 12, kind: input, shape index: {}, may-alias: {3,5,9,12,16}]   ;;  %s6808_s13 = inlined_call_operand.vmem [shape: f32[32,128], index: 13, kind: input, shape index: {}]   ;;  %s6809_s14 = inlined_call_operand.vmem [shape: f32[1,128], index: 14, kind: input, shape index: {}]   ;;  %s6810_s15 = inlined_call_operand.vmem [shape: f32[128,32], index: 15, kind: input, shape index: {}]   ;;  %s6811_s16 = inlined_call_operand.vmem [shape: f32[1,32], index: 16, kind: input, shape index: {}, may-alias: {3,5,9,12,16}]   ;;  %s6812_s17 = inlined_call_operand.vmem [shape: f32[128,32], index: 17, kind: output, shape index: {}]  }
   0x1   :  { %6817 = sst [smem:[#allocation13_spill]] %s6795_s0 }
   0x2   :  { %6818 = sst [smem:[#allocation14_spill]] %s6796_s1 }
   0x3   :  { %s5001_s24 = smov 0   ;;  %s5003_s25 = smov 0  }
   0x4   :  { %s5005_s26 = smov 0  }
   0x5 LB: > { %s4272_s27 = sadd.s32 4294967295, %s4898_s26   ;;  %s5018_s28 = sadd.s32 1, %s4898_s26   ;;  %s4898_s26 = sphi %s5005_s26, %s6849_s26   ;;  %s4894_s25 = sphi %s5003_s25, %s6848_s25   ;;  %s4890_s24 = sphi %s5001_s24, %s6847_s24  }
   0x6   : > { %s57_s29 = ssub.s32 %s4898_s26, %s5018_s28  ;;  %s60_s0 = sadd.s32 1, %s4894_s25 }
   0x7   : > { %p58_p0 = scmp.eq.s32.totalorder %s57_s29, 0  ;;  %p67_p1 = scmp.ne.s32.totalorder %s4894_s25, %s4890_s24 }
   0x8   : > { %p68_p2 = scmp.eq.s32.totalorder %s4898_s26, 0  ;;  %p4275_p4 = scmp.ge.s32.totalorder %s4898_s26, 2 }
   0x9   : > { %s5027_s30 = scalar_select %p58_p0, %s4894_s25, %s60_s0  }
   0xa   : > { %p69_p3 = por %p68_p2, %p67_p1  ;;  %479 = sbr.rel (%p4275_p4) target bundleno = 41 (0x29), region = 76 }
   0xf   : > { %491 = sbr.rel (!%p69_p3) target bundleno = 41 (0x29), region = 84  ;;  %s493_s18 = sand.u32 (%p69_p3), 1, %s4894_s25  }
  0x10   : > { %s4477_s19 = sshll.u32 (%p69_p3), %s4898_s26, 6  ;;  %s4276_s1 = sshll.u32 (%p69_p3), %s493_s18, 7 }
  0x11   : > { %s6819_s22 = sld [smem:[#allocation14_spill]] (%p69_p3)  ;;  %s495_s29 = scalar_lea.vmem (%p69_p3), [#allocation2], %s4276_s1 }
  0x17   : > { %s5035_s23 = scalar_lea.vmem %s6819_s22, %s4477_s19 }
  0x18   : > { %v557_v0 = vld [vmem:[%s5035_s23] sm:$0xff]  ;;  %v559_v1 = vld [vmem:[%s5035_s23 + $0x8] sm:$0xff]  ;;  %v561_v2 = vld [vmem:[%s5035_s23 + $0x10] sm:$0xff] }
  0x19   : > { %558 = vst [vmem:[%s495_s29] sm:$0xff] %v557_v0  ;;  %v563_v3 = vld [vmem:[%s5035_s23 + $0x18] sm:$0xff]  ;;  %v565_v4 = vld [vmem:[%s5035_s23 + $0x20] sm:$0xff]  ;;  %v567_v5 = vld [vmem:[%s5035_s23 + $0x28] sm:$0xff] }
  0x1a   : > { %560 = vst [vmem:[%s495_s29 + $0x8] sm:$0xff] %v559_v1  ;;  %v569_v6 = vld [vmem:[%s5035_s23 + $0x30] sm:$0xff]  ;;  %v571_v7 = vld [vmem:[%s5035_s23 + $0x38] sm:$0xff]  ;;  %v573_v8 = vld [vmem:[%s5035_s23 + $0x80] sm:$0xff] }
  0x1b   : > { %562 = vst [vmem:[%s495_s29 + $0x10] sm:$0xff] %v561_v2  ;;  %v575_v9 = vld [vmem:[%s5035_s23 + $0x88] sm:$0xff]  ;;  %v577_v10 = vld [vmem:[%s5035_s23 + $0x90] sm:$0xff]  ;;  %v579_v11 = vld [vmem:[%s5035_s23 + $0x98] sm:$0xff] }
  0x1c   : > { %564 = vst [vmem:[%s495_s29 + $0x18] sm:$0xff] %v563_v3  ;;  %v581_v12 = vld [vmem:[%s5035_s23 + $0xa0] sm:$0xff]  ;;  %v583_v13 = vld [vmem:[%s5035_s23 + $0xa8] sm:$0xff]  ;;  %v585_v14 = vld [vmem:[%s5035_s23 + $0xb0] sm:$0xff] }
  0x1d   : > { %566 = vst [vmem:[%s495_s29 + $0x20] sm:$0xff] %v565_v4  ;;  %v587_v15 = vld [vmem:[%s5035_s23 + $0xb8] sm:$0xff] }
  0x1e   : > { %568 = vst [vmem:[%s495_s29 + $0x28] sm:$0xff] %v567_v5 }
  0x1f   : > { %570 = vst [vmem:[%s495_s29 + $0x30] sm:$0xff] %v569_v6 }
  0x20   : > { %572 = vst [vmem:[%s495_s29 + $0x38] sm:$0xff] %v571_v7 }
  0x21   : > { %574 = vst [vmem:[%s495_s29 + $0x40] sm:$0xff] %v573_v8 }
  0x22   : > { %576 = vst [vmem:[%s495_s29 + $0x48] sm:$0xff] %v575_v9 }
  0x23   : > { %578 = vst [vmem:[%s495_s29 + $0x50] sm:$0xff] %v577_v10 }
  0x24   : > { %580 = vst [vmem:[%s495_s29 + $0x58] sm:$0xff] %v579_v11 }
  0x25   : > { %582 = vst [vmem:[%s495_s29 + $0x60] sm:$0xff] %v581_v12 }
  0x26   : > { %584 = vst [vmem:[%s495_s29 + $0x68] sm:$0xff] %v583_v13 }
  0x27   : > { %586 = vst [vmem:[%s495_s29 + $0x70] sm:$0xff] %v585_v14 }
  0x28   : > { %588 = vst [vmem:[%s495_s29 + $0x78] sm:$0xff] %v587_v15 }
  0x29 PF: > { %p4279_p5 = scmp.ge.s32.totalorder %s4898_s26, 1  ;;  %p593_p6 = scmp.lt.s32.totalorder %s4898_s26, 3 }
  0x2b   : > { %p594_p7 = pnand %p4279_p5, %p593_p6 }
  0x2d   : > { %597 = sbr.rel (%p594_p7) target bundleno = 3200 (0xc80), region = 122 }
  0x32   : > { %s4281_s0 = sshll.u32 %s4272_s27, 3  ;;  %vm679_vm0 = vcmask 261120   ;;  %s6820_s20 = sld [smem:[#allocation13_spill]]  ;;  %v4900_v30 = vmov 32.0   ;;  %v969_v41 = vld [vmem:[%s6801_s6 + $0x18] sm:$0xff]  ;;  %v968_v43 = vld [vmem:[%s6801_s6 + $0x10] sm:$0xff] }
  0x33   : > { %p657_p8 = scmp.lt.s32.totalorder %s4281_s0, 15  ;;  %4690 = vrcp.f32 %v4900_v30  ;;  %s600_s26 = sand.u32 1, %s4890_s24   ;;  %1010 = vmatpush.msra.mxu1 %v969_v41  ;;  %4478 = vmatpush.msra.mxu2 %v969_v41  ;;  %v967_v46 = vld [vmem:[%s6801_s6 + $0x8] sm:$0xff]  ;;  %v966_v50 = vld [vmem:[%s6801_s6] sm:$0xff]  ;;  %v887_v30 = vld [vmem:[%s6799_s4 + $0x10] sm:$0xff] }
  0x34   : > { %s4280_s19 = sshll.u32 %s600_s26, 7  ;;  %4482 = vmatpush.msra.mxu3 %v969_v41  ;;  %s4901_s1 = smov 120  }
  0x35   : > { %s6851_s0 = smov (!%p657_p8, %s4281_s0), 15  ;;  %1011 = vmatpush.msra.mxu1 %v968_v43  ;;  %4479 = vmatpush.msra.mxu2 %v968_v43  ;;  %s5122_s27 = scalar_lea.vmem [#allocation2], %s4280_s19 }
  0x36   : > { %s4282_s18 = sshll.u32 %s6851_s0, 3  ;;  %4483 = vmatpush.msra.mxu3 %v968_v43  ;;  %v958_v51 = vld [vmem:[%s5122_s27] sm:$0xff]  ;;  %v965_v52 = vld [vmem:[%s5122_s27 + $0x38] sm:$0xff]  ;;  %v4302_v58 = vld [vmem:[%s5122_s27 + $0x48] sm:$0xff]  ;;  %s4903_s26 = smov 112  }
  0x37   : > { %1012 = vmatpush.msra.mxu1 %v967_v46  ;;  %4480 = vmatpush.msra.mxu2 %v967_v46  ;;  %v959_v7 = vld [vmem:[%s5122_s27 + $0x8] sm:$0xff]  ;;  %v4301_v10 = vld [vmem:[%s5122_s27 + $0x40] sm:$0xff]  ;;  %v4303_v11 = vld [vmem:[%s5122_s27 + $0x50] sm:$0xff]  ;;  %s4905_s23 = smov 104   ;;  %s4907_s29 = smov 72  }
  0x38   : > { %s5065_s21 = scalar_lea.vmem %s6820_s20, %s4282_s18  ;;  %4484 = vmatpush.msra.mxu3 %v967_v46  ;;  %s4902_s20 = smov 96  }
  0x39   : > { %v5068_v16 = vld [vmem:[%s5065_s21 + $0x20] sm:$0xff]  ;;  %v671_v17 = vld [vmem:[%s5065_s21 + $0x10] sm:$0xff]  ;;  %v5077_v22 = vld [vmem:[%s5065_s21 + $0x28] sm:$0xff]  ;;  %v4691_v31 = vpop.eup %4690  ;;  %1013 = vmatpush.msra.mxu1 %v966_v50  ;;  %4481 = vmatpush.msra.mxu2 %v966_v50  ;;  %s4908_s19 = smov 16   ;;  %s4909_s24 = smov 8  }
  0x3a   : > { %v669_v18 = vld [vmem:[%s5065_s21] sm:$0xff]  ;;  %v692_v19 = vsel %vm679_vm0, %v5068_v16, 0.0  ;;  %v686_v20 = vsel %vm679_vm0, %v671_v17, 0.0  ;;  %v5080_v23 = vld [vmem:[%s5065_s21 + $0x18] sm:$0xff]  ;;  %v5083_v24 = vld [vmem:[%s5065_s21 + $0x8] sm:$0xff]  ;;  %v695_v25 = vsel %vm679_vm0, %v5077_v22, 0.0  ;;  %vm709_vm1 = vweird.f32 %v4691_v31  ;;  %4293 = vmatmul.msk.f32.vlgmr.msra.gmra.mxu1 %vm679_vm0, %v958_v51  ;;  %4300 = vmatmul.msk.f32.vlgmr.msra.gmra.mxu2 %vm679_vm0, %v965_v52 }
  0x3b   : > { %v680_v21 = vsel %vm679_vm0, %v669_v18, 0.0  ;;  %693 = vadd.xlane.f32.xlu2 %v692_v19  ;;  %687 = vadd.xlane.f32.xlu1 %v686_v20  ;;  %v689_v26 = vsel %vm679_vm0, %v5080_v23, 0.0  ;;  %v683_v27 = vsel %vm679_vm0, %v5083_v24, 0.0  ;;  %v5092_v28 = vld [vmem:[%s5065_s21 + $0x30] sm:$0xff]  ;;  %v705_v32 = vmul.f32 32.0, %v4691_v31  ;;  %v5138_v63 = vld [vmem:[%s5065_s21 + $0x38] sm:$0xff] }
  0x3c   : > { %681 = vadd.xlane.f32.xlu0 %v680_v21  ;;  %v698_v29 = vsel %vm679_vm0, %v5092_v28, 0.0  ;;  %1084 = vmatpush.msrb.mxu2 %v969_v41  ;;  %v701_v4 = vsel %vm679_vm0, %v5138_v63, 0.0  ;;  %v4304_v19 = vld [vmem:[%s5122_s27 + $0x58] sm:$0xff] }
  0x3d   : > { %v706_v33 = vsub.f32 1.0, %v705_v32  ;;  %4485 = vmatpush.msra.mxu3 %v966_v50  ;;  %v964_v32 = vld [vmem:[%s5122_s27 + $0x30] sm:$0xff] }
  0x3e   : > { %4310 = vmatmul.msk.f32.vlgmr.msra.gmra.mxu3 %vm679_vm0, %v4302_v58  ;;  %1085 = vmatpush.msrb.mxu2 %v968_v43 }
  0x3f   : > { %v707_v34 = vmul.f32 %v4691_v31, %v706_v33  ;;  %v885_v33 = vld [vmem:[%s6799_s4] sm:$0xff] }
  0x40   : > { %1086 = vmatpush.msrb.mxu2 %v967_v46 }
  0x41   : > { %v708_v35 = vadd.f32 %v4691_v31, %v707_v34 }
  0x42   : > { %1087 = vmatpush.msrb.mxu2 %v966_v50  ;;  %4294 = vmatmul.msk.f32.gmra.mxu1 %vm679_vm0, %v959_v7 }
  0x43   : > { %696 = vadd.xlane.f32.xlu2 %v695_v25  ;;  %690 = vadd.xlane.f32.xlu1 %v689_v26  ;;  %v5096_v36 = vsel %vm709_vm1, %v4691_v31, %v708_v35  ;;  %v4306_v25 = vld [vmem:[%s5122_s27 + $0x68] sm:$0xff]  ;;  %v4307_v26 = vld [vmem:[%s5122_s27 + $0x70] sm:$0xff] }
  0x44   : > { %684 = vadd.xlane.f32.xlu0 %v683_v27  ;;  %6821 = vst [vmem:[#allocation3_spill] sm:$0xff] %v5096_v36  ;;  %4309 = vmatmul.msk.f32.vlgmr.msrb.gmra.mxu2 %vm679_vm0, %v4301_v10  ;;  %v4308_v27 = vld [vmem:[%s5122_s27 + $0x78] sm:$0xff]  ;;  %v886_v31 = vld [vmem:[%s6799_s4 + $0x8] sm:$0xff] }
  0x46   : > { %4311 = vmatmul.msk.f32.gmra.mxu3 %vm679_vm0, %v4303_v11  ;;  %v5235_v11 = vld [vmem:[%s6797_s2] ss:$0 sm:$0xff] }
  0x4b   : > { %699 = vadd.xlane.f32.xlu1 %v698_v29  ;;  %v888_v29 = vld [vmem:[%s6799_s4 + $0x18] sm:$0xff] }
  0x4c   : > { %929 = vmatpush.msra.mxu0 %v888_v29 }
  0x4e   : > { %4312 = vmatmul.msk.f32.gmra.mxu3 %vm679_vm0, %v4304_v19  ;;  %930 = vmatpush.msra.mxu0 %v887_v30 }
  0x50   : > { %931 = vmatpush.msra.mxu0 %v886_v31 }
  0x52   : > { %932 = vmatpush.msra.mxu0 %v885_v33 }
  0xae   : > { %v694_v37 = vpop.xlane.xlu2 %693  ;;  %v688_v38 = vpop.xlane.xlu1 %687 }
  0xaf   : > { %v713_v39 = vmul.f32 %v5096_v36, %v688_v38  ;;  %v682_v40 = vpop.xlane.xlu0 %681  ;;  %v715_v59 = vmul.f32 %v5096_v36, %v694_v37 }
  0xb0   : > { %v711_v42 = vmul.f32 %v5096_v36, %v682_v40 }
  0xb1   : > { %v5107_v44 = vsub.f32 %v671_v17, %v713_v39  ;;  %v5147_v2 = vsub.f32 %v5068_v16, %v715_v59 }
  0xb2   : > { %v5109_v45 = vsub.f32 %v669_v18, %v711_v42  ;;  %v960_v18 = vld [vmem:[%s5122_s27 + $0x10] sm:$0xff] }
  0xb3   : > { %v729_v47 = vmul.f32 %v5107_v44, %v5107_v44  ;;  %v731_v13 = vmul.f32 %v5147_v2, %v5147_v2  ;;  %4295 = vmatmul.msk.f32.gmra.mxu1 %vm679_vm0, %v960_v18 }
  0xb4   : > { %v727_v48 = vmul.f32 %v5109_v45, %v5109_v45 }
  0xb5   : > { %v741_v49 = vsel %vm679_vm0, %v729_v47, 0.0  ;;  %v747_v16 = vsel %vm679_vm0, %v731_v13, 0.0 }
  0xb6   : > { %v697_v53 = vpop.xlane.xlu2 %696  ;;  %742 = vadd.xlane.f32.xlu1 %v741_v49  ;;  %v735_v54 = vsel %vm679_vm0, %v727_v48, 0.0  ;;  %v691_v55 = vpop.xlane.xlu1 %690 }
  0xb7   : > { %v716_v56 = vmul.f32 %v5096_v36, %v697_v53  ;;  %736 = vadd.xlane.f32.xlu0 %v735_v54  ;;  %v685_v57 = vpop.xlane.xlu0 %684  ;;  %v714_v61 = vmul.f32 %v5096_v36, %v691_v55 }
  0xb8   : > { %v712_v60 = vmul.f32 %v5096_v36, %v685_v57 }
  0xb9   : > { %v5135_v62 = vsub.f32 %v5077_v22, %v716_v56  ;;  %v5150_v3 = vsub.f32 %v5080_v23, %v714_v61  ;;  %v961_v22 = vld [vmem:[%s5122_s27 + $0x18] sm:$0xff]  ;;  %v4305_v23 = vld [vmem:[%s5122_s27 + $0x60] sm:$0xff] }
  0xba   : > { %v5141_v0 = vsub.f32 %v5083_v24, %v712_v60  ;;  %4313 = vmatmul.msk.f32.gmra.mxu3 %vm679_vm0, %v4305_v23  ;;  %v962_v24 = vld [vmem:[%s5122_s27 + $0x20] sm:$0xff] }
  0xbb   : > { %v732_v1 = vmul.f32 %v5135_v62, %v5135_v62  ;;  %v730_v14 = vmul.f32 %v5150_v3, %v5150_v3  ;;  %4296 = vmatmul.msk.f32.gmra.mxu1 %vm679_vm0, %v961_v22 }
  0xbc   : > { %v728_v5 = vmul.f32 %v5141_v0, %v5141_v0 }
  0xbd   : > { %v750_v6 = vsel %vm679_vm0, %v732_v1, 0.0  ;;  %v744_v17 = vsel %vm679_vm0, %v730_v14, 0.0 }
  0xbe   : > { %751 = vadd.xlane.f32.xlu1 %v750_v6  ;;  %v738_v8 = vsel %vm679_vm0, %v728_v5, 0.0  ;;  %v700_v9 = vpop.xlane.xlu1 %699 }
  0xbf   : > { %702 = vadd.xlane.f32.xlu0 %v701_v4  ;;  %739 = vadd.xlane.f32.xlu2 %v738_v8  ;;  %v717_v12 = vmul.f32 %v5096_v36, %v700_v9 }
  0xc1   : > { %v5170_v15 = vsub.f32 %v5092_v28, %v717_v12  ;;  %v963_v28 = vld [vmem:[%s5122_s27 + $0x28] sm:$0xff]  ;;  %s4904_s27 = smov 88  }
  0xc2   : > { %4314 = vmatmul.msk.f32.gmra.mxu3 %vm679_vm0, %v4306_v25 }
  0xc3   : > { %v733_v20 = vmul.f32 %v5170_v15, %v5170_v15  ;;  %4297 = vmatmul.msk.f32.gmra.mxu1 %vm679_vm0, %v962_v24 }
  0xc5   : > { %v753_v21 = vsel %vm679_vm0, %v733_v20, 0.0 }
  0xc7   : > { %748 = vadd.xlane.f32.xlu0 %v747_v16  ;;  %745 = vadd.xlane.f32.xlu2 %v744_v17  ;;  %v5244_v17 = vld [vmem:[%s6798_s3] ss:$0 sm:$0xff] }
  0xca   : > { %4315 = vmatmul.msk.f32.gmra.mxu3 %vm679_vm0, %v4307_v26 }
  0xcb   : > { %4298 = vmatmul.msk.f32.gmra.mxu1 %vm679_vm0, %v963_v28 }
  0xcf   : > { %754 = vadd.xlane.f32.xlu2 %v753_v21 }
  0xd2   : > { %4316 = vmatmul.msk.f32.gmra.mxu3 %vm679_vm0, %v4308_v27 }
  0xd3   : > { %4299 = vmatmul.msk.f32.gmra.mxu1 %vm679_vm0, %v964_v32 }
 0x129   : > { %v743_v34 = vpop.xlane.xlu1 %742 }
 0x12a   : > { %v761_v35 = vmul.f32 %v743_v34, %v5096_v36  ;;  %v737_v37 = vpop.xlane.xlu0 %736 }
 0x12b   : > { %v759_v38 = vmul.f32 %v737_v37, %v5096_v36 }
 0x12c   : > { %v5211_v39 = vadd.f32 1e-05, %v761_v35 }
 0x12d   : > { %v767_v40 = vadd.f32 1e-05, %v759_v38 }
 0x12e   : > { %4692 = vrsqrt.f32 %v5211_v39  ;;  %vm801_vm7 = vweird.f32 %v5211_v39 }
 0x12f   : > { %4694 = vrsqrt.f32 %v767_v40  ;;  %vm781_vm3 = vweird.f32 %v767_v40 }
 0x131   : > { %v752_v55 = vpop.xlane.xlu1 %751 }
 0x132   : > { %v740_v41 = vpop.xlane.xlu2 %739  ;;  %v703_v42 = vpop.xlane.xlu0 %702  ;;  %v764_v5 = vmul.f32 %v752_v55, %v5096_v36 }
 0x133   : > { %v760_v43 = vmul.f32 %v740_v41, %v5096_v36  ;;  %v718_v46 = vmul.f32 %v5096_v36, %v703_v42 }
 0x134   : > { %v5216_v47 = vpop.eup %4692  ;;  %v5238_v14 = vadd.f32 1e-05, %v764_v5  ;;  %v1092_v5 = vpop.f32.mrf.mxu3 }
 0x135   : > { %v4695_v48 = vpop.eup %4694  ;;  %v768_v49 = vadd.f32 1e-05, %v760_v43  ;;  %v5219_v50 = vsub.f32 %v5138_v63, %v718_v46  ;;  %v796_v51 = vmul.f32 %v5216_v47, %v5211_v39  ;;  %vm802_vm8 = vweird.f32 %v5216_v47 }
 0x136   : > { %v776_v52 = vmul.f32 %v4695_v48, %v767_v40  ;;  %vm782_vm2 = vweird.f32 %v4695_v48  ;;  %vm5253_vm10 = vmor %vm801_vm7, %vm802_vm8  ;;  %vm1123_vm8 = vcmask 64512  }
 0x137   : > { %4696 = vrsqrt.f32 %v768_v49  ;;  %v734_v53 = vmul.f32 %v5219_v50, %v5219_v50  ;;  %v797_v57 = vmul.f32 %v5216_v47, %v796_v51  ;;  %vm783_vm4 = vmor %vm781_vm3, %vm782_vm2  ;;  %vm791_vm5 = vweird.f32 %v768_v49 }
 0x138   : > { %v777_v54 = vmul.f32 %v4695_v48, %v776_v52  ;;  %vm831_vm2 = vweird.f32 %v5238_v14 }
 0x139   : > { %v756_v56 = vsel %vm679_vm0, %v734_v53, 0.0  ;;  %v798_v7 = vmul.f32 0.5, %v797_v57 }
 0x13a   : > { %v778_v58 = vmul.f32 0.5, %v777_v54  ;;  %v746_v59 = vpop.xlane.xlu2 %745  ;;  %757 = vadd.xlane.f32.xlu0 %v756_v56  ;;  %v749_v60 = vpop.xlane.xlu0 %748 }
 0x13b   : > { %v762_v61 = vmul.f32 %v746_v59, %v5096_v36  ;;  %v763_v63 = vmul.f32 %v749_v60, %v5096_v36  ;;  %v799_v18 = vsub.f32 1.5, %v798_v7 }
 0x13c   : > { %v779_v1 = vsub.f32 1.5, %v778_v58 }
 0x13d   : > { %v4697_v4 = vpop.eup %4696  ;;  %v770_v6 = vadd.f32 1e-05, %v762_v61  ;;  %v5230_v10 = vadd.f32 1e-05, %v763_v63  ;;  %v800_v26 = vmul.f32 %v5216_v47, %v799_v18  ;;  %v5298_v63 = vpop.f32.mrf.mxu2 }
 0x13e   : > { %v780_v8 = vmul.f32 %v4695_v48, %v779_v1  ;;  %v786_v9 = vmul.f32 %v4697_v4, %v768_v49  ;;  %vm792_vm6 = vweird.f32 %v4697_v4  ;;  %v1015_v49 = vpop.f32.mrf.mxu1 }
 0x13f   : > { %4698 = vrsqrt.f32 %v770_v6  ;;  %vm793_vm9 = vmor %vm791_vm5, %vm792_vm6  ;;  %v804_v38 = vsel %vm5253_vm10, %v5216_v47, %v800_v26  ;;  %vm811_vm11 = vweird.f32 %v770_v6  ;;  %v5277_v47 = vld [vmem:[%s6802_s7] ss:$0 sm:$0xff]  ;;  %vm821_vm14 = vweird.f32 %v5230_v10 }
 0x140   : > { %v787_v12 = vmul.f32 %v4697_v4, %v786_v9  ;;  %4700 = vrsqrt.f32 %v5230_v10  ;;  %v784_v13 = vsel %vm783_vm4, %v4695_v48, %v780_v8  ;;  %v857_v43 = vmul.f32 %v804_v38, %v5107_v44 }
 0x141   : > { %v855_v16 = vmul.f32 %v784_v13, %v5109_v45  ;;  %4702 = vrsqrt.f32 %v5238_v14  ;;  %v5281_v52 = vadd.f32 %v5277_v47, %v1015_v49 }
 0x142   : > { %v788_v19 = vmul.f32 0.5, %v787_v12  ;;  %v755_v20 = vpop.xlane.xlu2 %754  ;;  %v868_v51 = vmul.f32 %v5235_v11, %v857_v43 }
 0x143   : > { %v866_v21 = vmul.f32 %v5235_v11, %v855_v16  ;;  %v765_v45 = vmul.f32 %v755_v20, %v5096_v36  ;;  %1651 = vrot.lane.b32.xlu1 %v5281_v52, %s4901_s1 }
 0x144   : > { %v789_v22 = vsub.f32 1.5, %v788_v19  ;;  %v879_v56 = vadd.f32 %v5244_v17, %v868_v51 }
 0x145   : > { %v4699_v23 = vpop.eup %4698  ;;  %v877_v24 = vadd.f32 %v5244_v17, %v866_v21  ;;  %v5259_v33 = vadd.f32 1e-05, %v765_v45 }
 0x146   : > { %v4701_v25 = vpop.eup %4700  ;;  %v790_v27 = vmul.f32 %v4697_v4, %v789_v22  ;;  %v806_v28 = vmul.f32 %v4699_v23, %v770_v6  ;;  %vm812_vm12 = vweird.f32 %v4699_v23  ;;  %v1018_v1 = vpop.f32.mrf.mxu1  ;;  %v5305_v6 = vadd.f32 %v5277_v47, %v1092_v5 }
 0x147   : > { %v816_v30 = vmul.f32 %v4701_v25, %v5230_v10  ;;  %4285 = vmatmul.msk.f32.vlgmr.msra.gmra.mxu0 %vm679_vm0, %v877_v24  ;;  %v5265_v39 = vpop.eup %4702  ;;  %4704 = vrsqrt.f32 %v5259_v33  ;;  %vm813_vm13 = vmor %vm811_vm11, %vm812_vm12  ;;  %vm822_vm15 = vweird.f32 %v4701_v25  ;;  %v1095_v22 = vpop.f32.mrf.mxu3  ;;  %vm841_vm5 = vweird.f32 %v5259_v33 }
 0x148   : > { %v807_v31 = vmul.f32 %v4699_v23, %v806_v28  ;;  %v794_v32 = vsel %vm793_vm9, %v4697_v4, %v790_v27  ;;  %vm5293_vm1 = vmor %vm821_vm14, %vm822_vm15  ;;  %v5301_v4 = vadd.f32 %v5277_v47, %v1018_v1  ;;  %vm832_vm3 = vweird.f32 %v5265_v39  ;;  %4317 = vmatpush.xpose.msk.msrb.mxu3 %vm1123_vm8, %v5305_v6 }
 0x149   : > { %v856_v34 = vmul.f32 %v794_v32, %v5141_v0  ;;  %v817_v37 = vmul.f32 %v4701_v25, %v816_v30  ;;  %v826_v0 = vmul.f32 %v5265_v39, %v5238_v14  ;;  %vm5325_vm4 = vmor %vm831_vm2, %vm832_vm3  ;;  %v1089_v14 = vpop.f32.mrf.mxu2 }
 0x14a   : > { %v808_v35 = vmul.f32 0.5, %v807_v31  ;;  %1653 = vrot.lane.b32.xlu2 %v5301_v4, %s4901_s1  ;;  %v5318_v10 = vpack.i.bf16 %v5281_v52, %v5301_v4  ;;  %v5331_v21 = vadd.f32 %v5277_v47, %v1089_v14  ;;  %v5461_v14 = vld [vmem:[%s6800_s5] ss:$0 sm:$0xff] }
 0x14b   : > { %v867_v40 = vmul.f32 %v5235_v11, %v856_v34  ;;  %v818_v48 = vmul.f32 0.5, %v817_v37  ;;  %v827_v44 = vmul.f32 %v5265_v39, %v826_v0 }
 0x14c   : > { %v809_v41 = vsub.f32 1.5, %v808_v35  ;;  %4522 = vrot.lane.b32.xlu1 %v5318_v10, %s4902_s20  ;;  %v5339_v24 = vpack.i.bf16 %v5331_v21, %v5305_v6  ;;  %4318 = vmatpush.xpose.msk.msrb.mxu3 %vm1123_vm8, %v5331_v21 }
 0x14d   : > { %v878_v42 = vadd.f32 %v5244_v17, %v867_v40  ;;  %v819_v53 = vsub.f32 1.5, %v818_v48  ;;  %v5284_v55 = vpop.eup %4704  ;;  %v828_v58 = vmul.f32 0.5, %v827_v44 }
 0x14e   : > { %v810_v46 = vmul.f32 %v4699_v23, %v809_v41  ;;  %v836_v60 = vmul.f32 %v5284_v55, %v5259_v33  ;;  %1657 = vrot.lane.b32.xlu0 %v5305_v6, %s4901_s1  ;;  %v1021_v20 = vpop.f32.mrf.mxu1  ;;  %vm842_vm6 = vweird.f32 %v5284_v55 }
 0x14f   : > { %4286 = vmatmul.msk.f32.gmra.mxu0 %vm679_vm0, %v878_v42  ;;  %v820_v59 = vmul.f32 %v4701_v25, %v819_v53  ;;  %v829_v7 = vsub.f32 1.5, %v828_v58  ;;  %vm843_vm7 = vmor %vm841_vm5, %vm842_vm6  ;;  %v5357_v29 = vadd.f32 %v5277_v47, %v1021_v20  ;;  %v1098_v32 = vpop.f32.mrf.mxu3 }
 0x150   : > { %v814_v54 = vsel %vm813_vm13, %v4699_v23, %v810_v46  ;;  %v837_v8 = vmul.f32 %v5284_v55, %v836_v60  ;;  %v5362_v34 = vadd.f32 %v5277_v47, %v1098_v32  ;;  %4319 = vmatpush.xpose.msk.msrb.mxu3 %vm1123_vm8, %v5301_v4 }
 0x151   : > { %v858_v57 = vmul.f32 %v814_v54, %v5150_v3  ;;  %v824_v9 = vsel %vm5293_vm1, %v4701_v25, %v820_v59  ;;  %v830_v16 = vmul.f32 %v5265_v39, %v829_v7  ;;  %v5342_v25 = vadd.f32 %v5277_v47, %v1095_v22 }
 0x152   : > { %v859_v13 = vmul.f32 %v824_v9, %v5147_v2  ;;  %v838_v18 = vmul.f32 0.5, %v837_v8  ;;  %4527 = vrot.lane.b32.xlu2 %v5339_v24, %s4902_s20 }
 0x153   : > { %v869_v3 = vmul.f32 %v5235_v11, %v858_v57  ;;  %v834_v45 = vsel %vm5325_vm4, %v5265_v39, %v830_v16  ;;  %v5417_v54 = vpack.i.bf16 %v5342_v25, %v5362_v34 }
 0x154   : > { %v870_v2 = vmul.f32 %v5235_v11, %v859_v13  ;;  %v839_v23 = vsub.f32 1.5, %v838_v18  ;;  %v860_v27 = vmul.f32 %v834_v45, %v5135_v62  ;;  %1702 = vrot.lane.b32.xlu1 %v5342_v25, %s4901_s1  ;;  %4320 = vmatpush.xpose.msk.msrb.mxu3 %vm1123_vm8, %v5281_v52 }
 0x155   : > { %v880_v12 = vadd.f32 %v5244_v17, %v869_v3 }
 0x156   : > { %1655 = vrot.lane.b32.xlu0 %v5331_v21, %s4901_s1  ;;  %v881_v26 = vadd.f32 %v5244_v17, %v870_v2  ;;  %v840_v28 = vmul.f32 %v5284_v55, %v839_v23  ;;  %v871_v30 = vmul.f32 %v5235_v11, %v860_v27  ;;  %v1024_v31 = vpop.f32.mrf.mxu1 }
 0x157   : > { %4287 = vmatmul.msk.f32.gmra.mxu0 %vm679_vm0, %v879_v56  ;;  %v5367_v62 = vadd.f32 %v5277_v47, %v1024_v31  ;;  %v1101_v40 = vpop.f32.mrf.mxu3 }
 0x158   : > { %v844_v33 = vsel %vm843_vm7, %v5284_v55, %v840_v28  ;;  %v882_v35 = vadd.f32 %v5244_v17, %v871_v30  ;;  %4323 = vmatpush.xpose.msk.msra.mxu3 %vm1123_vm8, %v5362_v34  ;;  %v5423_v55 = vadd.f32 %v5277_v47, %v5298_v63 }
 0x159   : > { %v861_v37 = vmul.f32 %v844_v33, %v5170_v15  ;;  %v5376_v38 = vpack.i.bf16 %v5357_v29, %v5367_v62  ;;  %v5384_v15 = vadd.f32 %v5277_v47, %v1101_v40 }
 0x15a   : > { %1698 = vrot.lane.b32.xlu2 %v5357_v29, %s4901_s1 }
 0x15b   : > { %6828 = vst [vmem:[#allocation4_spill] sm:$0xff] %v5376_v38  ;;  %v872_v39 = vmul.f32 %v5235_v11, %v861_v37 }
 0x15c   : > { %1704 = vrot.lane.b32.xlu1 %v5362_v34, %s4901_s1  ;;  %4324 = vmatpush.xpose.msk.msra.mxu3 %vm1123_vm8, %v5342_v25 }
 0x15d   : > { %v883_v41 = vadd.f32 %v5244_v17, %v872_v39 }
 0x15e   : > { %v1027_v0 = vpop.f32.mrf.mxu1  ;;  %4532 = vrot.lane.b32.xlu0 %v5417_v54, %s4902_s20 }
 0x15f   : > { %4288 = vmatmul.msk.f32.gmra.mxu0 %vm679_vm0, %v880_v12  ;;  %v1104_v42 = vpop.f32.mrf.mxu3  ;;  %v5392_v46 = vadd.f32 %v5277_v47, %v1027_v0 }
 0x160   : > { %v5389_v43 = vadd.f32 %v5277_v47, %v1104_v42  ;;  %4325 = vmatpush.xpose.msk.msra.mxu3 %vm1123_vm8, %v5367_v62 }
 0x162   : > { %4537 = vrot.lane.b32.xlu2 %v5376_v38, %s4902_s20  ;;  %v5413_v53 = vpack.i.bf16 %v5384_v15, %v5389_v43 }
 0x164   : > { %1751 = vrot.lane.b32.xlu1 %v5389_v43, %s4901_s1  ;;  %6829 = vst [vmem:[#allocation5_spill] sm:$0xff] %v5413_v53  ;;  %4326 = vmatpush.xpose.msk.msra.mxu3 %vm1123_vm8, %v5357_v29 }
 0x166   : > { %v1030_v49 = vpop.f32.mrf.mxu1  ;;  %1700 = vrot.lane.b32.xlu0 %v5367_v62, %s4901_s1 }
 0x167   : > { %4289 = vmatmul.msk.f32.gmra.mxu0 %vm679_vm0, %v881_v26  ;;  %v1107_v48 = vpop.f32.mrf.mxu3 }
 0x168   : > { %v5441_v59 = vadd.f32 %v5277_v47, %v1107_v48 }
 0x16a   : > { %1749 = vrot.lane.b32.xlu2 %v5384_v15, %s4901_s1 }
 0x16e   : > { %v1033_v56 = vpop.f32.mrf.mxu1 }
 0x16f   : > { %4290 = vmatmul.msk.f32.gmra.mxu0 %vm679_vm0, %v882_v35  ;;  %v1110_v51 = vpop.f32.mrf.mxu3  ;;  %v5432_v57 = vadd.f32 %v5277_v47, %v1033_v56 }
 0x170   : > { %v5407_v44 = vadd.f32 %v5277_v47, %v1110_v51 }
 0x171   : > { %v5436_v58 = vpack.i.bf16 %v5432_v57, %v5423_v55 }
 0x172   : > { %1745 = vrot.lane.b32.xlu2 %v5392_v46, %s4901_s1  ;;  %1798 = vrot.lane.b32.xlu1 %v5407_v44, %s4901_s1  ;;  %v5452_v63 = vpack.i.bf16 %v5441_v59, %v5407_v44 }
 0x177   : > { %4291 = vmatmul.msk.f32.gmra.mxu0 %vm679_vm0, %v883_v41 }
 0x17a   : > { %4542 = vrot.lane.b32.xlu2 %v5413_v53, %s4902_s20 }
 0x182   : > { %4552 = vrot.lane.b32.xlu2 %v5436_v58, %s4902_s20 }
 0x18a   : > { %4557 = vrot.lane.b32.xlu2 %v5452_v63, %s4902_s20 }
 0x1a4   : > { %v5456_v5 = vpop.permute.xlu2 %1653 }
 0x1ac   : > { %v4528_v13 = vpop.permute.xlu2 %4527 }
 0x1ad   : > { %v758_v60 = vpop.xlane.xlu0 %757  ;;  %v4530_v16 = vunpack.i.h.bf16 %v4528_v13  ;;  %v4529_v18 = vunpack.i.l.bf16 %v4528_v13 }
 0x1ae   : > { %v766_v61 = vmul.f32 %v758_v60, %v5096_v36 }
 0x1af   : > { %1510 = vmatpush.msra.mxu2 %v4529_v18 }
 0x1b0   : > { %v774_v1 = vadd.f32 1e-05, %v766_v61 }
 0x1b1   : > { %1511 = vmatpush.msra.mxu2 %v4530_v16 }
 0x1b2   : > { %4706 = vrsqrt.f32 %v774_v1  ;;  %vm851_vm10 = vweird.f32 %v774_v1 }
 0x1b4   : > { %v5491_v32 = vpop.permute.xlu2 %1698 }
 0x1b5   : > { %v1652_v39 = vpop.permute.xlu1 %1651 }
 0x1b8   : > { %v4707_v3 = vpop.eup %4706 }
 0x1b9   : > { %v846_v7 = vmul.f32 %v4707_v3, %v774_v1  ;;  %vm852_vm9 = vweird.f32 %v4707_v3 }
 0x1ba   : > { %vm853_vm11 = vmor %vm851_vm10, %vm852_vm9 }
 0x1bb   : > { %v847_v8 = vmul.f32 %v4707_v3, %v846_v7 }
 0x1bc   : > { %v4538_v41 = vpop.permute.xlu2 %4537 }
 0x1bd   : > { %v848_v9 = vmul.f32 0.5, %v847_v8 }
 0x1be   : > { %v4523_v48 = vpop.permute.xlu1 %4522 }
 0x1bf   : > { %v849_v12 = vsub.f32 1.5, %v848_v9  ;;  %v4524_v51 = vunpack.i.l.bf16 %v4523_v48  ;;  %v4525_v56 = vunpack.i.h.bf16 %v4523_v48 }
 0x1c1   : > { %v850_v19 = vmul.f32 %v4707_v3, %v849_v12  ;;  %1512 = vmatpush.msra.mxu2 %v4524_v51  ;;  %v1658_v12 = vpop.permute.xlu0 %1657 }
 0x1c2   : > { %4351 = vmatpush.xpose.msk.msrb.mxu0 %vm1123_vm8, %v1658_v12 }
 0x1c3   : > { %v854_v20 = vsel %vm853_vm11, %v4707_v3, %v850_v19  ;;  %1513 = vmatpush.msra.mxu2 %v4525_v56 }
 0x1c4   : > { %v934_v22 = vpop.f32.mrf.mxu0  ;;  %v862_v2 = vmul.f32 %v854_v20, %v5219_v50  ;;  %v5529_v60 = vpop.permute.xlu2 %1749 }
 0x1c5   : > { %v935_v23 = vadd.f32 %v5461_v14, %v934_v22 }
 0x1c6   : > { %v873_v45 = vmul.f32 %v5235_v11, %v862_v2  ;;  %v5478_v11 = vadd.f32 %v5277_v47, %v1030_v49  ;;  %v1703_v16 = vpop.permute.xlu1 %1702 }
 0x1c7   : > { %v5466_v26 = vmul.f32 0.35355338, %v935_v23 }
 0x1c8   : > { %v884_v27 = vadd.f32 %v5244_v17, %v873_v45  ;;  %v5503_v33 = vpack.i.bf16 %v5392_v46, %v5478_v11 }
 0x1c9   : > { %1647 = vrot.lane.b32.xlu1 %v5466_v26, %s4901_s1  ;;  %4321 = vmatmul.msk.f32.vlgmr.msrb.gmra.mxu3 %vm1123_vm8, %v5466_v26  ;;  %v1656_v22 = vpop.permute.xlu0 %1655 }
 0x1ca   : > { %4292 = vmatmul.msk.f32.gmra.mxu0 %vm679_vm0, %v884_v27  ;;  %4329 = vmatpush.xpose.msk.msrb.mxu3 %vm1123_vm8, %v5389_v43 }
 0x1cb   : > { %4547 = vrot.lane.b32.xlu0 %v5503_v33, %s4902_s20  ;;  %4352 = vmatpush.xpose.msk.msrb.mxu0 %vm1123_vm8, %v1656_v22  ;;  %s4910_s20 = smov 24  }
 0x1cc   : > { %v937_v50 = vpop.f32.mrf.mxu0  ;;  %v5540_v7 = vpop.permute.xlu2 %1745 }
 0x1cd   : > { %v938_v28 = vadd.f32 %v5461_v14, %v937_v50 }
 0x1ce   : > { %4330 = vmatpush.xpose.msk.msrb.mxu3 %vm1123_vm8, %v5384_v15  ;;  %v1705_v2 = vpop.permute.xlu1 %1704 }
 0x1cf   : > { %v5482_v17 = vmul.f32 0.35355338, %v938_v28  ;;  %4353 = vmatpush.xpose.msk.msrb.mxu0 %vm1123_vm8, %v5456_v5  ;;  %v4539_v5 = vunpack.i.l.bf16 %v4538_v41 }
 0x1d1   : > { %1649 = vrot.lane.b32.xlu1 %v5482_v17, %s4901_s1  ;;  %4322 = vmatmul.msk.f32.gmra.mxu3 %vm1123_vm8, %v5482_v17 }
 0x1d2   : > { %4331 = vmatpush.xpose.msk.msrb.mxu3 %vm1123_vm8, %v5478_v11 }
 0x1d3   : > { %1747 = vrot.lane.b32.xlu0 %v5478_v11, %s4901_s1  ;;  %4354 = vmatpush.xpose.msk.msrb.mxu0 %vm1123_vm8, %v1652_v39  ;;  %v4540_v39 = vunpack.i.h.bf16 %v4538_v41 }
 0x1d4   : > { %v940_v30 = vpop.f32.mrf.mxu0  ;;  %v4543_v18 = vpop.permute.xlu2 %4542 }
 0x1d5   : > { %v941_v31 = vadd.f32 %v5461_v14, %v940_v30  ;;  %v4545_v19 = vunpack.i.h.bf16 %v4543_v18  ;;  %v4544_v20 = vunpack.i.l.bf16 %v4543_v18 }
 0x1d6   : > { %4332 = vmatpush.xpose.msk.msrb.mxu3 %vm1123_vm8, %v5392_v46  ;;  %v5552_v45 = vpop.permute.xlu1 %1751 }
 0x1d7   : > { %v5495_v47 = vmul.f32 0.35355338, %v941_v31  ;;  %1592 = vmatpush.msrb.mxu2 %v4544_v20 }
 0x1d9   : > { %1694 = vrot.lane.b32.xlu1 %v5495_v47, %s4901_s1  ;;  %4327 = vmatmul.msk.f32.vlgmr.msra.gmra.mxu3 %vm1123_vm8, %v5495_v47 }
 0x1da   : > { %4335 = vmatpush.xpose.msk.msra.mxu3 %vm1123_vm8, %v5407_v44  ;;  %1593 = vmatpush.msrb.mxu2 %v4545_v19 }
 0x1db   : > { %1796 = vrot.lane.b32.xlu0 %v5441_v59, %s4901_s1 }
 0x1dc   : > { %v943_v35 = vpop.f32.mrf.mxu0  ;;  %v4553_v23 = vpop.permute.xlu2 %4552 }
 0x1dd   : > { %v944_v37 = vadd.f32 %v5461_v14, %v943_v35  ;;  %v4554_v30 = vunpack.i.l.bf16 %v4553_v23  ;;  %v4555_v31 = vunpack.i.h.bf16 %v4553_v23  ;;  %v4533_v35 = vpop.permute.xlu0 %4532 }
 0x1de   : > { %4336 = vmatpush.xpose.msk.msra.mxu3 %vm1123_vm8, %v5441_v59 }
 0x1df   : > { %v5512_v40 = vmul.f32 0.35355338, %v944_v37 }
 0x1e1   : > { %4328 = vmatmul.msk.f32.gmra.mxu3 %vm1123_vm8, %v5512_v40 }
 0x1e2   : > { %4337 = vmatpush.xpose.msk.msra.mxu3 %vm1123_vm8, %v5423_v55 }
 0x1e4   : > { %v946_v42 = vpop.f32.mrf.mxu0  ;;  %v4558_v27 = vpop.permute.xlu2 %4557 }
 0x1e5   : > { %v947_v0 = vadd.f32 %v5461_v14, %v946_v42  ;;  %v4560_v50 = vunpack.i.h.bf16 %v4558_v27  ;;  %v4559_v28 = vunpack.i.l.bf16 %v4558_v27  ;;  %v1799_v37 = vpop.permute.xlu1 %1798  ;;  %v4534_v42 = vunpack.i.l.bf16 %v4533_v35  ;;  %v1701_v48 = vpop.permute.xlu0 %1700 }
 0x1e6   : > { %4338 = vmatpush.xpose.msk.msra.mxu3 %vm1123_vm8, %v5432_v57 }
 0x1e7   : > { %v5523_v49 = vmul.f32 0.35355338, %v947_v0  ;;  %v4535_v0 = vunpack.i.h.bf16 %v4533_v35  ;;  %1551 = vmatpush.msrb.mxu1 %v4534_v42 }
 0x1e9   : > { %1741 = vrot.lane.b32.xlu2 %v5523_v49, %s4901_s1  ;;  %4333 = vmatmul.msk.f32.vlgmr.msrb.gmra.mxu3 %vm1123_vm8, %v5523_v49 }
 0x1ea   : > { %1633 = vmatpush.msrb.mxu3 %v4559_v28  ;;  %1552 = vmatpush.msrb.mxu1 %v4535_v0 }
 0x1ec   : > { %v949_v61 = vpop.f32.mrf.mxu0  ;;  %1634 = vmatpush.msrb.mxu3 %v4560_v50  ;;  %1553 = vmatpush.msrb.mxu1 %v4539_v5 }
 0x1ed   : > { %v950_v1 = vadd.f32 %v5461_v14, %v949_v61 }
 0x1ee   : > { %1635 = vmatpush.msrb.mxu3 %v4554_v30  ;;  %1554 = vmatpush.msrb.mxu1 %v4540_v39 }
 0x1ef   : > { %v5534_v3 = vmul.f32 0.35355338, %v950_v1 }
 0x1f0   : > { %1636 = vmatpush.msrb.mxu3 %v4555_v31  ;;  %4357 = vmatpush.xpose.msk.msra.mxu1 %vm1123_vm8, %v1705_v2 }
 0x1f1   : > { %1743 = vrot.lane.b32.xlu2 %v5534_v3, %s4901_s1  ;;  %4334 = vmatmul.msk.f32.gmra.mxu3 %vm1123_vm8, %v5534_v3 }
 0x1f4   : > { %v952_v8 = vpop.f32.mrf.mxu0  ;;  %4358 = vmatpush.xpose.msk.msra.mxu1 %vm1123_vm8, %v1703_v16 }
 0x1f5   : > { %v953_v9 = vadd.f32 %v5461_v14, %v952_v8  ;;  %v1121_v8 = vld [vmem:[%s6805_s10] sm:$0xff] }
 0x1f7   : > { %v5543_v13 = vmul.f32 0.35355338, %v953_v9 }
 0x1f8   : > { %4359 = vmatpush.xpose.msk.msra.mxu1 %vm1123_vm8, %v1701_v48 }
 0x1f9   : > { %4339 = vmatmul.msk.f32.vlgmr.msra.gmra.mxu3 %vm1123_vm8, %v5543_v13 }
 0x1fa   : > { %4369 = vmatpush.xpose.msk.msra.mxu3 %vm1123_vm8, %v1799_v37 }
 0x1fc   : > { %4360 = vmatpush.xpose.msk.msra.mxu1 %vm1123_vm8, %v5491_v32 }
 0x23b   : > { %v1648_v51 = vpop.permute.xlu1 %1647 }
 0x23c   : > { %4355 = vmatmul.msk.f32.vlgmr.msrb.gmra.mxu0 %vm1123_vm8, %v1648_v51 }
 0x23d   : > { %v4548_v16 = vpop.permute.xlu0 %4547 }
 0x23e   : > { %v4550_v18 = vunpack.i.h.bf16 %v4548_v16  ;;  %v4549_v19 = vunpack.i.l.bf16 %v4548_v16 }
 0x240   : > { %1594 = vmatpush.msrb.mxu2 %v4549_v19 }
 0x242   : > { %1595 = vmatpush.msrb.mxu2 %v4550_v18 }
 0x243   : > { %v1650_v56 = vpop.permute.xlu1 %1649 }
 0x244   : > { %4356 = vmatmul.msk.f32.gmra.mxu0 %vm1123_vm8, %v1650_v56 }
 0x245   : > { %v5575_v27 = vpop.permute.xlu0 %1747 }
 0x247   : > { %v955_v61 = vpop.f32.mrf.mxu0 }
 0x248   : > { %v956_v41 = vadd.f32 %v5461_v14, %v955_v61  ;;  %v1122_v14 = vld [vmem:[%s6805_s10 + $0x8] sm:$0xff] }
 0x24a   : > { %v5563_v1 = vmul.f32 0.35355338, %v956_v41 }
 0x24c   : > { %v1159_v9 = vpop.f32.mrf.mxu3  ;;  %4340 = vmatmul.msk.f32.gmra.mxu3 %vm1123_vm8, %v5563_v1 }
 0x24d   : > { %v1160_v32 = vadd.f32 %v1159_v9, %v1121_v8  ;;  %v1797_v31 = vpop.permute.xlu0 %1796  ;;  %v5588_v9 = vpop.permute.xlu2 %1741 }
 0x24e   : > { %4370 = vmatpush.xpose.msk.msra.mxu3 %vm1123_vm8, %v1797_v31 }
 0x24f   : > { %v1288_v12 = vsel %vm679_vm0, %v1160_v32, -inf }
 0x250   : > { %1289 = vmax.xlane.f32.xlu1 %v1288_v12  ;;  %v5590_v12 = vpop.permute.xlu1 %1694 }
 0x254   : > { %v1162_v20 = vpop.f32.mrf.mxu3 }
 0x255   : > { %v1163_v22 = vadd.f32 %v1162_v20, %v1122_v14  ;;  %v5592_v16 = vpop.permute.xlu2 %1743 }
 0x257   : > { %v1291_v2 = vsel %vm679_vm0, %v1163_v22, -inf }
 0x258   : > { %1292 = vmax.xlane.f32.xlu2 %v1291_v2 }
 0x25c   : > { %v1200_v23 = vpop.f32.mrf.mxu3 }
 0x25d   : > { %v1201_v50 = vadd.f32 %v1200_v23, %v1121_v8 }
 0x25f   : > { %v1294_v28 = vsel %vm679_vm0, %v1201_v50, -inf }
 0x260   : > { %1295 = vmax.xlane.f32.xlu1 %v1294_v28 }
 0x264   : > { %v1203_v30 = vpop.f32.mrf.mxu3 }
 0x265   : > { %v5578_v35 = vadd.f32 %v1203_v30, %v1122_v14 }
 0x267   : > { %v1297_v37 = vsel %vm679_vm0, %v5578_v35, -inf }
 0x268   : > { %1298 = vmax.xlane.f32.xlu0 %v1297_v37 }
 0x26c   : > { %v1241_v42 = vpop.f32.mrf.mxu3 }
 0x26d   : > { %v1242_v0 = vadd.f32 %v1241_v42, %v1121_v8 }
 0x26f   : > { %v1300_v5 = vsel %vm679_vm0, %v1242_v0, -inf }
 0x270   : > { %1301 = vmax.xlane.f32.xlu0 %v1300_v5 }
 0x274   : > { %v1244_v39 = vpop.f32.mrf.mxu3 }
 0x275   : > { %v1245_v48 = vadd.f32 %v1244_v39, %v1122_v14 }
 0x277   : > { %v1303_v51 = vsel %vm679_vm0, %v1245_v48, -inf }
 0x278   : > { %1304 = vmax.xlane.f32.xlu2 %v1303_v51 }
 0x27c   : > { %v1282_v56 = vpop.f32.mrf.mxu3 }
 0x27d   : > { %v1283_v61 = vadd.f32 %v1282_v56, %v1121_v8 }
 0x27f   : > { %v1306_v41 = vsel %vm679_vm0, %v1283_v61, -inf }
 0x280   : > { %1307 = vmax.xlane.f32.xlu1 %v1306_v41 }
 0x284   : > { %1794 = vrot.lane.b32.xlu0 %v5423_v55, %s4901_s1 }
 0x2c3   : > { %v1290_v18 = vpop.xlane.xlu1 %1289 }
 0x2c4   : > { %v1312_v19 = vsub.f32 %v1160_v32, %v1290_v18 }
 0x2c6   : > { %v1320_v20 = vmul.f32 1.442695, %v1312_v19 }
 0x2c8   : > { %4708 = vpow2.f32 %v1320_v20 }
 0x2cb   : > { %v1293_v2 = vpop.xlane.xlu2 %1292 }
 0x2cc   : > { %v1313_v23 = vsub.f32 %v1163_v22, %v1293_v2 }
 0x2ce   : > { %v5594_v28 = vpop.eup %4708  ;;  %v1322_v8 = vmul.f32 1.442695, %v1313_v23 }
 0x2cf   : > { %v1285_v30 = vpop.f32.mrf.mxu3  ;;  %v1336_v31 = vsel %vm679_vm0, %v5594_v28, 0.0 }
 0x2d0   : > { %4710 = vpow2.f32 %v1322_v8  ;;  %v5598_v37 = vadd.f32 %v1285_v30, %v1122_v14  ;;  %1337 = vadd.xlane.f32.xlu0 %v1336_v31 }
 0x2d2   : > { %v1309_v42 = vsel %vm679_vm0, %v5598_v37, -inf }
 0x2d3   : > { %1310 = vmax.xlane.f32.xlu2 %v1309_v42  ;;  %v1296_v32 = vpop.xlane.xlu1 %1295 }
 0x2d4   : > { %v1314_v5 = vsub.f32 %v1201_v50, %v1296_v32 }
 0x2d6   : > { %v5602_v39 = vpop.eup %4710  ;;  %v1324_v22 = vmul.f32 1.442695, %v1314_v5 }
 0x2d7   : > { %v1339_v51 = vsel %vm679_vm0, %v5602_v39, 0.0 }
 0x2d8   : > { %4712 = vpow2.f32 %v1324_v22  ;;  %1340 = vadd.xlane.f32.xlu1 %v1339_v51 }
 0x2db   : > { %v1299_v56 = vpop.xlane.xlu0 %1298 }
 0x2de   : > { %v5606_v41 = vpop.eup %4712 }
 0x2df   : > { %v1342_v14 = vsel %vm679_vm0, %v5606_v41, 0.0 }
 0x2e0   : > { %1343 = vadd.xlane.f32.xlu0 %v1342_v14 }
 0x2e3   : > { %v1302_v18 = vpop.xlane.xlu0 %1301 }
 0x2e4   : > { %v1316_v19 = vsub.f32 %v1242_v0, %v1302_v18 }
 0x2e6   : > { %v1328_v20 = vmul.f32 1.442695, %v1316_v19  ;;  %v5631_v19 = vld [vmem:[%s6805_s10 + $0x10] sm:$0xff] }
 0x2e8   : > { %4714 = vpow2.f32 %v1328_v20  ;;  %v1688_v20 = vpop.f32.mrf.mxu0 }
 0x2eb   : > { %1696 = vrot.lane.b32.xlu2 %v5512_v40, %s4901_s1  ;;  %v1305_v50 = vpop.xlane.xlu2 %1304 }
 0x2ec   : > { %v1317_v2 = vsub.f32 %v1245_v48, %v1305_v50  ;;  %v1315_v48 = vsub.f32 %v5578_v35, %v1299_v56  ;;  %v5636_v35 = vadd.f32 %v5631_v19, %v1688_v20 }
 0x2ee   : > { %v5612_v23 = vpop.eup %4714  ;;  %v1330_v8 = vmul.f32 1.442695, %v1317_v2  ;;  %v1326_v32 = vmul.f32 1.442695, %v1315_v48  ;;  %v1835_v56 = vsel %vm679_vm0, %v5636_v35, -inf  ;;  %v4571_v2 = vpack.i.bf16 %v5362_v34, %v5389_v43 }
 0x2ef   : > { %v1348_v30 = vsel %vm679_vm0, %v5612_v23, 0.0 }
 0x2f0   : > { %4716 = vpow2.f32 %v1330_v8  ;;  %1349 = vadd.xlane.f32.xlu0 %v1348_v30  ;;  %v4581_v8 = vpack.i.bf16 %v5367_v62, %v5478_v11 }
 0x2f1   : > { %1792 = vrot.lane.b32.xlu1 %v5432_v57, %s4901_s1  ;;  %4718 = vpow2.f32 %v1326_v32 }
 0x2f3   : > { %v1308_v5 = vpop.xlane.xlu1 %1307 }
 0x2f4   : > { %v1318_v22 = vsub.f32 %v1283_v61, %v1308_v5  ;;  %v4576_v5 = vpack.i.bf16 %v5342_v25, %v5384_v15 }
 0x2f6   : > { %v5618_v31 = vpop.eup %4716  ;;  %v1795_v0 = vpop.permute.xlu0 %1794  ;;  %v1332_v51 = vmul.f32 1.442695, %v1318_v22 }
 0x2f7   : > { %4371 = vmatpush.xpose.msk.msra.mxu3 %vm1123_vm8, %v1795_v0  ;;  %v1351_v42 = vsel %vm679_vm0, %v5618_v31, 0.0  ;;  %v5624_v14 = vpop.eup %4718 }
 0x2f8   : > { %1352 = vadd.xlane.f32.xlu0 %v1351_v42  ;;  %4720 = vpow2.f32 %v1332_v51  ;;  %v1345_v18 = vsel %vm679_vm0, %v5624_v14, 0.0 }
 0x2fe   : > { %v5633_v50 = vpop.eup %4720 }
 0x2ff   : > { %v1354_v61 = vsel %vm679_vm0, %v5633_v50, 0.0 }
 0x314   : > { %1346 = vadd.xlane.f32.xlu2 %v1345_v18 }
 0x31b   : > { %1355 = vadd.xlane.f32.xlu1 %v1354_v61 }
 0x31c   : > { %1836 = vmax.xlane.f32.xlu2 %v1835_v56 }
 0x334   : > { %2204 = vrot.lane.b32.xlu2 %v5305_v6, %s4903_s26  ;;  %1790 = vrot.lane.b32.xlu1 %v5563_v1, %s4901_s1 }
 0x33c   : > { %2202 = vrot.lane.b32.xlu2 %v5331_v21, %s4903_s26  ;;  %4567 = vrot.lane.b32.xlu1 %v5318_v10, %s4904_s27 }
 0x343   : > { %v1338_v30 = vpop.xlane.xlu0 %1337 }
 0x344   : > { %4722 = vrcp.f32 %v1338_v30  ;;  %4572 = vrot.lane.b32.xlu2 %v4571_v2, %s4904_s27  ;;  %4582 = vrot.lane.b32.xlu1 %v4581_v8, %s4904_s27  ;;  %v1371_v20 = vand.u32 2147483648, %v1338_v30  ;;  %v1369_v56 = vand.u32 2147483647, %v1338_v30  ;;  %vm1365_vm13 = vweird.f32 %v1338_v30 }
 0x346   : > { %v1311_v0 = vpop.xlane.xlu2 %1310  ;;  %vm1370_vm15 = vcmp.eq.f32.partialorder %v1369_v56, 8.507059e+37 }
 0x347   : > { %v1319_v42 = vsub.f32 %v5598_v37, %v1311_v0  ;;  %v1372_v0 = vor.u32 1.1754944e-38, %v1371_v20 }
 0x349   : > { %v1334_v48 = vmul.f32 1.442695, %v1319_v42 }
 0x34a   : > { %v4723_v32 = vpop.eup %4722 }
 0x34b   : > { %v1361_v22 = vmul.f32 %v4723_v32, %v1338_v30  ;;  %4724 = vpow2.f32 %v1334_v48  ;;  %v1341_v51 = vpop.xlane.xlu1 %1340  ;;  %vm1366_vm12 = vweird.f32 %v4723_v32 }
 0x34c   : > { %4726 = vrcp.f32 %v1341_v51  ;;  %4577 = vrot.lane.b32.xlu2 %v4576_v5, %s4904_s27  ;;  %2194 = vrot.lane.b32.xlu1 %v5466_v26, %s4903_s26  ;;  %vm1367_vm14 = vmor %vm1365_vm13, %vm1366_vm12  ;;  %v1386_v20 = vand.u32 2147483648, %v1341_v51  ;;  %vm1380_vm2 = vweird.f32 %v1341_v51 }
 0x34d   : > { %v1362_v18 = vsub.f32 1.0, %v1361_v22 }
 0x34f   : > { %v1363_v61 = vmul.f32 %v4723_v32, %v1362_v18 }
 0x351   : > { %v5662_v37 = vpop.eup %4724  ;;  %v1364_v2 = vadd.f32 %v4723_v32, %v1363_v61 }
 0x352   : > { %v4727_v8 = vpop.eup %4726  ;;  %v1357_v42 = vsel %vm679_vm0, %v5662_v37, 0.0 }
 0x353   : > { %v1368_v48 = vsel %vm1367_vm14, %v4723_v32, %v1364_v2  ;;  %v1376_v5 = vmul.f32 %v4727_v8, %v1341_v51  ;;  %1358 = vadd.xlane.f32.xlu0 %v1357_v42  ;;  %v1344_v36 = vpop.xlane.xlu0 %1343  ;;  %vm1381_vm1 = vweird.f32 %v4727_v8  ;;  %v1384_v32 = vand.u32 2147483647, %v1341_v51 }
 0x354   : > { %4728 = vrcp.f32 %v1344_v36  ;;  %2251 = vrot.lane.b32.xlu2 %v5362_v34, %s4903_s26  ;;  %2296 = vrot.lane.b32.xlu1 %v5384_v15, %s4903_s26  ;;  %v1373_v22 = vsel %vm1370_vm15, %v1372_v0, %v1368_v48  ;;  %vm1382_vm3 = vmor %vm1380_vm2, %vm1381_vm1  ;;  %v1387_v42 = vor.u32 1.1754944e-38, %v1386_v20  ;;  %v1401_v48 = vand.u32 2147483648, %v1344_v36 }
 0x355   : > { %v1377_v30 = vsub.f32 1.0, %v1376_v5  ;;  %v1374_v18 = vmul.f32 %v5594_v28, %v1373_v22  ;;  %vm1385_vm4 = vcmp.eq.f32.partialorder %v1384_v32, 8.507059e+37  ;;  %vm1395_vm6 = vweird.f32 %v1344_v36 }
 0x356   : > { %v1402_v5 = vor.u32 1.1754944e-38, %v1401_v48 }
 0x357   : > { %4341 = vmatmul.msk.f32.vlgmr.msra.gmra.mxu2 %vm679_vm0, %v1374_v18  ;;  %v1378_v61 = vmul.f32 %v4727_v8, %v1377_v30 }
 0x358   : > { %4363 = vmatpush.xpose.msk.msra.mxu2 %vm1123_vm8, %v5552_v45 }
 0x359   : > { %v1379_v56 = vadd.f32 %v4727_v8, %v1378_v61 }
 0x35a   : > { %v4729_v2 = vpop.eup %4728 }
 0x35b   : > { %v1391_v53 = vmul.f32 %v4729_v2, %v1344_v36  ;;  %v1383_v38 = vsel %vm1382_vm3, %v4727_v8, %v1379_v56  ;;  %vm1396_vm5 = vweird.f32 %v4729_v2  ;;  %v1399_v8 = vand.u32 2147483647, %v1344_v36 }
 0x35c   : > { %4364 = vmatpush.xpose.msk.msra.mxu2 %vm1123_vm8, %v5529_v60  ;;  %2294 = vrot.lane.b32.xlu2 %v5478_v11, %s4903_s26  ;;  %v1388_v28 = vsel %vm1385_vm4, %v1387_v42, %v1383_v38  ;;  %vm1397_vm7 = vmor %vm1395_vm6, %vm1396_vm5 }
 0x35d   : > { %v1392_v0 = vsub.f32 1.0, %v1391_v53  ;;  %2249 = vrot.lane.b32.xlu1 %v5342_v25, %s4903_s26  ;;  %v1389_v45 = vmul.f32 %v5602_v39, %v1388_v28  ;;  %vm1400_vm9 = vcmp.eq.f32.partialorder %v1399_v8, 8.507059e+37 }
 0x35f   : > { %v1393_v51 = vmul.f32 %v4729_v2, %v1392_v0  ;;  %4342 = vmatmul.msk.f32.gmra.mxu2 %vm679_vm0, %v1389_v45 }
 0x360   : > { %4365 = vmatpush.xpose.msk.msra.mxu2 %vm1123_vm8, %v5575_v27 }
 0x361   : > { %v1394_v60 = vadd.f32 %v4729_v2, %v1393_v51 }
 0x363   : > { %v1350_v38 = vpop.xlane.xlu0 %1349  ;;  %v1793_v53 = vpop.permute.xlu1 %1792  ;;  %v1398_v22 = vsel %vm1397_vm7, %v4729_v2, %v1394_v60 }
 0x364   : > { %4366 = vmatpush.xpose.msk.msra.mxu2 %vm1123_vm8, %v5540_v7  ;;  %4730 = vrcp.f32 %v1350_v38  ;;  %2247 = vrot.lane.b32.xlu2 %v5367_v62, %s4903_s26  ;;  %v1403_v36 = vsel %vm1400_vm9, %v1402_v5, %v1398_v22  ;;  %v1431_v20 = vand.u32 2147483648, %v1350_v38  ;;  %vm1425_vm11 = vweird.f32 %v1350_v38 }
 0x365   : > { %4592 = vrot.lane.b32.xlu1 %v5452_v63, %s4904_s27  ;;  %4372 = vmatpush.xpose.msk.msra.mxu3 %vm1123_vm8, %v1793_v53  ;;  %v1404_v27 = vmul.f32 %v5606_v41, %v1403_v36  ;;  %v1429_v41 = vand.u32 2147483647, %v1350_v38  ;;  %v1697_v36 = vpop.permute.xlu2 %1696 }
 0x366   : > { %v1432_v2 = vor.u32 1.1754944e-38, %v1431_v20 }
 0x367   : > { %1788 = vrot.lane.b32.xlu0 %v5543_v13, %s4901_s1  ;;  %4343 = vmatmul.msk.f32.vlgmr.msrb.gmra.mxu1 %vm679_vm0, %v1404_v27  ;;  %vm1430_vm13 = vcmp.eq.f32.partialorder %v1429_v41, 8.507059e+37 }
 0x36a   : > { %v4731_v39 = vpop.eup %4730 }
 0x36b   : > { %v1421_v7 = vmul.f32 %v4731_v39, %v1350_v38  ;;  %v1353_v30 = vpop.xlane.xlu0 %1352  ;;  %vm1426_vm10 = vweird.f32 %v4731_v39 }
 0x36c   : > { %4732 = vrcp.f32 %v1353_v30  ;;  %2292 = vrot.lane.b32.xlu2 %v5392_v46, %s4903_s26  ;;  %vm1427_vm12 = vmor %vm1425_vm11, %vm1426_vm10  ;;  %v1446_v48 = vand.u32 2147483648, %v1353_v30  ;;  %v1444_v60 = vand.u32 2147483647, %v1353_v30  ;;  %vm1440_vm15 = vweird.f32 %v1353_v30 }
 0x36d   : > { %v1422_v18 = vsub.f32 1.0, %v1421_v7  ;;  %2196 = vrot.lane.b32.xlu1 %v5482_v17, %s4903_s26  ;;  %v1691_v7 = vpop.f32.mrf.mxu0 }
 0x36e   : > { %v1447_v38 = vor.u32 1.1754944e-38, %v1446_v48  ;;  %vm1445_vm2 = vcmp.eq.f32.partialorder %v1444_v60, 8.507059e+37 }
 0x36f   : > { %v1423_v61 = vmul.f32 %v4731_v39, %v1422_v18 }
 0x371   : > { %v1424_v32 = vadd.f32 %v4731_v39, %v1423_v61 }
 0x372   : > { %v4733_v56 = vpop.eup %4732 }
 0x373   : > { %v1428_v42 = vsel %vm1427_vm12, %v4731_v39, %v1424_v32  ;;  %v1436_v28 = vmul.f32 %v4733_v56, %v1353_v30  ;;  %vm1441_vm14 = vweird.f32 %v4733_v56  ;;  %v5718_v39 = vld [vmem:[%s6805_s10 + $0x18] sm:$0xff] }
 0x374   : > { %2345 = vrot.lane.b32.xlu2 %v5407_v44, %s4903_s26  ;;  %v1433_v0 = vsel %vm1430_vm13, %v1432_v2, %v1428_v42  ;;  %vm1442_vm1 = vmor %vm1440_vm15, %vm1441_vm14  ;;  %v5721_v30 = vadd.f32 %v5718_v39, %v1691_v7 }
 0x375   : > { %v1437_v45 = vsub.f32 1.0, %v1436_v28  ;;  %4597 = vrot.lane.b32.xlu1 %v5436_v58, %s4904_s27  ;;  %v1434_v51 = vmul.f32 %v5612_v23, %v1433_v0 }
 0x377   : > { %4345 = vmatmul.msk.f32.vlgmr.msrb.gmra.mxu2 %vm679_vm0, %v1434_v51  ;;  %v1438_v8 = vmul.f32 %v4733_v56, %v1437_v45 }
 0x379   : > { %v1439_v5 = vadd.f32 %v4733_v56, %v1438_v8 }
 0x37b   : > { %v1443_v53 = vsel %vm1442_vm1, %v4733_v56, %v1439_v5 }
 0x37c   : > { %2343 = vrot.lane.b32.xlu2 %v5441_v59, %s4903_s26  ;;  %v1448_v22 = vsel %vm1445_vm2, %v1447_v38, %v1443_v53 }
 0x37d   : > { %2288 = vrot.lane.b32.xlu1 %v5523_v49, %s4903_s26  ;;  %v1449_v23 = vmul.f32 %v5618_v31, %v1448_v22 }
 0x37f   : > { %4346 = vmatmul.msk.f32.gmra.mxu2 %vm679_vm0, %v1449_v23 }
 0x385   : > { %2241 = vrot.lane.b32.xlu1 %v5495_v47, %s4903_s26 }
 0x387   : > { %v1347_v27 = vpop.xlane.xlu2 %1346  ;;  %4367 = vmatmul.msk.f32.vlgmr.msra.gmra.mxu2 %vm1123_vm8, %v5588_v9  ;;  %v1838_v9 = vsel %vm679_vm0, %v5721_v30, -inf }
 0x388   : > { %4734 = vrcp.f32 %v1347_v27  ;;  %v1416_v32 = vand.u32 2147483648, %v1347_v27  ;;  %v1414_v2 = vand.u32 2147483647, %v1347_v27  ;;  %vm1410_vm4 = vweird.f32 %v1347_v27 }
 0x38a   : > { %v1417_v45 = vor.u32 1.1754944e-38, %v1416_v32  ;;  %vm1415_vm6 = vcmp.eq.f32.partialorder %v1414_v2, 8.507059e+37 }
 0x38e   : > { %v4735_v31 = vpop.eup %4734  ;;  %v1356_v18 = vpop.xlane.xlu1 %1355 }
 0x38f   : > { %v1406_v20 = vmul.f32 %v4735_v31, %v1347_v27  ;;  %4736 = vrcp.f32 %v1356_v18  ;;  %v1837_v61 = vpop.xlane.xlu2 %1836  ;;  %4368 = vmatmul.msk.f32.gmra.mxu2 %vm1123_vm8, %v5592_v16  ;;  %vm1411_vm3 = vweird.f32 %v4735_v31  ;;  %v1461_v60 = vand.u32 2147483648, %v1356_v18 }
 0x390   : > { %vm1412_vm5 = vmor %vm1410_vm4, %vm1411_vm3  ;;  %v1459_v53 = vand.u32 2147483647, %v1356_v18  ;;  %vm1455_vm9 = vweird.f32 %v1356_v18  ;;  %v1859_v27 = vsub.f32 %v5636_v35, %v1837_v61 }
 0x391   : > { %v1407_v41 = vsub.f32 1.0, %v1406_v20  ;;  %1839 = vmax.xlane.f32.xlu0 %v1838_v9  ;;  %v1462_v23 = vor.u32 1.1754944e-38, %v1461_v60 }
 0x392   : > { %vm1460_vm11 = vcmp.eq.f32.partialorder %v1459_v53, 8.507059e+37 }
 0x393   : > { %v1408_v56 = vmul.f32 %v4735_v31, %v1407_v41  ;;  %v1867_v41 = vmul.f32 1.442695, %v1859_v27 }
 0x395   : > { %v4737_v42 = vpop.eup %4736  ;;  %v1409_v28 = vadd.f32 %v4735_v31, %v1408_v56  ;;  %4738 = vpow2.f32 %v1867_v41 }
 0x396   : > { %v1451_v0 = vmul.f32 %v4737_v42, %v1356_v18  ;;  %vm1456_vm7 = vweird.f32 %v4737_v42 }
 0x397   : > { %v5727_v51 = vpop.permute.xlu2 %2204  ;;  %v1413_v48 = vsel %vm1412_vm5, %v4735_v31, %v1409_v28  ;;  %vm1457_vm10 = vmor %vm1455_vm9, %vm1456_vm7  ;;  %v4586_v28 = vpack.i.bf16 %v5357_v29, %v5392_v46 }
 0x398   : > { %v1452_v16 = vsub.f32 1.0, %v1451_v0  ;;  %v1418_v8 = vsel %vm1415_vm6, %v1417_v45, %v1413_v48 }
 0x399   : > { %v1419_v5 = vmul.f32 %v5624_v14, %v1418_v8 }
 0x39a   : > { %v1453_v38 = vmul.f32 %v4737_v42, %v1452_v16 }
 0x39b   : > { %4344 = vmatmul.msk.f32.gmra.mxu1 %vm679_vm0, %v1419_v5  ;;  %v5742_v32 = vpop.eup %4738 }
 0x39c   : > { %v1454_v22 = vadd.f32 %v4737_v42, %v1453_v38 }
 0x39e   : > { %v1458_v7 = vsel %vm1457_vm10, %v4737_v42, %v1454_v22 }
 0x39f   : > { %v5732_v31 = vpop.permute.xlu2 %2202  ;;  %v1463_v20 = vsel %vm1460_vm11, %v1462_v23, %v1458_v7 }
 0x3a0   : > { %v1464_v9 = vmul.f32 %v5633_v50, %v1463_v20 }
 0x3a2   : > { %4347 = vmatmul.msk.f32.vlgmr.msrb.gmra.mxu3 %vm679_vm0, %v1464_v9 }
 0x3a3   : > { %4361 = vmatmul.msk.f32.vlgmr.msra.gmra.mxu1 %vm1123_vm8, %v5590_v12  ;;  %v1883_v12 = vsel %vm679_vm0, %v5742_v32, 0.0 }
 0x3a5   : > { %4562 = vrot.lane.b32.xlu0 %v5339_v24, %s4904_s27 }
 0x3a6   : > { %v5740_v14 = vpop.permute.xlu1 %1790 }
 0x3a7   : > { %v4573_v35 = vpop.permute.xlu2 %4572 }
 0x3a8   : > { %v4575_v18 = vunpack.i.h.bf16 %v4573_v35  ;;  %v4574_v61 = vunpack.i.l.bf16 %v4573_v35 }
 0x3aa   : > { %2098 = vmatpush.msrb.mxu1 %v4575_v18  ;;  %2139 = vmatpush.msrb.mxu2 %v4574_v61 }
 0x3ab   : > { %4362 = vmatmul.msk.f32.gmra.mxu1 %vm1123_vm8, %v1697_v36 }
 0x3ad   : > { %2200 = vrot.lane.b32.xlu0 %v5301_v4, %s4903_s26 }
 0x3ae   : > { %v5749_v50 = vpop.permute.xlu1 %4567 }
 0x3af   : > { %1884 = vadd.xlane.f32.xlu1 %v1883_v12  ;;  %v4578_v56 = vpop.permute.xlu2 %4577 }
 0x3b0   : > { %v4580_v2 = vunpack.i.h.bf16 %v4578_v56  ;;  %v4579_v42 = vunpack.i.l.bf16 %v4578_v56 }
 0x3b2   : > { %2099 = vmatpush.msrb.mxu1 %v4580_v2  ;;  %2140 = vmatpush.msrb.mxu2 %v4579_v42 }
 0x3b5   : > { %4587 = vrot.lane.b32.xlu0 %v4586_v28, %s4904_s27 }
 0x3b6   : > { %v4583_v36 = vpop.permute.xlu1 %4582 }
 0x3b7   : > { %v4585_v0 = vunpack.i.h.bf16 %v4583_v36  ;;  %v4584_v45 = vunpack.i.l.bf16 %v4583_v36  ;;  %v5756_v48 = vpop.permute.xlu2 %2251 }
 0x3b9   : > { %2100 = vmatpush.msrb.mxu1 %v4585_v0  ;;  %2141 = vmatpush.msrb.mxu2 %v4584_v45 }
 0x3bd   : > { %2198 = vrot.lane.b32.xlu0 %v5281_v52, %s4903_s26 }
 0x3be   : > { %v5758_v16 = vpop.permute.xlu1 %2194 }
 0x3bf   : > { %v5764_v5 = vpop.permute.xlu2 %2294 }
 0x3c5   : > { %2298 = vrot.lane.b32.xlu0 %v5389_v43, %s4903_s26 }
 0x3c6   : > { %v1359_v8 = vpop.xlane.xlu0 %1358  ;;  %v5762_v60 = vpop.permute.xlu1 %2296 }
 0x3c7   : > { %4740 = vrcp.f32 %v1359_v8  ;;  %v1476_v27 = vand.u32 2147483648, %v1359_v8  ;;  %v5770_v7 = vpop.permute.xlu2 %2247  ;;  %v1474_v9 = vand.u32 2147483647, %v1359_v8  ;;  %vm1470_vm13 = vweird.f32 %v1359_v8 }
 0x3c9   : > { %v1477_v35 = vor.u32 1.1754944e-38, %v1476_v27  ;;  %vm1475_vm15 = vcmp.eq.f32.partialorder %v1474_v9, 8.507059e+37 }
 0x3cd   : > { %v4741_v38 = vpop.eup %4740  ;;  %2245 = vrot.lane.b32.xlu0 %v5357_v29, %s4903_s26 }
 0x3ce   : > { %v1466_v53 = vmul.f32 %v4741_v38, %v1359_v8  ;;  %vm1471_vm12 = vweird.f32 %v4741_v38 }
 0x3cf   : > { %v5768_v22 = vpop.permute.xlu1 %2249  ;;  %vm1472_vm14 = vmor %vm1470_vm13, %vm1471_vm12  ;;  %v5774_v28 = vpop.permute.xlu2 %2292 }
 0x3d0   : > { %v1467_v23 = vsub.f32 1.0, %v1466_v53 }
 0x3d2   : > { %v1468_v20 = vmul.f32 %v4741_v38, %v1467_v23 }
 0x3d4   : > { %v1469_v41 = vadd.f32 %v4741_v38, %v1468_v20 }
 0x3d6   : > { %v1473_v18 = vsel %vm1472_vm14, %v4741_v38, %v1469_v41 }
 0x3d7   : > { %v4593_v61 = vpop.permute.xlu1 %4592  ;;  %v1478_v12 = vsel %vm1475_vm15, %v1477_v35, %v1473_v18  ;;  %v2346_v45 = vpop.permute.xlu2 %2345 }
 0x3d8   : > { %v4594_v56 = vunpack.i.l.bf16 %v4593_v61  ;;  %v1479_v2 = vmul.f32 %v5662_v37, %v1478_v12  ;;  %v4595_v42 = vunpack.i.h.bf16 %v4593_v61 }
 0x3d9   : > { %v1789_v0 = vpop.permute.xlu0 %1788 }
 0x3da   : > { %2180 = vmatpush.msrb.mxu3 %v4594_v56  ;;  %v5779_v38 = vpop.f32.mrf.mxu2 }
 0x3db   : > { %4348 = vmatmul.msk.f32.gmra.mxu3 %vm679_vm0, %v1479_v2 }
 0x3dc   : > { %2181 = vmatpush.msrb.mxu3 %v4595_v42 }
 0x3df   : > { %v5776_v36 = vpop.permute.xlu1 %2196  ;;  %v2344_v37 = vpop.permute.xlu2 %2343 }
 0x3e2   : > { %v5785_v27 = vpop.f32.mrf.mxu2 }
 0x3e3   : > { %4373 = vmatmul.msk.f32.vlgmr.msra.gmra.mxu3 %vm1123_vm8, %v1789_v0  ;;  %6830 = vst [vmem:[#allocation6_spill] sm:$0xff] %v5785_v27 }
 0x3e7   : > { %v4598_v8 = vpop.permute.xlu1 %4597 }
 0x3e8   : > { %v4599_v53 = vunpack.i.l.bf16 %v4598_v8  ;;  %v4600_v23 = vunpack.i.h.bf16 %v4598_v8 }
 0x3ea   : > { %2182 = vmatpush.msrb.mxu3 %v4599_v53 }
 0x3eb   : > { %4374 = vmatmul.msk.f32.gmra.mxu3 %vm1123_vm8, %v5740_v14  ;;  %v5794_v14 = vpop.f32.mrf.mxu1 }
 0x3ec   : > { %2183 = vmatpush.msrb.mxu3 %v4600_v23  ;;  %6833 = vst [vmem:[#allocation9_spill] sm:$0xff] %v5794_v14 }
 0x3ee   : > { %4403 = vmatpush.xpose.msk.msra.mxu3 %vm1123_vm8, %v2346_v45 }
 0x3ef   : > { %v5796_v56 = vpop.permute.xlu1 %2288 }
 0x3f2   : > { %4404 = vmatpush.xpose.msk.msra.mxu3 %vm1123_vm8, %v2344_v37 }
 0x3f7   : > { %v5807_v23 = vpop.permute.xlu1 %2241 }
 0x3fa   : > { %v5787_v20 = vpop.f32.mrf.mxu2 }
 0x3fb   : > { %6831 = vst [vmem:[#allocation7_spill] sm:$0xff] %v5787_v20 }
 0x402   : > { %v5789_v9 = vpop.f32.mrf.mxu2 }
 0x403   : > { %6832 = vst [vmem:[#allocation8_spill] sm:$0xff] %v5789_v9 }
 0x404   : > { %v1840_v41 = vpop.xlane.xlu0 %1839 }
 0x405   : > { %v1860_v35 = vsub.f32 %v5721_v30, %v1840_v41  ;;  %v4569_v41 = vunpack.i.l.bf16 %v5749_v50 }
 0x407   : > { %v1869_v18 = vmul.f32 1.442695, %v1860_v35  ;;  %v4570_v35 = vunpack.i.h.bf16 %v5749_v50 }
 0x409   : > { %4742 = vpow2.f32 %v1869_v18 }
 0x40a   : > { %v1782_v61 = vpop.f32.mrf.mxu2 }
 0x40f   : > { %v5792_v12 = vpop.eup %4742 }
 0x410   : > { %v1886_v2 = vsel %vm679_vm0, %v5792_v12, 0.0 }
 0x411   : > { %1887 = vadd.xlane.f32.xlu2 %v1886_v2 }
 0x412   : > { %v1785_v42 = vpop.f32.mrf.mxu2 }
 0x413   : > { %v5801_v0 = vadd.f32 %v5718_v39, %v1785_v42 }
 0x415   : > { %v1850_v30 = vsel %vm679_vm0, %v5801_v0, -inf }
 0x416   : > { %1851 = vmax.xlane.f32.xlu0 %v1850_v30 }
 0x417   : > { %v4563_v45 = vpop.permute.xlu0 %4562 }
 0x418   : > { %v4564_v8 = vunpack.i.l.bf16 %v4563_v45  ;;  %v5805_v53 = vpop.f32.mrf.mxu1  ;;  %v4565_v37 = vunpack.i.h.bf16 %v4563_v45 }
 0x419   : > { %6834 = vst [vmem:[#allocation10_spill] sm:$0xff] %v5805_v53 }
 0x41a   : > { %2057 = vmatpush.msra.mxu0 %v4564_v8 }
 0x41c   : > { %2058 = vmatpush.msra.mxu0 %v4565_v37 }
 0x41e   : > { %2059 = vmatpush.msra.mxu0 %v4569_v41 }
 0x41f   : > { %v2201_v18 = vpop.permute.xlu0 %2200 }
 0x420   : > { %v1735_v2 = vpop.f32.mrf.mxu1  ;;  %2060 = vmatpush.msra.mxu0 %v4570_v35 }
 0x421   : > { %v5812_v42 = vadd.f32 %v5631_v19, %v1735_v2 }
 0x422   : > { %4385 = vmatpush.xpose.msk.msrb.mxu0 %vm1123_vm8, %v5727_v51  ;;  %v1885_v30 = vpop.xlane.xlu1 %1884 }
 0x423   : > { %4744 = vrcp.f32 %v1885_v30  ;;  %v1841_v45 = vsel %vm679_vm0, %v5812_v42, -inf  ;;  %v1918_v9 = vand.u32 2147483648, %v1885_v30  ;;  %v1916_v20 = vand.u32 2147483647, %v1885_v30 }
 0x424   : > { %1842 = vmax.xlane.f32.xlu2 %v1841_v45  ;;  %vm1912_vm2 = vweird.f32 %v1885_v30 }
 0x425   : > { %vm1917_vm4 = vcmp.eq.f32.partialorder %v1916_v20, 8.507059e+37 }
 0x426   : > { %4386 = vmatpush.xpose.msk.msrb.mxu0 %vm1123_vm8, %v5732_v31 }
 0x427   : > { %v4588_v50 = vpop.permute.xlu0 %4587 }
 0x428   : > { %v4590_v8 = vunpack.i.h.bf16 %v4588_v50  ;;  %v4589_v37 = vunpack.i.l.bf16 %v4588_v50  ;;  %v1738_v41 = vpop.f32.mrf.mxu1 }
 0x429   : > { %v4745_v35 = vpop.eup %4744  ;;  %v5821_v2 = vadd.f32 %v5718_v39, %v1738_v41  ;;  %v5829_v41 = vadd.f32 %v5631_v19, %v1782_v61 }
 0x42a   : > { %4387 = vmatpush.xpose.msk.msrb.mxu0 %vm1123_vm8, %v2201_v18  ;;  %v1908_v51 = vmul.f32 %v4745_v35, %v1885_v30  ;;  %2101 = vmatpush.msrb.mxu1 %v4590_v8  ;;  %vm1913_vm1 = vweird.f32 %v4745_v35 }
 0x42b   : > { %2142 = vmatpush.msrb.mxu2 %v4589_v37  ;;  %v1844_v45 = vsel %vm679_vm0, %v5821_v2, -inf  ;;  %vm1914_vm3 = vmor %vm1912_vm2, %vm1913_vm1  ;;  %v1847_v61 = vsel %vm679_vm0, %v5829_v41, -inf }
 0x42c   : > { %4391 = vmatpush.xpose.msk.msra.mxu1 %vm1123_vm8, %v5756_v48  ;;  %v1909_v31 = vsub.f32 1.0, %v1908_v51  ;;  %1845 = vmax.xlane.f32.xlu1 %v1844_v45  ;;  %v1919_v48 = vor.u32 1.1754944e-38, %v1918_v9 }
 0x42e   : > { %v1910_v50 = vmul.f32 %v4745_v35, %v1909_v31 }
 0x42f   : > { %v2199_v53 = vpop.permute.xlu0 %2198 }
 0x430   : > { %4392 = vmatpush.xpose.msk.msra.mxu1 %vm1123_vm8, %v5768_v22  ;;  %v1911_v18 = vadd.f32 %v4745_v35, %v1910_v50  ;;  %4388 = vmatpush.xpose.msk.msrb.mxu0 %vm1123_vm8, %v2199_v53 }
 0x432   : > { %v1915_v8 = vsel %vm1914_vm3, %v4745_v35, %v1911_v18 }
 0x433   : > { %v1920_v37 = vsel %vm1917_vm4, %v1919_v48, %v1915_v8 }
 0x434   : > { %4393 = vmatpush.xpose.msk.msra.mxu1 %vm1123_vm8, %v5770_v7  ;;  %1848 = vmax.xlane.f32.xlu1 %v1847_v61  ;;  %v1921_v51 = vmul.f32 %v5742_v32, %v1920_v37  ;;  %v5852_v32 = vpop.f32.mrf.mxu3 }
 0x435   : > { %6835 = vst [vmem:[#allocation11_spill] sm:$0xff] %v5852_v32 }
 0x436   : > { %4375 = vmatmul.msk.f32.vlgmr.msra.gmra.mxu0 %vm679_vm0, %v1921_v51 }
 0x437   : > { %v2299_v22 = vpop.permute.xlu0 %2298 }
 0x438   : > { %4397 = vmatpush.xpose.msk.msra.mxu2 %vm1123_vm8, %v2299_v22 }
 0x43c   : > { %4398 = vmatpush.xpose.msk.msra.mxu2 %vm1123_vm8, %v5762_v60  ;;  %2341 = vrot.lane.b32.xlu2 %v5423_v55, %s4903_s26 }
 0x43f   : > { %v2246_v20 = vpop.permute.xlu0 %2245 }
 0x440   : > { %4394 = vmatpush.xpose.msk.msra.mxu1 %vm1123_vm8, %v2246_v20  ;;  %4399 = vmatpush.xpose.msk.msra.mxu2 %vm1123_vm8, %v5764_v5 }
 0x444   : > { %4400 = vmatpush.xpose.msk.msra.mxu2 %vm1123_vm8, %v5774_v28 }
 0x44d   : > { %2290 = vrot.lane.b32.xlu1 %v5534_v3, %s4903_s26 }
 0x45e   : > { %v5854_v7 = vpop.f32.mrf.mxu3 }
 0x45f   : > { %6836 = vst [vmem:[#allocation12_spill] sm:$0xff] %v5854_v7 }
 0x466   : > { %v1829_v60 = vpop.f32.mrf.mxu3 }
 0x467   : > { %v1830_v9 = vadd.f32 %v5631_v19, %v1829_v60 }
 0x469   : > { %v1853_v53 = vsel %vm679_vm0, %v1830_v9, -inf }
 0x46a   : > { %1854 = vmax.xlane.f32.xlu2 %v1853_v53 }
 0x46e   : > { %v1832_v30 = vpop.f32.mrf.mxu3 }
 0x46f   : > { %v1833_v35 = vadd.f32 %v5718_v39, %v1832_v30 }
 0x471   : > { %v1856_v5 = vsel %vm679_vm0, %v1833_v35, -inf }
 0x472   : > { %1857 = vmax.xlane.f32.xlu0 %v1856_v5 }
 0x484   : > { %v1888_v28 = vpop.xlane.xlu2 %1887 }
 0x485   : > { %4746 = vrcp.f32 %v1888_v28  ;;  %v1933_v19 = vand.u32 2147483648, %v1888_v28  ;;  %v1931_v61 = vand.u32 2147483647, %v1888_v28  ;;  %vm1927_vm6 = vweird.f32 %v1888_v28 }
 0x487   : > { %v1934_v39 = vor.u32 1.1754944e-38, %v1933_v19  ;;  %vm1932_vm9 = vcmp.eq.f32.partialorder %v1931_v61, 8.507059e+37 }
 0x489   : > { %v1852_v45 = vpop.xlane.xlu0 %1851 }
 0x48a   : > { %v1864_v31 = vsub.f32 %v5801_v0, %v1852_v45 }
 0x48b   : > { %v4747_v50 = vpop.eup %4746 }
 0x48c   : > { %v1923_v18 = vmul.f32 %v4747_v50, %v1888_v28  ;;  %v1877_v48 = vmul.f32 1.442695, %v1864_v31  ;;  %vm1928_vm5 = vweird.f32 %v4747_v50 }
 0x48d   : > { %vm1929_vm7 = vmor %vm1927_vm6, %vm1928_vm5 }
 0x48e   : > { %v1924_v8 = vsub.f32 1.0, %v1923_v18  ;;  %4748 = vpow2.f32 %v1877_v48 }
 0x490   : > { %v1925_v37 = vmul.f32 %v4747_v50, %v1924_v8 }
 0x492   : > { %v1926_v51 = vadd.f32 %v4747_v50, %v1925_v37 }
 0x494   : > { %v5861_v22 = vpop.eup %4748  ;;  %v1930_v20 = vsel %vm1929_vm7, %v4747_v50, %v1926_v51 }
 0x495   : > { %v1898_v0 = vsel %vm679_vm0, %v5861_v22, 0.0  ;;  %v1935_v60 = vsel %vm1932_vm9, %v1934_v39, %v1930_v20 }
 0x496   : > { %1899 = vadd.xlane.f32.xlu0 %v1898_v0  ;;  %v1936_v53 = vmul.f32 %v5792_v12, %v1935_v60 }
 0x497   : > { %v1843_v30 = vpop.xlane.xlu2 %1842 }
 0x498   : > { %4376 = vmatmul.msk.f32.gmra.mxu0 %vm679_vm0, %v1936_v53  ;;  %v1861_v5 = vsub.f32 %v5812_v42, %v1843_v30 }
 0x49a   : > { %v1871_v28 = vmul.f32 1.442695, %v1861_v5 }
 0x49c   : > { %4750 = vpow2.f32 %v1871_v28 }
 0x49f   : > { %v1846_v45 = vpop.xlane.xlu1 %1845  ;;  %v2342_v31 = vpop.permute.xlu2 %2341 }
 0x4a0   : > { %v1862_v18 = vsub.f32 %v5821_v2, %v1846_v45  ;;  %4389 = vmatmul.msk.f32.vlgmr.msrb.gmra.mxu0 %vm1123_vm8, %v5758_v16  ;;  %4405 = vmatpush.xpose.msk.msra.mxu3 %vm1123_vm8, %v2342_v31  ;;  %v5916_v31 = vld [vmem:[%s6805_s10 + $0x20] sm:$0xff] }
 0x4a2   : > { %v1873_v50 = vmul.f32 1.442695, %v1862_v18  ;;  %v5872_v48 = vpop.eup %4750 }
 0x4a3   : > { %v1889_v12 = vsel %vm679_vm0, %v5872_v48, 0.0 }
 0x4a4   : > { %4752 = vpow2.f32 %v1873_v50  ;;  %1890 = vadd.xlane.f32.xlu2 %v1889_v12 }
 0x4a7   : > { %v1849_v42 = vpop.xlane.xlu1 %1848 }
 0x4a8   : > { %v1863_v8 = vsub.f32 %v5829_v41, %v1849_v42  ;;  %4390 = vmatmul.msk.f32.gmra.mxu0 %vm1123_vm8, %v5776_v36 }
 0x4aa   : > { %v5879_v2 = vpop.eup %4752  ;;  %v1875_v19 = vmul.f32 1.442695, %v1863_v8  ;;  %2243 = vrot.lane.b32.xlu0 %v5512_v40, %s4903_s26 }
 0x4ab   : > { %v1892_v16 = vsel %vm679_vm0, %v5879_v2, 0.0 }
 0x4ac   : > { %4754 = vpow2.f32 %v1875_v19  ;;  %1893 = vadd.xlane.f32.xlu1 %v1892_v16 }
 0x4b2   : > { %v5885_v37 = vpop.eup %4754 }
 0x4b3   : > { %v1895_v61 = vsel %vm679_vm0, %v5885_v37, 0.0 }
 0x4b4   : > { %1896 = vadd.xlane.f32.xlu1 %v1895_v61 }
 0x4bf   : > { %v5911_v28 = vpop.permute.xlu1 %2290 }
 0x4cd   : > { %2339 = vrot.lane.b32.xlu1 %v5432_v57, %s4903_s26 }
 0x4dd   : > { %v1855_v36 = vpop.xlane.xlu2 %1854 }
 0x4de   : > { %v1865_v41 = vsub.f32 %v1830_v9, %v1855_v36  ;;  %v5903_v9 = vpop.f32.mrf.mxu0 }
 0x4e0   : > { %v1879_v51 = vmul.f32 1.442695, %v1865_v41 }
 0x4e2   : > { %4756 = vpow2.f32 %v1879_v51 }
 0x4e5   : > { %v1858_v39 = vpop.xlane.xlu0 %1857 }
 0x4e6   : > { %v1866_v20 = vsub.f32 %v1833_v35, %v1858_v39 }
 0x4e8   : > { %v5891_v0 = vpop.eup %4756  ;;  %v1881_v60 = vmul.f32 1.442695, %v1866_v20 }
 0x4e9   : > { %v1901_v53 = vsel %vm679_vm0, %v5891_v0, 0.0 }
 0x4ea   : > { %4758 = vpow2.f32 %v1881_v60  ;;  %1902 = vadd.xlane.f32.xlu2 %v1901_v53 }
 0x4f0   : > { %v5895_v30 = vpop.eup %4758 }
 0x4f1   : > { %v1904_v5 = vsel %vm679_vm0, %v5895_v30, 0.0 }
 0x4f2   : > { %1905 = vadd.xlane.f32.xlu0 %v1904_v5 }
 0x502   : > { %2335 = vrot.lane.b32.xlu2 %v5543_v13, %s4903_s26 }
 0x506   : > { %2337 = vrot.lane.b32.xlu0 %v5563_v1, %s4903_s26  ;;  %s4906_s26 = smov 80  }
 0x509   : > { %v5923_v42 = vpop.xlane.xlu0 %1899 }
 0x50a   : > { %vm1987_vm9 = vweird.f32 %v5923_v42 }
 0x50e   : > { %2751 = vrot.lane.b32.xlu0 %v5305_v6, %s4905_s23 }
 0x515   : > { %v5907_v35 = vpop.f32.mrf.mxu0 }
 0x516   : > { %2741 = vrot.lane.b32.xlu0 %v5466_v26, %s4905_s23 }
 0x517   : > { %v1891_v45 = vpop.xlane.xlu2 %1890 }
 0x518   : > { %4760 = vrcp.f32 %v1891_v45  ;;  %v1948_v16 = vand.u32 2147483648, %v1891_v45  ;;  %v1946_v36 = vand.u32 2147483647, %v1891_v45  ;;  %vm1942_vm11 = vweird.f32 %v1891_v45 }
 0x51a   : > { %v1949_v60 = vor.u32 1.1754944e-38, %v1948_v16  ;;  %vm1947_vm13 = vcmp.eq.f32.partialorder %v1946_v36, 8.507059e+37 }
 0x51d   : > { %v2235_v18 = vpop.f32.mrf.mxu0 }
 0x51e   : > { %2796 = vrot.lane.b32.xlu0 %v5342_v25, %s4905_s23  ;;  %v5921_v6 = vadd.f32 %v5916_v31, %v2235_v18  ;;  %v4761_v50 = vpop.eup %4760  ;;  %v5931_v25 = vld [vmem:[%s6805_s10 + $0x28] sm:$0xff] }
 0x51f   : > { %v1894_v12 = vpop.xlane.xlu1 %1893  ;;  %v1938_v26 = vmul.f32 %v4761_v50, %v1891_v45  ;;  %vm1943_vm10 = vweird.f32 %v4761_v50 }
 0x520   : > { %4762 = vrcp.f32 %v1894_v12  ;;  %v2382_v8 = vsel %vm679_vm0, %v5921_v6, -inf  ;;  %vm1944_vm12 = vmor %vm1942_vm11, %vm1943_vm10  ;;  %v1963_v45 = vand.u32 2147483648, %v1894_v12  ;;  %vm1957_vm15 = vweird.f32 %v1894_v12 }
 0x521   : > { %v1939_v19 = vsub.f32 1.0, %v1938_v26  ;;  %2383 = vmax.xlane.f32.xlu1 %v2382_v8  ;;  %4764 = vrcp.f32 %v5923_v42 }
 0x523   : > { %v1940_v61 = vmul.f32 %v4761_v50, %v1939_v19 }
 0x525   : > { %v2238_v41 = vpop.f32.mrf.mxu0  ;;  %v1941_v39 = vadd.f32 %v4761_v50, %v1940_v61 }
 0x526   : > { %v4763_v51 = vpop.eup %4762  ;;  %2839 = vrot.lane.b32.xlu0 %v5392_v46, %s4905_s23  ;;  %v5936_v20 = vadd.f32 %v5931_v25, %v2238_v41  ;;  %v1961_v41 = vand.u32 2147483647, %v1894_v12 }
 0x527   : > { %v1953_v53 = vmul.f32 %v4763_v51, %v1894_v12  ;;  %v1897_v5 = vpop.xlane.xlu1 %1896  ;;  %v1945_v18 = vsel %vm1944_vm12, %v4761_v50, %v1941_v39  ;;  %v4765_v26 = vpop.eup %4764  ;;  %vm1958_vm14 = vweird.f32 %v4763_v51  ;;  %v1964_v39 = vor.u32 1.1754944e-38, %v1963_v45 }
 0x528   : > { %4766 = vrcp.f32 %v1897_v5  ;;  %v1950_v8 = vsel %vm1947_vm13, %v1949_v60, %v1945_v18  ;;  %v2385_v61 = vsel %vm679_vm0, %v5936_v20, -inf  ;;  %v1983_v16 = vmul.f32 %v4765_v26, %v5923_v42  ;;  %vm1959_vm1 = vmor %vm1957_vm15, %vm1958_vm14 }
 0x529   : > { %v1954_v19 = vsub.f32 1.0, %v1953_v53  ;;  %v1951_v7 = vmul.f32 %v5872_v48, %v1950_v8  ;;  %vm1962_vm2 = vcmp.eq.f32.partialorder %v1961_v41, 8.507059e+37  ;;  %v1978_v8 = vand.u32 2147483648, %v1897_v5 }
 0x52a   : > { %v1984_v18 = vsub.f32 1.0, %v1983_v16  ;;  %vm1972_vm4 = vweird.f32 %v1897_v5  ;;  %vm1988_vm7 = vweird.f32 %v4765_v26  ;;  %v1993_v41 = vand.u32 2147483648, %v5923_v42 }
 0x52b   : > { %v1955_v46 = vmul.f32 %v4763_v51, %v1954_v19  ;;  %2386 = vmax.xlane.f32.xlu2 %v2385_v61  ;;  %4377 = vmatmul.msk.f32.vlgmr.msrb.gmra.mxu1 %vm679_vm0, %v1951_v7  ;;  %v1976_v61 = vand.u32 2147483647, %v1897_v5  ;;  %v1979_v12 = vor.u32 1.1754944e-38, %v1978_v8  ;;  %vm1989_vm10 = vmor %vm1987_vm9, %vm1988_vm7 }
 0x52c   : > { %v1985_v27 = vmul.f32 %v4765_v26, %v1984_v18 }
 0x52d   : > { %v1956_v50 = vadd.f32 %v4763_v51, %v1955_v46  ;;  %vm1977_vm6 = vcmp.eq.f32.partialorder %v1976_v61, 8.507059e+37 }
 0x52e   : > { %v4767_v36 = vpop.eup %4766  ;;  %v1986_v46 = vadd.f32 %v4765_v26, %v1985_v27 }
 0x52f   : > { %v1968_v60 = vmul.f32 %v4767_v36, %v1897_v5  ;;  %v1960_v53 = vsel %vm1959_vm1, %v4763_v51, %v1956_v50  ;;  %vm1973_vm3 = vweird.f32 %v4767_v36 }
 0x530   : > { %v1965_v32 = vsel %vm1962_vm2, %v1964_v39, %v1960_v53  ;;  %vm1974_vm5 = vmor %vm1972_vm4, %vm1973_vm3  ;;  %v1990_v27 = vsel %vm1989_vm10, %v4765_v26, %v1986_v46 }
 0x531   : > { %v1969_v14 = vsub.f32 1.0, %v1968_v60  ;;  %v1966_v48 = vmul.f32 %v5879_v2, %v1965_v32  ;;  %v1994_v2 = vor.u32 1.1754944e-38, %v1993_v41 }
 0x533   : > { %v1970_v19 = vmul.f32 %v4767_v36, %v1969_v14  ;;  %4378 = vmatmul.msk.f32.gmra.mxu1 %vm679_vm0, %v1966_v48  ;;  %v1991_v14 = vand.u32 2147483647, %v5923_v42  ;;  %v2244_v42 = vpop.permute.xlu0 %2243 }
 0x535   : > { %v1971_v7 = vadd.f32 %v4767_v36, %v1970_v19  ;;  %vm1992_vm11 = vcmp.eq.f32.partialorder %v1991_v14, 8.507059e+37 }
 0x536   : > { %v1995_v16 = vsel %vm1992_vm11, %v1994_v2, %v1990_v27 }
 0x537   : > { %v1975_v45 = vsel %vm1974_vm5, %v4767_v36, %v1971_v7 }
 0x538   : > { %v1980_v51 = vsel %vm1977_vm6, %v1979_v12, %v1975_v45 }
 0x539   : > { %v1981_v32 = vmul.f32 %v5885_v37, %v1980_v51  ;;  %v1996_v37 = vmul.f32 %v5861_v22, %v1995_v16 }
 0x53a   : > { %4607 = vrot.lane.b32.xlu1 %v5318_v10, %s4906_s26 }
 0x53b   : > { %4379 = vmatmul.msk.f32.vlgmr.msrb.gmra.mxu2 %vm679_vm0, %v1981_v32  ;;  %4395 = vmatmul.msk.f32.vlgmr.msra.gmra.mxu1 %vm1123_vm8, %v5807_v23  ;;  %v4621_v23 = vpack.i.bf16 %v5384_v15, %v5357_v29 }
 0x53f   : > { %v2340_v5 = vpop.permute.xlu1 %2339 }
 0x540   : > { %4406 = vmatpush.xpose.msk.msra.mxu3 %vm1123_vm8, %v2340_v5 }
 0x542   : > { %2749 = vrot.lane.b32.xlu1 %v5331_v21, %s4905_s23  ;;  %v4616_v21 = vpack.i.bf16 %v5389_v43, %v5367_v62 }
 0x543   : > { %4602 = vrot.lane.b32.xlu2 %v5339_v24, %s4906_s26  ;;  %4380 = vmatmul.msk.f32.gmra.mxu2 %vm679_vm0, %v1996_v37 }
 0x544   : > { %4396 = vmatmul.msk.f32.gmra.mxu1 %vm1123_vm8, %v2244_v42 }
 0x54a   : > { %4612 = vrot.lane.b32.xlu1 %v5417_v54, %s4906_s26 }
 0x54b   : > { %4622 = vrot.lane.b32.xlu2 %v4621_v23, %s4906_s26  ;;  %4401 = vmatmul.msk.f32.vlgmr.msra.gmra.mxu2 %vm1123_vm8, %v5796_v56 }
 0x552   : > { %2747 = vrot.lane.b32.xlu1 %v5301_v4, %s4905_s23 }
 0x553   : > { %4627 = vrot.lane.b32.xlu2 %v5503_v33, %s4906_s26  ;;  %4402 = vmatmul.msk.f32.gmra.mxu2 %vm1123_vm8, %v5911_v28 }
 0x55a   : > { %4617 = vrot.lane.b32.xlu1 %v4616_v21, %s4906_s26 }
 0x55b   : > { %2798 = vrot.lane.b32.xlu2 %v5362_v34, %s4905_s23 }
 0x55d   : > { %v1903_v22 = vpop.xlane.xlu2 %1902 }
 0x55e   : > { %4768 = vrcp.f32 %v1903_v22  ;;  %v2008_v50 = vand.u32 2147483648, %v1903_v22  ;;  %v2006_v39 = vand.u32 2147483647, %v1903_v22  ;;  %vm2002_vm13 = vweird.f32 %v1903_v22 }
 0x560   : > { %vm2007_vm15 = vcmp.eq.f32.partialorder %v2006_v39, 8.507059e+37 }
 0x562   : > { %2745 = vrot.lane.b32.xlu1 %v5281_v52, %s4905_s23  ;;  %v2009_v52 = vor.u32 1.1754944e-38, %v2008_v50 }
 0x563   : > { %2845 = vrot.lane.b32.xlu2 %v5389_v43, %s4905_s23 }
 0x564   : > { %v4769_v4 = vpop.eup %4768 }
 0x565   : > { %v1998_v56 = vmul.f32 %v4769_v4, %v1903_v22  ;;  %v1906_v26 = vpop.xlane.xlu0 %1905  ;;  %vm2003_vm12 = vweird.f32 %v4769_v4 }
 0x566   : > { %4770 = vrcp.f32 %v1906_v26  ;;  %vm2004_vm14 = vmor %vm2002_vm13, %vm2003_vm12  ;;  %v2023_v19 = vand.u32 2147483648, %v1906_v26  ;;  %v2021_v7 = vand.u32 2147483647, %v1906_v26  ;;  %vm2017_vm2 = vweird.f32 %v1906_v26 }
 0x567   : > { %v1999_v28 = vsub.f32 1.0, %v1998_v56 }
 0x568   : > { %vm2022_vm4 = vcmp.eq.f32.partialorder %v2021_v7, 8.507059e+37 }
 0x569   : > { %v2000_v36 = vmul.f32 %v4769_v4, %v1999_v28 }
 0x56a   : > { %2794 = vrot.lane.b32.xlu1 %v5367_v62, %s4905_s23 }
 0x56b   : > { %v2001_v34 = vadd.f32 %v4769_v4, %v2000_v36  ;;  %2743 = vrot.lane.b32.xlu2 %v5482_v17, %s4905_s23  ;;  %v2024_v17 = vor.u32 1.1754944e-38, %v2023_v19 }
 0x56c   : > { %v4771_v43 = vpop.eup %4770 }
 0x56d   : > { %v2005_v60 = vsel %vm2004_vm14, %v4769_v4, %v2001_v34  ;;  %v2013_v53 = vmul.f32 %v4771_v43, %v1906_v26  ;;  %vm2018_vm1 = vweird.f32 %v4771_v43 }
 0x56e   : > { %v2010_v18 = vsel %vm2007_vm15, %v2009_v52, %v2005_v60  ;;  %vm2019_vm3 = vmor %vm2017_vm2, %vm2018_vm1 }
 0x56f   : > { %v2014_v48 = vsub.f32 1.0, %v2013_v53  ;;  %v2011_v8 = vmul.f32 %v5891_v0, %v2010_v18 }
 0x571   : > { %v2015_v61 = vmul.f32 %v4771_v43, %v2014_v48  ;;  %4381 = vmatmul.msk.f32.vlgmr.msrb.gmra.mxu3 %vm679_vm0, %v2011_v8 }
 0x572   : > { %2841 = vrot.lane.b32.xlu1 %v5478_v11, %s4905_s23 }
 0x573   : > { %2843 = vrot.lane.b32.xlu2 %v5384_v15, %s4905_s23  ;;  %v2016_v62 = vadd.f32 %v4771_v43, %v2015_v61  ;;  %v2336_v15 = vpop.permute.xlu2 %2335 }
 0x575   : > { %v2020_v12 = vsel %vm2019_vm3, %v4771_v43, %v2016_v62 }
 0x576   : > { %v2025_v45 = vsel %vm2022_vm4, %v2024_v17, %v2020_v12 }
 0x577   : > { %v2026_v0 = vmul.f32 %v5895_v30, %v2025_v45 }
 0x578   : > { %v2338_v11 = vpop.permute.xlu0 %2337 }
 0x579   : > { %4382 = vmatmul.msk.f32.gmra.mxu3 %vm679_vm0, %v2026_v0 }
 0x57a   : > { %4637 = vrot.lane.b32.xlu1 %v5436_v58, %s4906_s26 }
 0x57b   : > { %4632 = vrot.lane.b32.xlu2 %v5452_v63, %s4906_s26 }
 0x580   : > { %v2752_v23 = vpop.permute.xlu0 %2751 }
 0x581   : > { %4407 = vmatmul.msk.f32.vlgmr.msra.gmra.mxu3 %vm1123_vm8, %v2336_v15 }
 0x582   : > { %2892 = vrot.lane.b32.xlu1 %v5407_v44, %s4905_s23 }
 0x583   : > { %2792 = vrot.lane.b32.xlu2 %v5357_v29, %s4905_s23 }
 0x588   : > { %v6043_v8 = vpop.permute.xlu0 %2741 }
 0x589   : > { %4408 = vmatmul.msk.f32.gmra.mxu3 %vm1123_vm8, %v2338_v11 }
 0x58b   : > { %2788 = vrot.lane.b32.xlu2 %v5495_v47, %s4905_s23 }
 0x593   : > { %2835 = vrot.lane.b32.xlu2 %v5523_v49, %s4905_s23 }
 0x594   : > { %v2384_v30 = vpop.xlane.xlu1 %2383 }
 0x595   : > { %v2406_v51 = vsub.f32 %v5921_v6, %v2384_v30 }
 0x597   : > { %v2414_v46 = vmul.f32 1.442695, %v2406_v51 }
 0x599   : > { %4772 = vpow2.f32 %v2414_v46  ;;  %v2797_v46 = vpop.permute.xlu0 %2796 }
 0x59b   : > { %2790 = vrot.lane.b32.xlu2 %v5512_v40, %s4905_s23 }
 0x59e   : > { %v2387_v29 = vpop.xlane.xlu2 %2386 }
 0x59f   : > { %v2407_v44 = vsub.f32 %v5936_v20, %v2387_v29  ;;  %v6014_v41 = vpop.eup %4772 }
 0x5a0   : > { %v2430_v47 = vsel %vm679_vm0, %v6014_v41, 0.0 }
 0x5a1   : > { %v2416_v32 = vmul.f32 1.442695, %v2407_v44  ;;  %2431 = vadd.xlane.f32.xlu0 %v2430_v47 }
 0x5a3   : > { %4774 = vpow2.f32 %v2416_v32 }
 0x5a6   : > { %v4603_v49 = vpop.permute.xlu2 %4602 }
 0x5a7   : > { %v4604_v14 = vunpack.i.l.bf16 %v4603_v49  ;;  %v4605_v6 = vunpack.i.h.bf16 %v4603_v49 }
 0x5a8   : > { %v6020_v2 = vpop.f32.mrf.mxu1 }
 0x5a9   : > { %v6018_v27 = vpop.eup %4774  ;;  %2604 = vmatpush.msra.mxu0 %v4604_v14 }
 0x5aa   : > { %v2433_v40 = vsel %vm679_vm0, %v6018_v27, 0.0 }
 0x5ab   : > { %2605 = vmatpush.msra.mxu0 %v4605_v6 }
 0x5ac   : > { %2434 = vadd.xlane.f32.xlu1 %v2433_v40  ;;  %v4608_v20 = vpop.permute.xlu1 %4607 }
 0x5ad   : > { %v4609_v5 = vunpack.i.l.bf16 %v4608_v20  ;;  %v4610_v37 = vunpack.i.h.bf16 %v4608_v20 }
 0x5ae   : > { %v4623_v16 = vpop.permute.xlu2 %4622 }
 0x5af   : > { %2606 = vmatpush.msra.mxu0 %v4609_v5  ;;  %v4625_v12 = vunpack.i.h.bf16 %v4623_v16  ;;  %v4624_v45 = vunpack.i.l.bf16 %v4623_v16  ;;  %v2840_v16 = vpop.permute.xlu0 %2839 }
 0x5b0   : > { %v6024_v42 = vpop.f32.mrf.mxu1 }
 0x5b1   : > { %2607 = vmatpush.msra.mxu0 %v4610_v37 }
 0x5b3   : > { %4419 = vmatpush.xpose.msk.msrb.mxu0 %vm1123_vm8, %v2752_v23 }
 0x5b4   : > { %v2750_v21 = vpop.permute.xlu1 %2749 }
 0x5b6   : > { %v4628_v22 = vpop.permute.xlu2 %4627 }
 0x5b7   : > { %4420 = vmatpush.xpose.msk.msrb.mxu0 %vm1123_vm8, %v2750_v21  ;;  %v4629_v15 = vunpack.i.l.bf16 %v4628_v22  ;;  %v4630_v30 = vunpack.i.h.bf16 %v4628_v22 }
 0x5b8   : > { %v2282_v4 = vpop.f32.mrf.mxu1 }
 0x5b9   : > { %v6029_v56 = vadd.f32 %v5916_v31, %v2282_v4 }
 0x5bb   : > { %v2388_v26 = vsel %vm679_vm0, %v6029_v56, -inf }
 0x5bc   : > { %2389 = vmax.xlane.f32.xlu0 %v2388_v26  ;;  %v4613_v28 = vpop.permute.xlu1 %4612 }
 0x5bd   : > { %v4614_v50 = vunpack.i.l.bf16 %v4613_v28  ;;  %v4615_v34 = vunpack.i.h.bf16 %v4613_v28 }
 0x5be   : > { %v2799_v36 = vpop.permute.xlu2 %2798  ;;  %v6033_v39 = vpop.f32.mrf.mxu2 }
 0x5bf   : > { %2645 = vmatpush.msrb.mxu1 %v4614_v50 }
 0x5c1   : > { %v2285_v43 = vpop.f32.mrf.mxu1  ;;  %2646 = vmatpush.msrb.mxu1 %v4615_v34 }
 0x5c2   : > { %v6036_v52 = vadd.f32 %v5931_v25, %v2285_v43 }
 0x5c4   : > { %v2391_v60 = vsel %vm679_vm0, %v6036_v52, -inf  ;;  %v2748_v53 = vpop.permute.xlu1 %2747 }
 0x5c5   : > { %2392 = vmax.xlane.f32.xlu2 %v2391_v60  ;;  %4421 = vmatpush.xpose.msk.msrb.mxu0 %vm1123_vm8, %v2748_v53 }
 0x5c6   : > { %v2846_v18 = vpop.permute.xlu2 %2845  ;;  %v6041_v48 = vpop.f32.mrf.mxu2 }
 0x5cc   : > { %v4618_v19 = vpop.permute.xlu1 %4617 }
 0x5cd   : > { %v4620_v61 = vunpack.i.h.bf16 %v4618_v19  ;;  %v4619_v7 = vunpack.i.l.bf16 %v4618_v19 }
 0x5ce   : > { %v6045_v62 = vpop.permute.xlu2 %2743  ;;  %v2329_v17 = vpop.f32.mrf.mxu2 }
 0x5cf   : > { %v6048_v0 = vadd.f32 %v5916_v31, %v2329_v17  ;;  %2647 = vmatpush.msrb.mxu1 %v4619_v7  ;;  %2686 = vmatpush.msrb.mxu2 %v4620_v61 }
 0x5d1   : > { %2648 = vmatpush.msrb.mxu1 %v4624_v45  ;;  %2687 = vmatpush.msrb.mxu2 %v4625_v12  ;;  %v2394_v11 = vsel %vm679_vm0, %v6048_v0, -inf }
 0x5d2   : > { %2395 = vmax.xlane.f32.xlu1 %v2394_v11 }
 0x5d3   : > { %4425 = vmatpush.xpose.msk.msra.mxu1 %vm1123_vm8, %v2799_v36  ;;  %2688 = vmatpush.msrb.mxu2 %v4629_v15 }
 0x5d4   : > { %v2746_v51 = vpop.permute.xlu1 %2745 }
 0x5d5   : > { %2689 = vmatpush.msrb.mxu2 %v4630_v30  ;;  %4422 = vmatpush.xpose.msk.msrb.mxu0 %vm1123_vm8, %v2746_v51 }
 0x5d6   : > { %v2844_v29 = vpop.permute.xlu2 %2843  ;;  %v2332_v44 = vpop.f32.mrf.mxu2 }
 0x5d7   : > { %4426 = vmatpush.xpose.msk.msra.mxu1 %vm1123_vm8, %v2797_v46  ;;  %4431 = vmatpush.xpose.msk.msra.mxu2 %vm1123_vm8, %v2846_v18  ;;  %v6057_v32 = vadd.f32 %v5931_v25, %v2332_v44 }
 0x5d9   : > { %v2397_v47 = vsel %vm679_vm0, %v6057_v32, -inf }
 0x5da   : > { %2398 = vmax.xlane.f32.xlu0 %v2397_v47 }
 0x5db   : > { %4432 = vmatpush.xpose.msk.msra.mxu2 %vm1123_vm8, %v2844_v29 }
 0x5dc   : > { %v2795_v49 = vpop.permute.xlu1 %2794 }
 0x5dd   : > { %4427 = vmatpush.xpose.msk.msra.mxu1 %vm1123_vm8, %v2795_v49 }
 0x5de   : > { %v4633_v14 = vpop.permute.xlu2 %4632 }
 0x5df   : > { %v4634_v6 = vunpack.i.l.bf16 %v4633_v14  ;;  %v4635_v40 = vunpack.i.h.bf16 %v4633_v14 }
 0x5e1   : > { %2727 = vmatpush.msrb.mxu3 %v4634_v6 }
 0x5e3   : > { %2728 = vmatpush.msrb.mxu3 %v4635_v40 }
 0x5e4   : > { %v2842_v20 = vpop.permute.xlu1 %2841 }
 0x5e5   : > { %4433 = vmatpush.xpose.msk.msra.mxu2 %vm1123_vm8, %v2842_v20 }
 0x5e6   : > { %v2793_v5 = vpop.permute.xlu2 %2792 }
 0x5e7   : > { %4428 = vmatpush.xpose.msk.msra.mxu1 %vm1123_vm8, %v2793_v5 }
 0x5e9   : > { %4434 = vmatpush.xpose.msk.msra.mxu2 %vm1123_vm8, %v2840_v16 }
 0x5ec   : > { %v4638_v37 = vpop.permute.xlu1 %4637 }
 0x5ed   : > { %v4639_v23 = vunpack.i.l.bf16 %v4638_v37  ;;  %v4640_v21 = vunpack.i.h.bf16 %v4638_v37 }
 0x5ee   : > { %v6081_v7 = vpop.permute.xlu2 %2788 }
 0x5ef   : > { %2729 = vmatpush.msrb.mxu3 %v4639_v23 }
 0x5f1   : > { %2730 = vmatpush.msrb.mxu3 %v4640_v21 }
 0x5f4   : > { %v6066_v22 = vpop.f32.mrf.mxu3  ;;  %v2893_v4 = vpop.permute.xlu1 %2892 }
 0x5f5   : > { %4437 = vmatpush.xpose.msk.msra.mxu3 %vm1123_vm8, %v2893_v4 }
 0x5f6   : > { %v6089_v44 = vpop.permute.xlu2 %2835 }
 0x5fc   : > { %v6069_v26 = vpop.f32.mrf.mxu3 }
 0x5fe   : > { %v6093_v23 = vpop.permute.xlu2 %2790 }
 0x604   : > { %v2376_v28 = vpop.f32.mrf.mxu3 }
 0x605   : > { %v6072_v50 = vadd.f32 %v5916_v31, %v2376_v28 }
 0x607   : > { %v2400_v36 = vsel %vm679_vm0, %v6072_v50, -inf }
 0x608   : > { %2401 = vmax.xlane.f32.xlu1 %v2400_v36 }
 0x60c   : > { %v2379_v34 = vpop.f32.mrf.mxu3 }
 0x60d   : > { %v6077_v43 = vadd.f32 %v5931_v25, %v2379_v34 }
 0x60f   : > { %v2403_v60 = vsel %vm679_vm0, %v6077_v43, -inf }
 0x610   : > { %2404 = vmax.xlane.f32.xlu2 %v2403_v60 }
 0x614   : > { %v2432_v53 = vpop.xlane.xlu0 %2431 }
 0x615   : > { %4776 = vrcp.f32 %v2432_v53  ;;  %v2465_v31 = vand.u32 2147483648, %v2432_v53  ;;  %v2463_v45 = vand.u32 2147483647, %v2432_v53  ;;  %vm2459_vm6 = vweird.f32 %v2432_v53 }
 0x617   : > { %v2466_v15 = vor.u32 1.1754944e-38, %v2465_v31  ;;  %vm2464_vm9 = vcmp.eq.f32.partialorder %v2463_v45, 8.507059e+37 }
 0x61b   : > { %v4777_v18 = vpop.eup %4776 }
 0x61c   : > { %v2455_v19 = vmul.f32 %v4777_v18, %v2432_v53  ;;  %vm2460_vm5 = vweird.f32 %v4777_v18 }
 0x61d   : > { %vm2461_vm7 = vmor %vm2459_vm6, %vm2460_vm5 }
 0x61e   : > { %v2456_v61 = vsub.f32 1.0, %v2455_v19 }
 0x61f   : > { %v2435_v17 = vpop.xlane.xlu1 %2434 }
 0x620   : > { %v2457_v12 = vmul.f32 %v4777_v18, %v2456_v61  ;;  %4778 = vrcp.f32 %v2435_v17  ;;  %v2478_v14 = vand.u32 2147483647, %v2435_v17  ;;  %vm2474_vm11 = vweird.f32 %v2435_v17 }
 0x621   : > { %2890 = vrot.lane.b32.xlu1 %v5441_v59, %s4905_s23  ;;  %v2480_v59 = vand.u32 2147483648, %v2435_v17 }
 0x622   : > { %v2458_v25 = vadd.f32 %v4777_v18, %v2457_v12  ;;  %vm2479_vm13 = vcmp.eq.f32.partialorder %v2478_v14, 8.507059e+37 }
 0x623   : > { %v2481_v40 = vor.u32 1.1754944e-38, %v2480_v59 }
 0x624   : > { %v2462_v11 = vsel %vm2461_vm7, %v4777_v18, %v2458_v25 }
 0x625   : > { %v2467_v30 = vsel %vm2464_vm9, %v2466_v15, %v2462_v11 }
 0x626   : > { %v4779_v51 = vpop.eup %4778  ;;  %v2468_v46 = vmul.f32 %v6014_v41, %v2467_v30 }
 0x627   : > { %v2470_v29 = vmul.f32 %v4779_v51, %v2435_v17  ;;  %vm2475_vm10 = vweird.f32 %v4779_v51 }
 0x628   : > { %2837 = vrot.lane.b32.xlu2 %v5534_v3, %s4905_s23  ;;  %4409 = vmatmul.msk.f32.vlgmr.msra.gmra.mxu0 %vm679_vm0, %v2468_v46  ;;  %vm2476_vm12 = vmor %vm2474_vm11, %vm2475_vm10 }
 0x629   : > { %v2471_v47 = vsub.f32 1.0, %v2470_v29 }
 0x62b   : > { %v2472_v49 = vmul.f32 %v4779_v51, %v2471_v47 }
 0x62d   : > { %v2473_v6 = vadd.f32 %v4779_v51, %v2472_v49 }
 0x62f   : > { %v2390_v20 = vpop.xlane.xlu0 %2389  ;;  %v2477_v5 = vsel %vm2476_vm12, %v4779_v51, %v2473_v6 }
 0x630   : > { %v2408_v41 = vsub.f32 %v6029_v56, %v2390_v20  ;;  %v2482_v16 = vsel %vm2479_vm13, %v2481_v40, %v2477_v5 }
 0x631   : > { %v2483_v3 = vmul.f32 %v6018_v27, %v2482_v16 }
 0x632   : > { %v2418_v37 = vmul.f32 1.442695, %v2408_v41 }
 0x633   : > { %4410 = vmatmul.msk.f32.gmra.mxu0 %vm679_vm0, %v2483_v3 }
 0x634   : > { %4780 = vpow2.f32 %v2418_v37 }
 0x638   : > { %v2393_v4 = vpop.xlane.xlu2 %2392 }
 0x639   : > { %v2409_v56 = vsub.f32 %v6036_v52, %v2393_v4 }
 0x63a   : > { %v6096_v21 = vpop.eup %4780 }
 0x63b   : > { %4423 = vmatmul.msk.f32.vlgmr.msrb.gmra.mxu0 %vm1123_vm8, %v6043_v8  ;;  %v2436_v28 = vsel %vm679_vm0, %v6096_v21, 0.0  ;;  %v2420_v36 = vmul.f32 1.442695, %v2409_v56 }
 0x63c   : > { %2437 = vadd.xlane.f32.xlu0 %v2436_v28  ;;  %v6156_v28 = vld [vmem:[%s6805_s10 + $0x30] sm:$0xff] }
 0x63d   : > { %4782 = vpow2.f32 %v2420_v36 }
 0x643   : > { %4424 = vmatmul.msk.f32.gmra.mxu0 %vm1123_vm8, %v6045_v62  ;;  %v6106_v53 = vpop.eup %4782 }
 0x644   : > { %v2439_v19 = vsel %vm679_vm0, %v6106_v53, 0.0 }
 0x645   : > { %v2396_v27 = vpop.xlane.xlu1 %2395 }
 0x646   : > { %v2410_v34 = vsub.f32 %v6048_v0, %v2396_v27 }
 0x648   : > { %v2422_v60 = vmul.f32 1.442695, %v2410_v34 }
 0x64a   : > { %4784 = vpow2.f32 %v2422_v60 }
 0x64d   : > { %v2399_v18 = vpop.xlane.xlu0 %2398 }
 0x64e   : > { %v2411_v8 = vsub.f32 %v6057_v32, %v2399_v18 }
 0x650   : > { %v6111_v61 = vpop.eup %4784  ;;  %v2424_v52 = vmul.f32 1.442695, %v2411_v8 }
 0x651   : > { %2440 = vadd.xlane.f32.xlu2 %v2439_v19  ;;  %v2442_v62 = vsel %vm679_vm0, %v6111_v61, 0.0 }
 0x652   : > { %4786 = vpow2.f32 %v2424_v52  ;;  %2443 = vadd.xlane.f32.xlu0 %v2442_v62 }
 0x658   : > { %v6115_v0 = vpop.eup %4786 }
 0x659   : > { %v2445_v31 = vsel %vm679_vm0, %v6115_v0, 0.0 }
 0x65a   : > { %2446 = vadd.xlane.f32.xlu0 %v2445_v31 }
 0x669   : > { %2882 = vrot.lane.b32.xlu2 %v5543_v13, %s4905_s23 }
 0x66e   : > { %2888 = vrot.lane.b32.xlu0 %v5423_v55, %s4905_s23 }
 0x67b   : > { %v2402_v32 = vpop.xlane.xlu1 %2401 }
 0x67c   : > { %v2412_v17 = vsub.f32 %v6072_v50, %v2402_v32 }
 0x67e   : > { %v2426_v12 = vmul.f32 1.442695, %v2412_v17 }
 0x680   : > { %4788 = vpow2.f32 %v2426_v12 }
 0x683   : > { %v2405_v45 = vpop.xlane.xlu2 %2404 }
 0x684   : > { %v2413_v15 = vsub.f32 %v6077_v43, %v2405_v45 }
 0x686   : > { %v6124_v25 = vpop.eup %4788  ;;  %v2428_v30 = vmul.f32 1.442695, %v2413_v15 }
 0x687   : > { %v2448_v11 = vsel %vm679_vm0, %v6124_v25, 0.0 }
 0x688   : > { %2449 = vadd.xlane.f32.xlu1 %v2448_v11  ;;  %4790 = vpow2.f32 %v2428_v30 }
 0x68b   : > { %v6142_v6 = vpop.permute.xlu2 %2837 }
 0x68e   : > { %v6130_v55 = vpop.eup %4790 }
 0x68f   : > { %v2451_v50 = vsel %vm679_vm0, %v6130_v55, 0.0 }
 0x693   : > { %v2891_v13 = vpop.permute.xlu1 %2890 }
 0x694   : > { %4438 = vmatpush.xpose.msk.msra.mxu3 %vm1123_vm8, %v2891_v13 }
 0x698   : > { %2452 = vadd.xlane.f32.xlu0 %v2451_v50 }
 0x6a1   : > { %2886 = vrot.lane.b32.xlu1 %v5432_v57, %s4905_s23 }
 0x6a5   : > { %v6136_v51 = vpop.f32.mrf.mxu0 }
 0x6ac   : > { %2884 = vrot.lane.b32.xlu0 %v5563_v1, %s4905_s23  ;;  %v6147_v1 = vld [vmem:[%s6805_s10 + $0x38] sm:$0xff] }
 0x6af   : > { %v2438_v43 = vpop.xlane.xlu0 %2437 }
 0x6b0   : > { %4792 = vrcp.f32 %v2438_v43  ;;  %v6140_v46 = vpop.f32.mrf.mxu0  ;;  %v2495_v14 = vand.u32 2147483648, %v2438_v43  ;;  %v2493_v20 = vand.u32 2147483647, %v2438_v43  ;;  %vm2489_vm15 = vweird.f32 %v2438_v43 }
 0x6b2   : > { %v2496_v5 = vor.u32 1.1754944e-38, %v2495_v14  ;;  %vm2494_vm2 = vcmp.eq.f32.partialorder %v2493_v20, 8.507059e+37 }
 0x6b6   : > { %v4793_v29 = vpop.eup %4792 }
 0x6b7   : > { %v2485_v47 = vmul.f32 %v4793_v29, %v2438_v43  ;;  %vm2490_vm14 = vweird.f32 %v4793_v29 }
 0x6b8   : > { %v2782_v59 = vpop.f32.mrf.mxu0  ;;  %vm2491_vm1 = vmor %vm2489_vm15, %vm2490_vm14 }
 0x6b9   : > { %v2486_v49 = vsub.f32 1.0, %v2485_v47  ;;  %v6162_v27 = vadd.f32 %v6156_v28, %v2782_v59 }
 0x6bb   : > { %v2487_v40 = vmul.f32 %v4793_v29, %v2486_v49 }
 0x6bd   : > { %v2488_v57 = vadd.f32 %v4793_v29, %v2487_v40 }
 0x6bf   : > { %v2492_v41 = vsel %vm2491_vm1, %v4793_v29, %v2488_v57 }
 0x6c0   : > { %v2497_v16 = vsel %vm2494_vm2, %v2496_v5, %v2492_v41  ;;  %v2785_v3 = vpop.f32.mrf.mxu0 }
 0x6c1   : > { %v6150_v37 = vadd.f32 %v6147_v1, %v2785_v3  ;;  %v2498_v4 = vmul.f32 %v6096_v21, %v2497_v16  ;;  %v2929_v21 = vsel %vm679_vm0, %v6162_v27, -inf }
 0x6c3   : > { %4411 = vmatmul.msk.f32.vlgmr.msrb.gmra.mxu1 %vm679_vm0, %v2498_v4  ;;  %v2932_v36 = vsel %vm679_vm0, %v6150_v37, -inf }
 0x6c4   : > { %v2441_v56 = vpop.xlane.xlu2 %2440  ;;  %2933 = vmax.xlane.f32.xlu2 %v2932_v36 }
 0x6c5   : > { %4794 = vrcp.f32 %v2441_v56  ;;  %v2444_v34 = vpop.xlane.xlu0 %2443  ;;  %v2510_v31 = vand.u32 2147483648, %v2441_v56  ;;  %v2508_v12 = vand.u32 2147483647, %v2441_v56  ;;  %vm2504_vm4 = vweird.f32 %v2441_v56 }
 0x6c6   : > { %4796 = vrcp.f32 %v2444_v34  ;;  %v2525_v45 = vand.u32 2147483648, %v2444_v34  ;;  %v2523_v11 = vand.u32 2147483647, %v2444_v34  ;;  %vm2519_vm7 = vweird.f32 %v2444_v34 }
 0x6c7   : > { %v2511_v13 = vor.u32 1.1754944e-38, %v2510_v31  ;;  %vm2509_vm9 = vcmp.eq.f32.partialorder %v2508_v12, 8.507059e+37 }
 0x6c8   : > { %v2526_v47 = vor.u32 1.1754944e-38, %v2525_v45  ;;  %vm2524_vm11 = vcmp.eq.f32.partialorder %v2523_v11, 8.507059e+37 }
 0x6cb   : > { %v4795_v60 = vpop.eup %4794  ;;  %2930 = vmax.xlane.f32.xlu1 %v2929_v21 }
 0x6cc   : > { %v2500_v18 = vmul.f32 %v4795_v60, %v2441_v56  ;;  %v4797_v8 = vpop.eup %4796  ;;  %vm2505_vm3 = vweird.f32 %v4795_v60 }
 0x6cd   : > { %v2515_v52 = vmul.f32 %v4797_v8, %v2444_v34  ;;  %v2447_v62 = vpop.xlane.xlu0 %2446  ;;  %vm2520_vm5 = vweird.f32 %v4797_v8  ;;  %vm2506_vm6 = vmor %vm2504_vm4, %vm2505_vm3 }
 0x6ce   : > { %v2501_v19 = vsub.f32 1.0, %v2500_v18  ;;  %4798 = vrcp.f32 %v2447_v62  ;;  %vm2521_vm10 = vmor %vm2519_vm7, %vm2520_vm5  ;;  %v2540_v41 = vand.u32 2147483648, %v2447_v62  ;;  %v2538_v3 = vand.u32 2147483647, %v2447_v62 }
 0x6cf   : > { %v2516_v17 = vsub.f32 1.0, %v2515_v52  ;;  %vm2534_vm13 = vweird.f32 %v2447_v62 }
 0x6d0   : > { %v2502_v32 = vmul.f32 %v4795_v60, %v2501_v19  ;;  %v2541_v56 = vor.u32 1.1754944e-38, %v2540_v41  ;;  %vm2539_vm15 = vcmp.eq.f32.partialorder %v2538_v3, 8.507059e+37 }
 0x6d1   : > { %v2517_v15 = vmul.f32 %v4797_v8, %v2516_v17 }
 0x6d2   : > { %v2503_v30 = vadd.f32 %v4795_v60, %v2502_v32 }
 0x6d3   : > { %v2518_v50 = vadd.f32 %v4797_v8, %v2517_v15 }
 0x6d4   : > { %v2507_v43 = vsel %vm2506_vm6, %v4795_v60, %v2503_v30  ;;  %v4799_v29 = vpop.eup %4798 }
 0x6d5   : > { %v2512_v59 = vsel %vm2509_vm9, %v2511_v13, %v2507_v43  ;;  %v2522_v49 = vsel %vm2521_vm10, %v4797_v8, %v2518_v50  ;;  %v2530_v14 = vmul.f32 %v4799_v29, %v2447_v62  ;;  %vm2535_vm12 = vweird.f32 %v4799_v29 }
 0x6d6   : > { %v2513_v40 = vmul.f32 %v6106_v53, %v2512_v59  ;;  %v2527_v20 = vsel %vm2524_vm11, %v2526_v47, %v2522_v49  ;;  %vm2536_vm14 = vmor %vm2534_vm13, %vm2535_vm12 }
 0x6d7   : > { %v2531_v57 = vsub.f32 1.0, %v2530_v14  ;;  %v2528_v5 = vmul.f32 %v6111_v61, %v2527_v20 }
 0x6d8   : > { %4412 = vmatmul.msk.f32.gmra.mxu1 %vm679_vm0, %v2513_v40 }
 0x6d9   : > { %v2532_v16 = vmul.f32 %v4799_v29, %v2531_v57  ;;  %4413 = vmatmul.msk.f32.vlgmr.msrb.gmra.mxu2 %vm679_vm0, %v2528_v5 }
 0x6db   : > { %v2533_v4 = vadd.f32 %v4799_v29, %v2532_v16 }
 0x6dc   : > { %4642 = vrot.lane.b32.xlu2 %v5339_v24, %s4907_s29 }
 0x6dd   : > { %v2537_v53 = vsel %vm2536_vm14, %v4799_v29, %v2533_v4  ;;  %v2883_v29 = vpop.permute.xlu2 %2882 }
 0x6de   : > { %v2542_v36 = vsel %vm2539_vm15, %v2541_v56, %v2537_v53 }
 0x6df   : > { %v2543_v61 = vmul.f32 %v6115_v0, %v2542_v36 }
 0x6e0   : > { %4429 = vmatmul.msk.f32.vlgmr.msra.gmra.mxu1 %vm1123_vm8, %v6081_v7  ;;  %v2889_v34 = vpop.permute.xlu0 %2888 }
 0x6e1   : > { %4414 = vmatmul.msk.f32.gmra.mxu2 %vm679_vm0, %v2543_v61  ;;  %4439 = vmatpush.xpose.msk.msra.mxu3 %vm1123_vm8, %v2889_v34 }
 0x6e8   : > { %4430 = vmatmul.msk.f32.gmra.mxu1 %vm1123_vm8, %v6093_v23 }
 0x6e9   : > { %4435 = vmatmul.msk.f32.vlgmr.msra.gmra.mxu2 %vm1123_vm8, %v6089_v44 }
 0x6f1   : > { %4436 = vmatmul.msk.f32.gmra.mxu2 %vm1123_vm8, %v6142_v6 }
 0x6fb   : > { %v2450_v24 = vpop.xlane.xlu1 %2449 }
 0x6fc   : > { %4800 = vrcp.f32 %v2450_v24  ;;  %v2555_v0 = vand.u32 2147483648, %v2450_v24  ;;  %v2553_v8 = vand.u32 2147483647, %v2450_v24  ;;  %vm2549_vm2 = vweird.f32 %v2450_v24 }
 0x6fe   : > { %v2556_v52 = vor.u32 1.1754944e-38, %v2555_v0  ;;  %vm2554_vm4 = vcmp.eq.f32.partialorder %v2553_v8, 8.507059e+37 }
 0x702   : > { %v4801_v21 = vpop.eup %4800 }
 0x703   : > { %v2545_v7 = vmul.f32 %v4801_v21, %v2450_v24  ;;  %vm2550_vm1 = vweird.f32 %v4801_v21 }
 0x704   : > { %vm2551_vm3 = vmor %vm2549_vm2, %vm2550_vm1 }
 0x705   : > { %v2546_v60 = vsub.f32 1.0, %v2545_v7 }
 0x707   : > { %v2547_v18 = vmul.f32 %v4801_v21, %v2546_v60 }
 0x709   : > { %v2548_v19 = vadd.f32 %v4801_v21, %v2547_v18 }
 0x70b   : > { %v2552_v23 = vsel %vm2551_vm3, %v4801_v21, %v2548_v19  ;;  %v2453_v44 = vpop.xlane.xlu0 %2452 }
 0x70c   : > { %v2557_v62 = vsel %vm2554_vm4, %v2556_v52, %v2552_v23  ;;  %4802 = vrcp.f32 %v2453_v44  ;;  %v2570_v45 = vand.u32 2147483648, %v2453_v44  ;;  %v2568_v11 = vand.u32 2147483647, %v2453_v44 }
 0x70d   : > { %v2558_v6 = vmul.f32 %v6124_v25, %v2557_v62  ;;  %vm2564_vm6 = vweird.f32 %v2453_v44  ;;  %v6837_v62 = vld [vmem:[#allocation4_spill] sm:$0xff] }
 0x70e   : > { %v2571_v13 = vor.u32 1.1754944e-38, %v2570_v45  ;;  %vm2569_vm9 = vcmp.eq.f32.partialorder %v2568_v11, 8.507059e+37  ;;  %v6838_v11 = vld [vmem:[#allocation5_spill] sm:$0xff] }
 0x70f   : > { %4415 = vmatmul.msk.f32.vlgmr.msrb.gmra.mxu3 %vm679_vm0, %v2558_v6 }
 0x712   : > { %v4803_v31 = vpop.eup %4802 }
 0x713   : > { %v2887_v32 = vpop.permute.xlu1 %2886  ;;  %v2560_v17 = vmul.f32 %v4803_v31, %v2453_v44  ;;  %vm2565_vm5 = vweird.f32 %v4803_v31 }
 0x714   : > { %4440 = vmatpush.xpose.msk.msra.mxu3 %vm1123_vm8, %v2887_v32  ;;  %vm2566_vm7 = vmor %vm2564_vm6, %vm2565_vm5 }
 0x715   : > { %v2561_v12 = vsub.f32 1.0, %v2560_v17 }
 0x717   : > { %v2562_v15 = vmul.f32 %v4803_v31, %v2561_v12 }
 0x719   : > { %v2563_v30 = vadd.f32 %v4803_v31, %v2562_v15 }
 0x71b   : > { %v2567_v50 = vsel %vm2566_vm7, %v4803_v31, %v2563_v30 }
 0x71c   : > { %v2572_v43 = vsel %vm2569_vm9, %v2571_v13, %v2567_v50 }
 0x71d   : > { %v2573_v25 = vmul.f32 %v6130_v55, %v2572_v43 }
 0x71e   : > { %v2885_v47 = vpop.permute.xlu0 %2884 }
 0x71f   : > { %4416 = vmatmul.msk.f32.gmra.mxu3 %vm679_vm0, %v2573_v25 }
 0x727   : > { %4441 = vmatmul.msk.f32.vlgmr.msra.gmra.mxu3 %vm1123_vm8, %v2883_v29 }
 0x72f   : > { %4442 = vmatmul.msk.f32.gmra.mxu3 %vm1123_vm8, %v2885_v47 }
 0x737   : > { %v2934_v59 = vpop.xlane.xlu2 %2933 }
 0x738   : > { %v2954_v49 = vsub.f32 %v6150_v37, %v2934_v59 }
 0x73a   : > { %v2963_v14 = vmul.f32 1.442695, %v2954_v49 }
 0x73c   : > { %4804 = vpow2.f32 %v2963_v14 }
 0x73e   : > { %v2931_v40 = vpop.xlane.xlu1 %2930 }
 0x73f   : > { %v2953_v20 = vsub.f32 %v6162_v27, %v2931_v40  ;;  %v4643_v57 = vpop.permute.xlu2 %4642 }
 0x740   : > { %v4644_v41 = vunpack.i.l.bf16 %v4643_v57  ;;  %v4645_v16 = vunpack.i.h.bf16 %v4643_v57  ;;  %v6200_v27 = vpop.f32.mrf.mxu1 }
 0x741   : > { %v2961_v5 = vmul.f32 1.442695, %v2953_v20 }
 0x742   : > { %v6192_v55 = vpop.eup %4804  ;;  %3151 = vmatpush.msra.mxu0 %v4644_v41 }
 0x743   : > { %4806 = vpow2.f32 %v2961_v5  ;;  %v2980_v3 = vsel %vm679_vm0, %v6192_v55, 0.0 }
 0x744   : > { %3152 = vmatpush.msra.mxu0 %v4645_v16  ;;  %2981 = vadd.xlane.f32.xlu1 %v2980_v3 }
 0x749   : > { %v6196_v4 = vpop.eup %4806 }
 0x74a   : > { %v2977_v37 = vsel %vm679_vm0, %v6196_v4, 0.0 }
 0x74b   : > { %2978 = vadd.xlane.f32.xlu0 %v2977_v37 }
 0x755   : > { %v6202_v56 = vpop.f32.mrf.mxu1 }
 0x75c   : > { %v6204_v53 = vpop.f32.mrf.mxu2 }
 0x75d   : > { %v2829_v36 = vpop.f32.mrf.mxu1 }
 0x75e   : > { %v2830_v61 = vadd.f32 %v6156_v28, %v2829_v36 }
 0x760   : > { %v2935_v34 = vsel %vm679_vm0, %v2830_v61, -inf }
 0x761   : > { %2936 = vmax.xlane.f32.xlu0 %v2935_v34 }
 0x764   : > { %v6208_v24 = vpop.f32.mrf.mxu2 }
 0x765   : > { %v2832_v21 = vpop.f32.mrf.mxu1 }
 0x766   : > { %v2833_v7 = vadd.f32 %v6147_v1, %v2832_v21 }
 0x768   : > { %v2938_v60 = vsel %vm679_vm0, %v2833_v7, -inf }
 0x769   : > { %2939 = vmax.xlane.f32.xlu1 %v2938_v60 }
 0x76c   : > { %v2876_v0 = vpop.f32.mrf.mxu2 }
 0x76d   : > { %v2877_v18 = vadd.f32 %v6156_v28, %v2876_v0 }
 0x76f   : > { %v2941_v8 = vsel %vm679_vm0, %v2877_v18, -inf }
 0x770   : > { %2942 = vmax.xlane.f32.xlu2 %v2941_v8 }
 0x774   : > { %v2879_v19 = vpop.f32.mrf.mxu2 }
 0x775   : > { %v2880_v52 = vadd.f32 %v6147_v1, %v2879_v19 }
 0x777   : > { %v2944_v23 = vsel %vm679_vm0, %v2880_v52, -inf }
 0x778   : > { %2945 = vmax.xlane.f32.xlu0 %v2944_v23 }
 0x788   : > { %4652 = vrot.lane.b32.xlu2 %v5417_v54, %s4907_s29 }
 0x78c   : > { %4657 = vrot.lane.b32.xlu0 %v6837_v62, %s4907_s29 }
 0x792   : > { %v6220_v44 = vpop.f32.mrf.mxu3 }
 0x7a2   : > { %v6222_v6 = vpop.f32.mrf.mxu3 }
 0x7aa   : > { %v2923_v31 = vpop.f32.mrf.mxu3 }
 0x7ab   : > { %v2924_v32 = vadd.f32 %v6156_v28, %v2923_v31 }
 0x7ad   : > { %v2947_v17 = vsel %vm679_vm0, %v2924_v32, -inf }
 0x7ae   : > { %2948 = vmax.xlane.f32.xlu1 %v2947_v17 }
 0x7b2   : > { %v2926_v12 = vpop.f32.mrf.mxu3 }
 0x7b3   : > { %v2927_v45 = vadd.f32 %v6147_v1, %v2926_v12 }
 0x7b5   : > { %v2950_v15 = vsel %vm679_vm0, %v2927_v45, -inf }
 0x7b6   : > { %2951 = vmax.xlane.f32.xlu2 %v2950_v15 }
 0x7b7   : > { %v6234_v30 = vpop.xlane.xlu1 %2981 }
 0x7b8   : > { %vm3021_vm15 = vweird.f32 %v6234_v30 }
 0x7be   : > { %v6230_v54 = vpop.xlane.xlu0 %2978 }
 0x7bf   : > { %vm3006_vm11 = vweird.f32 %v6230_v54 }
 0x7c7   : > { %4647 = vrot.lane.b32.xlu1 %v5318_v10, %s4907_s29 }
 0x7ce   : > { %4662 = vrot.lane.b32.xlu2 %v6838_v11, %s4907_s29 }
 0x7d4   : > { %v2937_v28 = vpop.xlane.xlu0 %2936 }
 0x7d5   : > { %v2955_v13 = vsub.f32 %v2830_v61, %v2937_v28 }
 0x7d7   : > { %v2965_v50 = vmul.f32 1.442695, %v2955_v13 }
 0x7d9   : > { %4808 = vpow2.f32 %v2965_v50 }
 0x7dc   : > { %v2940_v43 = vpop.xlane.xlu1 %2939 }
 0x7dd   : > { %v2956_v25 = vsub.f32 %v2833_v7, %v2940_v43 }
 0x7df   : > { %v6236_v1 = vpop.eup %4808  ;;  %v2967_v29 = vmul.f32 1.442695, %v2956_v25  ;;  %v3010_v25 = vand.u32 2147483647, %v6230_v54 }
 0x7e0   : > { %v2983_v47 = vsel %vm679_vm0, %v6236_v1, 0.0 }
 0x7e1   : > { %4810 = vpow2.f32 %v2967_v29  ;;  %2984 = vadd.xlane.f32.xlu0 %v2983_v47  ;;  %vm3011_vm13 = vcmp.eq.f32.partialorder %v3010_v25, 8.507059e+37 }
 0x7e3   : > { %v2943_v10 = vpop.xlane.xlu2 %2942 }
 0x7e4   : > { %v2957_v59 = vsub.f32 %v2877_v18, %v2943_v10 }
 0x7e6   : > { %v2969_v14 = vmul.f32 1.442695, %v2957_v59 }
 0x7e7   : > { %v6240_v49 = vpop.eup %4810 }
 0x7e8   : > { %v2986_v40 = vsel %vm679_vm0, %v6240_v49, 0.0  ;;  %4812 = vpow2.f32 %v2969_v14 }
 0x7e9   : > { %2987 = vadd.xlane.f32.xlu0 %v2986_v40 }
 0x7eb   : > { %v4653_v20 = vpop.permute.xlu2 %4652  ;;  %v2946_v57 = vpop.xlane.xlu0 %2945 }
 0x7ec   : > { %v4654_v5 = vunpack.i.l.bf16 %v4653_v20  ;;  %v2958_v41 = vsub.f32 %v2880_v52, %v2946_v57  ;;  %v4655_v3 = vunpack.i.h.bf16 %v4653_v20 }
 0x7ee   : > { %v6244_v16 = vpop.eup %4812  ;;  %v2971_v37 = vmul.f32 1.442695, %v2958_v41  ;;  %3192 = vmatpush.msrb.mxu1 %v4654_v5  ;;  %v3027_v5 = vand.u32 2147483648, %v6234_v30 }
 0x7ef   : > { %v2989_v36 = vsel %vm679_vm0, %v6244_v16, 0.0 }
 0x7f0   : > { %4814 = vpow2.f32 %v2971_v37  ;;  %3193 = vmatpush.msrb.mxu1 %v4655_v3  ;;  %v3025_v3 = vand.u32 2147483647, %v6234_v30 }
 0x7f1   : > { %2990 = vadd.xlane.f32.xlu0 %v2989_v36  ;;  %4816 = vrcp.f32 %v6230_v54  ;;  %v3028_v36 = vor.u32 1.1754944e-38, %v3027_v5 }
 0x7f2   : > { %4818 = vrcp.f32 %v6234_v30  ;;  %vm3026_vm2 = vcmp.eq.f32.partialorder %v3025_v3, 8.507059e+37 }
 0x7f6   : > { %v6248_v61 = vpop.eup %4814 }
 0x7f7   : > { %v2992_v34 = vsel %vm679_vm0, %v6248_v61, 0.0  ;;  %v4817_v8 = vpop.eup %4816 }
 0x7f8   : > { %2993 = vadd.xlane.f32.xlu1 %v2992_v34  ;;  %v3002_v52 = vmul.f32 %v4817_v8, %v6230_v54  ;;  %v4819_v62 = vpop.eup %4818  ;;  %vm3007_vm10 = vweird.f32 %v4817_v8 }
 0x7f9   : > { %vm3008_vm12 = vmor %vm3006_vm11, %vm3007_vm10  ;;  %vm3022_vm14 = vweird.f32 %v4819_v62 }
 0x7fa   : > { %v3003_v31 = vsub.f32 1.0, %v3002_v52  ;;  %vm3023_vm1 = vmor %vm3021_vm15, %vm3022_vm14 }
 0x7fc   : > { %v3004_v12 = vmul.f32 %v4817_v8, %v3003_v31 }
 0x7fe   : > { %v4658_v21 = vpop.permute.xlu0 %4657  ;;  %v3005_v13 = vadd.f32 %v4817_v8, %v3004_v12 }
 0x7ff   : > { %v4659_v7 = vunpack.i.l.bf16 %v4658_v21  ;;  %v4660_v60 = vunpack.i.h.bf16 %v4658_v21 }
 0x800   : > { %v3009_v10 = vsel %vm3008_vm12, %v4817_v8, %v3005_v13 }
 0x801   : > { %3194 = vmatpush.msrb.mxu1 %v4659_v7 }
 0x803   : > { %3195 = vmatpush.msrb.mxu1 %v4660_v60 }
 0x805   : > { %4667 = vrot.lane.b32.xlu0 %v5503_v33, %s4907_s29 }
 0x811   : > { %4672 = vrot.lane.b32.xlu1 %v5452_v63, %s4907_s29 }
 0x819   : > { %3325 = vrot.lane.b32.xlu1 %v6136_v51, %s4908_s19 }
 0x821   : > { %v2949_v0 = vpop.xlane.xlu1 %2948 }
 0x822   : > { %v2959_v18 = vsub.f32 %v2924_v32, %v2949_v0  ;;  %v3017_v32 = vmul.f32 %v4819_v62, %v6234_v30 }
 0x824   : > { %v2973_v19 = vmul.f32 1.442695, %v2959_v18  ;;  %v3018_v28 = vsub.f32 1.0, %v3017_v32 }
 0x826   : > { %4820 = vpow2.f32 %v2973_v19  ;;  %v3019_v47 = vmul.f32 %v4819_v62, %v3018_v28 }
 0x828   : > { %v3020_v57 = vadd.f32 %v4819_v62, %v3019_v47 }
 0x829   : > { %v2952_v23 = vpop.xlane.xlu2 %2951 }
 0x82a   : > { %v2960_v33 = vsub.f32 %v2927_v45, %v2952_v23  ;;  %v3012_v45 = vand.u32 2147483648, %v6230_v54  ;;  %v3024_v37 = vsel %vm3023_vm1, %v4819_v62, %v3020_v57 }
 0x82b   : > { %v3029_v34 = vsel %vm3026_vm2, %v3028_v36, %v3024_v37 }
 0x82c   : > { %v6261_v63 = vpop.eup %4820  ;;  %v2975_v17 = vmul.f32 1.442695, %v2960_v33  ;;  %v3013_v59 = vor.u32 1.1754944e-38, %v3012_v45  ;;  %v3030_v21 = vmul.f32 %v6192_v55, %v3029_v34 }
 0x82d   : > { %v2995_v51 = vsel %vm679_vm0, %v6261_v63, 0.0 }
 0x82e   : > { %4822 = vpow2.f32 %v2975_v17  ;;  %2996 = vadd.xlane.f32.xlu2 %v2995_v51  ;;  %v3014_v40 = vsel %vm3011_vm13, %v3013_v59, %v3009_v10 }
 0x82f   : > { %v3015_v54 = vmul.f32 %v6196_v4, %v3014_v40 }
 0x831   : > { %v4663_v15 = vpop.permute.xlu2 %4662 }
 0x832   : > { %v4664_v11 = vunpack.i.l.bf16 %v4663_v15  ;;  %v4665_v43 = vunpack.i.h.bf16 %v4663_v15 }
 0x834   : > { %v6266_v50 = vpop.eup %4822  ;;  %3233 = vmatpush.msrb.mxu2 %v4664_v11 }
 0x835   : > { %v2998_v29 = vsel %vm679_vm0, %v6266_v50, 0.0 }
 0x836   : > { %3234 = vmatpush.msrb.mxu2 %v4665_v43  ;;  %2999 = vadd.xlane.f32.xlu0 %v2998_v29 }
 0x839   : > { %v4648_v14 = vpop.permute.xlu1 %4647 }
 0x83a   : > { %v4649_v20 = vunpack.i.l.bf16 %v4648_v14  ;;  %v4650_v41 = vunpack.i.h.bf16 %v4648_v14 }
 0x83c   : > { %3153 = vmatpush.msra.mxu0 %v4649_v20 }
 0x83e   : > { %3154 = vmatpush.msra.mxu0 %v4650_v41 }
 0x83f   : > { %4443 = vmatmul.msk.f32.vlgmr.msra.gmra.mxu0 %vm679_vm0, %v3015_v54 }
 0x846   : > { %4677 = vrot.lane.b32.xlu2 %v5436_v58, %s4907_s29 }
 0x847   : > { %4444 = vmatmul.msk.f32.gmra.mxu0 %vm679_vm0, %v3030_v21 }
 0x84a   : > { %3293 = vrot.lane.b32.xlu0 %v5903_v9, %s4909_s24 }
 0x84e   : > { %3295 = vrot.lane.b32.xlu2 %v5907_v35, %s4909_s24 }
 0x852   : > { %3297 = vrot.lane.b32.xlu0 %v6020_v2, %s4909_s24 }
 0x854   : > { %v2985_v4 = vpop.xlane.xlu0 %2984 }
 0x855   : > { %4824 = vrcp.f32 %v2985_v4  ;;  %v3042_v60 = vand.u32 2147483648, %v2985_v4  ;;  %v3040_v9 = vand.u32 2147483647, %v2985_v4  ;;  %vm3036_vm4 = vweird.f32 %v2985_v4 }
 0x857   : > { %v3043_v8 = vor.u32 1.1754944e-38, %v3042_v60  ;;  %vm3041_vm6 = vcmp.eq.f32.partialorder %v3040_v9, 8.507059e+37 }
 0x85a   : > { %3299 = vrot.lane.b32.xlu0 %v6024_v42, %s4909_s24 }
 0x85b   : > { %v4825_v30 = vpop.eup %4824 }
 0x85c   : > { %v3032_v55 = vmul.f32 %v4825_v30, %v2985_v4  ;;  %v2988_v58 = vpop.xlane.xlu0 %2987  ;;  %vm3037_vm3 = vweird.f32 %v4825_v30 }
 0x85d   : > { %4826 = vrcp.f32 %v2988_v58  ;;  %vm3038_vm5 = vmor %vm3036_vm4, %vm3037_vm3  ;;  %v3057_v62 = vand.u32 2147483648, %v2988_v58  ;;  %v3055_v17 = vand.u32 2147483647, %v2988_v58  ;;  %vm3051_vm9 = vweird.f32 %v2988_v58 }
 0x85e   : > { %v3033_v7 = vsub.f32 1.0, %v3032_v55 }
 0x85f   : > { %v3058_v12 = vor.u32 1.1754944e-38, %v3057_v62  ;;  %vm3056_vm11 = vcmp.eq.f32.partialorder %v3055_v17, 8.507059e+37 }
 0x860   : > { %v3034_v0 = vmul.f32 %v4825_v30, %v3033_v7 }
 0x862   : > { %v3035_v18 = vadd.f32 %v4825_v30, %v3034_v0  ;;  %3301 = vrot.lane.b32.xlu0 %v6033_v39, %s4909_s24 }
 0x863   : > { %v4827_v35 = vpop.eup %4826 }
 0x864   : > { %v3039_v2 = vsel %vm3038_vm5, %v4825_v30, %v3035_v18  ;;  %v3047_v19 = vmul.f32 %v4827_v35, %v2988_v58  ;;  %v2991_v42 = vpop.xlane.xlu0 %2990  ;;  %vm3052_vm7 = vweird.f32 %v4827_v35 }
 0x865   : > { %v3044_v52 = vsel %vm3041_vm6, %v3043_v8, %v3039_v2  ;;  %4828 = vrcp.f32 %v2991_v42  ;;  %vm3053_vm10 = vmor %vm3051_vm9, %vm3052_vm7  ;;  %v3072_v25 = vand.u32 2147483648, %v2991_v42  ;;  %vm3066_vm13 = vweird.f32 %v2991_v42 }
 0x866   : > { %v3048_v23 = vsub.f32 1.0, %v3047_v19  ;;  %v3045_v33 = vmul.f32 %v6236_v1, %v3044_v52  ;;  %v3070_v47 = vand.u32 2147483647, %v2991_v42 }
 0x867   : > { %v3073_v59 = vor.u32 1.1754944e-38, %v3072_v25 }
 0x868   : > { %v3049_v31 = vmul.f32 %v4827_v35, %v3048_v23  ;;  %4445 = vmatmul.msk.f32.vlgmr.msrb.gmra.mxu1 %vm679_vm0, %v3045_v33  ;;  %vm3071_vm15 = vcmp.eq.f32.partialorder %v3070_v47, 8.507059e+37 }
 0x86a   : > { %v3050_v51 = vadd.f32 %v4827_v35, %v3049_v31  ;;  %3303 = vrot.lane.b32.xlu0 %v6041_v48, %s4909_s24 }
 0x86b   : > { %v4829_v32 = vpop.eup %4828  ;;  %v2994_v15 = vpop.xlane.xlu1 %2993 }
 0x86c   : > { %v3062_v39 = vmul.f32 %v4829_v32, %v2991_v42  ;;  %v3054_v11 = vsel %vm3053_vm10, %v4827_v35, %v3050_v51  ;;  %4830 = vrcp.f32 %v2994_v15  ;;  %vm3067_vm12 = vweird.f32 %v4829_v32 }
 0x86d   : > { %v3059_v1 = vsel %vm3056_vm11, %v3058_v12, %v3054_v11  ;;  %vm3068_vm14 = vmor %vm3066_vm13, %vm3067_vm12  ;;  %v3087_v5 = vand.u32 2147483648, %v2994_v15  ;;  %vm3081_vm2 = vweird.f32 %v2994_v15  ;;  %v3085_v3 = vand.u32 2147483647, %v2994_v15 }
 0x86e   : > { %v3063_v28 = vsub.f32 1.0, %v3062_v39  ;;  %v3060_v13 = vmul.f32 %v6240_v49, %v3059_v1 }
 0x86f   : > { %v3088_v36 = vor.u32 1.1754944e-38, %v3087_v5  ;;  %vm3086_vm4 = vcmp.eq.f32.partialorder %v3085_v3, 8.507059e+37  ;;  %v6840_v5 = vld [vmem:[#allocation9_spill] sm:$0xff] }
 0x870   : > { %v3064_v45 = vmul.f32 %v4829_v32, %v3063_v28  ;;  %4446 = vmatmul.msk.f32.gmra.mxu1 %vm679_vm0, %v3060_v13 }
 0x872   : > { %v3065_v43 = vadd.f32 %v4829_v32, %v3064_v45  ;;  %v4831_v29 = vpop.eup %4830  ;;  %3305 = vrot.lane.b32.xlu0 %v6066_v22, %s4909_s24 }
 0x873   : > { %v3077_v48 = vmul.f32 %v4831_v29, %v2994_v15  ;;  %vm3082_vm1 = vweird.f32 %v4831_v29 }
 0x874   : > { %v3069_v10 = vsel %vm3068_vm14, %v4829_v32, %v3065_v43  ;;  %vm3083_vm3 = vmor %vm3081_vm2, %vm3082_vm1  ;;  %vm3389_vm14 = vcmask 130048  }
 0x875   : > { %v3078_v14 = vsub.f32 1.0, %v3077_v48  ;;  %v3074_v49 = vsel %vm3071_vm15, %v3073_v59, %v3069_v10  ;;  %vm3398_vm15 = vcmask 195584   ;;  %v6839_v10 = vld [vmem:[#allocation6_spill] sm:$0xff] }
 0x876   : > { %v3075_v22 = vmul.f32 %v6244_v16, %v3074_v49 }
 0x877   : > { %v4668_v40 = vpop.permute.xlu0 %4667  ;;  %v3079_v20 = vmul.f32 %v4831_v29, %v3078_v14 }
 0x878   : > { %v4669_v57 = vunpack.i.l.bf16 %v4668_v40  ;;  %v4670_v41 = vunpack.i.h.bf16 %v4668_v40 }
 0x879   : > { %v3080_v54 = vadd.f32 %v4831_v29, %v3079_v20 }
 0x87a   : > { %3235 = vmatpush.msrb.mxu2 %v4669_v57  ;;  %3307 = vrot.lane.b32.xlu0 %v6069_v26, %s4909_s24 }
 0x87b   : > { %v3084_v37 = vsel %vm3083_vm3, %v4831_v29, %v3080_v54 }
 0x87c   : > { %3236 = vmatpush.msrb.mxu2 %v4670_v41  ;;  %v3089_v34 = vsel %vm3086_vm4, %v3088_v36, %v3084_v37 }
 0x87d   : > { %4447 = vmatmul.msk.f32.vlgmr.msrb.gmra.mxu2 %vm679_vm0, %v3075_v22  ;;  %v3090_v21 = vmul.f32 %v6248_v61, %v3089_v34 }
 0x883   : > { %v4673_v4 = vpop.permute.xlu1 %4672 }
 0x884   : > { %v4674_v30 = vunpack.i.l.bf16 %v4673_v4  ;;  %v4675_v55 = vunpack.i.h.bf16 %v4673_v4 }
 0x885   : > { %4448 = vmatmul.msk.f32.gmra.mxu2 %vm679_vm0, %v3090_v21  ;;  %v6841_v21 = vld [vmem:[#allocation10_spill] sm:$0xff] }
 0x886   : > { %3274 = vmatpush.msrb.mxu3 %v4674_v30 }
 0x888   : > { %3275 = vmatpush.msrb.mxu3 %v4675_v55 }
 0x8a1   : > { %v2997_v26 = vpop.xlane.xlu2 %2996 }
 0x8a2   : > { %4832 = vrcp.f32 %v2997_v26  ;;  %v3102_v18 = vand.u32 2147483648, %v2997_v26  ;;  %v3100_v61 = vand.u32 2147483647, %v2997_v26  ;;  %vm3096_vm6 = vweird.f32 %v2997_v26 }
 0x8a4   : > { %v3103_v42 = vor.u32 1.1754944e-38, %v3102_v18  ;;  %vm3101_vm9 = vcmp.eq.f32.partialorder %v3100_v61, 8.507059e+37 }
 0x8a8   : > { %v4833_v16 = vpop.eup %4832 }
 0x8a9   : > { %v3092_v58 = vmul.f32 %v4833_v16, %v2997_v26  ;;  %v3000_v7 = vpop.xlane.xlu0 %2999  ;;  %v4678_v60 = vpop.permute.xlu2 %4677  ;;  %vm3097_vm5 = vweird.f32 %v4833_v16 }
 0x8aa   : > { %4834 = vrcp.f32 %v3000_v7  ;;  %v4679_v9 = vunpack.i.l.bf16 %v4678_v60  ;;  %v4680_v8 = vunpack.i.h.bf16 %v4678_v60  ;;  %vm3098_vm7 = vmor %vm3096_vm6, %vm3097_vm5  ;;  %v3117_v17 = vand.u32 2147483648, %v3000_v7  ;;  %v6842_v60 = vld [vmem:[#allocation7_spill] sm:$0xff] }
 0x8ab   : > { %v3093_v0 = vsub.f32 1.0, %v3092_v58  ;;  %v3115_v32 = vand.u32 2147483647, %v3000_v7  ;;  %vm3111_vm11 = vweird.f32 %v3000_v7 }
 0x8ac   : > { %3276 = vmatpush.msrb.mxu3 %v4679_v9  ;;  %v3118_v39 = vor.u32 1.1754944e-38, %v3117_v17 }
 0x8ad   : > { %v3094_v35 = vmul.f32 %v4833_v16, %v3093_v0  ;;  %vm3116_vm13 = vcmp.eq.f32.partialorder %v3115_v32, 8.507059e+37 }
 0x8ae   : > { %3277 = vmatpush.msrb.mxu3 %v4680_v8 }
 0x8af   : > { %v3095_v2 = vadd.f32 %v4833_v16, %v3094_v35 }
 0x8b0   : > { %v4835_v19 = vpop.eup %4834 }
 0x8b1   : > { %v3099_v52 = vsel %vm3098_vm7, %v4833_v16, %v3095_v2  ;;  %v3107_v23 = vmul.f32 %v4835_v19, %v3000_v7  ;;  %vm3112_vm10 = vweird.f32 %v4835_v19  ;;  %v3296_v25 = vpop.permute.xlu2 %3295  ;;  %v6843_v2 = vld [vmem:[#allocation8_spill] sm:$0xff] }
 0x8b2   : > { %v3104_v33 = vsel %vm3101_vm9, %v3103_v42, %v3099_v52  ;;  %vm3113_vm12 = vmor %vm3111_vm11, %vm3112_vm10  ;;  %v3382_v59 = vsel %vm1123_vm8, %v6839_v10, %v3296_v25 }
 0x8b3   : > { %v3105_v62 = vmul.f32 %v6261_v63, %v3104_v33  ;;  %v3108_v31 = vsub.f32 1.0, %v3107_v23 }
 0x8b5   : > { %v3109_v51 = vmul.f32 %v4835_v19, %v3108_v31  ;;  %4449 = vmatmul.msk.f32.vlgmr.msrb.gmra.mxu3 %vm679_vm0, %v3105_v62  ;;  %v6844_v31 = vld [vmem:[#allocation11_spill] sm:$0xff] }
 0x8b7   : > { %v3110_v12 = vadd.f32 %v4835_v19, %v3109_v51 }
 0x8b9   : > { %v3114_v15 = vsel %vm3113_vm12, %v4835_v19, %v3110_v12 }
 0x8ba   : > { %v3119_v11 = vsel %vm3116_vm13, %v3118_v39, %v3114_v15 }
 0x8bb   : > { %v3120_v1 = vmul.f32 %v6266_v50, %v3119_v11  ;;  %v6845_v11 = vld [vmem:[#allocation12_spill] sm:$0xff] }
 0x8bc   : > { %v3156_v28 = vpop.f32.mrf.mxu0  ;;  %v3294_v45 = vpop.permute.xlu0 %3293 }
 0x8bd   : > { %4450 = vmatmul.msk.f32.gmra.mxu3 %vm679_vm0, %v3120_v1  ;;  %3357 = vrot.lane.b32.xlu1 %v3156_v28, %s4910_s20  ;;  %v3381_v43 = vsel %vm1123_vm8, %v5779_v38, %v3294_v45 }
 0x8c4   : > { %v3159_v63 = vpop.f32.mrf.mxu0  ;;  %v3298_v57 = vpop.permute.xlu0 %3297 }
 0x8c5   : > { %3327 = vrot.lane.b32.xlu1 %v6140_v46, %s4908_s19  ;;  %3359 = vrot.lane.b32.xlu2 %v3159_v63, %s4910_s20  ;;  %v3383_v41 = vsel %vm1123_vm8, %v6840_v5, %v3298_v57  ;;  %v4872_v5 = vld [vmem:[%s5065_s21 + $0x20] sm:$0xff] }
 0x8cc   : > { %v3300_v34 = vpop.permute.xlu0 %3299 }
 0x8cd   : > { %3329 = vrot.lane.b32.xlu1 %v6200_v27, %s4908_s19  ;;  %v3410_v27 = vld [vmem:[%s6803_s8 + $0x18] sm:$0xff]  ;;  %v3384_v4 = vsel %vm1123_vm8, %v6841_v21, %v3300_v34 }
 0x8ce   : > { %3447 = vmatpush.msrb.mxu0 %v3410_v27  ;;  %v4868_v27 = vld [vmem:[%s5065_s21] sm:$0xff] }
 0x8d4   : > { %v3302_v58 = vpop.permute.xlu0 %3301 }
 0x8d5   : > { %3331 = vrot.lane.b32.xlu1 %v6202_v56, %s4908_s19  ;;  %v3409_v56 = vld [vmem:[%s6803_s8 + $0x10] sm:$0xff]  ;;  %v3385_v0 = vsel %vm1123_vm8, %v6842_v60, %v3302_v58 }
 0x8d6   : > { %3448 = vmatpush.msrb.mxu0 %v3409_v56 }
 0x8dc   : > { %v3304_v61 = vpop.permute.xlu0 %3303 }
 0x8dd   : > { %3333 = vrot.lane.b32.xlu1 %v6204_v53, %s4908_s19  ;;  %v3408_v53 = vld [vmem:[%s6803_s8 + $0x8] sm:$0xff]  ;;  %v3386_v19 = vsel %vm1123_vm8, %v6843_v2, %v3304_v61 }
 0x8de   : > { %3449 = vmatpush.msrb.mxu0 %v3408_v53 }
 0x8e4   : > { %v3306_v33 = vpop.permute.xlu0 %3305 }
 0x8e5   : > { %v3197_v50 = vpop.f32.mrf.mxu1  ;;  %3335 = vrot.lane.b32.xlu1 %v6208_v24, %s4908_s19  ;;  %v3387_v17 = vsel %vm1123_vm8, %v6844_v31, %v3306_v33 }
 0x8e6   : > { %3361 = vrot.lane.b32.xlu2 %v3197_v50, %s4910_s20 }
 0x8ec   : > { %v3308_v39 = vpop.permute.xlu0 %3307 }
 0x8ed   : > { %v3200_v13 = vpop.f32.mrf.mxu1  ;;  %3337 = vrot.lane.b32.xlu1 %v6220_v44, %s4908_s19  ;;  %v3407_v44 = vld [vmem:[%s6803_s8] sm:$0xff]  ;;  %v3388_v1 = vsel %vm1123_vm8, %v6845_v11, %v3308_v39 }
 0x8ee   : > { %3363 = vrot.lane.b32.xlu2 %v3200_v13, %s4910_s20  ;;  %3450 = vmatpush.msrb.mxu0 %v3407_v44  ;;  %v4685_v13 = vld [vmem:[%s6804_s9] ss:$0 sm:$0xff] }
 0x8f5   : > { %3339 = vrot.lane.b32.xlu1 %v6222_v6, %s4908_s19  ;;  %v3326_v6 = vpop.permute.xlu1 %3325 }
 0x8f6   : > { %v3390_v29 = vsel %vm3389_vm14, %v3381_v43, %v3326_v6  ;;  %v4869_v6 = vld [vmem:[%s5065_s21 + $0x8] sm:$0xff] }
 0x900   : > { %v3238_v46 = vpop.f32.mrf.mxu2 }
 0x901   : > { %3365 = vrot.lane.b32.xlu2 %v3238_v46, %s4910_s20 }
 0x908   : > { %v3241_v24 = vpop.f32.mrf.mxu2 }
 0x909   : > { %3367 = vrot.lane.b32.xlu2 %v3241_v24, %s4910_s20 }
 0x91f   : > { %v3360_v14 = vpop.permute.xlu2 %3359 }
 0x92f   : > { %v3358_v47 = vpop.permute.xlu1 %3357 }
 0x930   : > { %v3399_v48 = vsel %vm3398_vm15, %v3390_v29, %v3358_v47  ;;  %v4870_v47 = vld [vmem:[%s5065_s21 + $0x10] sm:$0xff] }
 0x931   : > { %4451 = vmatmul.msk.f32.vlgmr.msrb.gmra.mxu0 %vm679_vm0, %v3399_v48 }
 0x937   : > { %v3328_v40 = vpop.permute.xlu1 %3327 }
 0x938   : > { %v3391_v49 = vsel %vm3389_vm14, %v3382_v59, %v3328_v40  ;;  %v3279_v20 = vpop.f32.mrf.mxu3  ;;  %v4871_v40 = vld [vmem:[%s5065_s21 + $0x18] sm:$0xff] }
 0x939   : > { %3369 = vrot.lane.b32.xlu2 %v3279_v20, %s4910_s20  ;;  %v3400_v38 = vsel %vm3398_vm15, %v3391_v49, %v3360_v14 }
 0x93a   : > { %4452 = vmatmul.msk.f32.gmra.mxu0 %vm679_vm0, %v3400_v38 }
 0x93f   : > { %v3330_v54 = vpop.permute.xlu1 %3329 }
 0x940   : > { %v3362_v22 = vpop.permute.xlu2 %3361  ;;  %v3392_v3 = vsel %vm3389_vm14, %v3383_v41, %v3330_v54  ;;  %v3282_v37 = vpop.f32.mrf.mxu3 }
 0x941   : > { %3371 = vrot.lane.b32.xlu2 %v3282_v37, %s4910_s20  ;;  %v3401_v36 = vsel %vm3398_vm15, %v3392_v3, %v3362_v22  ;;  %v4873_v37 = vld [vmem:[%s5065_s21 + $0x28] sm:$0xff] }
 0x942   : > { %4453 = vmatmul.msk.f32.gmra.mxu0 %vm679_vm0, %v3401_v36 }
 0x947   : > { %v3332_v30 = vpop.permute.xlu1 %3331 }
 0x948   : > { %v3364_v55 = vpop.permute.xlu2 %3363  ;;  %v3393_v26 = vsel %vm3389_vm14, %v3384_v4, %v3332_v30  ;;  %v4874_v30 = vld [vmem:[%s5065_s21 + $0x30] sm:$0xff] }
 0x949   : > { %v3402_v16 = vsel %vm3398_vm15, %v3393_v26, %v3364_v55 }
 0x94a   : > { %4454 = vmatmul.msk.f32.gmra.mxu0 %vm679_vm0, %v3402_v16 }
 0x94f   : > { %v3334_v7 = vpop.permute.xlu1 %3333 }
 0x950   : > { %v3394_v9 = vsel %vm3389_vm14, %v3385_v0, %v3334_v7  ;;  %v6846_v7 = vld [vmem:[#allocation3_spill] sm:$0xff] }
 0x957   : > { %v3336_v8 = vpop.permute.xlu1 %3335 }
 0x958   : > { %v3395_v42 = vsel %vm3389_vm14, %v3386_v19, %v3336_v8 }
 0x95b   : > { %v3366_v18 = vpop.permute.xlu2 %3365 }
 0x95c   : > { %v3403_v35 = vsel %vm3398_vm15, %v3394_v9, %v3366_v18 }
 0x95d   : > { %4455 = vmatmul.msk.f32.gmra.mxu0 %vm679_vm0, %v3403_v35  ;;  %v4875_v35 = vld [vmem:[%s5065_s21 + $0x38] sm:$0xff]  ;;  %s667_s21 = scalar_lea.vmem %s6812_s17, %s4282_s18 }
 0x95f   : > { %v3338_v62 = vpop.permute.xlu1 %3337 }
 0x960   : > { %v3396_v51 = vsel %vm3389_vm14, %v3387_v17, %v3338_v62 }
 0x963   : > { %v3368_v52 = vpop.permute.xlu2 %3367 }
 0x964   : > { %v3404_v23 = vsel %vm3398_vm15, %v3395_v42, %v3368_v52 }
 0x965   : > { %4456 = vmatmul.msk.f32.gmra.mxu0 %vm679_vm0, %v3404_v23 }
 0x967   : > { %v3340_v15 = vpop.permute.xlu1 %3339 }
 0x968   : > { %v3397_v28 = vsel %vm3389_vm14, %v3388_v1, %v3340_v15 }
 0x993   : > { %v3370_v32 = vpop.permute.xlu2 %3369 }
 0x994   : > { %v3405_v12 = vsel %vm3398_vm15, %v3396_v51, %v3370_v32 }
 0x995   : > { %4457 = vmatmul.msk.f32.gmra.mxu0 %vm679_vm0, %v3405_v12 }
 0x99b   : > { %v3372_v63 = vpop.permute.xlu2 %3371 }
 0x99c   : > { %v3406_v50 = vsel %vm3398_vm15, %v3397_v28, %v3372_v63 }
 0x99d   : > { %4458 = vmatmul.msk.f32.gmra.mxu0 %vm679_vm0, %v3406_v50 }
 0x9ae   : > { %v3452_v46 = vpop.f32.mrf.mxu0 }
 0x9af   : > { %v3476_v56 = vadd.f32 %v4868_v27, %v3452_v46 }
 0x9b1   : > { %v6388_v53 = vadd.f32 %v4685_v13, %v3476_v56 }
 0x9b3   : > { %v3498_v24 = vsel %vm679_vm0, %v6388_v53, 0.0 }
 0x9b4   : > { %3499 = vadd.xlane.f32.xlu0 %v3498_v24 }
 0x9b7   : > { %v3455_v44 = vpop.f32.mrf.mxu0 }
 0x9b8   : > { %v3477_v45 = vadd.f32 %v4869_v6, %v3455_v44 }
 0x9ba   : > { %v6393_v43 = vadd.f32 %v4685_v13, %v3477_v45 }
 0x9bc   : > { %v3501_v25 = vsel %vm679_vm0, %v6393_v43, 0.0 }
 0x9bd   : > { %3502 = vadd.xlane.f32.xlu1 %v3501_v25 }
 0x9bf   : > { %v3458_v29 = vpop.f32.mrf.mxu0 }
 0x9c0   : > { %v3478_v48 = vadd.f32 %v4870_v47, %v3458_v29 }
 0x9c2   : > { %v6398_v10 = vadd.f32 %v4685_v13, %v3478_v48 }
 0x9c4   : > { %v3504_v59 = vsel %vm679_vm0, %v6398_v10, 0.0 }
 0x9c5   : > { %3505 = vadd.xlane.f32.xlu2 %v3504_v59 }
 0x9c7   : > { %v3461_v14 = vpop.f32.mrf.mxu0 }
 0x9c8   : > { %v3479_v49 = vadd.f32 %v4871_v40, %v3461_v14  ;;  %v3699_v14 = vld [vmem:[%s6808_s13 + $0x18] sm:$0xff]  ;;  %v3698_v40 = vld [vmem:[%s6808_s13 + $0x10] sm:$0xff] }
 0x9c9   : > { %3740 = vmatpush.msra.mxu1 %v3699_v14 }
 0x9ca   : > { %v6403_v20 = vadd.f32 %v4685_v13, %v3479_v49  ;;  %v3697_v49 = vld [vmem:[%s6808_s13 + $0x8] sm:$0xff] }
 0x9cb   : > { %3741 = vmatpush.msra.mxu1 %v3698_v40 }
 0x9cc   : > { %v3507_v38 = vsel %vm679_vm0, %v6403_v20, 0.0 }
 0x9cd   : > { %3508 = vadd.xlane.f32.xlu0 %v3507_v38  ;;  %3742 = vmatpush.msra.mxu1 %v3697_v49  ;;  %v3696_v38 = vld [vmem:[%s6808_s13] sm:$0xff] }
 0x9cf   : > { %3743 = vmatpush.msra.mxu1 %v3696_v38 }
 0x9da   : > { %v3464_v57 = vpop.f32.mrf.mxu0 }
 0x9db   : > { %v3480_v41 = vadd.f32 %v4872_v5, %v3464_v57 }
 0x9dd   : > { %v6408_v54 = vadd.f32 %v4685_v13, %v3480_v41 }
 0x9df   : > { %v3510_v22 = vsel %vm679_vm0, %v6408_v54, 0.0 }
 0x9e0   : > { %3511 = vadd.xlane.f32.xlu1 %v3510_v22 }
 0x9e2   : > { %v3467_v3 = vpop.f32.mrf.mxu0 }
 0x9e3   : > { %v3481_v36 = vadd.f32 %v4873_v37, %v3467_v3 }
 0x9e5   : > { %v6413_v34 = vadd.f32 %v4685_v13, %v3481_v36 }
 0x9e7   : > { %v3513_v21 = vsel %vm679_vm0, %v6413_v34, 0.0 }
 0x9e8   : > { %3514 = vadd.xlane.f32.xlu2 %v3513_v21 }
 0xa12   : > { %v3470_v4 = vpop.f32.mrf.mxu0 }
 0xa13   : > { %v3482_v55 = vadd.f32 %v4874_v30, %v3470_v4 }
 0xa15   : > { %v6418_v26 = vadd.f32 %v4685_v13, %v3482_v55 }
 0xa17   : > { %v3516_v16 = vsel %vm679_vm0, %v6418_v26, 0.0 }
 0xa18   : > { %3517 = vadd.xlane.f32.xlu1 %v3516_v16 }
 0xa1a   : > { %v3473_v9 = vpop.f32.mrf.mxu0 }
 0xa1b   : > { %v3483_v61 = vadd.f32 %v4875_v35, %v3473_v9 }
 0xa1d   : > { %v6431_v42 = vadd.f32 %v4685_v13, %v3483_v61 }
 0xa1f   : > { %v3519_v33 = vsel %vm679_vm0, %v6431_v42, 0.0 }
 0xa27   : > { %v3500_v58 = vpop.xlane.xlu0 %3499 }
 0xa28   : > { %v3522_v60 = vmul.f32 %v3500_v58, %v6846_v7 }
 0xa2a   : > { %v6424_v0 = vsub.f32 %v6388_v53, %v3522_v60 }
 0xa2c   : > { %v3538_v18 = vmul.f32 %v6424_v0, %v6424_v0 }
 0xa2e   : > { %v3546_v8 = vsel %vm679_vm0, %v3538_v18, 0.0 }
 0xa2f   : > { %3547 = vadd.xlane.f32.xlu0 %v3546_v8 }
 0xa30   : > { %v3503_v2 = vpop.xlane.xlu1 %3502 }
 0xa31   : > { %v3523_v19 = vmul.f32 %v3503_v2, %v6846_v7 }
 0xa33   : > { %v6434_v52 = vsub.f32 %v6393_v43, %v3523_v19 }
 0xa35   : > { %v3539_v23 = vmul.f32 %v6434_v52, %v6434_v52 }
 0xa37   : > { %3520 = vadd.xlane.f32.xlu0 %v3519_v33  ;;  %v3549_v62 = vsel %vm679_vm0, %v3539_v23, 0.0  ;;  %v6501_v23 = vld [vmem:[%s6806_s11] ss:$0 sm:$0xff] }
 0xa38   : > { %v3506_v31 = vpop.xlane.xlu2 %3505  ;;  %3550 = vadd.xlane.f32.xlu2 %v3549_v62 }
 0xa39   : > { %v3524_v17 = vmul.f32 %v3506_v31, %v6846_v7 }
 0xa3b   : > { %v6443_v51 = vsub.f32 %v6398_v10, %v3524_v17 }
 0xa3d   : > { %v3540_v32 = vmul.f32 %v6443_v51, %v6443_v51 }
 0xa3f   : > { %v3552_v12 = vsel %vm679_vm0, %v3540_v32, 0.0  ;;  %v6507_v32 = vld [vmem:[%s6807_s12] ss:$0 sm:$0xff] }
 0xa40   : > { %v3509_v39 = vpop.xlane.xlu0 %3508  ;;  %3553 = vadd.xlane.f32.xlu1 %v3552_v12 }
 0xa41   : > { %v3525_v15 = vmul.f32 %v3509_v39, %v6846_v7 }
 0xa43   : > { %v6450_v11 = vsub.f32 %v6403_v20, %v3525_v15 }
 0xa45   : > { %v3541_v1 = vmul.f32 %v6450_v11, %v6450_v11 }
 0xa47   : > { %v3555_v28 = vsel %vm679_vm0, %v3541_v1, 0.0 }
 0xa48   : > { %3556 = vadd.xlane.f32.xlu2 %v3555_v28 }
 0xa53   : > { %v3512_v63 = vpop.xlane.xlu1 %3511 }
 0xa54   : > { %v3526_v50 = vmul.f32 %v3512_v63, %v6846_v7 }
 0xa56   : > { %v6457_v13 = vsub.f32 %v6408_v54, %v3526_v50 }
 0xa58   : > { %v3542_v46 = vmul.f32 %v6457_v13, %v6457_v13 }
 0xa5a   : > { %v3558_v27 = vsel %vm679_vm0, %v3542_v46, 0.0 }
 0xa5b   : > { %v3515_v56 = vpop.xlane.xlu2 %3514  ;;  %3559 = vadd.xlane.f32.xlu0 %v3558_v27 }
 0xa5c   : > { %v3527_v24 = vmul.f32 %v3515_v56, %v6846_v7 }
 0xa5e   : > { %v6464_v44 = vsub.f32 %v6413_v34, %v3527_v24 }
 0xa60   : > { %v3543_v6 = vmul.f32 %v6464_v44, %v6464_v44 }
 0xa62   : > { %v3561_v45 = vsel %vm679_vm0, %v3543_v6, 0.0 }
 0xa63   : > { %3562 = vadd.xlane.f32.xlu1 %v3561_v45 }
 0xa8b   : > { %v3518_v25 = vpop.xlane.xlu1 %3517 }
 0xa8c   : > { %v3528_v29 = vmul.f32 %v3518_v25, %v6846_v7 }
 0xa8e   : > { %v6471_v47 = vsub.f32 %v6418_v26, %v3528_v29 }
 0xa90   : > { %v3544_v48 = vmul.f32 %v6471_v47, %v6471_v47 }
 0xa92   : > { %v3564_v59 = vsel %vm679_vm0, %v3544_v48, 0.0 }
 0xa93   : > { %3565 = vadd.xlane.f32.xlu2 %v3564_v59 }
 0xaa2   : > { %v3548_v57 = vpop.xlane.xlu0 %3547 }
 0xaa3   : > { %v3570_v5 = vmul.f32 %v3548_v57, %v6846_v7 }
 0xaa5   : > { %v3578_v41 = vadd.f32 1e-05, %v3570_v5 }
 0xaa7   : > { %4836 = vrsqrt.f32 %v3578_v41  ;;  %vm3592_vm1 = vweird.f32 %v3578_v41 }
 0xaaa   : > { %v3521_v22 = vpop.xlane.xlu0 %3520 }
 0xaab   : > { %v3529_v3 = vmul.f32 %v3521_v22, %v6846_v7  ;;  %v3551_v37 = vpop.xlane.xlu2 %3550 }
 0xaac   : > { %v3571_v36 = vmul.f32 %v3551_v37, %v6846_v7 }
 0xaad   : > { %v4837_v21 = vpop.eup %4836  ;;  %v6492_v4 = vsub.f32 %v6431_v42, %v3529_v3 }
 0xaae   : > { %v3587_v30 = vmul.f32 %v4837_v21, %v3578_v41  ;;  %v3579_v55 = vadd.f32 1e-05, %v3571_v36  ;;  %vm3593_vm8 = vweird.f32 %v4837_v21 }
 0xaaf   : > { %v3545_v16 = vmul.f32 %v6492_v4, %v6492_v4  ;;  %vm3594_vm2 = vmor %vm3592_vm1, %vm3593_vm8 }
 0xab0   : > { %v3588_v58 = vmul.f32 %v4837_v21, %v3587_v30  ;;  %4838 = vrsqrt.f32 %v3579_v55  ;;  %vm3602_vm4 = vweird.f32 %v3579_v55 }
 0xab1   : > { %v3567_v60 = vsel %vm679_vm0, %v3545_v16, 0.0 }
 0xab2   : > { %v3589_v9 = vmul.f32 0.5, %v3588_v58  ;;  %3568 = vadd.xlane.f32.xlu0 %v3567_v60 }
 0xab3   : > { %v3554_v18 = vpop.xlane.xlu1 %3553 }
 0xab4   : > { %v3590_v35 = vsub.f32 1.5, %v3589_v9  ;;  %v3572_v61 = vmul.f32 %v3554_v18, %v6846_v7 }
 0xab6   : > { %v4839_v8 = vpop.eup %4838  ;;  %v3591_v2 = vmul.f32 %v4837_v21, %v3590_v35  ;;  %v3580_v19 = vadd.f32 1e-05, %v3572_v61 }
 0xab7   : > { %v3597_v33 = vmul.f32 %v4839_v8, %v3579_v55  ;;  %vm3603_vm3 = vweird.f32 %v4839_v8 }
 0xab8   : > { %v3595_v62 = vsel %vm3594_vm2, %v4837_v21, %v3591_v2  ;;  %4840 = vrsqrt.f32 %v3580_v19  ;;  %vm3604_vm5 = vmor %vm3602_vm4, %vm3603_vm3  ;;  %vm3612_vm7 = vweird.f32 %v3580_v19 }
 0xab9   : > { %v3666_v31 = vmul.f32 %v3595_v62, %v6424_v0  ;;  %v3598_v17 = vmul.f32 %v4839_v8, %v3597_v33 }
 0xabb   : > { %v3677_v12 = vmul.f32 %v6501_v23, %v3666_v31  ;;  %v3599_v39 = vmul.f32 0.5, %v3598_v17  ;;  %v3557_v15 = vpop.xlane.xlu2 %3556 }
 0xabc   : > { %v3573_v1 = vmul.f32 %v3557_v15, %v6846_v7 }
 0xabd   : > { %v3600_v28 = vsub.f32 1.5, %v3599_v39  ;;  %v3688_v63 = vadd.f32 %v6507_v32, %v3677_v12 }
 0xabe   : > { %v4841_v50 = vpop.eup %4840  ;;  %v3581_v46 = vadd.f32 1e-05, %v3573_v1 }
 0xabf   : > { %v3601_v27 = vmul.f32 %v4839_v8, %v3600_v28  ;;  %v3607_v0 = vmul.f32 %v4841_v50, %v3580_v19  ;;  %4459 = vmatmul.msk.f32.vlgmr.msra.gmra.mxu1 %vm679_vm0, %v3688_v63  ;;  %vm3613_vm6 = vweird.f32 %v4841_v50 }
 0xac0   : > { %4842 = vrsqrt.f32 %v3581_v46  ;;  %vm3614_vm9 = vmor %vm3612_vm7, %vm3613_vm6  ;;  %vm3622_vm11 = vweird.f32 %v3581_v46 }
 0xac1   : > { %v3605_v56 = vsel %vm3604_vm5, %v4839_v8, %v3601_v27  ;;  %v3608_v24 = vmul.f32 %v4841_v50, %v3607_v0 }
 0xac2   : > { %v3667_v6 = vmul.f32 %v3605_v56, %v6434_v52 }
 0xac3   : > { %v3609_v45 = vmul.f32 0.5, %v3608_v24 }
 0xac4   : > { %v3678_v25 = vmul.f32 %v6501_v23, %v3667_v6 }
 0xac5   : > { %v3610_v29 = vsub.f32 1.5, %v3609_v45 }
 0xac6   : > { %v4843_v48 = vpop.eup %4842  ;;  %v3689_v59 = vadd.f32 %v6507_v32, %v3678_v25 }
 0xac7   : > { %v3611_v14 = vmul.f32 %v4841_v50, %v3610_v29  ;;  %v3617_v40 = vmul.f32 %v4843_v48, %v3581_v46  ;;  %vm3623_vm10 = vweird.f32 %v4843_v48 }
 0xac8   : > { %4460 = vmatmul.msk.f32.gmra.mxu1 %vm679_vm0, %v3689_v59  ;;  %vm3624_vm12 = vmor %vm3622_vm11, %vm3623_vm10 }
 0xac9   : > { %v3615_v49 = vsel %vm3614_vm9, %v4841_v50, %v3611_v14  ;;  %v3618_v38 = vmul.f32 %v4843_v48, %v3617_v40 }
 0xaca   : > { %v3668_v57 = vmul.f32 %v3615_v49, %v6443_v51 }
 0xacb   : > { %v3619_v5 = vmul.f32 0.5, %v3618_v38 }
 0xacc   : > { %v3679_v52 = vmul.f32 %v6501_v23, %v3668_v57 }
 0xacd   : > { %v3620_v41 = vsub.f32 1.5, %v3619_v5 }
 0xace   : > { %v3560_v22 = vpop.xlane.xlu0 %3559  ;;  %v3690_v37 = vadd.f32 %v6507_v32, %v3679_v52 }
 0xacf   : > { %v3574_v3 = vmul.f32 %v3560_v22, %v6846_v7  ;;  %v3621_v36 = vmul.f32 %v4843_v48, %v3620_v41 }
 0xad0   : > { %4461 = vmatmul.msk.f32.gmra.mxu1 %vm679_vm0, %v3690_v37  ;;  %v4127_v37 = vld [vmem:[%s6810_s15 + $0x70] sm:$0xff] }
 0xad1   : > { %v3582_v21 = vadd.f32 1e-05, %v3574_v3  ;;  %v3625_v30 = vsel %vm3624_vm12, %v4843_v48, %v3621_v36  ;;  %v4128_v3 = vld [vmem:[%s6810_s15 + $0x78] sm:$0xff] }
 0xad2   : > { %v3669_v55 = vmul.f32 %v3625_v30, %v6450_v11  ;;  %4129 = vmatpush.msra.mxu2 %v4128_v3 }
 0xad3   : > { %4844 = vrsqrt.f32 %v3582_v21  ;;  %vm3632_vm14 = vweird.f32 %v3582_v21 }
 0xad4   : > { %v3680_v51 = vmul.f32 %v6501_v23, %v3669_v55  ;;  %4130 = vmatpush.msra.mxu2 %v4127_v37 }
 0xad6   : > { %v3563_v16 = vpop.xlane.xlu1 %3562  ;;  %v3691_v60 = vadd.f32 %v6507_v32, %v3680_v51 }
 0xad7   : > { %v3575_v58 = vmul.f32 %v3563_v16, %v6846_v7  ;;  %v4125_v16 = vld [vmem:[%s6810_s15 + $0x60] sm:$0xff] }
 0xad8   : > { %4462 = vmatmul.msk.f32.gmra.mxu1 %vm679_vm0, %v3691_v60 }
 0xad9   : > { %v4845_v9 = vpop.eup %4844  ;;  %v3583_v18 = vadd.f32 1e-05, %v3575_v58 }
 0xada   : > { %v3627_v35 = vmul.f32 %v4845_v9, %v3582_v21  ;;  %vm3633_vm13 = vweird.f32 %v4845_v9  ;;  %v4126_v21 = vld [vmem:[%s6810_s15 + $0x68] sm:$0xff] }
 0xadb   : > { %4846 = vrsqrt.f32 %v3583_v18  ;;  %vm3634_vm15 = vmor %vm3632_vm14, %vm3633_vm13  ;;  %vm3642_vm1 = vweird.f32 %v3583_v18  ;;  %4131 = vmatpush.msra.mxu2 %v4126_v21 }
 0xadc   : > { %v3628_v61 = vmul.f32 %v4845_v9, %v3627_v35  ;;  %v4123_v35 = vld [vmem:[%s6810_s15 + $0x50] sm:$0xff] }
 0xadd   : > { %4132 = vmatpush.msra.mxu2 %v4125_v16 }
 0xade   : > { %v3629_v8 = vmul.f32 0.5, %v3628_v61 }
 0xae0   : > { %v3630_v2 = vsub.f32 1.5, %v3629_v8 }
 0xae1   : > { %v4847_v19 = vpop.eup %4846 }
 0xae2   : > { %v3631_v11 = vmul.f32 %v4845_v9, %v3630_v2  ;;  %v3637_v33 = vmul.f32 %v4847_v19, %v3583_v18  ;;  %vm3643_vm8 = vweird.f32 %v4847_v19 }
 0xae3   : > { %vm3644_vm2 = vmor %vm3642_vm1, %vm3643_vm8 }
 0xae4   : > { %v3635_v62 = vsel %vm3634_vm15, %v4845_v9, %v3631_v11  ;;  %v3638_v31 = vmul.f32 %v4847_v19, %v3637_v33  ;;  %v4124_v9 = vld [vmem:[%s6810_s15 + $0x58] sm:$0xff] }
 0xae5   : > { %v3670_v17 = vmul.f32 %v3635_v62, %v6457_v13  ;;  %4133 = vmatpush.msra.mxu2 %v4124_v9  ;;  %v4120_v33 = vld [vmem:[%s6810_s15 + $0x38] sm:$0xff] }
 0xae6   : > { %v3639_v12 = vmul.f32 0.5, %v3638_v31 }
 0xae7   : > { %v3681_v39 = vmul.f32 %v6501_v23, %v3670_v17  ;;  %4134 = vmatpush.msra.mxu2 %v4123_v35  ;;  %v4119_v17 = vld [vmem:[%s6810_s15 + $0x30] sm:$0xff] }
 0xae8   : > { %v3640_v15 = vsub.f32 1.5, %v3639_v12 }
 0xae9   : > { %v3692_v1 = vadd.f32 %v6507_v32, %v3681_v39 }
 0xaea   : > { %v3641_v28 = vmul.f32 %v4847_v19, %v3640_v15 }
 0xaeb   : > { %4463 = vmatmul.msk.f32.gmra.mxu1 %vm679_vm0, %v3692_v1  ;;  %v4118_v1 = vld [vmem:[%s6810_s15 + $0x28] sm:$0xff] }
 0xaec   : > { %v3645_v63 = vsel %vm3644_vm2, %v4847_v19, %v3641_v28 }
 0xaed   : > { %v3671_v50 = vmul.f32 %v3645_v63, %v6464_v44 }
 0xaef   : > { %v3682_v46 = vmul.f32 %v6501_v23, %v3671_v50  ;;  %v4117_v50 = vld [vmem:[%s6810_s15 + $0x20] sm:$0xff] }
 0xaf1   : > { %v3693_v27 = vadd.f32 %v6507_v32, %v3682_v46 }
 0xaf3   : > { %4464 = vmatmul.msk.f32.gmra.mxu1 %vm679_vm0, %v3693_v27 }
 0xb06   : > { %v3566_v13 = vpop.xlane.xlu2 %3565 }
 0xb07   : > { %v3576_v0 = vmul.f32 %v3566_v13, %v6846_v7 }
 0xb09   : > { %v3584_v56 = vadd.f32 1e-05, %v3576_v0 }
 0xb0b   : > { %4848 = vrsqrt.f32 %v3584_v56  ;;  %vm3652_vm4 = vweird.f32 %v3584_v56 }
 0xb11   : > { %v4849_v24 = vpop.eup %4848 }
 0xb12   : > { %v3647_v6 = vmul.f32 %v4849_v24, %v3584_v56  ;;  %vm3653_vm3 = vweird.f32 %v4849_v24  ;;  %v4116_v56 = vld [vmem:[%s6810_s15 + $0x18] sm:$0xff] }
 0xb13   : > { %vm3654_vm5 = vmor %vm3652_vm4, %vm3653_vm3 }
 0xb14   : > { %v3648_v45 = vmul.f32 %v4849_v24, %v3647_v6 }
 0xb16   : > { %v3649_v25 = vmul.f32 0.5, %v3648_v45 }
 0xb18   : > { %v3650_v29 = vsub.f32 1.5, %v3649_v25  ;;  %v4115_v25 = vld [vmem:[%s6810_s15 + $0x10] sm:$0xff] }
 0xb1a   : > { %v3651_v48 = vmul.f32 %v4849_v24, %v3650_v29 }
 0xb1c   : > { %v3655_v44 = vsel %vm3654_vm5, %v4849_v24, %v3651_v48 }
 0xb1d   : > { %v3672_v59 = vmul.f32 %v3655_v44, %v6471_v47 }
 0xb1f   : > { %v3683_v14 = vmul.f32 %v6501_v23, %v3672_v59 }
 0xb21   : > { %v3694_v40 = vadd.f32 %v6507_v32, %v3683_v14  ;;  %v4114_v14 = vld [vmem:[%s6810_s15 + $0x8] sm:$0xff] }
 0xb23   : > { %4465 = vmatmul.msk.f32.gmra.mxu1 %vm679_vm0, %v3694_v40 }
 0xb25   : > { %v3569_v49 = vpop.xlane.xlu0 %3568 }
 0xb26   : > { %v3577_v38 = vmul.f32 %v3569_v49, %v6846_v7  ;;  %v6550_v7 = vld [vmem:[%s6809_s14] ss:$0 sm:$0xff] }
 0xb28   : > { %v3585_v57 = vadd.f32 1e-05, %v3577_v38 }
 0xb2a   : > { %4850 = vrsqrt.f32 %v3585_v57  ;;  %vm3662_vm7 = vweird.f32 %v3585_v57 }
 0xb30   : > { %v4851_v5 = vpop.eup %4850 }
 0xb31   : > { %v3657_v52 = vmul.f32 %v4851_v5, %v3585_v57  ;;  %vm3663_vm6 = vweird.f32 %v4851_v5 }
 0xb32   : > { %vm3664_vm9 = vmor %vm3662_vm7, %vm3663_vm6 }
 0xb33   : > { %v3658_v41 = vmul.f32 %v4851_v5, %v3657_v52 }
 0xb35   : > { %v3659_v22 = vmul.f32 0.5, %v3658_v41 }
 0xb37   : > { %v3660_v47 = vsub.f32 1.5, %v3659_v22 }
 0xb39   : > { %v3661_v36 = vmul.f32 %v4851_v5, %v3660_v47 }
 0xb3b   : > { %v3665_v30 = vsel %vm3664_vm9, %v4851_v5, %v3661_v36  ;;  %v4113_v5 = vld [vmem:[%s6810_s15] sm:$0xff] }
 0xb3c   : > { %v3673_v55 = vmul.f32 %v3665_v30, %v6492_v4  ;;  %v3745_v51 = vpop.f32.mrf.mxu1 }
 0xb3d   : > { %v6560_v58 = vadd.f32 %v6550_v7, %v3745_v51 }
 0xb3e   : > { %v3684_v60 = vmul.f32 %v6501_v23, %v3673_v55  ;;  %v4122_v23 = vld [vmem:[%s6810_s15 + $0x48] sm:$0xff] }
 0xb3f   : > { %v3777_v18 = vmul.f32 0.70710677, %v6560_v58  ;;  %4135 = vmatpush.msra.mxu2 %v4122_v23 }
 0xb40   : > { %v3695_v4 = vadd.f32 %v6507_v32, %v3684_v60  ;;  %v4121_v32 = vld [vmem:[%s6810_s15 + $0x40] sm:$0xff] }
 0xb41   : > { %v6571_v61 = vclamps-f32 %v3777_v18, 4.0  ;;  %4136 = vmatpush.msra.mxu2 %v4121_v32 }
 0xb42   : > { %4466 = vmatmul.msk.f32.gmra.mxu1 %vm679_vm0, %v3695_v4 }
 0xb43   : > { %v6579_v8 = vmul.f32 %v6571_v61, %v6571_v61  ;;  %4137 = vmatpush.msra.mxu2 %v4120_v33 }
 0xb45   : > { %v3873_v2 = vmul.f32 -1.1791603e-07, %v6579_v8  ;;  %v3748_v19 = vpop.f32.mrf.mxu1  ;;  %4138 = vmatpush.msra.mxu2 %v4119_v17  ;;  %v3809_v39 = vmul.f32 0.00022905065, %v6579_v8 }
 0xb46   : > { %v6586_v11 = vadd.f32 %v6550_v7, %v3748_v19 }
 0xb47   : > { %v3881_v62 = vadd.f32 2.3547966e-05, %v3873_v2  ;;  %4139 = vmatpush.msra.mxu2 %v4118_v1  ;;  %v3817_v13 = vadd.f32 0.003408291, %v3809_v39 }
 0xb48   : > { %v3778_v31 = vmul.f32 0.70710677, %v6586_v11 }
 0xb49   : > { %v3889_v12 = vmul.f32 %v3881_v62, %v6579_v8  ;;  %4140 = vmatpush.msra.mxu2 %v4117_v50  ;;  %v3825_v44 = vmul.f32 %v3817_v13, %v6579_v8 }
 0xb4a   : > { %v6597_v15 = vclamps-f32 %v3778_v31, 4.0 }
 0xb4b   : > { %v3897_v28 = vadd.f32 0.0010179626, %v3889_v12  ;;  %4141 = vmatpush.msra.mxu2 %v4116_v56  ;;  %v3833_v3 = vadd.f32 0.050955694, %v3825_v44 }
 0xb4c   : > { %v6604_v63 = vmul.f32 %v6597_v15, %v6597_v15 }
 0xb4d   : > { %v3905_v46 = vmul.f32 %v3897_v28, %v6579_v8  ;;  %v3751_v27 = vpop.f32.mrf.mxu1  ;;  %4142 = vmatpush.msra.mxu2 %v4115_v25  ;;  %v3841_v9 = vmul.f32 %v3833_v3, %v6579_v8 }
 0xb4e   : > { %v6611_v0 = vadd.f32 %v6550_v7, %v3751_v27  ;;  %v3874_v24 = vmul.f32 -1.1791603e-07, %v6604_v63  ;;  %v3810_v38 = vmul.f32 0.00022905065, %v6604_v63 }
 0xb4f   : > { %v3913_v6 = vadd.f32 0.01407047, %v3905_v46  ;;  %4143 = vmatpush.msra.mxu2 %v4114_v14  ;;  %v3849_v2 = vadd.f32 0.18520832, %v3841_v9 }
 0xb50   : > { %v3779_v45 = vmul.f32 0.70710677, %v6611_v0  ;;  %v3882_v48 = vadd.f32 2.3547966e-05, %v3874_v24  ;;  %v3818_v30 = vadd.f32 0.003408291, %v3810_v38 }
 0xb51   : > { %v3921_v29 = vmul.f32 %v3913_v6, %v6579_v8  ;;  %4144 = vmatpush.msra.mxu2 %v4113_v5  ;;  %v3857_v1 = vmul.f32 %v3849_v2, %v6579_v8 }
 0xb52   : > { %v6623_v59 = vclamps-f32 %v3779_v45, 4.0  ;;  %v3890_v49 = vmul.f32 %v3882_v48, %v6604_v63  ;;  %v3826_v32 = vmul.f32 %v3818_v30, %v6604_v63 }
 0xb53   : > { %v3929_v40 = vadd.f32 0.11098505, %v3921_v29  ;;  %v3865_v25 = vadd.f32 1.1283791, %v3857_v1 }
 0xb54   : > { %v6632_v57 = vmul.f32 %v6623_v59, %v6623_v59  ;;  %v3898_v22 = vadd.f32 0.0010179626, %v3890_v49  ;;  %v3834_v12 = vadd.f32 0.050955694, %v3826_v32 }
 0xb55   : > { %v3937_v52 = vmul.f32 %v3929_v40, %v6579_v8  ;;  %v3754_v41 = vpop.f32.mrf.mxu1 }
 0xb56   : > { %v6639_v47 = vadd.f32 %v6550_v7, %v3754_v41  ;;  %v3875_v37 = vmul.f32 -1.1791603e-07, %v6632_v57  ;;  %v3906_v21 = vmul.f32 %v3898_v22, %v6604_v63  ;;  %v3811_v28 = vmul.f32 0.00022905065, %v6632_v57 }
 0xb57   : > { %v3945_v36 = vadd.f32 0.49746925, %v3937_v52  ;;  %v3842_v48 = vmul.f32 %v3834_v12, %v6604_v63 }
 0xb58   : > { %v3780_v51 = vmul.f32 0.70710677, %v6639_v47  ;;  %v3914_v16 = vadd.f32 0.01407047, %v3906_v21  ;;  %v3883_v60 = vadd.f32 2.3547966e-05, %v3875_v37 }
 0xb59   : > { %v3953_v55 = vmul.f32 %v3945_v36, %v6579_v8  ;;  %v3819_v44 = vadd.f32 0.003408291, %v3811_v28 }
 0xb5a   : > { %v6646_v4 = vclamps-f32 %v3780_v51, 4.0  ;;  %v3922_v35 = vmul.f32 %v3914_v16, %v6604_v63  ;;  %v3891_v23 = vmul.f32 %v3883_v60, %v6632_v57  ;;  %v3969_v51 = vmul.f32 %v6571_v61, %v3865_v25 }
 0xb5b   : > { %v3961_v18 = vadd.f32 1.0, %v3953_v55  ;;  %v3827_v3 = vmul.f32 %v3819_v44, %v6632_v57  ;;  %v3850_v60 = vadd.f32 0.18520832, %v3842_v48 }
 0xb5c   : > { %v6653_v19 = vmul.f32 %v6646_v4, %v6646_v4  ;;  %v3930_v33 = vadd.f32 0.11098505, %v3922_v35  ;;  %v3899_v62 = vadd.f32 0.0010179626, %v3891_v23 }
 0xb5d   : > { %4852 = vrcp.f32 %v3961_v18  ;;  %v3988_v14 = vand.u32 2147483648, %v3961_v18  ;;  %v3986_v52 = vand.u32 2147483647, %v3961_v18  ;;  %vm3982_vm11 = vweird.f32 %v3961_v18 }
 0xb5e   : > { %v3938_v31 = vmul.f32 %v3930_v33, %v6604_v63  ;;  %v3876_v17 = vmul.f32 -1.1791603e-07, %v6653_v19  ;;  %v3907_v39 = vmul.f32 %v3899_v62, %v6632_v57  ;;  %v3812_v21 = vmul.f32 0.00022905065, %v6653_v19 }
 0xb5f   : > { %v3989_v36 = vor.u32 1.1754944e-38, %v3988_v14  ;;  %vm3987_vm13 = vcmp.eq.f32.partialorder %v3986_v52, 8.507059e+37  ;;  %v3835_v2 = vadd.f32 0.050955694, %v3827_v3  ;;  %v3858_v1 = vmul.f32 %v3850_v60, %v6604_v63 }
 0xb60   : > { %v3946_v50 = vadd.f32 0.49746925, %v3938_v31  ;;  %v3884_v46 = vadd.f32 2.3547966e-05, %v3876_v17  ;;  %v3915_v13 = vadd.f32 0.01407047, %v3907_v39 }
 0xb61   : > { %v3820_v62 = vadd.f32 0.003408291, %v3812_v21  ;;  %v3769_v39 = vmul.f32 0.5, %v6560_v58 }
 0xb62   : > { %v3954_v24 = vmul.f32 %v3946_v50, %v6604_v63  ;;  %v3923_v6 = vmul.f32 %v3915_v13, %v6632_v57  ;;  %v3892_v45 = vmul.f32 %v3884_v46, %v6653_v19 }
 0xb63   : > { %v4853_v27 = vpop.eup %4852 }
 0xb64   : > { %v3978_v56 = vmul.f32 %v4853_v27, %v3961_v18  ;;  %v6664_v40 = vadd.f32 1.0, %v3954_v24  ;;  %v3931_v49 = vadd.f32 0.11098505, %v3923_v6  ;;  %v3900_v38 = vadd.f32 0.0010179626, %v3892_v45 }
 0xb65   : > { %vm3983_vm10 = vweird.f32 %v4853_v27  ;;  %v3843_v24 = vmul.f32 %v3835_v2, %v6632_v57  ;;  %v3828_v6 = vmul.f32 %v3820_v62, %v6653_v19  ;;  %v3866_v45 = vadd.f32 1.1283791, %v3858_v1 }
 0xb66   : > { %v3979_v29 = vsub.f32 1.0, %v3978_v56  ;;  %4854 = vrcp.f32 %v6664_v40  ;;  %vm3984_vm12 = vmor %vm3982_vm11, %vm3983_vm10  ;;  %v3939_v30 = vmul.f32 %v3931_v49, %v6632_v57  ;;  %v3908_v55 = vmul.f32 %v3900_v38, %v6653_v19 }
 0xb67   : > { %v4001_v14 = vand.u32 2147483647, %v6664_v40  ;;  %v3851_v49 = vadd.f32 0.18520832, %v3843_v24  ;;  %v3836_v52 = vadd.f32 0.050955694, %v3828_v6  ;;  %vm3997_vm15 = vweird.f32 %v6664_v40 }
 0xb68   : > { %v3757_v8 = vpop.f32.mrf.mxu1  ;;  %v3980_v5 = vmul.f32 %v4853_v27, %v3979_v29  ;;  %v3947_v18 = vadd.f32 0.49746925, %v3939_v30  ;;  %v3916_v23 = vadd.f32 0.01407047, %v3908_v55  ;;  %v4003_v29 = vand.u32 2147483648, %v6664_v40 }
 0xb69   : > { %v6667_v41 = vadd.f32 %v6550_v7, %v3757_v8  ;;  %v3970_v55 = vmul.f32 %v6597_v15, %v3866_v45  ;;  %vm4002_vm1 = vcmp.eq.f32.partialorder %v4001_v14, 8.507059e+37  ;;  %v3859_v60 = vmul.f32 %v3851_v49, %v6632_v57 }
 0xb6a   : > { %v3981_v22 = vadd.f32 %v4853_v27, %v3980_v5  ;;  %v3955_v17 = vmul.f32 %v3947_v18, %v6632_v57  ;;  %v3924_v12 = vmul.f32 %v3916_v23, %v6653_v19  ;;  %v3770_v15 = vmul.f32 0.5, %v6586_v11 }
 0xb6b   : > { %v3781_v37 = vmul.f32 0.70710677, %v6667_v41  ;;  %v3867_v57 = vadd.f32 1.1283791, %v3859_v60 }
 0xb6c   : > { %v3985_v16 = vsel %vm3984_vm12, %v4853_v27, %v3981_v22  ;;  %v4855_v33 = vpop.eup %4854  ;;  %v6690_v27 = vadd.f32 1.0, %v3955_v17  ;;  %v3932_v13 = vadd.f32 0.11098505, %v3924_v12 }
 0xb6d   : > { %v3990_v9 = vsel %vm3987_vm13, %v3989_v36, %v3985_v16  ;;  %v6676_v35 = vclamps-f32 %v3781_v37, 4.0  ;;  %v3993_v46 = vmul.f32 %v4855_v33, %v6664_v40  ;;  %vm3998_vm14 = vweird.f32 %v4855_v33 }
 0xb6e   : > { %v3991_v32 = vmul.f32 %v3990_v9, %v3969_v51  ;;  %4856 = vrcp.f32 %v6690_v27  ;;  %v3940_v48 = vmul.f32 %v3932_v13, %v6653_v19  ;;  %vm3999_vm8 = vmor %vm3997_vm15, %vm3998_vm14  ;;  %v4004_v37 = vor.u32 1.1754944e-38, %v4003_v29 }
 0xb6f   : > { %v6687_v50 = vmul.f32 %v6676_v35, %v6676_v35  ;;  %v3994_v63 = vsub.f32 1.0, %v3993_v46  ;;  %v3844_v40 = vmul.f32 %v3836_v52, %v6653_v19  ;;  %v4018_v12 = vand.u32 2147483648, %v6690_v27 }
 0xb70   : > { %v3760_v31 = vpop.f32.mrf.mxu1  ;;  %v4097_v61 = vadd.f32 1.0, %v3991_v32  ;;  %v3948_v5 = vadd.f32 0.49746925, %v3940_v48  ;;  %vm4012_vm3 = vweird.f32 %v6690_v27  ;;  %v3971_v45 = vmul.f32 %v6623_v59, %v3867_v57 }
 0xb71   : > { %v6683_v28 = vadd.f32 %v6550_v7, %v3760_v31  ;;  %v3995_v44 = vmul.f32 %v4855_v33, %v3994_v63  ;;  %v3877_v8 = vmul.f32 -1.1791603e-07, %v6687_v50  ;;  %v3813_v62 = vmul.f32 0.00022905065, %v6687_v50 }
 0xb72   : > { %v4105_v56 = vmul.f32 %v4097_v61, %v3769_v39  ;;  %v3956_v36 = vmul.f32 %v3948_v5, %v6653_v19  ;;  %v4016_v61 = vand.u32 2147483647, %v6690_v27  ;;  %v3852_v1 = vadd.f32 0.18520832, %v3844_v40 }
 0xb73   : > { %v3782_v58 = vmul.f32 0.70710677, %v6683_v28  ;;  %v3996_v22 = vadd.f32 %v4855_v33, %v3995_v44  ;;  %v3885_v3 = vadd.f32 2.3547966e-05, %v3877_v8  ;;  %v3821_v24 = vadd.f32 0.003408291, %v3813_v62 }
 0xb74   : > { %4145 = vmatmul.f32.vlgmr.msra.gmra.mxu2 %v4105_v56  ;;  %v4857_v30 = vpop.eup %4856  ;;  %v6714_v32 = vadd.f32 1.0, %v3956_v36  ;;  %v4019_v11 = vor.u32 1.1754944e-38, %v4018_v12  ;;  %vm4017_vm5 = vcmp.eq.f32.partialorder %v4016_v61, 8.507059e+37  ;;  %v3860_v14 = vmul.f32 %v3852_v1, %v6653_v19 }
 0xb75   : > { %v6696_v25 = vclamps-f32 %v3782_v58, 4.0  ;;  %v4000_v51 = vsel %vm3999_vm8, %v4855_v33, %v3996_v22  ;;  %v3893_v16 = vmul.f32 %v3885_v3, %v6687_v50  ;;  %v4008_v18 = vmul.f32 %v4857_v30, %v6690_v27 }
 0xb76   : > { %v4005_v9 = vsel %vm4002_vm1, %v4004_v37, %v4000_v51  ;;  %4858 = vrcp.f32 %v6714_v32  ;;  %vm4013_vm2 = vweird.f32 %v4857_v30  ;;  %v3829_v22 = vmul.f32 %v3821_v24, %v6687_v50 }
 0xb77   : > { %v6704_v38 = vmul.f32 %v6696_v25, %v6696_v25  ;;  %v4006_v23 = vmul.f32 %v4005_v9, %v3970_v55  ;;  %v3901_v2 = vadd.f32 0.0010179626, %v3893_v16  ;;  %v4009_v31 = vsub.f32 1.0, %v4008_v18  ;;  %vm4014_vm4 = vmor %vm4012_vm3, %vm4013_vm2 }
 0xb78   : > { %v3771_v59 = vmul.f32 0.5, %v6611_v0  ;;  %v3868_v55 = vadd.f32 1.1283791, %v3860_v14  ;;  %v4033_v19 = vand.u32 2147483648, %v6714_v32  ;;  %v4031_v18 = vand.u32 2147483647, %v6714_v32 }
 0xb79   : > { %v3878_v21 = vmul.f32 -1.1791603e-07, %v6704_v38  ;;  %v4098_v33 = vadd.f32 1.0, %v4006_v23  ;;  %v4010_v39 = vmul.f32 %v4857_v30, %v4009_v31  ;;  %v3909_v13 = vmul.f32 %v3901_v2, %v6687_v50 }
 0xb7a   : > { %v3814_v29 = vmul.f32 0.00022905065, %v6704_v38  ;;  %v3837_v40 = vadd.f32 0.050955694, %v3829_v22  ;;  %vm4027_vm7 = vweird.f32 %v6714_v32  ;;  %v4034_v31 = vor.u32 1.1754944e-38, %v4033_v19 }
 0xb7b   : > { %v3886_v17 = vadd.f32 2.3547966e-05, %v3878_v21  ;;  %v4106_v46 = vmul.f32 %v4098_v33, %v3770_v15  ;;  %v4011_v58 = vadd.f32 %v4857_v30, %v4010_v39  ;;  %v3917_v6 = vadd.f32 0.01407047, %v3909_v13 }
 0xb7c   : > { %v4859_v44 = vpop.eup %4858  ;;  %v3822_v36 = vadd.f32 0.003408291, %v3814_v29  ;;  %v3972_v33 = vmul.f32 %v6646_v4, %v3868_v55  ;;  %vm4032_vm10 = vcmp.eq.f32.partialorder %v4031_v18, 8.507059e+37  ;;  %v3845_v57 = vmul.f32 %v3837_v40, %v6687_v50 }
 0xb7d   : > { %v3894_v56 = vmul.f32 %v3886_v17, %v6704_v38  ;;  %4148 = vmatmul.f32.gmra.mxu2 %v4106_v46  ;;  %v4015_v48 = vsel %vm4014_vm4, %v4857_v30, %v4011_v58  ;;  %v3925_v49 = vmul.f32 %v3917_v6, %v6687_v50  ;;  %v4023_v52 = vmul.f32 %v4859_v44, %v6714_v32 }
 0xb7e   : > { %v4020_v8 = vsel %vm4017_vm5, %v4019_v11, %v4015_v48  ;;  %vm4028_vm6 = vweird.f32 %v4859_v44  ;;  %v3830_v0 = vmul.f32 %v3822_v36, %v6704_v38  ;;  %v3772_v32 = vmul.f32 0.5, %v6639_v47 }
 0xb7f   : > { %v3902_v63 = vadd.f32 0.0010179626, %v3894_v56  ;;  %v4021_v27 = vmul.f32 %v4020_v8, %v3971_v45  ;;  %v3933_v3 = vadd.f32 0.11098505, %v3925_v49  ;;  %v4024_v30 = vsub.f32 1.0, %v4023_v52  ;;  %vm4029_vm9 = vmor %vm4027_vm7, %vm4028_vm6 }
 0xb80   : > { %v3838_v46 = vadd.f32 0.050955694, %v3830_v0  ;;  %v3853_v58 = vadd.f32 0.18520832, %v3845_v57 }
 0xb81   : > { %v3910_v5 = vmul.f32 %v3902_v63, %v6704_v38  ;;  %v4099_v21 = vadd.f32 1.0, %v4021_v27  ;;  %v3941_v51 = vmul.f32 %v3933_v3, %v6687_v50  ;;  %v4025_v9 = vmul.f32 %v4859_v44, %v4024_v30 }
 0xb82   : > { %v3846_v11 = vmul.f32 %v3838_v46, %v6704_v38  ;;  %v3861_v45 = vmul.f32 %v3853_v58, %v6687_v50 }
 0xb83   : > { %v3918_v37 = vadd.f32 0.01407047, %v3910_v5  ;;  %v4107_v60 = vmul.f32 %v4099_v21, %v3771_v59  ;;  %v3949_v23 = vadd.f32 0.49746925, %v3941_v51  ;;  %v4026_v62 = vadd.f32 %v4859_v44, %v4025_v9 }
 0xb84   : > { %v3854_v29 = vadd.f32 0.18520832, %v3846_v11  ;;  %v3869_v14 = vadd.f32 1.1283791, %v3861_v45 }
 0xb85   : > { %v3926_v16 = vmul.f32 %v3918_v37, %v6704_v38  ;;  %4151 = vmatmul.f32.gmra.mxu2 %v4107_v60  ;;  %v3957_v17 = vmul.f32 %v3949_v23, %v6687_v50  ;;  %v4030_v12 = vsel %vm4029_vm9, %v4859_v44, %v4026_v62 }
 0xb86   : > { %v4035_v39 = vsel %vm4032_vm10, %v4034_v31, %v4030_v12  ;;  %v3862_v47 = vmul.f32 %v3854_v29, %v6704_v38  ;;  %v3973_v3 = vmul.f32 %v6676_v35, %v3869_v14  ;;  %v3773_v35 = vmul.f32 0.5, %v6667_v41 }
 0xb87   : > { %v3934_v2 = vadd.f32 0.11098505, %v3926_v16  ;;  %v3965_v61 = vadd.f32 1.0, %v3957_v17  ;;  %v4036_v13 = vmul.f32 %v4035_v39, %v3972_v33  ;;  %v3774_v12 = vmul.f32 0.5, %v6683_v28 }
 0xb88   : > { %v3870_v50 = vadd.f32 1.1283791, %v3862_v47 }
 0xb89   : > { %v3942_v15 = vmul.f32 %v3934_v2, %v6704_v38  ;;  %4860 = vrcp.f32 %v3965_v61  ;;  %v4100_v56 = vadd.f32 1.0, %v4036_v13  ;;  %v4048_v8 = vand.u32 2147483648, %v3965_v61 }
 0xb8a   : > { %v4046_v27 = vand.u32 2147483647, %v3965_v61  ;;  %vm4042_vm12 = vweird.f32 %v3965_v61  ;;  %v3974_v40 = vmul.f32 %v6696_v25, %v3870_v50 }
 0xb8b   : > { %v3950_v1 = vadd.f32 0.49746925, %v3942_v15  ;;  %v4108_v6 = vmul.f32 %v4100_v56, %v3772_v32  ;;  %v4049_v37 = vor.u32 1.1754944e-38, %v4048_v8 }
 0xb8c   : > { %vm4047_vm14 = vcmp.eq.f32.partialorder %v4046_v27, 8.507059e+37 }
 0xb8d   : > { %v3958_v24 = vmul.f32 %v3950_v1, %v6704_v38  ;;  %4154 = vmatmul.f32.gmra.mxu2 %v4108_v6 }
 0xb8f   : > { %v3966_v4 = vadd.f32 1.0, %v3958_v24  ;;  %v4861_v63 = vpop.eup %4860 }
 0xb90   : > { %v4038_v48 = vmul.f32 %v4861_v63, %v3965_v61  ;;  %vm4043_vm11 = vweird.f32 %v4861_v63 }
 0xb91   : > { %4862 = vrcp.f32 %v3966_v4  ;;  %vm4044_vm13 = vmor %vm4042_vm12, %vm4043_vm11  ;;  %v4063_v21 = vand.u32 2147483648, %v3966_v4  ;;  %v4061_v19 = vand.u32 2147483647, %v3966_v4  ;;  %vm4057_vm8 = vweird.f32 %v3966_v4 }
 0xb92   : > { %v4039_v44 = vsub.f32 1.0, %v4038_v48 }
 0xb93   : > { %v4064_v18 = vor.u32 1.1754944e-38, %v4063_v21  ;;  %vm4062_vm2 = vcmp.eq.f32.partialorder %v4061_v19, 8.507059e+37 }
 0xb94   : > { %v4040_v5 = vmul.f32 %v4861_v63, %v4039_v44 }
 0xb96   : > { %v4041_v22 = vadd.f32 %v4861_v63, %v4040_v5 }
 0xb97   : > { %v4863_v49 = vpop.eup %4862 }
 0xb98   : > { %v4053_v52 = vmul.f32 %v4863_v49, %v3966_v4  ;;  %v4045_v36 = vsel %vm4044_vm13, %v4861_v63, %v4041_v22  ;;  %vm4058_vm15 = vweird.f32 %v4863_v49 }
 0xb99   : > { %v4050_v30 = vsel %vm4047_vm14, %v4049_v37, %v4045_v36  ;;  %vm4059_vm1 = vmor %vm4057_vm8, %vm4058_vm15 }
 0xb9a   : > { %v4054_v59 = vsub.f32 1.0, %v4053_v52  ;;  %v4051_v38 = vmul.f32 %v4050_v30, %v3973_v3 }
 0xb9c   : > { %v4055_v55 = vmul.f32 %v4863_v49, %v4054_v59  ;;  %v4101_v9 = vadd.f32 1.0, %v4051_v38 }
 0xb9e   : > { %v4056_v60 = vadd.f32 %v4863_v49, %v4055_v55  ;;  %v4109_v0 = vmul.f32 %v4101_v9, %v3773_v35 }
 0xba0   : > { %v3763_v51 = vpop.f32.mrf.mxu1  ;;  %v4060_v2 = vsel %vm4059_vm1, %v4863_v49, %v4056_v60  ;;  %4157 = vmatmul.f32.gmra.mxu2 %v4109_v0 }
 0xba1   : > { %v6749_v16 = vadd.f32 %v6550_v7, %v3763_v51  ;;  %v4065_v62 = vsel %vm4062_vm2, %v4064_v18, %v4060_v2 }
 0xba2   : > { %v4066_v17 = vmul.f32 %v4065_v62, %v3974_v40 }
 0xba3   : > { %v3783_v23 = vmul.f32 0.70710677, %v6749_v16 }
 0xba4   : > { %v4102_v33 = vadd.f32 1.0, %v4066_v17 }
 0xba5   : > { %v4473_v31 = vclamps-f32 %v3783_v23, 4.0  ;;  %v3775_v23 = vmul.f32 0.5, %v6749_v16 }
 0xba6   : > { %v4110_v41 = vmul.f32 %v4102_v33, %v3774_v12 }
 0xba7   : > { %v3807_v15 = vmul.f32 %v4473_v31, %v4473_v31 }
 0xba8   : > { %4160 = vmatmul.f32.gmra.mxu2 %v4110_v41 }
 0xba9   : > { %v3879_v57 = vmul.f32 -1.1791603e-07, %v3807_v15  ;;  %v3815_v1 = vmul.f32 0.00022905065, %v3807_v15 }
 0xbab   : > { %v3887_v39 = vadd.f32 2.3547966e-05, %v3879_v57  ;;  %v3823_v13 = vadd.f32 0.003408291, %v3815_v1 }
 0xbad   : > { %v3895_v61 = vmul.f32 %v3887_v39, %v3807_v15  ;;  %v3831_v24 = vmul.f32 %v3823_v13, %v3807_v15 }
 0xbaf   : > { %v3903_v25 = vadd.f32 0.0010179626, %v3895_v61  ;;  %v3839_v6 = vadd.f32 0.050955694, %v3831_v24 }
 0xbb1   : > { %v3911_v46 = vmul.f32 %v3903_v25, %v3807_v15  ;;  %v3847_v45 = vmul.f32 %v3839_v6, %v3807_v15 }
 0xbb3   : > { %v3919_v32 = vadd.f32 0.01407047, %v3911_v46  ;;  %v3855_v14 = vadd.f32 0.18520832, %v3847_v45 }
 0xbb5   : > { %v3927_v56 = vmul.f32 %v3919_v32, %v3807_v15  ;;  %v3863_v5 = vmul.f32 %v3855_v14, %v3807_v15  ;;  %v4689_v14 = vld [vmem:[%s6811_s16] ss:$0 sm:$0xff] }
 0xbb7   : > { %v3935_v58 = vadd.f32 0.11098505, %v3927_v56  ;;  %v3871_v37 = vadd.f32 1.1283791, %v3863_v5 }
 0xbb9   : > { %v3943_v11 = vmul.f32 %v3935_v58, %v3807_v15  ;;  %v3975_v38 = vmul.f32 %v4473_v31, %v3871_v37 }
 0xbbb   : > { %v3951_v4 = vadd.f32 0.49746925, %v3943_v11 }
 0xbbd   : > { %v3959_v63 = vmul.f32 %v3951_v4, %v3807_v15 }
 0xbbf   : > { %v3766_v29 = vpop.f32.mrf.mxu1  ;;  %v3967_v28 = vadd.f32 1.0, %v3959_v63 }
 0xbc0   : > { %v6756_v48 = vadd.f32 %v6550_v7, %v3766_v29 }
 0xbc1   : > { %4864 = vrcp.f32 %v3967_v28  ;;  %v4078_v59 = vand.u32 2147483648, %v3967_v28  ;;  %v4076_v36 = vand.u32 2147483647, %v3967_v28  ;;  %vm4072_vm4 = vweird.f32 %v3967_v28 }
 0xbc2   : > { %v3784_v44 = vmul.f32 0.70710677, %v6756_v48  ;;  %v3776_v29 = vmul.f32 0.5, %v6756_v48 }
 0xbc3   : > { %v4079_v19 = vor.u32 1.1754944e-38, %v4078_v59  ;;  %vm4077_vm6 = vcmp.eq.f32.partialorder %v4076_v36, 8.507059e+37 }
 0xbc4   : > { %v4474_v8 = vclamps-f32 %v3784_v44, 4.0 }
 0xbc6   : > { %v3808_v49 = vmul.f32 %v4474_v8, %v4474_v8 }
 0xbc7   : > { %v4865_v47 = vpop.eup %4864 }
 0xbc8   : > { %v4068_v27 = vmul.f32 %v4865_v47, %v3967_v28  ;;  %v3880_v52 = vmul.f32 -1.1791603e-07, %v3808_v49  ;;  %vm4073_vm3 = vweird.f32 %v4865_v47  ;;  %v3816_v55 = vmul.f32 0.00022905065, %v3808_v49 }
 0xbc9   : > { %vm4074_vm5 = vmor %vm4072_vm4, %vm4073_vm3 }
 0xbca   : > { %v4069_v22 = vsub.f32 1.0, %v4068_v27  ;;  %v3888_v3 = vadd.f32 2.3547966e-05, %v3880_v52  ;;  %v3824_v40 = vadd.f32 0.003408291, %v3816_v55 }
 0xbcc   : > { %v4070_v50 = vmul.f32 %v4865_v47, %v4069_v22  ;;  %v3896_v21 = vmul.f32 %v3888_v3, %v3808_v49  ;;  %v3832_v15 = vmul.f32 %v3824_v40, %v3808_v49 }
 0xbce   : > { %v4071_v7 = vadd.f32 %v4865_v47, %v4070_v50  ;;  %v3904_v30 = vadd.f32 0.0010179626, %v3896_v21  ;;  %v3840_v57 = vadd.f32 0.050955694, %v3832_v15 }
 0xbd0   : > { %v4075_v51 = vsel %vm4074_vm5, %v4865_v47, %v4071_v7  ;;  %v3912_v60 = vmul.f32 %v3904_v30, %v3808_v49  ;;  %v3848_v39 = vmul.f32 %v3840_v57, %v3808_v49 }
 0xbd1   : > { %v4080_v35 = vsel %vm4077_vm6, %v4079_v19, %v4075_v51 }
 0xbd2   : > { %v4081_v9 = vmul.f32 %v4080_v35, %v3975_v38  ;;  %v3920_v18 = vadd.f32 0.01407047, %v3912_v60  ;;  %v3856_v61 = vadd.f32 0.18520832, %v3848_v39 }
 0xbd4   : > { %v4103_v2 = vadd.f32 1.0, %v4081_v9  ;;  %v3928_v0 = vmul.f32 %v3920_v18, %v3808_v49  ;;  %v3864_v25 = vmul.f32 %v3856_v61, %v3808_v49 }
 0xbd6   : > { %v4111_v62 = vmul.f32 %v4103_v2, %v3775_v23  ;;  %v3936_v17 = vadd.f32 0.11098505, %v3928_v0  ;;  %v3872_v16 = vadd.f32 1.1283791, %v3864_v25 }
 0xbd8   : > { %4163 = vmatmul.f32.gmra.mxu2 %v4111_v62  ;;  %v3944_v33 = vmul.f32 %v3936_v17, %v3808_v49  ;;  %v3976_v6 = vmul.f32 %v4474_v8, %v3872_v16 }
 0xbda   : > { %v3952_v12 = vadd.f32 0.49746925, %v3944_v33 }
 0xbdc   : > { %v3960_v41 = vmul.f32 %v3952_v12, %v3808_v49 }
 0xbde   : > { %v3968_v31 = vadd.f32 1.0, %v3960_v41 }
 0xbe0   : > { %4866 = vrcp.f32 %v3968_v31  ;;  %v4093_v32 = vand.u32 2147483648, %v3968_v31  ;;  %v4091_v24 = vand.u32 2147483647, %v3968_v31  ;;  %vm4087_vm9 = vweird.f32 %v3968_v31 }
 0xbe2   : > { %v4094_v11 = vor.u32 1.1754944e-38, %v4093_v32  ;;  %vm4092_vm11 = vcmp.eq.f32.partialorder %v4091_v24, 8.507059e+37 }
 0xbe6   : > { %v4867_v1 = vpop.eup %4866 }
 0xbe7   : > { %v4083_v46 = vmul.f32 %v4867_v1, %v3968_v31  ;;  %vm4088_vm7 = vweird.f32 %v4867_v1 }
 0xbe8   : > { %vm4089_vm10 = vmor %vm4087_vm9, %vm4088_vm7 }
 0xbe9   : > { %v4084_v13 = vsub.f32 1.0, %v4083_v46 }
 0xbeb   : > { %v4085_v56 = vmul.f32 %v4867_v1, %v4084_v13 }
 0xbed   : > { %v4086_v58 = vadd.f32 %v4867_v1, %v4085_v56 }
 0xbef   : > { %v4090_v4 = vsel %vm4089_vm10, %v4867_v1, %v4086_v58 }
 0xbf0   : > { %v4095_v63 = vsel %vm4092_vm11, %v4094_v11, %v4090_v4 }
 0xbf1   : > { %v4096_v45 = vmul.f32 %v4095_v63, %v3976_v6 }
 0xbf3   : > { %v4104_v28 = vadd.f32 1.0, %v4096_v45 }
 0xbf5   : > { %v4112_v44 = vmul.f32 %v4104_v28, %v3776_v29 }
 0xbf7   : > { %v4146_v49 = vpop.f32.mrf.mxu2  ;;  %4166 = vmatmul.f32.gmra.mxu2 %v4112_v44 }
 0xbf8   : > { %v4170_v47 = vadd.f32 %v4146_v49, %v6388_v53 }
 0xbfa   : > { %v4182_v8 = vadd.f32 %v4689_v14, %v4170_v47 }
 0xbfc   : > { %4190 = vst.msk [vmem:[%s667_s21] sm:$0xff] %vm679_vm0, %v4182_v8 }
 0xc00   : > { %v4149_v5 = vpop.f32.mrf.mxu2 }
 0xc01   : > { %v4171_v48 = vadd.f32 %v4149_v5, %v6393_v43 }
 0xc03   : > { %v4183_v27 = vadd.f32 %v4689_v14, %v4171_v48 }
 0xc05   : > { %4191 = vst.msk [vmem:[%s667_s21 + $0x8] sm:$0xff] %vm679_vm0, %v4183_v27 }
 0xc08   : > { %v4152_v52 = vpop.f32.mrf.mxu2 }
 0xc09   : > { %v4172_v22 = vadd.f32 %v4152_v52, %v6398_v10 }
 0xc0b   : > { %v4184_v3 = vadd.f32 %v4689_v14, %v4172_v22 }
 0xc0d   : > { %4192 = vst.msk [vmem:[%s667_s21 + $0x10] sm:$0xff] %vm679_vm0, %v4184_v3 }
 0xc10   : > { %v4155_v53 = vpop.f32.mrf.mxu2 }
 0xc11   : > { %v4173_v37 = vadd.f32 %v4155_v53, %v6403_v20 }
 0xc13   : > { %v4185_v59 = vadd.f32 %v4689_v14, %v4173_v37 }
 0xc15   : > { %4193 = vst.msk [vmem:[%s667_s21 + $0x18] sm:$0xff] %vm679_vm0, %v4185_v59 }
 0xc23   : > { %v4158_v50 = vpop.f32.mrf.mxu2 }
 0xc24   : > { %v4174_v36 = vadd.f32 %v4158_v50, %v6408_v54 }
 0xc26   : > { %v4186_v21 = vadd.f32 %v4689_v14, %v4174_v36 }
 0xc28   : > { %4194 = vst.msk [vmem:[%s667_s21 + $0x20] sm:$0xff] %vm679_vm0, %v4186_v21 }
 0xc2b   : > { %v4161_v43 = vpop.f32.mrf.mxu2 }
 0xc2c   : > { %v4175_v7 = vadd.f32 %v4161_v43, %v6413_v34 }
 0xc2e   : > { %v4187_v30 = vadd.f32 %v4689_v14, %v4175_v7 }
 0xc30   : > { %4195 = vst.msk [vmem:[%s667_s21 + $0x28] sm:$0xff] %vm679_vm0, %v4187_v30 }
 0xc5b   : > { %v4164_v10 = vpop.f32.mrf.mxu2 }
 0xc5c   : > { %v4176_v55 = vadd.f32 %v4164_v10, %v6418_v26 }
 0xc5e   : > { %v4188_v19 = vadd.f32 %v4689_v14, %v4176_v55 }
 0xc60   : > { %4196 = vst.msk [vmem:[%s667_s21 + $0x30] sm:$0xff] %vm679_vm0, %v4188_v19 }
 0xc7a   : > { %v4167_v20 = vpop.f32.mrf.mxu2 }
 0xc7b   : > { %v4177_v38 = vadd.f32 %v4167_v20, %v6431_v42 }
 0xc7d   : > { %v4189_v51 = vadd.f32 %v4689_v14, %v4177_v38 }
 0xc7f   : > { %4197 = vst.msk [vmem:[%s667_s21 + $0x38] sm:$0xff] %vm679_vm0, %v4189_v51 }
 0xc80 PF: > { %p24_p9 = scmp.ge.s32.totalorder %s5018_s28, 4   ;;  %s6847_s24 = smov %s4894_s25 }
 0xc81   : > { %s6848_s25 = smov %s5027_s30  ;;  %s6849_s26 = smov %s5018_s28 }
 0xc82   :  { %26 = sbr.rel (!%p24_p9) target bundleno = 5 (0x5), region = 168 }

// kernel: swin_decoder_block.2
= control target key start
LH: loop header
LB: loop body
LE: loop exit
PB: predicated region body
PF: predicated region fallthrough
CT: control target
= control target key end

     0   :  { %s4263_s29 = smov 0   ;;  %s5592_s0 = inlined_call_operand.vmem [shape: f32[128,32], index: 0, kind: input, shape index: {}]   ;;  %s5593_s1 = inlined_call_operand.vmem [shape: f32[1,32], index: 1, kind: input, shape index: {}, may-alias: {1,8}]   ;;  %s5594_s2 = inlined_call_operand.vmem [shape: f32[1,32], index: 2, kind: input, shape index: {}, may-alias: {2,6,9,13}]   ;;  %s5595_s3 = inlined_call_operand.vmem [shape: f32[32,96], index: 3, kind: input, shape index: {}]   ;;  %s5596_s4 = inlined_call_operand.vmem [shape: f32[1,96], index: 4, kind: input, shape index: {}]   ;;  %s5597_s5 = inlined_call_operand.vmem [shape: f32[32,32], index: 5, kind: input, shape index: {}]   ;;  %s5598_s6 = inlined_call_operand.vmem [shape: f32[1,32], index: 6, kind: input, shape index: {}, may-alias: {2,6,9,13}]   ;;  %s5599_s7 = inlined_call_operand.vmem [shape: f32[4,16,16], index: 7, kind: input, shape index: {}]   ;;  %s5600_s8 = inlined_call_operand.vmem [shape: f32[1,32], index: 8, kind: input, shape index: {}, may-alias: {1,8}]   ;;  %s5601_s9 = inlined_call_operand.vmem [shape: f32[1,32], index: 9, kind: input, shape index: {}, may-alias: {2,6,9,13}]   ;;  %s5602_s10 = inlined_call_operand.vmem [shape: f32[32,128], index: 10, kind: input, shape index: {}]   ;;  %s5603_s11 = inlined_call_operand.vmem [shape: f32[1,128], index: 11, kind: input, shape index: {}]   ;;  %s5604_s12 = inlined_call_operand.vmem [shape: f32[128,32], index: 12, kind: input, shape index: {}]   ;;  %s5605_s13 = inlined_call_operand.vmem [shape: f32[1,32], index: 13, kind: input, shape index: {}, may-alias: {2,6,9,13}]   ;;  %s5606_s14 = inlined_call_operand.vmem [shape: f32[128,32], index: 14, kind: output, shape index: {}]  }
   0x1 LB: > { %s3701_s30 = sadd.s32 4294967295, %s4171_s29   ;;  %p3705_p0 = scmp.ge.s32.totalorder %s4171_s29, 1  ;;  %s4171_s29 = sphi %s4263_s29, %s24_s29  }
   0x2   : > { %p413_p1 = scmp.lt.s32.totalorder %s4171_s29, 3 }
   0x4   : > { %p414_p2 = pnand %p3705_p0, %p413_p1 }
   0x5   : > { %s3706_s15 = sshll.u32 (!%p414_p2), %s3701_s30, 3  ;;  %s4174_s22 = smov (!%p414_p2), 96  }
   0x6   : > { %417 = sbr.rel (%p414_p2) target bundleno = 3442 (0xd72), region = 76  ;;  %p460_p3 = scmp.lt.s32.totalorder (!%p414_p2), %s3706_s15, 15 }
   0x7   : > { %s4175_s27 = smov (!%p414_p2), 88   ;;  %s4176_s28 = smov (!%p414_p2), 64  }
   0x8   : > { %s4177_s30 = smov (!%p414_p2), 120   ;;  %s4178_s17 = smov (!%p414_p2), 80  }
   0x9   : > { %s4179_s18 = smov (!%p414_p2), 56   ;;  %s4180_s24 = smov (!%p414_p2), 112  }
   0xa   : > { %s4181_s25 = smov (!%p414_p2), 48   ;;  %s4182_s26 = smov (!%p414_p2), 72  }
   0xb   : > { %s5608_s15 = smov (!%p460_p3, %s3706_s15), 15  ;;  %vm481_vm0 = vcmask 261120   ;;  %v4173_v16 = vmov 32.0   ;;  %v690_v63 = vld [vmem:[%s5595_s3 + $0x18] sm:$0xff] }
   0xc   : > { %s3707_s16 = sshll.u32 %s5608_s15, 3  ;;  %3979 = vrcp.f32 %v4173_v16  ;;  %731 = vmatpush.msra.mxu0 %v690_v63  ;;  %3846 = vmatpush.msra.mxu3 %v690_v63 }
   0xd   : > { %s4279_s19 = scalar_lea.vmem %s5592_s0, %s3707_s16 }
   0xe   : > { %v473_v0 = vld [vmem:[%s4279_s19 + $0x10] sm:$0xff]  ;;  %v471_v1 = vld [vmem:[%s4279_s19] sm:$0xff]  ;;  %v474_v6 = vld [vmem:[%s4279_s19 + $0x18] sm:$0xff] }
   0xf   : > { %v475_v2 = vld [vmem:[%s4279_s19 + $0x20] sm:$0xff]  ;;  %v488_v3 = vsel %vm481_vm0, %v473_v0, 0.0  ;;  %v482_v4 = vsel %vm481_vm0, %v471_v1, 0.0  ;;  %v472_v7 = vld [vmem:[%s4279_s19 + $0x8] sm:$0xff]  ;;  %v478_v8 = vld [vmem:[%s4279_s19 + $0x38] sm:$0xff]  ;;  %v491_v9 = vsel %vm481_vm0, %v474_v6, 0.0 }
  0x10   : > { %v494_v5 = vsel %vm481_vm0, %v475_v2, 0.0  ;;  %489 = vadd.xlane.f32.xlu1 %v488_v3  ;;  %483 = vadd.xlane.f32.xlu0 %v482_v4  ;;  %v485_v10 = vsel %vm481_vm0, %v472_v7, 0.0  ;;  %v503_v11 = vsel %vm481_vm0, %v478_v8, 0.0  ;;  %v476_v12 = vld [vmem:[%s4279_s19 + $0x28] sm:$0xff]  ;;  %v477_v13 = vld [vmem:[%s4279_s19 + $0x30] sm:$0xff] }
  0x11   : > { %495 = vadd.xlane.f32.xlu2 %v494_v5  ;;  %v497_v14 = vsel %vm481_vm0, %v476_v12, 0.0  ;;  %v500_v15 = vsel %vm481_vm0, %v477_v13, 0.0 }
  0x12   : > { %v3980_v17 = vpop.eup %3979 }
  0x13   : > { %v507_v18 = vmul.f32 32.0, %v3980_v17  ;;  %vm511_vm1 = vweird.f32 %v3980_v17 }
  0x15   : > { %v508_v19 = vsub.f32 1.0, %v507_v18 }
  0x17   : > { %v509_v20 = vmul.f32 %v3980_v17, %v508_v19 }
  0x18   : > { %492 = vadd.xlane.f32.xlu1 %v491_v9  ;;  %486 = vadd.xlane.f32.xlu0 %v485_v10 }
  0x19   : > { %504 = vadd.xlane.f32.xlu2 %v503_v11  ;;  %v510_v21 = vadd.f32 %v3980_v17, %v509_v20 }
  0x1b   : > { %v4297_v22 = vsel %vm511_vm1, %v3980_v17, %v510_v21 }
  0x20   : > { %498 = vadd.xlane.f32.xlu0 %v497_v14 }
  0x21   : > { %501 = vadd.xlane.f32.xlu2 %v500_v15 }
  0x83   : > { %v490_v23 = vpop.xlane.xlu1 %489  ;;  %v484_v24 = vpop.xlane.xlu0 %483 }
  0x84   : > { %v515_v25 = vmul.f32 %v4297_v22, %v490_v23  ;;  %v513_v26 = vmul.f32 %v4297_v22, %v484_v24  ;;  %v496_v27 = vpop.xlane.xlu2 %495 }
  0x85   : > { %v517_v38 = vmul.f32 %v4297_v22, %v496_v27 }
  0x86   : > { %v4301_v28 = vsub.f32 %v471_v1, %v513_v26  ;;  %v4303_v29 = vsub.f32 %v473_v0, %v515_v25  ;;  %v689_v0 = vld [vmem:[%s5595_s3 + $0x10] sm:$0xff]  ;;  %v688_v1 = vld [vmem:[%s5595_s3 + $0x8] sm:$0xff] }
  0x87   : > { %v4325_v46 = vsub.f32 %v475_v2, %v517_v38  ;;  %732 = vmatpush.msra.mxu0 %v689_v0  ;;  %3847 = vmatpush.msra.mxu3 %v689_v0  ;;  %v687_v2 = vld [vmem:[%s5595_s3] sm:$0xff] }
  0x88   : > { %v529_v30 = vmul.f32 %v4301_v28, %v4301_v28  ;;  %v531_v37 = vmul.f32 %v4303_v29, %v4303_v29 }
  0x89   : > { %v533_v54 = vmul.f32 %v4325_v46, %v4325_v46  ;;  %733 = vmatpush.msra.mxu0 %v688_v1  ;;  %3848 = vmatpush.msra.mxu3 %v688_v1 }
  0x8a   : > { %v537_v31 = vsel %vm481_vm0, %v529_v30, 0.0  ;;  %v543_v44 = vsel %vm481_vm0, %v531_v37, 0.0 }
  0x8b   : > { %v493_v32 = vpop.xlane.xlu1 %492  ;;  %538 = vadd.xlane.f32.xlu1 %v537_v31  ;;  %v487_v33 = vpop.xlane.xlu0 %486  ;;  %v549_v59 = vsel %vm481_vm0, %v533_v54, 0.0  ;;  %734 = vmatpush.msra.mxu0 %v687_v2 }
  0x8c   : > { %v516_v34 = vmul.f32 %v4297_v22, %v493_v32  ;;  %v514_v35 = vmul.f32 %v4297_v22, %v487_v33  ;;  %v505_v36 = vpop.xlane.xlu2 %504  ;;  %3849 = vmatpush.msra.mxu3 %v687_v2 }
  0x8d   : > { %v520_v39 = vmul.f32 %v4297_v22, %v505_v36 }
  0x8e   : > { %v4314_v40 = vsub.f32 %v474_v6, %v516_v34  ;;  %v4316_v41 = vsub.f32 %v472_v7, %v514_v35 }
  0x8f   : > { %v4318_v42 = vsub.f32 %v478_v8, %v520_v39  ;;  %v4387_v39 = vld [vmem:[%s5593_s1] ss:$0 sm:$0xff] }
  0x90   : > { %v532_v43 = vmul.f32 %v4314_v40, %v4314_v40  ;;  %v530_v45 = vmul.f32 %v4316_v41, %v4316_v41 }
  0x91   : > { %v536_v52 = vmul.f32 %v4318_v42, %v4318_v42 }
  0x92   : > { %v546_v47 = vsel %vm481_vm0, %v532_v43, 0.0  ;;  %v540_v48 = vsel %vm481_vm0, %v530_v45, 0.0 }
  0x93   : > { %547 = vadd.xlane.f32.xlu2 %v546_v47  ;;  %544 = vadd.xlane.f32.xlu1 %v543_v44  ;;  %v499_v49 = vpop.xlane.xlu0 %498  ;;  %v558_v56 = vsel %vm481_vm0, %v536_v52, 0.0 }
  0x94   : > { %541 = vadd.xlane.f32.xlu0 %v540_v48  ;;  %v518_v50 = vmul.f32 %v4297_v22, %v499_v49  ;;  %v502_v51 = vpop.xlane.xlu2 %501 }
  0x95   : > { %v519_v53 = vmul.f32 %v4297_v22, %v502_v51 }
  0x96   : > { %v4335_v55 = vsub.f32 %v476_v12, %v518_v50 }
  0x97   : > { %v4340_v58 = vsub.f32 %v477_v13, %v519_v53  ;;  %v4397_v53 = vld [vmem:[%s5594_s2] ss:$0 sm:$0xff] }
  0x98   : > { %v534_v57 = vmul.f32 %v4335_v55, %v4335_v55 }
  0x99   : > { %v535_v61 = vmul.f32 %v4340_v58, %v4340_v58 }
  0x9a   : > { %v552_v60 = vsel %vm481_vm0, %v534_v57, 0.0 }
  0x9b   : > { %559 = vadd.xlane.f32.xlu1 %v558_v56  ;;  %553 = vadd.xlane.f32.xlu2 %v552_v60  ;;  %v555_v62 = vsel %vm481_vm0, %v535_v61, 0.0 }
  0x9c   : > { %550 = vadd.xlane.f32.xlu0 %v549_v59 }
  0xa4   : > { %556 = vadd.xlane.f32.xlu0 %v555_v62 }
  0xfe   : > { %v539_v3 = vpop.xlane.xlu1 %538 }
  0xff   : > { %v561_v4 = vmul.f32 %v539_v3, %v4297_v22 }
 0x101   : > { %v569_v5 = vadd.f32 1e-05, %v561_v4 }
 0x103   : > { %3981 = vrsqrt.f32 %v569_v5  ;;  %vm583_vm3 = vweird.f32 %v569_v5 }
 0x106   : > { %v548_v6 = vpop.xlane.xlu2 %547  ;;  %v545_v7 = vpop.xlane.xlu1 %544 }
 0x107   : > { %v564_v8 = vmul.f32 %v548_v6, %v4297_v22  ;;  %v563_v9 = vmul.f32 %v545_v7, %v4297_v22  ;;  %v542_v10 = vpop.xlane.xlu0 %541 }
 0x108   : > { %v562_v11 = vmul.f32 %v542_v10, %v4297_v22 }
 0x109   : > { %v3982_v12 = vpop.eup %3981  ;;  %v4363_v13 = vadd.f32 1e-05, %v564_v8  ;;  %v4365_v14 = vadd.f32 1e-05, %v563_v9 }
 0x10a   : > { %v578_v15 = vmul.f32 %v3982_v12, %v569_v5  ;;  %v570_v16 = vadd.f32 1e-05, %v562_v11  ;;  %vm584_vm2 = vweird.f32 %v3982_v12 }
 0x10b   : > { %3983 = vrsqrt.f32 %v4363_v13  ;;  %vm585_vm4 = vmor %vm583_vm3, %vm584_vm2  ;;  %vm603_vm6 = vweird.f32 %v4365_v14  ;;  %vm613_vm14 = vweird.f32 %v4363_v13 }
 0x10c   : > { %v579_v17 = vmul.f32 %v3982_v12, %v578_v15  ;;  %3985 = vrsqrt.f32 %v4365_v14  ;;  %vm593_vm8 = vweird.f32 %v570_v16 }
 0x10d   : > { %3987 = vrsqrt.f32 %v570_v16 }
 0x10e   : > { %v580_v18 = vmul.f32 0.5, %v579_v17  ;;  %v560_v19 = vpop.xlane.xlu1 %559  ;;  %v554_v27 = vpop.xlane.xlu2 %553 }
 0x10f   : > { %v568_v20 = vmul.f32 %v560_v19, %v4297_v22  ;;  %v551_v21 = vpop.xlane.xlu0 %550  ;;  %v566_v36 = vmul.f32 %v554_v27, %v4297_v22 }
 0x110   : > { %v581_v23 = vsub.f32 1.5, %v580_v18  ;;  %v565_v24 = vmul.f32 %v551_v21, %v4297_v22 }
 0x111   : > { %v4371_v25 = vpop.eup %3983  ;;  %v576_v26 = vadd.f32 1e-05, %v568_v20  ;;  %v4390_v49 = vadd.f32 1e-05, %v566_v36 }
 0x112   : > { %v4373_v30 = vpop.eup %3985  ;;  %v582_v31 = vmul.f32 %v3982_v12, %v581_v23  ;;  %v4375_v32 = vadd.f32 1e-05, %v565_v24  ;;  %v608_v37 = vmul.f32 %v4371_v25, %v4363_v13  ;;  %vm614_vm15 = vweird.f32 %v4371_v25 }
 0x113   : > { %v3988_v33 = vpop.eup %3987  ;;  %v598_v34 = vmul.f32 %v4373_v30, %v4365_v14  ;;  %3989 = vrsqrt.f32 %v576_v26  ;;  %vm604_vm7 = vweird.f32 %v4373_v30  ;;  %vm653_vm9 = vweird.f32 %v576_v26  ;;  %vm615_vm1 = vmor %vm613_vm14, %vm614_vm15 }
 0x114   : > { %v588_v35 = vmul.f32 %v3988_v33, %v570_v16  ;;  %3991 = vrsqrt.f32 %v4375_v32  ;;  %v586_v44 = vsel %vm585_vm4, %v3982_v12, %v582_v31  ;;  %v609_v51 = vmul.f32 %v4371_v25, %v608_v37  ;;  %vm605_vm12 = vmor %vm603_vm6, %vm604_vm7 }
 0x115   : > { %v599_v38 = vmul.f32 %v4373_v30, %v598_v34  ;;  %v657_v47 = vmul.f32 %v586_v44, %v4301_v28  ;;  %vm594_vm5 = vweird.f32 %v3988_v33  ;;  %3993 = vrsqrt.f32 %v4390_v49 }
 0x116   : > { %v589_v43 = vmul.f32 %v3988_v33, %v588_v35  ;;  %v610_v62 = vmul.f32 0.5, %v609_v51  ;;  %vm595_vm10 = vmor %vm593_vm8, %vm594_vm5  ;;  %vm623_vm2 = vweird.f32 %v4375_v32  ;;  %vm633_vm5 = vweird.f32 %v4390_v49 }
 0x117   : > { %v600_v45 = vmul.f32 0.5, %v599_v38  ;;  %v668_v52 = vmul.f32 %v4387_v39, %v657_v47  ;;  %v557_v59 = vpop.xlane.xlu0 %556 }
 0x118   : > { %v590_v48 = vmul.f32 0.5, %v589_v43  ;;  %v567_v63 = vmul.f32 %v557_v59, %v4297_v22  ;;  %v611_v10 = vsub.f32 1.5, %v610_v62  ;;  %v3973_v59 = vld [vmem:[%s5596_s4] ss:$0 sm:$0xff] }
 0x119   : > { %v3990_v50 = vpop.eup %3989  ;;  %v601_v54 = vsub.f32 1.5, %v600_v45  ;;  %v679_v0 = vadd.f32 %v4397_v53, %v668_v52 }
 0x11a   : > { %v591_v56 = vsub.f32 1.5, %v590_v48  ;;  %v648_v57 = vmul.f32 %v3990_v50, %v576_v26  ;;  %v4399_v60 = vpop.eup %3991  ;;  %vm654_vm11 = vweird.f32 %v3990_v50  ;;  %v575_v7 = vadd.f32 1e-05, %v567_v63 }
 0x11b   : > { %v602_v1 = vmul.f32 %v4373_v30, %v601_v54  ;;  %v618_v3 = vmul.f32 %v4399_v60, %v4375_v32  ;;  %3710 = vmatmul.msk.f32.vlgmr.msra.gmra.mxu0 %vm481_vm0, %v679_v0  ;;  %vm655_vm13 = vmor %vm653_vm9, %vm654_vm11  ;;  %v3994_v9 = vpop.eup %3993  ;;  %v612_v18 = vmul.f32 %v4371_v25, %v611_v10  ;;  %vm624_vm3 = vweird.f32 %v4399_v60 }
 0x11c   : > { %v592_v28 = vmul.f32 %v3988_v33, %v591_v56  ;;  %v649_v61 = vmul.f32 %v3990_v50, %v648_v57  ;;  %3995 = vrsqrt.f32 %v575_v7  ;;  %v628_v19 = vmul.f32 %v3994_v9, %v4390_v49  ;;  %vm625_vm4 = vmor %vm623_vm2, %vm624_vm3 }
 0x11d   : > { %v619_v12 = vmul.f32 %v4399_v60, %v618_v3  ;;  %v606_v15 = vsel %vm605_vm12, %v4373_v30, %v602_v1  ;;  %vm634_vm6 = vweird.f32 %v3994_v9  ;;  %vm643_vm8 = vweird.f32 %v575_v7 }
 0x11e   : > { %v650_v2 = vmul.f32 0.5, %v649_v61  ;;  %v596_v4 = vsel %vm595_vm10, %v3988_v33, %v592_v28  ;;  %v659_v16 = vmul.f32 %v606_v15, %v4303_v29  ;;  %v629_v24 = vmul.f32 %v3994_v9, %v628_v19  ;;  %vm635_vm7 = vmor %vm633_vm5, %vm634_vm6 }
 0x11f   : > { %v658_v5 = vmul.f32 %v596_v4, %v4316_v41  ;;  %v620_v20 = vmul.f32 0.5, %v619_v12  ;;  %v616_v29 = vsel %vm615_vm1, %v4371_v25, %v612_v18  ;;  %vm776_vm11 = vcmask 64512  }
 0x120   : > { %v651_v6 = vsub.f32 1.5, %v650_v2  ;;  %v670_v13 = vmul.f32 %v4387_v39, %v659_v16  ;;  %v660_v30 = vmul.f32 %v616_v29, %v4314_v40  ;;  %v630_v31 = vmul.f32 0.5, %v629_v24 }
 0x121   : > { %v669_v8 = vmul.f32 %v4387_v39, %v658_v5  ;;  %v621_v26 = vsub.f32 1.5, %v620_v20  ;;  %vm927_vm12 = vcmask 130048  }
 0x122   : > { %v652_v11 = vmul.f32 %v3990_v50, %v651_v6  ;;  %v3996_v27 = vpop.eup %3995  ;;  %v671_v25 = vmul.f32 %v4387_v39, %v660_v30  ;;  %v631_v35 = vsub.f32 1.5, %v630_v31 }
 0x123   : > { %v680_v41 = vadd.f32 %v4397_v53, %v669_v8  ;;  %v622_v33 = vmul.f32 %v4399_v60, %v621_v26  ;;  %v638_v34 = vmul.f32 %v3996_v27, %v575_v7  ;;  %vm644_vm9 = vweird.f32 %v3996_v27 }
 0x124   : > { %v656_v14 = vsel %vm655_vm13, %v3990_v50, %v652_v11  ;;  %v682_v40 = vadd.f32 %v4397_v53, %v671_v25  ;;  %v632_v38 = vmul.f32 %v3994_v9, %v631_v35  ;;  %vm645_vm10 = vmor %vm643_vm8, %vm644_vm9 }
 0x125   : > { %v664_v17 = vmul.f32 %v656_v14, %v4318_v42  ;;  %3711 = vmatmul.msk.f32.gmra.mxu0 %vm481_vm0, %v680_v41  ;;  %v681_v42 = vadd.f32 %v4397_v53, %v670_v13  ;;  %v639_v36 = vmul.f32 %v3996_v27, %v638_v34  ;;  %v626_v37 = vsel %vm625_vm4, %v4399_v60, %v622_v33 }
 0x126   : > { %v661_v32 = vmul.f32 %v626_v37, %v4325_v46  ;;  %v636_v47 = vsel %vm635_vm7, %v3994_v9, %v632_v38 }
 0x127   : > { %v675_v21 = vmul.f32 %v4387_v39, %v664_v17  ;;  %v640_v43 = vmul.f32 0.5, %v639_v36  ;;  %v662_v49 = vmul.f32 %v636_v47, %v4335_v55 }
 0x128   : > { %v672_v44 = vmul.f32 %v4387_v39, %v661_v32 }
 0x129   : > { %v686_v23 = vadd.f32 %v4397_v53, %v675_v21  ;;  %v641_v45 = vsub.f32 1.5, %v640_v43  ;;  %v673_v46 = vmul.f32 %v4387_v39, %v662_v49 }
 0x12a   : > { %v683_v48 = vadd.f32 %v4397_v53, %v672_v44 }
 0x12b   : > { %3717 = vmatmul.msk.f32.vlgmr.msra.gmra.mxu3 %vm481_vm0, %v686_v23  ;;  %v642_v50 = vmul.f32 %v3996_v27, %v641_v45  ;;  %v684_v52 = vadd.f32 %v4397_v53, %v673_v46  ;;  %v768_v23 = vld [vmem:[%s5599_s7] sm:$0xff] }
 0x12d   : > { %3712 = vmatmul.msk.f32.gmra.mxu0 %vm481_vm0, %v681_v42  ;;  %v646_v51 = vsel %vm645_vm10, %v3996_v27, %v642_v50  ;;  %v769_v27 = vld [vmem:[%s5599_s7 + $0x8] sm:$0xff] }
 0x12e   : > { %v663_v54 = vmul.f32 %v646_v51, %v4340_v58 }
 0x130   : > { %v674_v56 = vmul.f32 %v4387_v39, %v663_v54 }
 0x132   : > { %v685_v57 = vadd.f32 %v4397_v53, %v674_v56 }
 0x135   : > { %3713 = vmatmul.msk.f32.gmra.mxu0 %vm481_vm0, %v682_v40 }
 0x13d   : > { %3714 = vmatmul.msk.f32.gmra.mxu0 %vm481_vm0, %v683_v48 }
 0x145   : > { %3715 = vmatmul.msk.f32.gmra.mxu0 %vm481_vm0, %v684_v52 }
 0x14d   : > { %3716 = vmatmul.msk.f32.gmra.mxu0 %vm481_vm0, %v685_v57 }
 0x198   : > { %v736_v55 = vpop.f32.mrf.mxu0 }
 0x199   : > { %v4461_v61 = vadd.f32 %v3973_v59, %v736_v55 }
 0x19b   : > { %v4487_v9 = vmul.f32 0.35355338, %v4461_v61 }
 0x1a2   : > { %v739_v60 = vpop.f32.mrf.mxu0 }
 0x1a3   : > { %v4458_v28 = vadd.f32 %v3973_v59, %v739_v60 }
 0x1a5   : > { %774 = vrot.lane.b32.xlu2 %v4458_v28, %s4174_s22  ;;  %v4490_v10 = vmul.f32 0.35355338, %v4458_v28  ;;  %v4563_v54 = vpack.i.bf16 %v4461_v61, %v4458_v28 }
 0x1aa   : > { %v742_v58 = vpop.f32.mrf.mxu0 }
 0x1ab   : > { %v4463_v62 = vadd.f32 %v3973_v59, %v742_v58 }
 0x1ad   : > { %812 = vrot.lane.b32.xlu0 %v4463_v62, %s4174_s22  ;;  %772 = vrot.lane.b32.xlu2 %v4461_v61, %s4174_s22  ;;  %v4499_v15 = vmul.f32 0.35355338, %v4463_v62 }
 0x1ae   : > { %v757_v63 = vpop.f32.mrf.mxu3 }
 0x1af   : > { %v4470_v1 = vadd.f32 %v3973_v59, %v757_v63 }
 0x1b1   : > { %v4521_v21 = vmul.f32 0.35355338, %v4470_v1 }
 0x1b2   : > { %v745_v39 = vpop.f32.mrf.mxu0 }
 0x1b3   : > { %v4467_v53 = vadd.f32 %v3973_v59, %v745_v39 }
 0x1b5   : > { %814 = vrot.lane.b32.xlu1 %v4467_v53, %s4174_s22  ;;  %v4506_v16 = vmul.f32 0.35355338, %v4467_v53  ;;  %v4556_v52 = vpack.i.bf16 %v4463_v62, %v4467_v53 }
 0x1ba   : > { %v748_v0 = vpop.f32.mrf.mxu0 }
 0x1bb   : > { %v4473_v3 = vadd.f32 %v3973_v59, %v748_v0 }
 0x1bd   : > { %892 = vrot.lane.b32.xlu1 %v4470_v1, %s4174_s22  ;;  %v4518_v20 = vmul.f32 0.35355338, %v4473_v3 }
 0x1c2   : > { %v751_v2 = vpop.f32.mrf.mxu0 }
 0x1c3   : > { %v4475_v4 = vadd.f32 %v3973_v59, %v751_v2 }
 0x1c5   : > { %853 = vrot.lane.b32.xlu0 %v4475_v4, %s4174_s22  ;;  %851 = vrot.lane.b32.xlu1 %v4473_v3, %s4174_s22  ;;  %v4528_v13 = vmul.f32 0.35355338, %v4475_v4  ;;  %v4579_v57 = vpack.i.bf16 %v4473_v3, %v4475_v4 }
 0x1ca   : > { %v754_v5 = vpop.f32.mrf.mxu0 }
 0x1cb   : > { %v4479_v6 = vadd.f32 %v3973_v59, %v754_v5 }
 0x1cd   : > { %890 = vrot.lane.b32.xlu2 %v4479_v6, %s4174_s22  ;;  %v4509_v17 = vmul.f32 0.35355338, %v4479_v6  ;;  %v4567_v56 = vpack.i.bf16 %v4479_v6, %v4470_v1 }
 0x1ff   : > { %v775_v7 = vpop.permute.xlu2 %774 }
 0x200   : > { %3718 = vmatpush.xpose.msk.msra.mxu1 %vm776_vm11, %v775_v7  ;;  %3850 = vmatpush.xpose.msk.msrb.mxu3 %vm776_vm11, %v775_v7 }
 0x207   : > { %v773_v8 = vpop.permute.xlu2 %772 }
 0x208   : > { %3719 = vmatpush.xpose.msk.msra.mxu1 %vm776_vm11, %v773_v8  ;;  %3851 = vmatpush.xpose.msk.msrb.mxu3 %vm776_vm11, %v773_v8 }
 0x20b   : > { %3720 = vmatmul.msk.f32.vlgmr.msra.gmra.mxu1 %vm776_vm11, %v4487_v9  ;;  %3721 = vmatmul.msk.f32.vlgmr.msrb.gmra.mxu3 %vm776_vm11, %v4490_v10 }
 0x21f   : > { %v813_v12 = vpop.permute.xlu0 %812 }
 0x227   : > { %v815_v11 = vpop.permute.xlu1 %814  ;;  %v891_v14 = vpop.permute.xlu2 %890 }
 0x228   : > { %3722 = vmatpush.xpose.msk.msra.mxu2 %vm776_vm11, %v815_v11 }
 0x22c   : > { %3723 = vmatpush.xpose.msk.msra.mxu2 %vm776_vm11, %v813_v12 }
 0x22f   : > { %v893_v41 = vpop.permute.xlu1 %892  ;;  %3724 = vmatmul.msk.f32.vlgmr.msra.gmra.mxu2 %vm776_vm11, %v4499_v15 }
 0x230   : > { %3730 = vmatpush.xpose.msk.msrb.mxu1 %vm776_vm11, %v893_v41 }
 0x234   : > { %3731 = vmatpush.xpose.msk.msrb.mxu1 %vm776_vm11, %v891_v14 }
 0x237   : > { %3725 = vmatmul.msk.f32.gmra.mxu2 %vm776_vm11, %v4506_v16  ;;  %3732 = vmatmul.msk.f32.vlgmr.msrb.gmra.mxu1 %vm776_vm11, %v4509_v17  ;;  %v854_v18 = vpop.permute.xlu0 %853  ;;  %v852_v19 = vpop.permute.xlu1 %851 }
 0x238   : > { %3726 = vmatpush.xpose.msk.msra.mxu3 %vm776_vm11, %v854_v18 }
 0x23c   : > { %3727 = vmatpush.xpose.msk.msra.mxu3 %vm776_vm11, %v852_v19 }
 0x23f   : > { %3728 = vmatmul.msk.f32.vlgmr.msra.gmra.mxu3 %vm776_vm11, %v4518_v20  ;;  %3733 = vmatmul.msk.f32.gmra.mxu1 %vm776_vm11, %v4521_v21 }
 0x247   : > { %3729 = vmatmul.msk.f32.gmra.mxu3 %vm776_vm11, %v4528_v13 }
 0x288   : > { %v804_v24 = vpop.f32.mrf.mxu1 }
 0x289   : > { %v805_v26 = vadd.f32 %v804_v24, %v768_v23 }
 0x28b   : > { %v928_v29 = vsel %vm927_vm12, %v805_v26, -inf }
 0x28c   : > { %929 = vmax.xlane.f32.xlu0 %v928_v29 }
 0x28e   : > { %v807_v42 = vpop.f32.mrf.mxu3 }
 0x28f   : > { %v808_v30 = vadd.f32 %v807_v42, %v769_v27 }
 0x291   : > { %v931_v31 = vsel %vm927_vm12, %v808_v30, -inf }
 0x292   : > { %932 = vmax.xlane.f32.xlu1 %v931_v31 }
 0x2b2   : > { %v843_v33 = vpop.f32.mrf.mxu2 }
 0x2b3   : > { %v844_v34 = vadd.f32 %v843_v33, %v768_v23 }
 0x2b4   : > { %v921_v25 = vpop.f32.mrf.mxu1 }
 0x2b5   : > { %v934_v35 = vsel %vm927_vm12, %v844_v34, -inf  ;;  %v922_v36 = vadd.f32 %v921_v25, %v768_v23 }
 0x2b6   : > { %935 = vmax.xlane.f32.xlu2 %v934_v35 }
 0x2b7   : > { %v946_v38 = vsel %vm927_vm12, %v922_v36, -inf }
 0x2ba   : > { %v846_v37 = vpop.f32.mrf.mxu2 }
 0x2bb   : > { %v4541_v40 = vadd.f32 %v846_v37, %v769_v27 }
 0x2bc   : > { %v924_v43 = vpop.f32.mrf.mxu1 }
 0x2bd   : > { %v937_v32 = vsel %vm927_vm12, %v4541_v40, -inf  ;;  %v4546_v44 = vadd.f32 %v924_v43, %v769_v27 }
 0x2be   : > { %938 = vmax.xlane.f32.xlu0 %v937_v32  ;;  %947 = vmax.xlane.f32.xlu2 %v946_v38 }
 0x2bf   : > { %v949_v48 = vsel %vm927_vm12, %v4546_v44, -inf }
 0x2c2   : > { %v882_v45 = vpop.f32.mrf.mxu3 }
 0x2c3   : > { %v883_v47 = vadd.f32 %v882_v45, %v768_v23 }
 0x2c5   : > { %v940_v49 = vsel %vm927_vm12, %v883_v47, -inf }
 0x2c6   : > { %950 = vmax.xlane.f32.xlu0 %v949_v48  ;;  %941 = vmax.xlane.f32.xlu1 %v940_v49 }
 0x2ca   : > { %v885_v50 = vpop.f32.mrf.mxu3 }
 0x2cb   : > { %v886_v46 = vadd.f32 %v885_v50, %v769_v27 }
 0x2cd   : > { %v943_v51 = vsel %vm927_vm12, %v886_v46, -inf }
 0x2ce   : > { %944 = vmax.xlane.f32.xlu2 %v943_v51 }
 0x2da   : > { %1269 = vrot.lane.b32.xlu0 %v4458_v28, %s4175_s27 }
 0x2df   : > { %3897 = vrot.lane.b32.xlu1 %v4556_v52, %s4176_s28 }
 0x2e2   : > { %1263 = vrot.lane.b32.xlu0 %v4487_v9, %s4177_s30 }
 0x2e6   : > { %3892 = vrot.lane.b32.xlu2 %v4563_v54, %s4176_s28 }
 0x2e7   : > { %3902 = vrot.lane.b32.xlu1 %v4567_v56, %s4176_s28 }
 0x2ea   : > { %1347 = vrot.lane.b32.xlu0 %v4475_v4, %s4175_s27 }
 0x2ef   : > { %1267 = vrot.lane.b32.xlu1 %v4461_v61, %s4175_s27 }
 0x2f2   : > { %1345 = vrot.lane.b32.xlu0 %v4473_v3, %s4175_s27 }
 0x2f7   : > { %3907 = vrot.lane.b32.xlu1 %v4579_v57, %s4176_s28 }
 0x2fa   : > { %1308 = vrot.lane.b32.xlu0 %v4467_v53, %s4175_s27 }
 0x2ff   : > { %1265 = vrot.lane.b32.xlu1 %v4490_v10, %s4177_s30  ;;  %v930_v63 = vpop.xlane.xlu0 %929 }
 0x300   : > { %v952_v0 = vsub.f32 %v805_v26, %v930_v63 }
 0x302   : > { %v960_v2 = vmul.f32 1.442695, %v952_v0 }
 0x305   : > { %v933_v55 = vpop.xlane.xlu1 %932 }
 0x306   : > { %v953_v59 = vsub.f32 %v808_v30, %v933_v55 }
 0x308   : > { %v962_v60 = vmul.f32 1.442695, %v953_v59 }
 0x30a   : > { %3997 = vpow2.f32 %v962_v60 }
 0x30b   : > { %3999 = vpow2.f32 %v960_v2 }
 0x310   : > { %v4586_v58 = vpop.eup %3997 }
 0x311   : > { %v979_v39 = vsel %vm927_vm12, %v4586_v58, 0.0  ;;  %v4590_v5 = vpop.eup %3999 }
 0x312   : > { %980 = vadd.xlane.f32.xlu2 %v979_v39  ;;  %v976_v7 = vsel %vm927_vm12, %v4590_v5, 0.0 }
 0x329   : > { %v936_v8 = vpop.xlane.xlu2 %935  ;;  %977 = vadd.xlane.f32.xlu1 %v976_v7 }
 0x32a   : > { %v954_v11 = vsub.f32 %v844_v34, %v936_v8 }
 0x32c   : > { %v964_v12 = vmul.f32 1.442695, %v954_v11 }
 0x32e   : > { %4001 = vpow2.f32 %v964_v12 }
 0x331   : > { %v948_v41 = vpop.xlane.xlu2 %947  ;;  %v939_v14 = vpop.xlane.xlu0 %938 }
 0x332   : > { %v958_v18 = vsub.f32 %v922_v36, %v948_v41  ;;  %v955_v39 = vsub.f32 %v4541_v40, %v939_v14 }
 0x334   : > { %v4594_v19 = vpop.eup %4001  ;;  %v972_v23 = vmul.f32 1.442695, %v958_v18  ;;  %v966_v7 = vmul.f32 1.442695, %v955_v39 }
 0x335   : > { %v982_v24 = vsel %vm927_vm12, %v4594_v19, 0.0 }
 0x336   : > { %4003 = vpow2.f32 %v972_v23  ;;  %983 = vadd.xlane.f32.xlu0 %v982_v24  ;;  %v3916_v24 = vpack.i.bf16 %v4467_v53, %v4475_v4 }
 0x339   : > { %v942_v26 = vpop.xlane.xlu1 %941  ;;  %v951_v27 = vpop.xlane.xlu0 %950 }
 0x33a   : > { %v956_v29 = vsub.f32 %v883_v47, %v942_v26  ;;  %v959_v31 = vsub.f32 %v4546_v44, %v951_v27 }
 0x33c   : > { %v4598_v42 = vpop.eup %4003  ;;  %v968_v30 = vmul.f32 1.442695, %v956_v29  ;;  %v974_v34 = vmul.f32 1.442695, %v959_v31 }
 0x33d   : > { %v994_v33 = vsel %vm927_vm12, %v4598_v42, 0.0 }
 0x33e   : > { %4005 = vpow2.f32 %v968_v30  ;;  %995 = vadd.xlane.f32.xlu0 %v994_v33 }
 0x33f   : > { %4007 = vpow2.f32 %v974_v34  ;;  %v3921_v34 = vpack.i.bf16 %v4463_v62, %v4473_v3 }
 0x341   : > { %v945_v25 = vpop.xlane.xlu2 %944 }
 0x342   : > { %v957_v35 = vsub.f32 %v886_v46, %v945_v25  ;;  %1341 = vrot.lane.b32.xlu1 %v4518_v20, %s4177_s30 }
 0x344   : > { %v4605_v36 = vpop.eup %4005  ;;  %v970_v37 = vmul.f32 1.442695, %v957_v35 }
 0x345   : > { %v988_v32 = vsel %vm927_vm12, %v4605_v36, 0.0  ;;  %v4609_v44 = vpop.eup %4007 }
 0x346   : > { %4009 = vpow2.f32 %v970_v37  ;;  %989 = vadd.xlane.f32.xlu0 %v988_v32  ;;  %v997_v50 = vsel %vm927_vm12, %v4609_v44, 0.0 }
 0x347   : > { %4011 = vpow2.f32 %v966_v7 }
 0x349   : > { %v3893_v38 = vpop.permute.xlu2 %3892 }
 0x34a   : > { %v3894_v43 = vunpack.i.l.bf16 %v3893_v38  ;;  %v3895_v48 = vunpack.i.h.bf16 %v3893_v38 }
 0x34c   : > { %v4611_v45 = vpop.eup %4009  ;;  %1146 = vmatpush.msrb.mxu2 %v3894_v43  ;;  %v1270_v47 = vpop.permute.xlu0 %1269 }
 0x34d   : > { %v991_v49 = vsel %vm927_vm12, %v4611_v45, 0.0  ;;  %v4630_v40 = vpop.eup %4011 }
 0x34e   : > { %992 = vadd.xlane.f32.xlu2 %v991_v49  ;;  %1147 = vmatpush.msrb.mxu2 %v3895_v48  ;;  %v985_v14 = vsel %vm927_vm12, %v4630_v40, 0.0 }
 0x34f   : > { %998 = vadd.xlane.f32.xlu0 %v997_v50 }
 0x351   : > { %v3898_v46 = vpop.permute.xlu1 %3897 }
 0x352   : > { %v3899_v51 = vunpack.i.l.bf16 %v3898_v46  ;;  %v3900_v55 = vunpack.i.h.bf16 %v3898_v46 }
 0x354   : > { %1181 = vmatpush.msrb.mxu3 %v3899_v51  ;;  %v4617_v59 = vpop.permute.xlu0 %1263 }
 0x356   : > { %1182 = vmatpush.msrb.mxu3 %v3900_v55 }
 0x358   : > { %3744 = vmatpush.xpose.msk.msra.mxu3 %vm776_vm11, %v1270_v47 }
 0x359   : > { %v3903_v60 = vpop.permute.xlu1 %3902 }
 0x35a   : > { %v3904_v63 = vunpack.i.l.bf16 %v3903_v60  ;;  %v3905_v0 = vunpack.i.h.bf16 %v3903_v60 }
 0x35c   : > { %1251 = vmatpush.msra.mxu2 %v3904_v63  ;;  %v4621_v2 = vpop.permute.xlu0 %1347 }
 0x35e   : > { %1252 = vmatpush.msra.mxu2 %v3905_v0 }
 0x361   : > { %v1268_v8 = vpop.permute.xlu1 %1267 }
 0x362   : > { %3745 = vmatpush.xpose.msk.msra.mxu3 %vm776_vm11, %v1268_v8 }
 0x363   : > { %1343 = vrot.lane.b32.xlu0 %v4528_v13, %s4177_s30 }
 0x364   : > { %v4626_v11 = vpop.permute.xlu0 %1345 }
 0x366   : > { %1306 = vrot.lane.b32.xlu2 %v4463_v62, %s4175_s27 }
 0x369   : > { %v3908_v12 = vpop.permute.xlu1 %3907 }
 0x36a   : > { %v3909_v41 = vunpack.i.l.bf16 %v3908_v12  ;;  %v3910_v18 = vunpack.i.h.bf16 %v3908_v12 }
 0x36b   : > { %1384 = vrot.lane.b32.xlu0 %v4479_v6, %s4175_s27 }
 0x36c   : > { %1216 = vmatpush.msra.mxu1 %v3909_v41  ;;  %986 = vadd.xlane.f32.xlu1 %v985_v14  ;;  %v1309_v23 = vpop.permute.xlu0 %1308 }
 0x36e   : > { %1382 = vrot.lane.b32.xlu2 %v4521_v21, %s4177_s30  ;;  %1217 = vmatpush.msra.mxu1 %v3910_v18 }
 0x370   : > { %3748 = vmatpush.xpose.msk.msrb.mxu1 %vm776_vm11, %v1309_v23 }
 0x371   : > { %v4650_v26 = vpop.permute.xlu1 %1265 }
 0x373   : > { %1380 = vrot.lane.b32.xlu0 %v4509_v17, %s4177_s30 }
 0x376   : > { %1760 = vrot.lane.b32.xlu2 %v4458_v28, %s4178_s17 }
 0x37b   : > { %3917 = vrot.lane.b32.xlu0 %v3916_v24, %s4179_s18 }
 0x385   : > { %1302 = vrot.lane.b32.xlu1 %v4499_v15, %s4177_s30  ;;  %v981_v29 = vpop.xlane.xlu2 %980 }
 0x386   : > { %4013 = vrcp.f32 %v981_v29  ;;  %v1026_v60 = vand.u32 2147483648, %v981_v29  ;;  %vm1020_vm3 = vweird.f32 %v981_v29  ;;  %v1024_v63 = vand.u32 2147483647, %v981_v29 }
 0x388   : > { %v1027_v41 = vor.u32 1.1754944e-38, %v1026_v60  ;;  %vm1025_vm5 = vcmp.eq.f32.partialorder %v1024_v63, 8.507059e+37 }
 0x38c   : > { %v4014_v30 = vpop.eup %4013 }
 0x38d   : > { %1386 = vrot.lane.b32.xlu1 %v4470_v1, %s4175_s27  ;;  %v1016_v31 = vmul.f32 %v4014_v30, %v981_v29  ;;  %vm1021_vm2 = vweird.f32 %v4014_v30  ;;  %s4187_s27 = smov 24  }
 0x38e   : > { %vm1022_vm4 = vmor %vm1020_vm3, %vm1021_vm2 }
 0x38f   : > { %v1017_v25 = vsub.f32 1.0, %v1016_v31 }
 0x391   : > { %v1018_v47 = vmul.f32 %v4014_v30, %v1017_v25 }
 0x393   : > { %v1019_v51 = vadd.f32 %v4014_v30, %v1018_v47 }
 0x395   : > { %1304 = vrot.lane.b32.xlu1 %v4506_v16, %s4177_s30  ;;  %v1023_v7 = vsel %vm1022_vm4, %v4014_v30, %v1019_v51 }
 0x396   : > { %v1028_v18 = vsel %vm1025_vm5, %v1027_v41, %v1023_v7 }
 0x397   : > { %v1029_v29 = vmul.f32 %v4586_v58, %v1028_v18 }
 0x39c   : > { %v978_v27 = vpop.xlane.xlu1 %977 }
 0x39d   : > { %4015 = vrcp.f32 %v978_v27  ;;  %3912 = vrot.lane.b32.xlu1 %v4563_v54, %s4179_s18  ;;  %v1011_v32 = vand.u32 2147483648, %v978_v27  ;;  %v1009_v43 = vand.u32 2147483647, %v978_v27  ;;  %vm1005_vm14 = vweird.f32 %v978_v27 }
 0x39f   : > { %v1012_v50 = vor.u32 1.1754944e-38, %v1011_v32  ;;  %vm1010_vm1 = vcmp.eq.f32.partialorder %v1009_v43, 8.507059e+37 }
 0x3a3   : > { %v4016_v33 = vpop.eup %4015 }
 0x3a4   : > { %v1001_v35 = vmul.f32 %v4016_v33, %v978_v27  ;;  %vm1006_vm13 = vweird.f32 %v4016_v33 }
 0x3a5   : > { %3922 = vrot.lane.b32.xlu1 %v3921_v34, %s4179_s18  ;;  %vm1007_vm15 = vmor %vm1005_vm14, %vm1006_vm13 }
 0x3a6   : > { %v1002_v37 = vsub.f32 1.0, %v1001_v35 }
 0x3a8   : > { %v1003_v38 = vmul.f32 %v4016_v33, %v1002_v37 }
 0x3a9   : > { %v984_v48 = vpop.xlane.xlu0 %983 }
 0x3aa   : > { %v1004_v49 = vadd.f32 %v4016_v33, %v1003_v38  ;;  %4017 = vrcp.f32 %v984_v48  ;;  %v1039_v24 = vand.u32 2147483647, %v984_v48  ;;  %vm1035_vm7 = vweird.f32 %v984_v48 }
 0x3ac   : > { %v1008_v46 = vsel %vm1007_vm15, %v4016_v33, %v1004_v49  ;;  %vm1040_vm9 = vcmp.eq.f32.partialorder %v1039_v24, 8.507059e+37 }
 0x3ad   : > { %v1013_v55 = vsel %vm1010_vm1, %v1012_v50, %v1008_v46 }
 0x3ae   : > { %v1014_v39 = vmul.f32 %v4590_v5, %v1013_v55  ;;  %v1041_v5 = vand.u32 2147483648, %v984_v48 }
 0x3b0   : > { %v4018_v0 = vpop.eup %4017  ;;  %3734 = vmatmul.msk.f32.vlgmr.msrb.gmra.mxu2 %vm927_vm12, %v1014_v39  ;;  %v1042_v31 = vor.u32 1.1754944e-38, %v1041_v5 }
 0x3b1   : > { %v1031_v8 = vmul.f32 %v4018_v0, %v984_v48  ;;  %3752 = vmatpush.xpose.msk.msrb.mxu2 %vm776_vm11, %v4621_v2  ;;  %v996_v12 = vpop.xlane.xlu0 %995  ;;  %vm1036_vm6 = vweird.f32 %v4018_v0 }
 0x3b2   : > { %4019 = vrcp.f32 %v996_v12  ;;  %vm1037_vm8 = vmor %vm1035_vm7, %vm1036_vm6  ;;  %v1101_v37 = vand.u32 2147483648, %v996_v12  ;;  %v1099_v58 = vand.u32 2147483647, %v996_v12  ;;  %vm1095_vm13 = vweird.f32 %v996_v12 }
 0x3b3   : > { %v1032_v14 = vsub.f32 1.0, %v1031_v8 }
 0x3b4   : > { %v1102_v47 = vor.u32 1.1754944e-38, %v1101_v37  ;;  %vm1100_vm15 = vcmp.eq.f32.partialorder %v1099_v58, 8.507059e+37 }
 0x3b5   : > { %v1033_v23 = vmul.f32 %v4018_v0, %v1032_v14  ;;  %3753 = vmatpush.xpose.msk.msrb.mxu2 %vm776_vm11, %v4626_v11 }
 0x3b7   : > { %v1034_v27 = vadd.f32 %v4018_v0, %v1033_v23 }
 0x3b8   : > { %v4020_v30 = vpop.eup %4019  ;;  %3735 = vmatmul.msk.f32.gmra.mxu2 %vm927_vm12, %v1029_v29 }
 0x3b9   : > { %v1038_v2 = vsel %vm1037_vm8, %v4018_v0, %v1034_v27  ;;  %v1091_v33 = vmul.f32 %v4020_v30, %v996_v12  ;;  %v990_v34 = vpop.xlane.xlu0 %989  ;;  %vm1096_vm10 = vweird.f32 %v4020_v30 }
 0x3ba   : > { %4021 = vrcp.f32 %v990_v34  ;;  %v1043_v35 = vsel %vm1040_vm9, %v1042_v31, %v1038_v2  ;;  %vm1097_vm14 = vmor %vm1095_vm13, %vm1096_vm10  ;;  %v1071_v60 = vand.u32 2147483648, %v990_v34  ;;  %v1069_v63 = vand.u32 2147483647, %v990_v34 }
 0x3bb   : > { %v1092_v25 = vsub.f32 1.0, %v1091_v33  ;;  %v1044_v11 = vmul.f32 %v4594_v19, %v1043_v35  ;;  %vm1065_vm2 = vweird.f32 %v990_v34 }
 0x3bc   : > { %v1072_v8 = vor.u32 1.1754944e-38, %v1071_v60  ;;  %vm1070_vm4 = vcmp.eq.f32.partialorder %v1069_v63, 8.507059e+37 }
 0x3bd   : > { %v1093_v32 = vmul.f32 %v4020_v30, %v1092_v25  ;;  %3736 = vmatmul.msk.f32.vlgmr.msrb.gmra.mxu3 %vm927_vm12, %v1044_v11 }
 0x3bf   : > { %v1094_v38 = vadd.f32 %v4020_v30, %v1093_v32 }
 0x3c0   : > { %v4022_v43 = vpop.eup %4021 }
 0x3c1   : > { %v1098_v48 = vsel %vm1097_vm14, %v4020_v30, %v1094_v38  ;;  %v1061_v49 = vmul.f32 %v4022_v43, %v990_v34  ;;  %v993_v50 = vpop.xlane.xlu2 %992  ;;  %vm1066_vm1 = vweird.f32 %v4022_v43 }
 0x3c2   : > { %4023 = vrcp.f32 %v993_v50  ;;  %v999_v46 = vpop.xlane.xlu0 %998  ;;  %v1103_v51 = vsel %vm1100_vm15, %v1102_v47, %v1098_v48  ;;  %vm1067_vm3 = vmor %vm1065_vm2, %vm1066_vm1  ;;  %v1086_v27 = vand.u32 2147483648, %v993_v50  ;;  %v1084_v2 = vand.u32 2147483647, %v993_v50 }
 0x3c3   : > { %v1062_v55 = vsub.f32 1.0, %v1061_v49  ;;  %4025 = vrcp.f32 %v999_v46  ;;  %v1104_v19 = vmul.f32 %v4598_v42, %v1103_v51  ;;  %v1116_v31 = vand.u32 2147483648, %v999_v46  ;;  %v1342_v49 = vpop.permute.xlu1 %1341 }
 0x3c4   : > { %v1114_v34 = vand.u32 2147483647, %v999_v46  ;;  %vm1080_vm7 = vweird.f32 %v993_v50  ;;  %v1087_v35 = vor.u32 1.1754944e-38, %v1086_v27  ;;  %vm1110_vm9 = vweird.f32 %v999_v46 }
 0x3c5   : > { %v1063_v39 = vmul.f32 %v4022_v43, %v1062_v55  ;;  %3740 = vmatmul.msk.f32.vlgmr.msra.gmra.mxu2 %vm927_vm12, %v1104_v19  ;;  %vm1085_vm10 = vcmp.eq.f32.partialorder %v1084_v2, 8.507059e+37 }
 0x3c6   : > { %vm1115_vm14 = vcmp.eq.f32.partialorder %v1114_v34, 8.507059e+37 }
 0x3c7   : > { %v1064_v0 = vadd.f32 %v4022_v43, %v1063_v39 }
 0x3c8   : > { %v4024_v7 = vpop.eup %4023 }
 0x3c9   : > { %v4026_v12 = vpop.eup %4025  ;;  %v1068_v41 = vsel %vm1067_vm3, %v4022_v43, %v1064_v0  ;;  %v1076_v14 = vmul.f32 %v4024_v7, %v993_v50  ;;  %v1307_v18 = vpop.permute.xlu2 %1306  ;;  %vm1081_vm5 = vweird.f32 %v4024_v7 }
 0x3ca   : > { %v1106_v23 = vmul.f32 %v4026_v12, %v999_v46  ;;  %3749 = vmatpush.xpose.msk.msrb.mxu1 %vm776_vm11, %v1307_v18  ;;  %v1073_v42 = vsel %vm1070_vm4, %v1072_v8, %v1068_v41  ;;  %vm1111_vm6 = vweird.f32 %v4026_v12  ;;  %vm1082_vm8 = vmor %vm1080_vm7, %vm1081_vm5 }
 0x3cb   : > { %v1077_v5 = vsub.f32 1.0, %v1076_v14  ;;  %v1074_v24 = vmul.f32 %v4605_v36, %v1073_v42  ;;  %vm1112_vm13 = vmor %vm1110_vm9, %vm1111_vm6  ;;  %v1117_v36 = vor.u32 1.1754944e-38, %v1116_v31 }
 0x3cc   : > { %v1107_v29 = vsub.f32 1.0, %v1106_v23 }
 0x3cd   : > { %3738 = vmatmul.msk.f32.vlgmr.msra.gmra.mxu1 %vm927_vm12, %v1074_v24  ;;  %v1078_v30 = vmul.f32 %v4024_v7, %v1077_v5 }
 0x3ce   : > { %v1108_v33 = vmul.f32 %v4026_v12, %v1107_v29 }
 0x3cf   : > { %v1079_v25 = vadd.f32 %v4024_v7, %v1078_v30 }
 0x3d0   : > { %v1109_v37 = vadd.f32 %v4026_v12, %v1108_v33 }
 0x3d1   : > { %v1083_v11 = vsel %vm1082_vm8, %v4024_v7, %v1079_v25 }
 0x3d2   : > { %v1088_v32 = vsel %vm1085_vm10, %v1087_v35, %v1083_v11  ;;  %v1113_v58 = vsel %vm1112_vm13, %v4026_v12, %v1109_v37  ;;  %v3742_v35 = vld [vmem:[%s5599_s7 + $0x10] sm:$0xff] }
 0x3d3   : > { %v1089_v38 = vmul.f32 %v4611_v45, %v1088_v32  ;;  %v1118_v43 = vsel %vm1115_vm14, %v1117_v36, %v1113_v58  ;;  %v3743_v32 = vld [vmem:[%s5599_s7 + $0x18] sm:$0xff] }
 0x3d4   : > { %v1119_v47 = vmul.f32 %v4609_v44, %v1118_v43 }
 0x3d5   : > { %v1344_v48 = vpop.permute.xlu0 %1343  ;;  %3739 = vmatmul.msk.f32.gmra.mxu1 %vm927_vm12, %v1089_v38 }
 0x3d6   : > { %3741 = vmatmul.msk.f32.gmra.mxu2 %vm927_vm12, %v1119_v47 }
 0x3dd   : > { %v1385_v50 = vpop.permute.xlu0 %1384 }
 0x3de   : > { %3754 = vmatmul.msk.f32.vlgmr.msrb.gmra.mxu2 %vm776_vm11, %v1342_v49 }
 0x3df   : > { %v987_v46 = vpop.xlane.xlu1 %986 }
 0x3e0   : > { %4027 = vrcp.f32 %v987_v46  ;;  %v1056_v60 = vand.u32 2147483648, %v987_v46  ;;  %v1054_v44 = vand.u32 2147483647, %v987_v46  ;;  %vm1050_vm1 = vweird.f32 %v987_v46 }
 0x3e2   : > { %v1057_v7 = vor.u32 1.1754944e-38, %v1056_v60  ;;  %vm1055_vm3 = vcmp.eq.f32.partialorder %v1054_v44, 8.507059e+37 }
 0x3e5   : > { %v1381_v51 = vpop.permute.xlu0 %1380 }
 0x3e6   : > { %v4028_v55 = vpop.eup %4027  ;;  %3755 = vmatmul.msk.f32.gmra.mxu2 %vm776_vm11, %v1344_v48 }
 0x3e7   : > { %v1046_v19 = vmul.f32 %v4028_v55, %v987_v46  ;;  %vm1051_vm15 = vweird.f32 %v4028_v55 }
 0x3e8   : > { %vm1052_vm2 = vmor %vm1050_vm1, %vm1051_vm15 }
 0x3e9   : > { %v1047_v45 = vsub.f32 1.0, %v1046_v19 }
 0x3eb   : > { %v1048_v39 = vmul.f32 %v4028_v55, %v1047_v45 }
 0x3ed   : > { %v3918_v63 = vpop.permute.xlu0 %3917  ;;  %v1049_v0 = vadd.f32 %v4028_v55, %v1048_v39 }
 0x3ee   : > { %v3920_v8 = vunpack.i.h.bf16 %v3918_v63  ;;  %v3919_v12 = vunpack.i.l.bf16 %v3918_v63 }
 0x3ef   : > { %v1053_v41 = vsel %vm1052_vm2, %v4028_v55, %v1049_v0 }
 0x3f0   : > { %1672 = vmatpush.msra.mxu1 %v3920_v8  ;;  %1707 = vmatpush.msra.mxu2 %v3919_v12  ;;  %v1058_v14 = vsel %vm1055_vm3, %v1057_v7, %v1053_v41 }
 0x3f1   : > { %v1059_v18 = vmul.f32 %v4630_v40, %v1058_v14  ;;  %v1383_v40 = vpop.permute.xlu2 %1382 }
 0x3f3   : > { %3737 = vmatmul.msk.f32.gmra.mxu3 %vm927_vm12, %v1059_v18 }
 0x3f7   : > { %v1303_v23 = vpop.permute.xlu1 %1302 }
 0x3f8   : > { %3750 = vmatmul.msk.f32.vlgmr.msrb.gmra.mxu1 %vm776_vm11, %v1303_v23 }
 0x3fb   : > { %3746 = vmatmul.msk.f32.vlgmr.msra.gmra.mxu3 %vm776_vm11, %v4617_v59  ;;  %v1761_v59 = vpop.permute.xlu2 %1760 }
 0x3ff   : > { %v1387_v42 = vpop.permute.xlu1 %1386 }
 0x400   : > { %3756 = vmatpush.xpose.msk.msrb.mxu3 %vm776_vm11, %v1387_v42 }
 0x403   : > { %3747 = vmatmul.msk.f32.gmra.mxu3 %vm776_vm11, %v4650_v26 }
 0x404   : > { %3757 = vmatpush.xpose.msk.msrb.mxu3 %vm776_vm11, %v1385_v50 }
 0x407   : > { %v1305_v5 = vpop.permute.xlu1 %1304 }
 0x408   : > { %3751 = vmatmul.msk.f32.gmra.mxu1 %vm776_vm11, %v1305_v5 }
 0x40b   : > { %3758 = vmatmul.msk.f32.vlgmr.msrb.gmra.mxu3 %vm776_vm11, %v1381_v51 }
 0x40f   : > { %v3913_v24 = vpop.permute.xlu1 %3912 }
 0x410   : > { %v3914_v29 = vunpack.i.l.bf16 %v3913_v24  ;;  %v3915_v27 = vunpack.i.h.bf16 %v3913_v24 }
 0x412   : > { %1637 = vmatpush.msrb.mxu0 %v3914_v29 }
 0x413   : > { %3759 = vmatmul.msk.f32.gmra.mxu3 %vm776_vm11, %v1383_v40 }
 0x414   : > { %1638 = vmatpush.msrb.mxu0 %v3915_v27 }
 0x416   : > { %3770 = vmatpush.xpose.msk.msra.mxu0 %vm776_vm11, %v1761_v59 }
 0x417   : > { %v3923_v30 = vpop.permute.xlu1 %3922 }
 0x418   : > { %v3925_v26 = vunpack.i.h.bf16 %v3923_v30  ;;  %v3924_v2 = vunpack.i.l.bf16 %v3923_v30 }
 0x41a   : > { %1673 = vmatpush.msra.mxu1 %v3925_v26  ;;  %1708 = vmatpush.msra.mxu2 %v3924_v2 }
 0x433   : > { %v4693_v31 = vpop.f32.mrf.mxu2 }
 0x43b   : > { %v4695_v33 = vpop.f32.mrf.mxu2 }
 0x440   : > { %v4709_v47 = vpop.f32.mrf.mxu3 }
 0x448   : > { %v4697_v34 = vpop.f32.mrf.mxu2 }
 0x44a   : > { %v4711_v48 = vpop.f32.mrf.mxu1 }
 0x452   : > { %v4715_v50 = vpop.f32.mrf.mxu1 }
 0x459   : > { %v4699_v25 = vpop.f32.mrf.mxu2 }
 0x461   : > { %v1374_v37 = vpop.f32.mrf.mxu2 }
 0x462   : > { %v1375_v11 = vadd.f32 %v3742_v35, %v1374_v37 }
 0x464   : > { %v1431_v36 = vsel %vm927_vm12, %v1375_v11, -inf }
 0x465   : > { %1432 = vmax.xlane.f32.xlu2 %v1431_v36 }
 0x469   : > { %v1377_v58 = vpop.f32.mrf.mxu2 }
 0x46a   : > { %v1378_v38 = vadd.f32 %v3743_v32, %v1377_v58 }
 0x46c   : > { %v1434_v43 = vsel %vm927_vm12, %v1378_v38, -inf }
 0x46d   : > { %1435 = vmax.xlane.f32.xlu2 %v1434_v43 }
 0x475   : > { %v1335_v19 = vpop.f32.mrf.mxu1 }
 0x476   : > { %v4713_v49 = vpop.f32.mrf.mxu3  ;;  %v4718_v45 = vadd.f32 %v3742_v35, %v1335_v19 }
 0x478   : > { %v1425_v63 = vsel %vm927_vm12, %v4718_v45, -inf }
 0x47e   : > { %v1296_v46 = vpop.f32.mrf.mxu3 }
 0x47f   : > { %v1297_v51 = vadd.f32 %v3742_v35, %v1296_v46 }
 0x481   : > { %v1419_v55 = vsel %vm927_vm12, %v1297_v51, -inf }
 0x482   : > { %1420 = vmax.xlane.f32.xlu1 %v1419_v55 }
 0x485   : > { %v1338_v0 = vpop.f32.mrf.mxu1 }
 0x486   : > { %v1299_v60 = vpop.f32.mrf.mxu3  ;;  %v4723_v7 = vadd.f32 %v3743_v32, %v1338_v0 }
 0x487   : > { %v1300_v39 = vadd.f32 %v3743_v32, %v1299_v60 }
 0x488   : > { %v1428_v41 = vsel %vm927_vm12, %v4723_v7, -inf }
 0x489   : > { %v1422_v44 = vsel %vm927_vm12, %v1300_v39, -inf }
 0x48a   : > { %1423 = vmax.xlane.f32.xlu0 %v1422_v44  ;;  %1426 = vmax.xlane.f32.xlu1 %v1425_v63 }
 0x48e   : > { %v1413_v8 = vpop.f32.mrf.mxu3 }
 0x48f   : > { %v4725_v12 = vadd.f32 %v3742_v35, %v1413_v8 }
 0x491   : > { %v1437_v14 = vsel %vm927_vm12, %v4725_v12, -inf }
 0x492   : > { %1429 = vmax.xlane.f32.xlu0 %v1428_v41  ;;  %1438 = vmax.xlane.f32.xlu1 %v1437_v14 }
 0x496   : > { %v1416_v18 = vpop.f32.mrf.mxu3 }
 0x497   : > { %v1417_v23 = vadd.f32 %v3743_v32, %v1416_v18 }
 0x499   : > { %v1440_v42 = vsel %vm927_vm12, %v1417_v23, -inf }
 0x49a   : > { %1441 = vmax.xlane.f32.xlu2 %v1440_v42 }
 0x4b2   : > { %1754 = vrot.lane.b32.xlu2 %v4487_v9, %s4180_s24 }
 0x4ba   : > { %1756 = vrot.lane.b32.xlu2 %v4490_v10, %s4180_s24 }
 0x4c2   : > { %3927 = vrot.lane.b32.xlu2 %v4567_v56, %s4179_s18  ;;  %s4183_s18 = smov 104  }
 0x4ca   : > { %1797 = vrot.lane.b32.xlu2 %v4463_v62, %s4178_s17 }
 0x4d2   : > { %1793 = vrot.lane.b32.xlu2 %v4499_v15, %s4180_s24 }
 0x4d8   : > { %v1433_v5 = vpop.xlane.xlu2 %1432 }
 0x4d9   : > { %v1447_v40 = vsub.f32 %v1375_v11, %v1433_v5 }
 0x4db   : > { %v1459_v24 = vmul.f32 1.442695, %v1447_v40 }
 0x4dd   : > { %4029 = vpow2.f32 %v1459_v24 }
 0x4e0   : > { %v1436_v29 = vpop.xlane.xlu2 %1435 }
 0x4e1   : > { %v1448_v27 = vsub.f32 %v1378_v38, %v1436_v29 }
 0x4e3   : > { %v1461_v59 = vmul.f32 1.442695, %v1448_v27  ;;  %v4742_v2 = vpop.eup %4029 }
 0x4e4   : > { %v1479_v37 = vsel %vm927_vm12, %v4742_v2, 0.0 }
 0x4e5   : > { %4031 = vpow2.f32 %v1461_v59 }
 0x4eb   : > { %v4746_v58 = vpop.eup %4031 }
 0x4ec   : > { %v1482_v46 = vsel %vm927_vm12, %v4746_v58, 0.0 }
 0x4f5   : > { %v1421_v30 = vpop.xlane.xlu1 %1420 }
 0x4f6   : > { %v1443_v26 = vsub.f32 %v1297_v51, %v1421_v30 }
 0x4f8   : > { %v1451_v35 = vmul.f32 1.442695, %v1443_v26 }
 0x4fa   : > { %4033 = vpow2.f32 %v1451_v35 }
 0x4fb   : > { %1480 = vadd.xlane.f32.xlu2 %v1479_v37 }
 0x4fd   : > { %v1424_v36 = vpop.xlane.xlu0 %1423  ;;  %v1427_v14 = vpop.xlane.xlu1 %1426 }
 0x4fe   : > { %v1444_v32 = vsub.f32 %v1300_v39, %v1424_v36  ;;  %v1445_v5 = vsub.f32 %v4718_v45, %v1427_v14 }
 0x500   : > { %v4748_v11 = vpop.eup %4033  ;;  %v1453_v43 = vmul.f32 1.442695, %v1444_v32  ;;  %v1455_v40 = vmul.f32 1.442695, %v1445_v5 }
 0x501   : > { %v1467_v38 = vsel %vm927_vm12, %v4748_v11, 0.0 }
 0x502   : > { %1468 = vadd.xlane.f32.xlu0 %v1467_v38  ;;  %4035 = vpow2.f32 %v1453_v43 }
 0x503   : > { %1483 = vadd.xlane.f32.xlu2 %v1482_v46 }
 0x505   : > { %v1439_v24 = vpop.xlane.xlu1 %1438  ;;  %v1430_v27 = vpop.xlane.xlu0 %1429 }
 0x506   : > { %v1446_v30 = vsub.f32 %v4723_v7, %v1430_v27 }
 0x508   : > { %v4754_v51 = vpop.eup %4035  ;;  %v1457_v45 = vmul.f32 1.442695, %v1446_v30 }
 0x509   : > { %v1470_v55 = vsel %vm927_vm12, %v4754_v51, 0.0 }
 0x50a   : > { %1471 = vadd.xlane.f32.xlu1 %v1470_v55 }
 0x50d   : > { %v1442_v19 = vpop.xlane.xlu2 %1441 }
 0x50e   : > { %v1450_v8 = vsub.f32 %v1417_v23, %v1442_v19 }
 0x510   : > { %v1465_v41 = vmul.f32 1.442695, %v1450_v8 }
 0x512   : > { %4037 = vpow2.f32 %v1465_v41 }
 0x513   : > { %4039 = vpow2.f32 %v1455_v40 }
 0x515   : > { %v4758_v60 = vpop.permute.xlu2 %1754 }
 0x516   : > { %1838 = vrot.lane.b32.xlu0 %v4475_v4, %s4178_s17 }
 0x518   : > { %v4782_v18 = vpop.eup %4037 }
 0x519   : > { %v1488_v42 = vsel %vm927_vm12, %v4782_v18, 0.0  ;;  %v4788_v59 = vpop.eup %4039 }
 0x51a   : > { %v1473_v26 = vsel %vm927_vm12, %v4788_v59, 0.0 }
 0x51b   : > { %1877 = vrot.lane.b32.xlu2 %v4470_v1, %s4178_s17 }
 0x51d   : > { %v4764_v39 = vpop.permute.xlu2 %1756 }
 0x51e   : > { %1799 = vrot.lane.b32.xlu0 %v4467_v53, %s4178_s17 }
 0x523   : > { %1871 = vrot.lane.b32.xlu2 %v4509_v17, %s4180_s24  ;;  %1758 = vrot.lane.b32.xlu1 %v4461_v61, %s4178_s17 }
 0x525   : > { %v3928_v44 = vpop.permute.xlu2 %3927 }
 0x526   : > { %v3929_v63 = vunpack.i.l.bf16 %v3928_v44  ;;  %1836 = vrot.lane.b32.xlu0 %v4473_v3, %s4178_s17  ;;  %v3930_v0 = vunpack.i.h.bf16 %v3928_v44 }
 0x528   : > { %1742 = vmatpush.msra.mxu3 %v3929_v63 }
 0x52a   : > { %1743 = vmatpush.msra.mxu3 %v3930_v0 }
 0x52b   : > { %3932 = vrot.lane.b32.xlu2 %v4563_v54, %s4181_s25 }
 0x52d   : > { %v4790_v23 = vpop.permute.xlu2 %1797 }
 0x52e   : > { %1832 = vrot.lane.b32.xlu0 %v4518_v20, %s4180_s24 }
 0x533   : > { %2249 = vrot.lane.b32.xlu2 %v4461_v61, %s4182_s26  ;;  %v1449_v61 = vsub.f32 %v4725_v12, %v1439_v24 }
 0x535   : > { %v1463_v29 = vmul.f32 1.442695, %v1449_v61  ;;  %v4797_v37 = vpop.permute.xlu2 %1793 }
 0x536   : > { %1834 = vrot.lane.b32.xlu0 %v4528_v13, %s4180_s24 }
 0x537   : > { %4041 = vpow2.f32 %v1463_v29 }
 0x538   : > { %4043 = vpow2.f32 %v1457_v45 }
 0x53d   : > { %v4795_v35 = vpop.eup %4041 }
 0x53e   : > { %v1485_v12 = vsel %vm927_vm12, %v4795_v35, 0.0  ;;  %v4803_v36 = vpop.eup %4043 }
 0x53f   : > { %v1476_v32 = vsel %vm927_vm12, %v4803_v36, 0.0 }
 0x54d   : > { %1489 = vadd.xlane.f32.xlu1 %v1488_v42 }
 0x560   : > { %1474 = vadd.xlane.f32.xlu0 %v1473_v26 }
 0x566   : > { %1875 = vrot.lane.b32.xlu1 %v4479_v6, %s4178_s17 }
 0x568   : > { %1486 = vadd.xlane.f32.xlu0 %v1485_v12 }
 0x56e   : > { %v1481_v7 = vpop.xlane.xlu2 %1480  ;;  %2251 = vrot.lane.b32.xlu1 %v4458_v28, %s4182_s26 }
 0x56f   : > { %4045 = vrcp.f32 %v1481_v7  ;;  %v1562_v44 = vand.u32 2147483648, %v1481_v7  ;;  %v1560_v0 = vand.u32 2147483647, %v1481_v7  ;;  %vm1556_vm5 = vweird.f32 %v1481_v7 }
 0x570   : > { %1477 = vadd.xlane.f32.xlu0 %v1476_v32 }
 0x571   : > { %v1563_v28 = vor.u32 1.1754944e-38, %v1562_v44  ;;  %vm1561_vm7 = vcmp.eq.f32.partialorder %v1560_v0, 8.507059e+37 }
 0x575   : > { %v4046_v43 = vpop.eup %4045  ;;  %v1469_v38 = vpop.xlane.xlu0 %1468 }
 0x576   : > { %v1552_v46 = vmul.f32 %v4046_v43, %v1481_v7  ;;  %4047 = vrcp.f32 %v1469_v38  ;;  %v1484_v55 = vpop.xlane.xlu2 %1483  ;;  %vm1557_vm4 = vweird.f32 %v4046_v43  ;;  %v1502_v30 = vand.u32 2147483648, %v1469_v38 }
 0x577   : > { %4049 = vrcp.f32 %v1484_v55  ;;  %vm1558_vm6 = vmor %vm1556_vm5, %vm1557_vm4  ;;  %v1500_v7 = vand.u32 2147483647, %v1469_v38  ;;  %v1577_v32 = vand.u32 2147483648, %v1484_v55  ;;  %vm1496_vm10 = vweird.f32 %v1469_v38 }
 0x578   : > { %v1553_v19 = vsub.f32 1.0, %v1552_v46  ;;  %v1503_v44 = vor.u32 1.1754944e-38, %v1502_v30  ;;  %vm1571_vm14 = vweird.f32 %v1484_v55 }
 0x579   : > { %vm1501_vm15 = vcmp.eq.f32.partialorder %v1500_v7, 8.507059e+37 }
 0x57a   : > { %v1554_v63 = vmul.f32 %v4046_v43, %v1553_v19 }
 0x57c   : > { %v4048_v8 = vpop.eup %4047  ;;  %v1555_v41 = vadd.f32 %v4046_v43, %v1554_v63 }
 0x57d   : > { %v4050_v14 = vpop.eup %4049  ;;  %v1492_v42 = vmul.f32 %v4048_v8, %v1469_v38  ;;  %v1472_v24 = vpop.xlane.xlu1 %1471  ;;  %vm1497_vm8 = vweird.f32 %v4048_v8 }
 0x57e   : > { %v1559_v5 = vsel %vm1558_vm6, %v4046_v43, %v1555_v41  ;;  %v1567_v40 = vmul.f32 %v4050_v14, %v1484_v55  ;;  %v1878_v61 = vpop.permute.xlu2 %1877  ;;  %4051 = vrcp.f32 %v1472_v24  ;;  %vm1572_vm9 = vweird.f32 %v4050_v14  ;;  %vm1498_vm13 = vmor %vm1496_vm10, %vm1497_vm8 }
 0x57f   : > { %v1564_v29 = vsel %vm1561_vm7, %v1563_v28, %v1559_v5  ;;  %v1493_v27 = vsub.f32 1.0, %v1492_v42  ;;  %3782 = vmatpush.xpose.msk.msrb.mxu3 %vm776_vm11, %v1878_v61  ;;  %v1575_v43 = vand.u32 2147483647, %v1484_v55  ;;  %vm1573_vm1 = vmor %vm1571_vm14, %vm1572_vm9  ;;  %vm1511_vm4 = vweird.f32 %v1472_v24 }
 0x580   : > { %v1568_v26 = vsub.f32 1.0, %v1567_v40  ;;  %v1565_v45 = vmul.f32 %v4742_v2, %v1564_v29  ;;  %v1578_v2 = vor.u32 1.1754944e-38, %v1577_v32 }
 0x581   : > { %v1494_v12 = vmul.f32 %v4048_v8, %v1493_v27  ;;  %vm1576_vm2 = vcmp.eq.f32.partialorder %v1575_v43, 8.507059e+37  ;;  %v1517_v27 = vand.u32 2147483648, %v1472_v24 }
 0x582   : > { %v1569_v46 = vmul.f32 %v4050_v14, %v1568_v26  ;;  %3764 = vmatmul.msk.f32.vlgmr.msra.gmra.mxu2 %vm927_vm12, %v1565_v45 }
 0x583   : > { %v1495_v19 = vadd.f32 %v4048_v8, %v1494_v12  ;;  %v1518_v26 = vor.u32 1.1754944e-38, %v1517_v27 }
 0x584   : > { %1795 = vrot.lane.b32.xlu0 %v4506_v16, %s4180_s24  ;;  %v1570_v63 = vadd.f32 %v4050_v14, %v1569_v46  ;;  %v4052_v0 = vpop.eup %4051 }
 0x585   : > { %v1499_v41 = vsel %vm1498_vm13, %v4048_v8, %v1495_v19  ;;  %v1507_v28 = vmul.f32 %v4052_v0, %v1472_v24  ;;  %vm1512_vm3 = vweird.f32 %v4052_v0 }
 0x586   : > { %v1504_v42 = vsel %vm1501_vm15, %v1503_v44, %v1499_v41  ;;  %v1574_v5 = vsel %vm1573_vm1, %v4050_v14, %v1570_v63  ;;  %v4816_v30 = vpop.permute.xlu2 %1871  ;;  %v1515_v14 = vand.u32 2147483647, %v1472_v24  ;;  %vm1513_vm5 = vmor %vm1511_vm4, %vm1512_vm3 }
 0x587   : > { %v1505_v40 = vmul.f32 %v4748_v11, %v1504_v42  ;;  %v1579_v61 = vsel %vm1576_vm2, %v1578_v2, %v1574_v5  ;;  %v1508_v38 = vsub.f32 1.0, %v1507_v28 }
 0x588   : > { %v1839_v29 = vpop.permute.xlu0 %1838  ;;  %v1580_v55 = vmul.f32 %v4746_v58, %v1579_v61  ;;  %vm1516_vm6 = vcmp.eq.f32.partialorder %v1515_v14, 8.507059e+37 }
 0x589   : > { %3760 = vmatmul.msk.f32.vlgmr.msrb.gmra.mxu0 %vm927_vm12, %v1505_v40  ;;  %3778 = vmatpush.xpose.msk.msrb.mxu2 %vm776_vm11, %v1839_v29  ;;  %v1509_v8 = vmul.f32 %v4052_v0, %v1508_v38 }
 0x58a   : > { %3765 = vmatmul.msk.f32.gmra.mxu2 %vm927_vm12, %v1580_v55 }
 0x58b   : > { %v1510_v11 = vadd.f32 %v4052_v0, %v1509_v8 }
 0x58c   : > { %1873 = vrot.lane.b32.xlu0 %v4521_v21, %s4180_s24  ;;  %s4184_s24 = smov 40  }
 0x58d   : > { %v1514_v58 = vsel %vm1513_vm5, %v4052_v0, %v1510_v11 }
 0x58e   : > { %v1519_v45 = vsel %vm1516_vm6, %v1518_v26, %v1514_v58  ;;  %v3933_v32 = vpop.permute.xlu2 %3932 }
 0x58f   : > { %v1520_v7 = vmul.f32 %v4754_v51, %v1519_v45  ;;  %v3934_v24 = vunpack.i.l.bf16 %v3933_v32  ;;  %v3935_v19 = vunpack.i.h.bf16 %v3933_v32 }
 0x590   : > { %v1800_v12 = vpop.permute.xlu0 %1799 }
 0x591   : > { %3774 = vmatpush.xpose.msk.msrb.mxu1 %vm776_vm11, %v1800_v12  ;;  %3761 = vmatmul.msk.f32.gmra.mxu0 %vm927_vm12, %v1520_v7 }
 0x594   : > { %3937 = vrot.lane.b32.xlu0 %v4556_v52, %s4181_s25 }
 0x595   : > { %3775 = vmatpush.xpose.msk.msrb.mxu1 %vm776_vm11, %v4790_v23  ;;  %v1759_v46 = vpop.permute.xlu1 %1758 }
 0x596   : > { %3771 = vmatpush.xpose.msk.msra.mxu0 %vm776_vm11, %v1759_v46  ;;  %v2250_v45 = vpop.permute.xlu2 %2249 }
 0x598   : > { %v1837_v43 = vpop.permute.xlu0 %1836 }
 0x599   : > { %3779 = vmatpush.xpose.msk.msrb.mxu2 %vm776_vm11, %v1837_v43  ;;  %3772 = vmatmul.msk.f32.vlgmr.msra.gmra.mxu0 %vm776_vm11, %v4758_v60 }
 0x59a   : > { %2128 = vmatpush.msrb.mxu0 %v3934_v24 }
 0x59c   : > { %2129 = vmatpush.msrb.mxu0 %v3935_v19 }
 0x5a0   : > { %v1833_v51 = vpop.permute.xlu0 %1832 }
 0x5a1   : > { %3780 = vmatmul.msk.f32.vlgmr.msrb.gmra.mxu2 %vm776_vm11, %v1833_v51  ;;  %3773 = vmatmul.msk.f32.gmra.mxu0 %vm776_vm11, %v4764_v39 }
 0x5a8   : > { %v1835_v23 = vpop.permute.xlu0 %1834 }
 0x5a9   : > { %3781 = vmatmul.msk.f32.gmra.mxu2 %vm776_vm11, %v1835_v23 }
 0x5c0   : > { %v4838_v44 = vpop.xlane.xlu1 %1489 }
 0x5c1   : > { %vm1601_vm3 = vweird.f32 %v4838_v44 }
 0x5d3   : > { %v1475_v63 = vpop.xlane.xlu0 %1474 }
 0x5d4   : > { %4053 = vrcp.f32 %v1475_v63  ;;  %v1532_v39 = vand.u32 2147483648, %v1475_v63  ;;  %v1530_v61 = vand.u32 2147483647, %v1475_v63  ;;  %vm1526_vm8 = vweird.f32 %v1475_v63 }
 0x5d5   : > { %4055 = vrcp.f32 %v4838_v44 }
 0x5d6   : > { %v1533_v27 = vor.u32 1.1754944e-38, %v1532_v39  ;;  %vm1531_vm10 = vcmp.eq.f32.partialorder %v1530_v61, 8.507059e+37 }
 0x5d8   : > { %v1876_v0 = vpop.permute.xlu1 %1875 }
 0x5d9   : > { %3783 = vmatpush.xpose.msk.msrb.mxu3 %vm776_vm11, %v1876_v0 }
 0x5da   : > { %v4054_v2 = vpop.eup %4053 }
 0x5db   : > { %v1522_v60 = vmul.f32 %v4054_v2, %v1475_v63  ;;  %v1487_v41 = vpop.xlane.xlu0 %1486  ;;  %v4842_v28 = vpop.eup %4055  ;;  %vm1527_vm7 = vweird.f32 %v4054_v2 }
 0x5dc   : > { %4057 = vrcp.f32 %v1487_v41  ;;  %v1597_v5 = vmul.f32 %v4842_v28, %v4838_v44  ;;  %vm1528_vm9 = vmor %vm1526_vm8, %vm1527_vm7  ;;  %v1592_v32 = vand.u32 2147483648, %v1487_v41  ;;  %v1590_v43 = vand.u32 2147483647, %v1487_v41 }
 0x5dd   : > { %v1523_v42 = vsub.f32 1.0, %v1522_v60  ;;  %vm1586_vm14 = vweird.f32 %v1487_v41  ;;  %vm1602_vm1 = vweird.f32 %v4842_v28 }
 0x5de   : > { %v1598_v8 = vsub.f32 1.0, %v1597_v5  ;;  %v1593_v23 = vor.u32 1.1754944e-38, %v1592_v32  ;;  %vm1591_vm2 = vcmp.eq.f32.partialorder %v1590_v43, 8.507059e+37  ;;  %vm1603_vm4 = vmor %vm1601_vm3, %vm1602_vm1  ;;  %v3769_v43 = vld [vmem:[%s5599_s7 + $0x28] sm:$0xff] }
 0x5df   : > { %v1524_v40 = vmul.f32 %v4054_v2, %v1523_v42 }
 0x5e0   : > { %v2252_v29 = vpop.permute.xlu1 %2251  ;;  %v1599_v24 = vmul.f32 %v4842_v28, %v1598_v8 }
 0x5e1   : > { %v1525_v38 = vadd.f32 %v4054_v2, %v1524_v40  ;;  %3796 = vmatpush.xpose.msk.msra.mxu0 %vm776_vm11, %v2252_v29 }
 0x5e2   : > { %v4058_v55 = vpop.eup %4057  ;;  %v1600_v0 = vadd.f32 %v4842_v28, %v1599_v24 }
 0x5e3   : > { %v1529_v14 = vsel %vm1528_vm9, %v4054_v2, %v1525_v38  ;;  %v1582_v11 = vmul.f32 %v4058_v55, %v1487_v41  ;;  %v1478_v26 = vpop.xlane.xlu0 %1477  ;;  %vm1587_vm13 = vweird.f32 %v4058_v55  ;;  %v1607_v2 = vand.u32 2147483648, %v4838_v44 }
 0x5e4   : > { %v1534_v58 = vsel %vm1531_vm10, %v1533_v27, %v1529_v14  ;;  %4059 = vrcp.f32 %v1478_v26  ;;  %vm1588_vm15 = vmor %vm1586_vm14, %vm1587_vm13  ;;  %v1605_v41 = vand.u32 2147483647, %v4838_v44  ;;  %v1547_v5 = vand.u32 2147483648, %v1478_v26 }
 0x5e5   : > { %v1583_v12 = vsub.f32 1.0, %v1582_v11  ;;  %v1535_v7 = vmul.f32 %v4788_v59, %v1534_v58  ;;  %3797 = vmatpush.xpose.msk.msra.mxu0 %vm776_vm11, %v2250_v45  ;;  %v1545_v61 = vand.u32 2147483647, %v1478_v26  ;;  %v1604_v38 = vsel %vm1603_vm4, %v4842_v28, %v1600_v0 }
 0x5e6   : > { %v1608_v29 = vor.u32 1.1754944e-38, %v1607_v2  ;;  %vm1541_vm6 = vweird.f32 %v1478_v26  ;;  %vm1606_vm7 = vcmp.eq.f32.partialorder %v1605_v41, 8.507059e+37  ;;  %v1548_v27 = vor.u32 1.1754944e-38, %v1547_v5 }
 0x5e7   : > { %v1584_v46 = vmul.f32 %v4058_v55, %v1583_v12  ;;  %3762 = vmatmul.msk.f32.vlgmr.msra.gmra.mxu1 %vm927_vm12, %v1535_v7  ;;  %vm1546_vm9 = vcmp.eq.f32.partialorder %v1545_v61, 8.507059e+37 }
 0x5e8   : > { %v1609_v8 = vsel %vm1606_vm7, %v1608_v29, %v1604_v38 }
 0x5e9   : > { %v1585_v19 = vadd.f32 %v4058_v55, %v1584_v46  ;;  %v1610_v11 = vmul.f32 %v4782_v18, %v1609_v8 }
 0x5ea   : > { %v4060_v51 = vpop.eup %4059 }
 0x5eb   : > { %v1589_v63 = vsel %vm1588_vm15, %v4058_v55, %v1585_v19  ;;  %v1537_v59 = vmul.f32 %v4060_v51, %v1478_v26  ;;  %vm1542_vm5 = vweird.f32 %v4060_v51 }
 0x5ec   : > { %v1594_v60 = vsel %vm1591_vm2, %v1593_v23, %v1589_v63  ;;  %vm1543_vm8 = vmor %vm1541_vm6, %vm1542_vm5 }
 0x5ed   : > { %v1538_v42 = vsub.f32 1.0, %v1537_v59  ;;  %v1595_v39 = vmul.f32 %v4795_v35, %v1594_v60 }
 0x5ef   : > { %v1539_v40 = vmul.f32 %v4060_v51, %v1538_v42  ;;  %3766 = vmatmul.msk.f32.vlgmr.msra.gmra.mxu3 %vm927_vm12, %v1595_v39 }
 0x5f1   : > { %v1540_v55 = vadd.f32 %v4060_v51, %v1539_v40 }
 0x5f3   : > { %v1544_v14 = vsel %vm1543_vm8, %v4060_v51, %v1540_v55 }
 0x5f4   : > { %v1549_v35 = vsel %vm1546_vm9, %v1548_v27, %v1544_v14 }
 0x5f5   : > { %v1550_v44 = vmul.f32 %v4803_v36, %v1549_v35 }
 0x5f6   : > { %v1796_v58 = vpop.permute.xlu0 %1795 }
 0x5f7   : > { %3763 = vmatmul.msk.f32.gmra.mxu1 %vm927_vm12, %v1550_v44  ;;  %3767 = vmatmul.msk.f32.gmra.mxu3 %vm927_vm12, %v1610_v11 }
 0x5fe   : > { %v1874_v28 = vpop.permute.xlu0 %1873 }
 0x5ff   : > { %3776 = vmatmul.msk.f32.vlgmr.msrb.gmra.mxu1 %vm776_vm11, %v4797_v37  ;;  %3784 = vmatmul.msk.f32.vlgmr.msrb.gmra.mxu3 %vm776_vm11, %v4816_v30  ;;  %v3768_v37 = vld [vmem:[%s5599_s7 + $0x20] sm:$0xff] }
 0x605   : > { %v4873_v7 = vpop.f32.mrf.mxu2 }
 0x606   : > { %v4867_v26 = vpop.f32.mrf.mxu0  ;;  %v3938_v45 = vpop.permute.xlu0 %3937 }
 0x607   : > { %v3939_v12 = vunpack.i.l.bf16 %v3938_v45  ;;  %3777 = vmatmul.msk.f32.gmra.mxu1 %vm776_vm11, %v1796_v58  ;;  %3785 = vmatmul.msk.f32.gmra.mxu3 %vm776_vm11, %v1874_v28  ;;  %v3940_v18 = vunpack.i.h.bf16 %v3938_v45 }
 0x609   : > { %2163 = vmatpush.msra.mxu1 %v3939_v12 }
 0x60b   : > { %2164 = vmatpush.msra.mxu1 %v3940_v18 }
 0x60d   : > { %v4879_v46 = vpop.f32.mrf.mxu2 }
 0x60e   : > { %v4871_v36 = vpop.f32.mrf.mxu0 }
 0x616   : > { %v1787_v30 = vpop.f32.mrf.mxu0 }
 0x617   : > { %v1788_v32 = vadd.f32 %v3768_v37, %v1787_v30 }
 0x619   : > { %v1910_v24 = vsel %vm927_vm12, %v1788_v32, -inf }
 0x61a   : > { %1911 = vmax.xlane.f32.xlu2 %v1910_v24 }
 0x61e   : > { %v1790_v19 = vpop.f32.mrf.mxu0 }
 0x61f   : > { %v1791_v51 = vadd.f32 %v3769_v43, %v1790_v19 }
 0x621   : > { %v1913_v23 = vsel %vm927_vm12, %v1791_v51, -inf }
 0x622   : > { %1914 = vmax.xlane.f32.xlu0 %v1913_v23 }
 0x624   : > { %v1865_v63 = vpop.f32.mrf.mxu2 }
 0x625   : > { %v1866_v59 = vadd.f32 %v3768_v37, %v1865_v63 }
 0x627   : > { %v1922_v0 = vsel %vm927_vm12, %v1866_v59, -inf }
 0x628   : > { %1923 = vmax.xlane.f32.xlu2 %v1922_v0 }
 0x62c   : > { %v1868_v2 = vpop.f32.mrf.mxu2 }
 0x62d   : > { %v4886_v60 = vadd.f32 %v3769_v43, %v1868_v2 }
 0x62f   : > { %v1925_v42 = vsel %vm927_vm12, %v4886_v60, -inf }
 0x630   : > { %1926 = vmax.xlane.f32.xlu2 %v1925_v42 }
 0x636   : > { %3942 = vrot.lane.b32.xlu0 %v4579_v57, %s4181_s25 }
 0x63e   : > { %2247 = vrot.lane.b32.xlu0 %v4490_v10, %s4183_s18 }
 0x646   : > { %2290 = vrot.lane.b32.xlu0 %v4467_v53, %s4182_s26 }
 0x64e   : > { %2288 = vrot.lane.b32.xlu0 %v4463_v62, %s4182_s26 }
 0x664   : > { %v4898_v39 = vpop.f32.mrf.mxu1 }
 0x672   : > { %v4900_v41 = vpop.f32.mrf.mxu3 }
 0x674   : > { %v4902_v5 = vpop.f32.mrf.mxu1 }
 0x67a   : > { %v4904_v38 = vpop.f32.mrf.mxu3 }
 0x67c   : > { %v1826_v40 = vpop.f32.mrf.mxu1 }
 0x67d   : > { %v1827_v61 = vadd.f32 %v3768_v37, %v1826_v40 }
 0x67f   : > { %v1916_v29 = vsel %vm927_vm12, %v1827_v61, -inf }
 0x680   : > { %1917 = vmax.xlane.f32.xlu1 %v1916_v29 }
 0x682   : > { %v1904_v27 = vpop.f32.mrf.mxu3 }
 0x683   : > { %v4908_v62 = vadd.f32 %v3768_v37, %v1904_v27 }
 0x684   : > { %v1829_v10 = vpop.f32.mrf.mxu1 }
 0x685   : > { %v1830_v55 = vadd.f32 %v3769_v43, %v1829_v10  ;;  %v1928_v35 = vsel %vm927_vm12, %v4908_v62, -inf }
 0x687   : > { %v1919_v53 = vsel %vm927_vm12, %v1830_v55, -inf }
 0x688   : > { %1920 = vmax.xlane.f32.xlu0 %v1919_v53 }
 0x68d   : > { %v1912_v8 = vpop.xlane.xlu2 %1911 }
 0x68e   : > { %v1934_v14 = vsub.f32 %v1788_v32, %v1912_v8 }
 0x690   : > { %1929 = vmax.xlane.f32.xlu0 %v1928_v35  ;;  %v1942_v44 = vmul.f32 1.442695, %v1934_v14 }
 0x692   : > { %4061 = vpow2.f32 %v1942_v44 }
 0x695   : > { %v1915_v28 = vpop.xlane.xlu0 %1914 }
 0x696   : > { %v1935_v19 = vsub.f32 %v1791_v51, %v1915_v28 }
 0x698   : > { %v4912_v11 = vpop.eup %4061  ;;  %v1944_v63 = vmul.f32 1.442695, %v1935_v19 }
 0x699   : > { %2245 = vrot.lane.b32.xlu1 %v4487_v9, %s4183_s18  ;;  %v1958_v58 = vsel %vm927_vm12, %v4912_v11, 0.0 }
 0x69a   : > { %1959 = vadd.xlane.f32.xlu2 %v1958_v58  ;;  %4063 = vpow2.f32 %v1944_v63 }
 0x69b   : > { %v1924_v23 = vpop.xlane.xlu2 %1923 }
 0x6a0   : > { %v4934_v2 = vpop.eup %4063 }
 0x6a1   : > { %v1961_v42 = vsel %vm927_vm12, %v4934_v2, 0.0 }
 0x6a4   : > { %2284 = vrot.lane.b32.xlu0 %v4499_v15, %s4183_s18  ;;  %v1907_v15 = vpop.f32.mrf.mxu3 }
 0x6a5   : > { %v4929_v30 = vadd.f32 %v3769_v43, %v1907_v15 }
 0x6a7   : > { %v1931_v24 = vsel %vm927_vm12, %v4929_v30, -inf }
 0x6a8   : > { %v3943_v45 = vpop.permute.xlu0 %3942 }
 0x6a9   : > { %v3944_v12 = vunpack.i.l.bf16 %v3943_v45  ;;  %v3945_v18 = vunpack.i.h.bf16 %v3943_v45 }
 0x6ab   : > { %2198 = vmatpush.msra.mxu2 %v3944_v12 }
 0x6ac   : > { %3947 = vrot.lane.b32.xlu0 %v4567_v56, %s4181_s25  ;;  %s4185_s25 = smov 16  }
 0x6ad   : > { %2199 = vmatpush.msra.mxu2 %v3945_v18 }
 0x6b0   : > { %v4922_v37 = vpop.permute.xlu0 %2247 }
 0x6b2   : > { %2329 = vrot.lane.b32.xlu2 %v4475_v4, %s4182_s26  ;;  %v1938_v4 = vsub.f32 %v1866_v59, %v1924_v23 }
 0x6b4   : > { %2327 = vrot.lane.b32.xlu0 %v4473_v3, %s4182_s26  ;;  %v1950_v0 = vmul.f32 1.442695, %v1938_v4  ;;  %v1927_v3 = vpop.xlane.xlu2 %1926 }
 0x6b5   : > { %v1939_v43 = vsub.f32 %v4886_v60, %v1927_v3 }
 0x6b6   : > { %4065 = vpow2.f32 %v1950_v0 }
 0x6b7   : > { %v1952_v40 = vmul.f32 1.442695, %v1939_v43 }
 0x6b8   : > { %v2291_v9 = vpop.permute.xlu0 %2290 }
 0x6b9   : > { %3800 = vmatpush.xpose.msk.msrb.mxu1 %vm776_vm11, %v2291_v9  ;;  %4067 = vpow2.f32 %v1952_v40 }
 0x6bc   : > { %v4939_v29 = vpop.eup %4065 }
 0x6bd   : > { %v1970_v51 = vsel %vm927_vm12, %v4939_v29, 0.0 }
 0x6bf   : > { %v4943_v59 = vpop.eup %4067 }
 0x6c0   : > { %v2289_v32 = vpop.permute.xlu0 %2288  ;;  %v1973_v10 = vsel %vm927_vm12, %v4943_v59, 0.0 }
 0x6c1   : > { %3801 = vmatpush.xpose.msk.msrb.mxu1 %vm776_vm11, %v2289_v32 }
 0x6c3   : > { %1932 = vmax.xlane.f32.xlu1 %v1931_v24 }
 0x6de   : > { %1962 = vadd.xlane.f32.xlu0 %v1961_v42 }
 0x6e6   : > { %1971 = vadd.xlane.f32.xlu0 %v1970_v51 }
 0x6ee   : > { %1974 = vadd.xlane.f32.xlu0 %v1973_v10 }
 0x6f3   : > { %v1918_v53 = vpop.xlane.xlu1 %1917 }
 0x6f4   : > { %v1936_v60 = vsub.f32 %v1827_v61, %v1918_v53 }
 0x6f6   : > { %v1946_v27 = vmul.f32 1.442695, %v1936_v60 }
 0x6f8   : > { %4069 = vpow2.f32 %v1946_v27 }
 0x6fb   : > { %v1921_v8 = vpop.xlane.xlu0 %1920 }
 0x6fc   : > { %v1937_v14 = vsub.f32 %v1830_v55, %v1921_v8 }
 0x6fe   : > { %v4947_v35 = vpop.eup %4069  ;;  %v1948_v44 = vmul.f32 1.442695, %v1937_v14 }
 0x6ff   : > { %v1964_v58 = vsel %vm927_vm12, %v4947_v35, 0.0 }
 0x700   : > { %4071 = vpow2.f32 %v1948_v44  ;;  %1965 = vadd.xlane.f32.xlu1 %v1964_v58 }
 0x702   : > { %2325 = vrot.lane.b32.xlu0 %v4528_v13, %s4183_s18 }
 0x703   : > { %v1930_v28 = vpop.xlane.xlu0 %1929 }
 0x704   : > { %v1940_v45 = vsub.f32 %v4908_v62, %v1930_v28 }
 0x706   : > { %v4954_v12 = vpop.eup %4071  ;;  %v1954_v61 = vmul.f32 1.442695, %v1940_v45 }
 0x707   : > { %v1967_v55 = vsel %vm927_vm12, %v4954_v12, 0.0 }
 0x708   : > { %4073 = vpow2.f32 %v1954_v61  ;;  %1968 = vadd.xlane.f32.xlu1 %v1967_v55 }
 0x70a   : > { %2366 = vrot.lane.b32.xlu0 %v4479_v6, %s4182_s26 }
 0x70b   : > { %v2246_v53 = vpop.permute.xlu1 %2245 }
 0x70d   : > { %v1960_v9 = vpop.xlane.xlu2 %1959 }
 0x70e   : > { %v4960_v18 = vpop.eup %4073  ;;  %4075 = vrcp.f32 %v1960_v9  ;;  %v1993_v6 = vand.u32 2147483648, %v1960_v9  ;;  %v1991_v63 = vand.u32 2147483647, %v1960_v9  ;;  %vm1987_vm13 = vweird.f32 %v1960_v9 }
 0x70f   : > { %v1976_v13 = vsel %vm927_vm12, %v4960_v18, 0.0 }
 0x710   : > { %1977 = vadd.xlane.f32.xlu2 %v1976_v13  ;;  %v1994_v0 = vor.u32 1.1754944e-38, %v1993_v6  ;;  %vm1992_vm15 = vcmp.eq.f32.partialorder %v1991_v63, 8.507059e+37 }
 0x712   : > { %2364 = vrot.lane.b32.xlu0 %v4521_v21, %s4183_s18 }
 0x714   : > { %v4076_v62 = vpop.eup %4075 }
 0x715   : > { %v1983_v15 = vmul.f32 %v4076_v62, %v1960_v9  ;;  %v2330_v32 = vpop.permute.xlu2 %2329  ;;  %vm1988_vm10 = vweird.f32 %v4076_v62 }
 0x716   : > { %v4966_v24 = vpop.permute.xlu0 %2284  ;;  %3804 = vmatpush.xpose.msk.msrb.mxu2 %vm776_vm11, %v2330_v32  ;;  %vm1989_vm14 = vmor %vm1987_vm13, %vm1988_vm10 }
 0x717   : > { %v1984_v19 = vsub.f32 1.0, %v1983_v15 }
 0x719   : > { %v1985_v23 = vmul.f32 %v4076_v62, %v1984_v19 }
 0x71b   : > { %v1986_v4 = vadd.f32 %v4076_v62, %v1985_v23 }
 0x71d   : > { %v1990_v3 = vsel %vm1989_vm14, %v4076_v62, %v1986_v4 }
 0x71e   : > { %v3948_v43 = vpop.permute.xlu0 %3947  ;;  %v1995_v21 = vsel %vm1992_vm15, %v1994_v0, %v1990_v3 }
 0x71f   : > { %v3949_v42 = vunpack.i.l.bf16 %v3948_v43  ;;  %v1996_v40 = vmul.f32 %v4912_v11, %v1995_v21  ;;  %v3950_v51 = vunpack.i.h.bf16 %v3948_v43 }
 0x721   : > { %2233 = vmatpush.msra.mxu3 %v3949_v42  ;;  %3786 = vmatmul.msk.f32.vlgmr.msrb.gmra.mxu0 %vm927_vm12, %v1996_v40 }
 0x723   : > { %2234 = vmatpush.msra.mxu3 %v3950_v51 }
 0x726   : > { %v2328_v10 = vpop.permute.xlu0 %2327 }
 0x727   : > { %3805 = vmatpush.xpose.msk.msrb.mxu2 %vm776_vm11, %v2328_v10 }
 0x728   : > { %2286 = vrot.lane.b32.xlu2 %v4506_v16, %s4183_s18 }
 0x730   : > { %2368 = vrot.lane.b32.xlu2 %v4470_v1, %s4182_s26  ;;  %s4186_s26 = smov 8  }
 0x736   : > { %v1933_v60 = vpop.xlane.xlu1 %1932 }
 0x737   : > { %v1941_v27 = vsub.f32 %v4929_v30, %v1933_v60 }
 0x738   : > { %2362 = vrot.lane.b32.xlu2 %v4509_v17, %s4183_s18 }
 0x739   : > { %v1956_v8 = vmul.f32 1.442695, %v1941_v27 }
 0x73b   : > { %4077 = vpow2.f32 %v1956_v8 }
 0x741   : > { %v4979_v11 = vpop.eup %4077 }
 0x742   : > { %v1979_v14 = vsel %vm927_vm12, %v4979_v11, 0.0 }
 0x743   : > { %1980 = vadd.xlane.f32.xlu1 %v1979_v14 }
 0x751   : > { %v1963_v44 = vpop.xlane.xlu0 %1962 }
 0x752   : > { %4079 = vrcp.f32 %v1963_v44  ;;  %v2008_v45 = vand.u32 2147483648, %v1963_v44  ;;  %v2006_v17 = vand.u32 2147483647, %v1963_v44  ;;  %vm2002_vm2 = vweird.f32 %v1963_v44 }
 0x754   : > { %v2009_v9 = vor.u32 1.1754944e-38, %v2008_v45  ;;  %vm2007_vm4 = vcmp.eq.f32.partialorder %v2006_v17, 8.507059e+37 }
 0x758   : > { %v4080_v16 = vpop.eup %4079 }
 0x759   : > { %v1998_v58 = vmul.f32 %v4080_v16, %v1963_v44  ;;  %v1972_v28 = vpop.xlane.xlu0 %1971  ;;  %vm2003_vm1 = vweird.f32 %v4080_v16 }
 0x75a   : > { %4081 = vrcp.f32 %v1972_v28  ;;  %vm2004_vm3 = vmor %vm2002_vm2, %vm2003_vm1  ;;  %v2053_v23 = vand.u32 2147483648, %v1972_v28  ;;  %vm2047_vm6 = vweird.f32 %v1972_v28 }
 0x75b   : > { %v1999_v1 = vsub.f32 1.0, %v1998_v58 }
 0x75c   : > { %2323 = vrot.lane.b32.xlu1 %v4518_v20, %s4183_s18  ;;  %v2051_v20 = vand.u32 2147483647, %v1972_v28  ;;  %v2054_v3 = vor.u32 1.1754944e-38, %v2053_v23 }
 0x75d   : > { %v2000_v30 = vmul.f32 %v4080_v16, %v1999_v1 }
 0x75e   : > { %vm2052_vm8 = vcmp.eq.f32.partialorder %v2051_v20, 8.507059e+37 }
 0x75f   : > { %v2001_v61 = vadd.f32 %v4080_v16, %v2000_v30 }
 0x760   : > { %v4082_v55 = vpop.eup %4081 }
 0x761   : > { %v2043_v13 = vmul.f32 %v4082_v55, %v1972_v28  ;;  %v1975_v62 = vpop.xlane.xlu0 %1974  ;;  %v2005_v15 = vsel %vm2004_vm3, %v4080_v16, %v2001_v61  ;;  %vm2048_vm5 = vweird.f32 %v4082_v55 }
 0x762   : > { %4083 = vrcp.f32 %v1975_v62  ;;  %v2010_v32 = vsel %vm2007_vm4, %v2009_v9, %v2005_v15  ;;  %vm2049_vm7 = vmor %vm2047_vm6, %vm2048_vm5  ;;  %v2068_v10 = vand.u32 2147483648, %v1975_v62  ;;  %v2066_v60 = vand.u32 2147483647, %v1975_v62 }
 0x763   : > { %v2044_v19 = vsub.f32 1.0, %v2043_v13  ;;  %v2011_v6 = vmul.f32 %v4934_v2, %v2010_v32  ;;  %vm2062_vm10 = vweird.f32 %v1975_v62 }
 0x764   : > { %v2069_v8 = vor.u32 1.1754944e-38, %v2068_v10  ;;  %vm2067_vm14 = vcmp.eq.f32.partialorder %v2066_v60, 8.507059e+37 }
 0x765   : > { %v2045_v63 = vmul.f32 %v4082_v55, %v2044_v19  ;;  %3787 = vmatmul.msk.f32.gmra.mxu0 %vm927_vm12, %v2011_v6 }
 0x767   : > { %v2046_v4 = vadd.f32 %v4082_v55, %v2045_v63 }
 0x768   : > { %v4084_v0 = vpop.eup %4083 }
 0x769   : > { %v2050_v43 = vsel %vm2049_vm7, %v4082_v55, %v2046_v4  ;;  %v2058_v21 = vmul.f32 %v4084_v0, %v1975_v62  ;;  %vm2063_vm9 = vweird.f32 %v4084_v0 }
 0x76a   : > { %v2055_v42 = vsel %vm2052_vm8, %v2054_v3, %v2050_v43  ;;  %vm2064_vm13 = vmor %vm2062_vm10, %vm2063_vm9 }
 0x76b   : > { %v2059_v40 = vsub.f32 1.0, %v2058_v21  ;;  %v2056_v51 = vmul.f32 %v4939_v29, %v2055_v42 }
 0x76d   : > { %v2060_v2 = vmul.f32 %v4084_v0, %v2059_v40  ;;  %3790 = vmatmul.msk.f32.vlgmr.msra.gmra.mxu2 %vm927_vm12, %v2056_v51  ;;  %3798 = vmatmul.msk.f32.vlgmr.msra.gmra.mxu0 %vm776_vm11, %v2246_v53 }
 0x76f   : > { %v2061_v27 = vadd.f32 %v4084_v0, %v2060_v2 }
 0x771   : > { %v2065_v14 = vsel %vm2064_vm13, %v4084_v0, %v2061_v27 }
 0x772   : > { %v2070_v44 = vsel %vm2067_vm14, %v2069_v8, %v2065_v14 }
 0x773   : > { %v1966_v16 = vpop.xlane.xlu1 %1965  ;;  %v2071_v58 = vmul.f32 %v4943_v59, %v2070_v44 }
 0x774   : > { %4085 = vrcp.f32 %v1966_v16  ;;  %v2023_v45 = vand.u32 2147483648, %v1966_v16  ;;  %v2021_v17 = vand.u32 2147483647, %v1966_v16  ;;  %vm2017_vm1 = vweird.f32 %v1966_v16  ;;  %v2326_v40 = vpop.permute.xlu0 %2325 }
 0x775   : > { %3791 = vmatmul.msk.f32.gmra.mxu2 %vm927_vm12, %v2071_v58  ;;  %3799 = vmatmul.msk.f32.gmra.mxu0 %vm776_vm11, %v4922_v37 }
 0x776   : > { %v2024_v59 = vor.u32 1.1754944e-38, %v2023_v45  ;;  %vm2022_vm3 = vcmp.eq.f32.partialorder %v2021_v17, 8.507059e+37 }
 0x77a   : > { %v4086_v29 = vpop.eup %4085 }
 0x77b   : > { %v2013_v53 = vmul.f32 %v4086_v29, %v1966_v16  ;;  %v1969_v28 = vpop.xlane.xlu1 %1968  ;;  %vm2018_vm15 = vweird.f32 %v4086_v29 }
 0x77c   : > { %4087 = vrcp.f32 %v1969_v28  ;;  %vm2019_vm2 = vmor %vm2017_vm1, %vm2018_vm15  ;;  %v2038_v32 = vand.u32 2147483648, %v1969_v28  ;;  %v2036_v23 = vand.u32 2147483647, %v1969_v28  ;;  %vm2032_vm5 = vweird.f32 %v1969_v28  ;;  %v2367_v16 = vpop.permute.xlu0 %2366 }
 0x77d   : > { %v2014_v1 = vsub.f32 1.0, %v2013_v53 }
 0x77e   : > { %v2039_v20 = vor.u32 1.1754944e-38, %v2038_v32  ;;  %vm2037_vm7 = vcmp.eq.f32.partialorder %v2036_v23, 8.507059e+37 }
 0x77f   : > { %v2015_v30 = vmul.f32 %v4086_v29, %v2014_v1 }
 0x781   : > { %v2016_v61 = vadd.f32 %v4086_v29, %v2015_v30 }
 0x782   : > { %v4088_v55 = vpop.eup %4087 }
 0x783   : > { %v2020_v9 = vsel %vm2019_vm2, %v4086_v29, %v2016_v61  ;;  %v2028_v13 = vmul.f32 %v4088_v55, %v1969_v28  ;;  %v1978_v15 = vpop.xlane.xlu2 %1977  ;;  %vm2033_vm4 = vweird.f32 %v4088_v55 }
 0x784   : > { %v2025_v62 = vsel %vm2022_vm3, %v2024_v59, %v2020_v9  ;;  %4089 = vrcp.f32 %v1978_v15  ;;  %vm2034_vm6 = vmor %vm2032_vm5, %vm2033_vm4  ;;  %v2081_v2 = vand.u32 2147483647, %v1978_v15  ;;  %vm2077_vm9 = vweird.f32 %v1978_v15 }
 0x785   : > { %v2029_v37 = vsub.f32 1.0, %v2028_v13  ;;  %v2026_v19 = vmul.f32 %v4947_v35, %v2025_v62  ;;  %v2083_v35 = vand.u32 2147483648, %v1978_v15  ;;  %v2365_v13 = vpop.permute.xlu0 %2364 }
 0x786   : > { %vm2082_vm13 = vcmp.eq.f32.partialorder %v2081_v2, 8.507059e+37 }
 0x787   : > { %v2030_v6 = vmul.f32 %v4088_v55, %v2029_v37  ;;  %3788 = vmatmul.msk.f32.vlgmr.msra.gmra.mxu1 %vm927_vm12, %v2026_v19  ;;  %v2084_v27 = vor.u32 1.1754944e-38, %v2083_v35 }
 0x789   : > { %v2031_v63 = vadd.f32 %v4088_v55, %v2030_v6  ;;  %v3795_v6 = vld [vmem:[%s5599_s7 + $0x38] sm:$0xff] }
 0x78a   : > { %v4090_v4 = vpop.eup %4089 }
 0x78b   : > { %v2035_v0 = vsel %vm2034_vm6, %v4088_v55, %v2031_v63  ;;  %v2073_v3 = vmul.f32 %v4090_v4, %v1978_v15  ;;  %v2287_v43 = vpop.permute.xlu2 %2286  ;;  %vm2078_vm8 = vweird.f32 %v4090_v4 }
 0x78c   : > { %v2040_v21 = vsel %vm2037_vm7, %v2039_v20, %v2035_v0  ;;  %vm2079_vm10 = vmor %vm2077_vm9, %vm2078_vm8 }
 0x78d   : > { %v2041_v42 = vmul.f32 %v4954_v12, %v2040_v21  ;;  %v2074_v51 = vsub.f32 1.0, %v2073_v3 }
 0x78f   : > { %v2075_v10 = vmul.f32 %v4090_v4, %v2074_v51  ;;  %3789 = vmatmul.msk.f32.gmra.mxu1 %vm927_vm12, %v2041_v42 }
 0x791   : > { %v2076_v60 = vadd.f32 %v4090_v4, %v2075_v10 }
 0x793   : > { %v2080_v8 = vsel %vm2079_vm10, %v4090_v4, %v2076_v60  ;;  %v2369_v14 = vpop.permute.xlu2 %2368 }
 0x794   : > { %v2085_v44 = vsel %vm2082_vm13, %v2084_v27, %v2080_v8  ;;  %3808 = vmatpush.xpose.msk.msrb.mxu3 %vm776_vm11, %v2369_v14 }
 0x795   : > { %v2086_v12 = vmul.f32 %v4960_v18, %v2085_v44 }
 0x797   : > { %3792 = vmatmul.msk.f32.vlgmr.msra.gmra.mxu3 %vm927_vm12, %v2086_v12  ;;  %3802 = vmatmul.msk.f32.vlgmr.msrb.gmra.mxu1 %vm776_vm11, %v4966_v24 }
 0x798   : > { %3809 = vmatpush.xpose.msk.msrb.mxu3 %vm776_vm11, %v2367_v16 }
 0x79b   : > { %v2363_v9 = vpop.permute.xlu2 %2362 }
 0x79e   : > { %v5010_v62 = vpop.f32.mrf.mxu0 }
 0x79f   : > { %3803 = vmatmul.msk.f32.gmra.mxu1 %vm776_vm11, %v2287_v43 }
 0x7b6   : > { %v1981_v58 = vpop.xlane.xlu1 %1980 }
 0x7b7   : > { %4091 = vrcp.f32 %v1981_v58  ;;  %v2098_v1 = vand.u32 2147483648, %v1981_v58  ;;  %v2096_v30 = vand.u32 2147483647, %v1981_v58  ;;  %vm2092_vm15 = vweird.f32 %v1981_v58 }
 0x7b9   : > { %v2099_v17 = vor.u32 1.1754944e-38, %v2098_v1  ;;  %vm2097_vm2 = vcmp.eq.f32.partialorder %v2096_v30, 8.507059e+37 }
 0x7bd   : > { %v4092_v29 = vpop.eup %4091 }
 0x7be   : > { %v2088_v53 = vmul.f32 %v4092_v29, %v1981_v58  ;;  %vm2093_vm14 = vweird.f32 %v4092_v29 }
 0x7bf   : > { %vm2094_vm1 = vmor %vm2092_vm15, %vm2093_vm14 }
 0x7c0   : > { %v2089_v28 = vsub.f32 1.0, %v2088_v53 }
 0x7c2   : > { %v2090_v45 = vmul.f32 %v4092_v29, %v2089_v28 }
 0x7c4   : > { %v2091_v18 = vadd.f32 %v4092_v29, %v2090_v45 }
 0x7c6   : > { %v2095_v61 = vsel %vm2094_vm1, %v4092_v29, %v2091_v18 }
 0x7c7   : > { %v2100_v24 = vsel %vm2097_vm2, %v2099_v17, %v2095_v61 }
 0x7c8   : > { %v2101_v55 = vmul.f32 %v4979_v11, %v2100_v24  ;;  %v3794_v11 = vld [vmem:[%s5599_s7 + $0x30] sm:$0xff] }
 0x7ca   : > { %3793 = vmatmul.msk.f32.gmra.mxu3 %vm927_vm12, %v2101_v55 }
 0x7ce   : > { %v2324_v59 = vpop.permute.xlu1 %2323 }
 0x7cf   : > { %3806 = vmatmul.msk.f32.vlgmr.msrb.gmra.mxu2 %vm776_vm11, %v2324_v59 }
 0x7d2   : > { %3810 = vmatmul.msk.f32.vlgmr.msrb.gmra.mxu3 %vm776_vm11, %v2363_v9 }
 0x7d7   : > { %3807 = vmatmul.msk.f32.gmra.mxu2 %vm776_vm11, %v2326_v40 }
 0x7da   : > { %3811 = vmatmul.msk.f32.gmra.mxu3 %vm776_vm11, %v2365_v13 }
 0x7e2   : > { %v5013_v15 = vpop.f32.mrf.mxu0 }
 0x7ea   : > { %v2278_v37 = vpop.f32.mrf.mxu0 }
 0x7eb   : > { %v2279_v32 = vadd.f32 %v3794_v11, %v2278_v37 }
 0x7ed   : > { %v2401_v19 = vsel %vm927_vm12, %v2279_v32, -inf }
 0x7ee   : > { %2402 = vmax.xlane.f32.xlu1 %v2401_v19 }
 0x7f0   : > { %v5029_v35 = vpop.f32.mrf.mxu2 }
 0x7f2   : > { %v2281_v23 = vpop.f32.mrf.mxu0 }
 0x7f3   : > { %v2282_v63 = vadd.f32 %v3795_v6, %v2281_v23 }
 0x7f5   : > { %v2404_v20 = vsel %vm927_vm12, %v2282_v63, -inf }
 0x7f6   : > { %2405 = vmax.xlane.f32.xlu2 %v2404_v20 }
 0x7f8   : > { %v5033_v2 = vpop.f32.mrf.mxu2 }
 0x804   : > { %v5023_v4 = vpop.f32.mrf.mxu1 }
 0x80c   : > { %v5025_v0 = vpop.f32.mrf.mxu1 }
 0x814   : > { %v2317_v3 = vpop.f32.mrf.mxu1 }
 0x815   : > { %v2318_v43 = vadd.f32 %v3794_v11, %v2317_v3 }
 0x817   : > { %v2407_v21 = vsel %vm927_vm12, %v2318_v43, -inf }
 0x818   : > { %2408 = vmax.xlane.f32.xlu0 %v2407_v21 }
 0x81a   : > { %v5031_v10 = vpop.f32.mrf.mxu3 }
 0x81c   : > { %v2320_v42 = vpop.f32.mrf.mxu1 }
 0x81d   : > { %v2321_v40 = vadd.f32 %v3795_v6, %v2320_v42 }
 0x81f   : > { %v2410_v51 = vsel %vm927_vm12, %v2321_v40, -inf }
 0x820   : > { %2411 = vmax.xlane.f32.xlu1 %v2410_v51 }
 0x84d   : > { %v5035_v60 = vpop.f32.mrf.mxu3 }
 0x852   : > { %v2356_v27 = vpop.f32.mrf.mxu2 }
 0x853   : > { %v2357_v8 = vadd.f32 %v3794_v11, %v2356_v27 }
 0x855   : > { %v2395_v14 = vpop.f32.mrf.mxu3  ;;  %v2413_v44 = vsel %vm927_vm12, %v2357_v8, -inf }
 0x856   : > { %v2396_v12 = vadd.f32 %v3794_v11, %v2395_v14  ;;  %2414 = vmax.xlane.f32.xlu2 %v2413_v44 }
 0x858   : > { %v2419_v16 = vsel %vm927_vm12, %v2396_v12, -inf }
 0x859   : > { %2420 = vmax.xlane.f32.xlu1 %v2419_v16 }
 0x85a   : > { %v2359_v58 = vpop.f32.mrf.mxu2 }
 0x85b   : > { %v5039_v29 = vadd.f32 %v3795_v6, %v2359_v58 }
 0x85d   : > { %v2398_v53 = vpop.f32.mrf.mxu3  ;;  %v2416_v28 = vsel %vm927_vm12, %v5039_v29, -inf }
 0x85e   : > { %v2399_v1 = vadd.f32 %v3795_v6, %v2398_v53  ;;  %2417 = vmax.xlane.f32.xlu0 %v2416_v28 }
 0x860   : > { %v2422_v45 = vsel %vm927_vm12, %v2399_v1, -inf }
 0x861   : > { %v2403_v30 = vpop.xlane.xlu1 %2402  ;;  %2423 = vmax.xlane.f32.xlu2 %v2422_v45 }
 0x862   : > { %v2425_v18 = vsub.f32 %v2279_v32, %v2403_v30 }
 0x864   : > { %v2433_v17 = vmul.f32 1.442695, %v2425_v18 }
 0x866   : > { %4093 = vpow2.f32 %v2433_v17 }
 0x869   : > { %v2406_v61 = vpop.xlane.xlu2 %2405 }
 0x86a   : > { %v2426_v24 = vsub.f32 %v2282_v63, %v2406_v61 }
 0x86c   : > { %v5044_v55 = vpop.eup %4093  ;;  %v2435_v59 = vmul.f32 1.442695, %v2426_v24 }
 0x86d   : > { %v2449_v9 = vsel %vm927_vm12, %v5044_v55, 0.0 }
 0x86e   : > { %4095 = vpow2.f32 %v2435_v59  ;;  %2450 = vadd.xlane.f32.xlu0 %v2449_v9 }
 0x874   : > { %v5048_v13 = vpop.eup %4095 }
 0x875   : > { %v2452_v11 = vsel %vm927_vm12, %v5048_v13, 0.0 }
 0x876   : > { %2453 = vadd.xlane.f32.xlu1 %v2452_v11 }
 0x882   : > { %3952 = vrot.lane.b32.xlu0 %v4563_v54, %s4184_s24 }
 0x88b   : > { %v2409_v37 = vpop.xlane.xlu0 %2408 }
 0x88c   : > { %v2427_v32 = vsub.f32 %v2318_v43, %v2409_v37 }
 0x88e   : > { %v2437_v19 = vmul.f32 1.442695, %v2427_v32 }
 0x890   : > { %4097 = vpow2.f32 %v2437_v19 }
 0x893   : > { %v2412_v6 = vpop.xlane.xlu1 %2411 }
 0x894   : > { %v2428_v23 = vsub.f32 %v2321_v40, %v2412_v6 }
 0x896   : > { %v5054_v63 = vpop.eup %4097  ;;  %v2439_v20 = vmul.f32 1.442695, %v2428_v23 }
 0x897   : > { %v2455_v3 = vsel %vm927_vm12, %v5054_v63, 0.0 }
 0x898   : > { %4099 = vpow2.f32 %v2439_v20  ;;  %2456 = vadd.xlane.f32.xlu2 %v2455_v3 }
 0x89e   : > { %v5058_v21 = vpop.eup %4099 }
 0x89f   : > { %v2458_v42 = vsel %vm927_vm12, %v5058_v21, 0.0 }
 0x8a0   : > { %2459 = vadd.xlane.f32.xlu1 %v2458_v42 }
 0x8b9   : > { %3957 = vrot.lane.b32.xlu1 %v4556_v52, %s4184_s24 }
 0x8c9   : > { %v2415_v54 = vpop.xlane.xlu2 %2414 }
 0x8ca   : > { %v2429_v43 = vsub.f32 %v2357_v8, %v2415_v54 }
 0x8cc   : > { %v2441_v40 = vmul.f32 1.442695, %v2429_v43  ;;  %v2421_v51 = vpop.xlane.xlu1 %2420 }
 0x8cd   : > { %v2431_v27 = vsub.f32 %v2396_v12, %v2421_v51 }
 0x8ce   : > { %4101 = vpow2.f32 %v2441_v40 }
 0x8cf   : > { %v2445_v14 = vmul.f32 1.442695, %v2431_v27 }
 0x8d1   : > { %4103 = vpow2.f32 %v2445_v14  ;;  %v2418_v8 = vpop.xlane.xlu0 %2417 }
 0x8d4   : > { %v5064_v44 = vpop.eup %4101  ;;  %v2424_v16 = vpop.xlane.xlu2 %2423 }
 0x8d5   : > { %v2432_v58 = vsub.f32 %v2399_v1, %v2424_v16  ;;  %v2461_v53 = vsel %vm927_vm12, %v5064_v44, 0.0 }
 0x8d6   : > { %2462 = vadd.xlane.f32.xlu2 %v2461_v53  ;;  %v2430_v53 = vsub.f32 %v5039_v29, %v2418_v8 }
 0x8d7   : > { %v5068_v28 = vpop.eup %4103  ;;  %v2447_v45 = vmul.f32 1.442695, %v2432_v58 }
 0x8d8   : > { %v2467_v52 = vsel %vm927_vm12, %v5068_v28, 0.0 }
 0x8d9   : > { %2468 = vadd.xlane.f32.xlu0 %v2467_v52  ;;  %4105 = vpow2.f32 %v2447_v45  ;;  %v2443_v45 = vmul.f32 1.442695, %v2430_v53 }
 0x8df   : > { %v5072_v12 = vpop.eup %4105 }
 0x8e0   : > { %v2470_v1 = vsel %vm927_vm12, %v5072_v12, 0.0 }
 0x8e1   : > { %v2451_v30 = vpop.xlane.xlu0 %2450 }
 0x8e2   : > { %4107 = vrcp.f32 %v2451_v30  ;;  %v2484_v11 = vand.u32 2147483648, %v2451_v30  ;;  %vm2478_vm4 = vweird.f32 %v2451_v30  ;;  %v2482_v32 = vand.u32 2147483647, %v2451_v30 }
 0x8e3   : > { %2471 = vadd.xlane.f32.xlu1 %v2470_v1 }
 0x8e4   : > { %v2485_v23 = vor.u32 1.1754944e-38, %v2484_v11  ;;  %vm2483_vm6 = vcmp.eq.f32.partialorder %v2482_v32, 8.507059e+37 }
 0x8e8   : > { %v4108_v18 = vpop.eup %4107 }
 0x8e9   : > { %v2474_v17 = vmul.f32 %v4108_v18, %v2451_v30  ;;  %v2454_v61 = vpop.xlane.xlu1 %2453  ;;  %vm2479_vm3 = vweird.f32 %v4108_v18 }
 0x8ea   : > { %4109 = vrcp.f32 %v2454_v61  ;;  %vm2480_vm5 = vmor %vm2478_vm4, %vm2479_vm3  ;;  %vm2493_vm8 = vweird.f32 %v2454_v61  ;;  %v2497_v27 = vand.u32 2147483647, %v2454_v61 }
 0x8eb   : > { %v2475_v24 = vsub.f32 1.0, %v2474_v17  ;;  %4111 = vpow2.f32 %v2443_v45 }
 0x8ec   : > { %vm2498_vm10 = vcmp.eq.f32.partialorder %v2497_v27, 8.507059e+37 }
 0x8ed   : > { %v2476_v59 = vmul.f32 %v4108_v18, %v2475_v24  ;;  %2773 = vrot.lane.b32.xlu0 %v5010_v62, %s4185_s25 }
 0x8ee   : > { %3962 = vrot.lane.b32.xlu2 %v4579_v57, %s4184_s24  ;;  %v2499_v57 = vand.u32 2147483648, %v2454_v61 }
 0x8ef   : > { %v2477_v9 = vadd.f32 %v4108_v18, %v2476_v59 }
 0x8f0   : > { %v4110_v37 = vpop.eup %4109  ;;  %v2500_v16 = vor.u32 1.1754944e-38, %v2499_v57 }
 0x8f1   : > { %v2489_v19 = vmul.f32 %v4110_v37, %v2454_v61  ;;  %v2481_v6 = vsel %vm2480_vm5, %v4108_v18, %v2477_v9  ;;  %vm2494_vm7 = vweird.f32 %v4110_v37  ;;  %v5089_v52 = vpop.eup %4111 }
 0x8f2   : > { %v2486_v42 = vsel %vm2483_vm6, %v2485_v23, %v2481_v6  ;;  %vm2495_vm9 = vmor %vm2493_vm8, %vm2494_vm7  ;;  %v2464_v1 = vsel %vm927_vm12, %v5089_v52, 0.0 }
 0x8f3   : > { %v2490_v20 = vsub.f32 1.0, %v2489_v19  ;;  %v2487_v51 = vmul.f32 %v5044_v55, %v2486_v42 }
 0x8f4   : > { %v3953_v3 = vpop.permute.xlu0 %3952 }
 0x8f5   : > { %v2491_v54 = vmul.f32 %v4110_v37, %v2490_v20  ;;  %v3954_v43 = vunpack.i.l.bf16 %v3953_v3  ;;  %2745 = vrot.lane.b32.xlu0 %v4898_v39, %s4186_s26  ;;  %v3955_v62 = vunpack.i.h.bf16 %v3953_v3 }
 0x8f7   : > { %2619 = vmatpush.msrb.mxu0 %v3954_v43  ;;  %v2492_v40 = vadd.f32 %v4110_v37, %v2491_v54 }
 0x8f9   : > { %2620 = vmatpush.msrb.mxu0 %v3955_v62  ;;  %v2496_v14 = vsel %vm2495_vm9, %v4110_v37, %v2492_v40 }
 0x8fa   : > { %3812 = vmatmul.msk.f32.vlgmr.msrb.gmra.mxu0 %vm927_vm12, %v2487_v51  ;;  %v2501_v39 = vsel %vm2498_vm10, %v2500_v16, %v2496_v14 }
 0x8fb   : > { %v2502_v58 = vmul.f32 %v5048_v13, %v2501_v39 }
 0x8fc   : > { %2775 = vrot.lane.b32.xlu1 %v5013_v15, %s4185_s25 }
 0x902   : > { %3813 = vmatmul.msk.f32.gmra.mxu0 %vm927_vm12, %v2502_v58 }
 0x90b   : > { %v2457_v55 = vpop.xlane.xlu2 %2456 }
 0x90c   : > { %4113 = vrcp.f32 %v2457_v55  ;;  %v2514_v8 = vand.u32 2147483648, %v2457_v55  ;;  %vm2508_vm14 = vweird.f32 %v2457_v55  ;;  %v2512_v9 = vand.u32 2147483647, %v2457_v55 }
 0x90e   : > { %v2515_v32 = vor.u32 1.1754944e-38, %v2514_v8  ;;  %vm2513_vm1 = vcmp.eq.f32.partialorder %v2512_v9, 8.507059e+37 }
 0x912   : > { %v4114_v18 = vpop.eup %4113 }
 0x913   : > { %v2460_v30 = vpop.xlane.xlu1 %2459  ;;  %v2504_v15 = vmul.f32 %v4114_v18, %v2457_v55  ;;  %vm2509_vm13 = vweird.f32 %v4114_v18 }
 0x914   : > { %4115 = vrcp.f32 %v2460_v30  ;;  %vm2510_vm15 = vmor %vm2508_vm14, %vm2509_vm13  ;;  %v2529_v3 = vand.u32 2147483648, %v2460_v30  ;;  %vm2523_vm3 = vweird.f32 %v2460_v30  ;;  %v2527_v43 = vand.u32 2147483647, %v2460_v30 }
 0x915   : > { %v2505_v17 = vsub.f32 1.0, %v2504_v15 }
 0x916   : > { %v2530_v62 = vor.u32 1.1754944e-38, %v2529_v3  ;;  %vm2528_vm5 = vcmp.eq.f32.partialorder %v2527_v43, 8.507059e+37 }
 0x917   : > { %2465 = vadd.xlane.f32.xlu2 %v2464_v1  ;;  %v2506_v61 = vmul.f32 %v4114_v18, %v2505_v17 }
 0x919   : > { %v2507_v59 = vadd.f32 %v4114_v18, %v2506_v61 }
 0x91a   : > { %v4116_v13 = vpop.eup %4115 }
 0x91b   : > { %v2519_v24 = vmul.f32 %v4116_v13, %v2460_v30  ;;  %v2511_v11 = vsel %vm2510_vm15, %v4114_v18, %v2507_v59  ;;  %vm2524_vm2 = vweird.f32 %v4116_v13 }
 0x91c   : > { %v2516_v6 = vsel %vm2513_vm1, %v2515_v32, %v2511_v11  ;;  %vm2525_vm4 = vmor %vm2523_vm3, %vm2524_vm2 }
 0x91d   : > { %v2520_v29 = vsub.f32 1.0, %v2519_v24  ;;  %v2517_v54 = vmul.f32 %v5054_v63, %v2516_v6 }
 0x91f   : > { %v2521_v37 = vmul.f32 %v4116_v13, %v2520_v29 }
 0x921   : > { %v2522_v20 = vadd.f32 %v4116_v13, %v2521_v37 }
 0x923   : > { %v2526_v57 = vsel %vm2525_vm4, %v4116_v13, %v2522_v20 }
 0x924   : > { %v2531_v40 = vsel %vm2528_vm5, %v2530_v62, %v2526_v57 }
 0x925   : > { %v2532_v51 = vmul.f32 %v5058_v21, %v2531_v40 }
 0x92b   : > { %v3958_v19 = vpop.permute.xlu1 %3957 }
 0x92c   : > { %v3959_v23 = vunpack.i.l.bf16 %v3958_v19  ;;  %v3960_v42 = vunpack.i.h.bf16 %v3958_v19 }
 0x92e   : > { %2654 = vmatpush.msra.mxu1 %v3959_v23 }
 0x92f   : > { %3967 = vrot.lane.b32.xlu2 %v4567_v56, %s4184_s24  ;;  %s5502_s24 = scalar_lea.vmem %s5606_s14, %s3707_s16 }
 0x930   : > { %2655 = vmatpush.msra.mxu1 %v3960_v42 }
 0x931   : > { %3814 = vmatmul.msk.f32.vlgmr.msra.gmra.mxu1 %vm927_vm12, %v2517_v54 }
 0x937   : > { %2741 = vrot.lane.b32.xlu2 %v4867_v26, %s4186_s26 }
 0x939   : > { %3815 = vmatmul.msk.f32.gmra.mxu1 %vm927_vm12, %v2532_v51 }
 0x93f   : > { %2743 = vrot.lane.b32.xlu2 %v4871_v36, %s4186_s26 }
 0x949   : > { %v2463_v56 = vpop.xlane.xlu2 %2462 }
 0x94a   : > { %4117 = vrcp.f32 %v2463_v56  ;;  %v2544_v58 = vand.u32 2147483648, %v2463_v56  ;;  %v2542_v26 = vand.u32 2147483647, %v2463_v56  ;;  %vm2538_vm7 = vweird.f32 %v2463_v56 }
 0x94c   : > { %v2545_v55 = vor.u32 1.1754944e-38, %v2544_v58  ;;  %vm2543_vm9 = vcmp.eq.f32.partialorder %v2542_v26, 8.507059e+37  ;;  %v2469_v18 = vpop.xlane.xlu0 %2468 }
 0x94d   : > { %4119 = vrcp.f32 %v2469_v18  ;;  %v2574_v32 = vand.u32 2147483648, %v2469_v18  ;;  %vm2568_vm13 = vweird.f32 %v2469_v18  ;;  %v2572_v19 = vand.u32 2147483647, %v2469_v18 }
 0x94f   : > { %v2575_v3 = vor.u32 1.1754944e-38, %v2574_v32  ;;  %vm2573_vm15 = vcmp.eq.f32.partialorder %v2572_v19, 8.507059e+37 }
 0x950   : > { %v4118_v63 = vpop.eup %4117 }
 0x951   : > { %v2534_v27 = vmul.f32 %v4118_v63, %v2463_v56  ;;  %v3963_v14 = vpop.permute.xlu2 %3962  ;;  %vm2539_vm6 = vweird.f32 %v4118_v63 }
 0x952   : > { %v3964_v16 = vunpack.i.l.bf16 %v3963_v14  ;;  %v3965_v53 = vunpack.i.h.bf16 %v3963_v14  ;;  %vm2540_vm8 = vmor %vm2538_vm7, %vm2539_vm6 }
 0x953   : > { %v2535_v39 = vsub.f32 1.0, %v2534_v27  ;;  %v4120_v13 = vpop.eup %4119 }
 0x954   : > { %2689 = vmatpush.msra.mxu2 %v3964_v16  ;;  %v2564_v24 = vmul.f32 %v4120_v13, %v2469_v18  ;;  %vm2569_vm10 = vweird.f32 %v4120_v13 }
 0x955   : > { %v2536_v45 = vmul.f32 %v4118_v63, %v2535_v39  ;;  %vm2570_vm14 = vmor %vm2568_vm13, %vm2569_vm10 }
 0x956   : > { %2690 = vmatpush.msra.mxu2 %v3965_v53  ;;  %v2472_v17 = vpop.xlane.xlu1 %2471  ;;  %v2565_v59 = vsub.f32 1.0, %v2564_v24 }
 0x957   : > { %v2537_v21 = vadd.f32 %v4118_v63, %v2536_v45  ;;  %4121 = vrcp.f32 %v2472_v17  ;;  %vm2583_vm1 = vweird.f32 %v2472_v17  ;;  %v2589_v40 = vand.u32 2147483648, %v2472_v17 }
 0x958   : > { %v2566_v8 = vmul.f32 %v4120_v13, %v2565_v59 }
 0x959   : > { %v2541_v30 = vsel %vm2540_vm8, %v4118_v63, %v2537_v21  ;;  %v2587_v63 = vand.u32 2147483647, %v2472_v17  ;;  %v2590_v58 = vor.u32 1.1754944e-38, %v2589_v40 }
 0x95a   : > { %v2546_v36 = vsel %vm2543_vm9, %v2545_v55, %v2541_v30  ;;  %v2567_v11 = vadd.f32 %v4120_v13, %v2566_v8  ;;  %vm2845_vm9 = vcmask 195584  }
 0x95b   : > { %v2547_v1 = vmul.f32 %v5064_v44, %v2546_v36  ;;  %vm2588_vm8 = vcmp.eq.f32.partialorder %v2587_v63, 8.507059e+37 }
 0x95c   : > { %v2571_v6 = vsel %vm2570_vm14, %v4120_v13, %v2567_v11 }
 0x95d   : > { %3816 = vmatmul.msk.f32.vlgmr.msra.gmra.mxu2 %vm927_vm12, %v2547_v1  ;;  %v4122_v29 = vpop.eup %4121 }
 0x95e   : > { %v2579_v9 = vmul.f32 %v4122_v29, %v2472_v17  ;;  %vm2584_vm2 = vweird.f32 %v4122_v29 }
 0x95f   : > { %vm2585_vm4 = vmor %vm2583_vm1, %vm2584_vm2  ;;  %v2774_v18 = vpop.permute.xlu0 %2773 }
 0x960   : > { %v2580_v37 = vsub.f32 1.0, %v2579_v9 }
 0x962   : > { %v2581_v23 = vmul.f32 %v4122_v29, %v2580_v37 }
 0x964   : > { %v2582_v62 = vadd.f32 %v4122_v29, %v2581_v23 }
 0x966   : > { %v2586_v39 = vsel %vm2585_vm4, %v4122_v29, %v2582_v62 }
 0x967   : > { %v2746_v24 = vpop.permute.xlu0 %2745 }
 0x968   : > { %v2831_v29 = vsel %vm776_vm11, %v4709_v47, %v2746_v24 }
 0x977   : > { %v2622_v15 = vpop.f32.mrf.mxu0 }
 0x978   : > { %2805 = vrot.lane.b32.xlu2 %v2622_v15, %s4187_s27 }
 0x97f   : > { %v2625_v61 = vpop.f32.mrf.mxu0 }
 0x980   : > { %2807 = vrot.lane.b32.xlu2 %v2625_v61, %s4187_s27 }
 0x988   : > { %2777 = vrot.lane.b32.xlu2 %v5023_v4, %s4185_s25  ;;  %v2576_v4 = vsel %vm2573_vm15, %v2575_v3, %v2571_v6 }
 0x989   : > { %v2577_v14 = vmul.f32 %v5068_v28, %v2576_v4  ;;  %v2591_v28 = vsel %vm2588_vm8, %v2590_v58, %v2586_v39  ;;  %v4157_v4 = vld [vmem:[%s4279_s19] sm:$0xff] }
 0x98a   : > { %v2466_v44 = vpop.xlane.xlu2 %2465  ;;  %v2592_v55 = vmul.f32 %v5072_v12, %v2591_v28 }
 0x98b   : > { %4123 = vrcp.f32 %v2466_v44  ;;  %v2559_v51 = vand.u32 2147483648, %v2466_v44  ;;  %vm2553_vm5 = vweird.f32 %v2466_v44 }
 0x98d   : > { %v2560_v53 = vor.u32 1.1754944e-38, %v2559_v51 }
 0x990   : > { %2747 = vrot.lane.b32.xlu2 %v4902_v5, %s4186_s26  ;;  %v2557_v5 = vand.u32 2147483647, %v2466_v44 }
 0x991   : > { %v4124_v20 = vpop.eup %4123 }
 0x992   : > { %v2549_v42 = vmul.f32 %v4124_v20, %v2466_v44  ;;  %v3968_v54 = vpop.permute.xlu2 %3967  ;;  %vm2554_vm3 = vweird.f32 %v4124_v20  ;;  %vm2558_vm7 = vcmp.eq.f32.partialorder %v2557_v5, 8.507059e+37 }
 0x993   : > { %v3969_v43 = vunpack.i.l.bf16 %v3968_v54  ;;  %v3970_v56 = vunpack.i.h.bf16 %v3968_v54  ;;  %vm2555_vm6 = vmor %vm2553_vm5, %vm2554_vm3 }
 0x994   : > { %v2550_v57 = vsub.f32 1.0, %v2549_v42 }
 0x995   : > { %2724 = vmatpush.msra.mxu3 %v3969_v43 }
 0x996   : > { %v2551_v27 = vmul.f32 %v4124_v20, %v2550_v57 }
 0x997   : > { %2725 = vmatpush.msra.mxu3 %v3970_v56 }
 0x998   : > { %2749 = vrot.lane.b32.xlu2 %v4873_v7, %s4186_s26  ;;  %3818 = vmatmul.msk.f32.vlgmr.msra.gmra.mxu3 %vm927_vm12, %v2577_v14  ;;  %v2552_v16 = vadd.f32 %v4124_v20, %v2551_v27  ;;  %v2857_v7 = vld [vmem:[%s5597_s5 + $0x18] sm:$0xff]  ;;  %v4158_v27 = vld [vmem:[%s4279_s19 + $0x8] sm:$0xff] }
 0x999   : > { %2894 = vmatpush.msra.mxu0 %v2857_v7 }
 0x99a   : > { %v2556_v45 = vsel %vm2555_vm6, %v4124_v20, %v2552_v16  ;;  %v2742_v36 = vpop.permute.xlu2 %2741 }
 0x99b   : > { %v2561_v26 = vsel %vm2558_vm7, %v2560_v53, %v2556_v45  ;;  %v2829_v1 = vsel %vm776_vm11, %v4693_v31, %v2742_v36 }
 0x99c   : > { %v2562_v21 = vmul.f32 %v5089_v52, %v2561_v26  ;;  %v2856_v52 = vld [vmem:[%s5597_s5 + $0x10] sm:$0xff] }
 0x99d   : > { %2895 = vmatpush.msra.mxu0 %v2856_v52 }
 0x99e   : > { %3817 = vmatmul.msk.f32.gmra.mxu2 %vm927_vm12, %v2562_v21 }
 0x9a0   : > { %2751 = vrot.lane.b32.xlu2 %v4879_v46, %s4186_s26  ;;  %3819 = vmatmul.msk.f32.gmra.mxu3 %vm927_vm12, %v2592_v55  ;;  %v2855_v46 = vld [vmem:[%s5597_s5 + $0x8] sm:$0xff] }
 0x9a1   : > { %2896 = vmatpush.msra.mxu0 %v2855_v46 }
 0x9a8   : > { %2753 = vrot.lane.b32.xlu2 %v4900_v41, %s4186_s26  ;;  %v2854_v41 = vld [vmem:[%s5597_s5] sm:$0xff] }
 0x9a9   : > { %2897 = vmatpush.msra.mxu0 %v2854_v41 }
 0x9ae   : > { %v2657_v30 = vpop.f32.mrf.mxu1 }
 0x9af   : > { %2809 = vrot.lane.b32.xlu0 %v2657_v30, %s4187_s27 }
 0x9b0   : > { %2755 = vrot.lane.b32.xlu2 %v4904_v38, %s4186_s26  ;;  %v2744_v38 = vpop.permute.xlu2 %2743 }
 0x9b6   : > { %v2660_v12 = vpop.f32.mrf.mxu1 }
 0x9b7   : > { %2779 = vrot.lane.b32.xlu0 %v5025_v0, %s4185_s25  ;;  %2811 = vrot.lane.b32.xlu1 %v2660_v12, %s4187_s27  ;;  %v2837_v0 = vsel %vm927_vm12, %v2829_v1, %v2774_v18  ;;  %v4159_v12 = vld [vmem:[%s4279_s19 + $0x10] sm:$0xff] }
 0x9bf   : > { %2781 = vrot.lane.b32.xlu0 %v5029_v35, %s4185_s25  ;;  %v2830_v35 = vsel %vm776_vm11, %v4695_v33, %v2744_v38 }
 0x9c7   : > { %2783 = vrot.lane.b32.xlu0 %v5033_v2, %s4185_s25  ;;  %v2776_v2 = vpop.permute.xlu1 %2775 }
 0x9c8   : > { %v2838_v13 = vsel %vm927_vm12, %v2830_v35, %v2776_v2  ;;  %v4160_v35 = vld [vmem:[%s4279_s19 + $0x18] sm:$0xff] }
 0x9cf   : > { %2785 = vrot.lane.b32.xlu0 %v5031_v10, %s4185_s25 }
 0x9d2   : > { %v2806_v15 = vpop.permute.xlu2 %2805 }
 0x9d3   : > { %v2846_v17 = vsel %vm2845_vm9, %v2837_v0, %v2806_v15 }
 0x9d4   : > { %3820 = vmatmul.msk.f32.vlgmr.msra.gmra.mxu0 %vm481_vm0, %v2846_v17 }
 0x9d7   : > { %2787 = vrot.lane.b32.xlu0 %v5035_v60, %s4185_s25 }
 0x9da   : > { %v2808_v31 = vpop.permute.xlu2 %2807 }
 0x9db   : > { %v2847_v10 = vsel %vm2845_vm9, %v2838_v13, %v2808_v31 }
 0x9dc   : > { %3821 = vmatmul.msk.f32.gmra.mxu0 %vm481_vm0, %v2847_v10 }
 0x9e0   : > { %v2692_v61 = vpop.f32.mrf.mxu2 }
 0x9e1   : > { %2813 = vrot.lane.b32.xlu1 %v2692_v61, %s4187_s27 }
 0x9e2   : > { %v2778_v59 = vpop.permute.xlu2 %2777 }
 0x9e3   : > { %v2839_v8 = vsel %vm927_vm12, %v2831_v29, %v2778_v59 }
 0x9ea   : > { %v2748_v44 = vpop.permute.xlu2 %2747 }
 0x9eb   : > { %v2832_v37 = vsel %vm776_vm11, %v4713_v49, %v2748_v44  ;;  %v5176_v49 = vld [vmem:[%s5598_s6] ss:$0 sm:$0xff] }
 0x9f2   : > { %v2750_v20 = vpop.permute.xlu2 %2749 }
 0x9f3   : > { %v2833_v54 = vsel %vm776_vm11, %v4711_v48, %v2750_v20 }
 0x9fa   : > { %v2752_v16 = vpop.permute.xlu2 %2751 }
 0x9fb   : > { %v2834_v58 = vsel %vm776_vm11, %v4715_v50, %v2752_v16 }
 0xa02   : > { %v2754_v28 = vpop.permute.xlu2 %2753 }
 0xa03   : > { %v2835_v55 = vsel %vm776_vm11, %v4697_v34, %v2754_v28 }
 0xa0a   : > { %v2756_v50 = vpop.permute.xlu2 %2755 }
 0xa0b   : > { %v2836_v38 = vsel %vm776_vm11, %v4699_v25, %v2756_v50 }
 0xa1b   : > { %v2727_v11 = vpop.f32.mrf.mxu3 }
 0xa21   : > { %v2695_v33 = vpop.f32.mrf.mxu2  ;;  %v2810_v60 = vpop.permute.xlu0 %2809 }
 0xa22   : > { %2815 = vrot.lane.b32.xlu1 %v2695_v33, %s4187_s27  ;;  %v2848_v9 = vsel %vm2845_vm9, %v2839_v8, %v2810_v60  ;;  %v4161_v33 = vld [vmem:[%s4279_s19 + $0x20] sm:$0xff] }
 0xa23   : > { %3822 = vmatmul.msk.f32.gmra.mxu0 %vm481_vm0, %v2848_v9  ;;  %v2730_v23 = vpop.f32.mrf.mxu3 }
 0xa29   : > { %v2780_v32 = vpop.permute.xlu0 %2779  ;;  %v2812_v19 = vpop.permute.xlu1 %2811 }
 0xa2a   : > { %2817 = vrot.lane.b32.xlu1 %v2727_v11, %s4187_s27  ;;  %v2840_v47 = vsel %vm927_vm12, %v2832_v37, %v2780_v32  ;;  %v4162_v32 = vld [vmem:[%s4279_s19 + $0x28] sm:$0xff] }
 0xa2b   : > { %v2849_v6 = vsel %vm2845_vm9, %v2840_v47, %v2812_v19 }
 0xa2c   : > { %3823 = vmatmul.msk.f32.gmra.mxu0 %vm481_vm0, %v2849_v6 }
 0xa31   : > { %v2782_v3 = vpop.permute.xlu0 %2781 }
 0xa32   : > { %2819 = vrot.lane.b32.xlu1 %v2730_v23, %s4187_s27  ;;  %v2841_v57 = vsel %vm927_vm12, %v2833_v54, %v2782_v3  ;;  %v4163_v54 = vld [vmem:[%s4279_s19 + $0x30] sm:$0xff] }
 0xa39   : > { %v2784_v39 = vpop.permute.xlu0 %2783 }
 0xa3a   : > { %v2842_v53 = vsel %vm927_vm12, %v2834_v58, %v2784_v39 }
 0xa41   : > { %v2786_v21 = vpop.permute.xlu0 %2785 }
 0xa42   : > { %v2843_v7 = vsel %vm927_vm12, %v2835_v55, %v2786_v21  ;;  %v3146_v55 = vld [vmem:[%s5602_s10 + $0x18] sm:$0xff] }
 0xa43   : > { %3187 = vmatpush.msrb.mxu1 %v3146_v55 }
 0xa49   : > { %v2788_v46 = vpop.permute.xlu0 %2787 }
 0xa4a   : > { %v2844_v1 = vsel %vm927_vm12, %v2836_v38, %v2788_v46 }
 0xa51   : > { %v2899_v42 = vpop.f32.mrf.mxu0 }
 0xa52   : > { %v2923_v43 = vadd.f32 %v4157_v4, %v2899_v42 }
 0xa53   : > { %v2814_v62 = vpop.permute.xlu1 %2813 }
 0xa54   : > { %v5183_v40 = vadd.f32 %v5176_v49, %v2923_v43  ;;  %v2850_v51 = vsel %vm2845_vm9, %v2841_v57, %v2814_v62 }
 0xa55   : > { %3824 = vmatmul.msk.f32.gmra.mxu0 %vm481_vm0, %v2850_v51 }
 0xa56   : > { %v2945_v56 = vsel %vm481_vm0, %v5183_v40, 0.0 }
 0xa57   : > { %2946 = vadd.xlane.f32.xlu2 %v2945_v56 }
 0xa59   : > { %v2902_v63 = vpop.f32.mrf.mxu0 }
 0xa5a   : > { %v2924_v14 = vadd.f32 %v4158_v27, %v2902_v63 }
 0xa5c   : > { %v5191_v48 = vadd.f32 %v5176_v49, %v2924_v14 }
 0xa5e   : > { %v2948_v5 = vsel %vm481_vm0, %v5191_v48, 0.0 }
 0xa5f   : > { %2949 = vadd.xlane.f32.xlu0 %v2948_v5  ;;  %v4164_v5 = vld [vmem:[%s4279_s19 + $0x38] sm:$0xff] }
 0xa94   : > { %v2816_v45 = vpop.permute.xlu1 %2815 }
 0xa95   : > { %v2851_v26 = vsel %vm2845_vm9, %v2842_v53, %v2816_v45 }
 0xa96   : > { %3825 = vmatmul.msk.f32.gmra.mxu0 %vm481_vm0, %v2851_v26 }
 0xa9c   : > { %v2818_v52 = vpop.permute.xlu1 %2817 }
 0xa9d   : > { %v2852_v30 = vsel %vm2845_vm9, %v2843_v7, %v2818_v52  ;;  %v3144_v7 = vld [vmem:[%s5602_s10 + $0x8] sm:$0xff]  ;;  %v3143_v52 = vld [vmem:[%s5602_s10] sm:$0xff] }
 0xa9e   : > { %3826 = vmatmul.msk.f32.gmra.mxu0 %vm481_vm0, %v2852_v30 }
 0xaa0   : > { %v2905_v41 = vpop.f32.mrf.mxu0 }
 0xaa1   : > { %v2925_v36 = vadd.f32 %v4159_v12, %v2905_v41 }
 0xaa3   : > { %v5210_v34 = vadd.f32 %v5176_v49, %v2925_v36 }
 0xaa4   : > { %v2820_v18 = vpop.permute.xlu1 %2819 }
 0xaa5   : > { %v2853_v0 = vsel %vm2845_vm9, %v2844_v1, %v2820_v18  ;;  %v2951_v15 = vsel %vm481_vm0, %v5210_v34, 0.0 }
 0xaa6   : > { %3827 = vmatmul.msk.f32.gmra.mxu0 %vm481_vm0, %v2853_v0  ;;  %2952 = vadd.xlane.f32.xlu1 %v2951_v15 }
 0xaa9   : > { %v2908_v17 = vpop.f32.mrf.mxu0 }
 0xaaa   : > { %v2926_v2 = vadd.f32 %v4160_v35, %v2908_v17 }
 0xaac   : > { %v5218_v25 = vadd.f32 %v5176_v49, %v2926_v2 }
 0xaae   : > { %v2954_v31 = vsel %vm481_vm0, %v5218_v25, 0.0 }
 0xaaf   : > { %2955 = vadd.xlane.f32.xlu2 %v2954_v31  ;;  %v5297_v31 = vld [vmem:[%s5600_s8] ss:$0 sm:$0xff] }
 0xaca   : > { %v2947_v13 = vpop.xlane.xlu2 %2946 }
 0xacb   : > { %v2969_v10 = vmul.f32 %v2947_v13, %v4297_v22 }
 0xacd   : > { %v5224_v61 = vsub.f32 %v5183_v40, %v2969_v10 }
 0xacf   : > { %v2985_v24 = vmul.f32 %v5224_v61, %v5224_v61 }
 0xad1   : > { %v2993_v59 = vsel %vm481_vm0, %v2985_v24, 0.0  ;;  %v5303_v24 = vld [vmem:[%s5601_s9] ss:$0 sm:$0xff] }
 0xad2   : > { %v2911_v29 = vpop.f32.mrf.mxu0  ;;  %2994 = vadd.xlane.f32.xlu1 %v2993_v59  ;;  %v2950_v44 = vpop.xlane.xlu0 %2949 }
 0xad3   : > { %v2927_v8 = vadd.f32 %v4161_v33, %v2911_v29  ;;  %v2970_v37 = vmul.f32 %v2950_v44, %v4297_v22 }
 0xad5   : > { %v5231_v60 = vadd.f32 %v5176_v49, %v2927_v8  ;;  %v5241_v6 = vsub.f32 %v5191_v48, %v2970_v37 }
 0xad7   : > { %v2957_v9 = vsel %vm481_vm0, %v5231_v60, 0.0  ;;  %v2986_v43 = vmul.f32 %v5241_v6, %v5241_v6 }
 0xad8   : > { %2958 = vadd.xlane.f32.xlu0 %v2957_v9 }
 0xad9   : > { %v2996_v51 = vsel %vm481_vm0, %v2986_v43, 0.0 }
 0xb13   : > { %v2914_v11 = vpop.f32.mrf.mxu0 }
 0xb14   : > { %v2928_v19 = vadd.f32 %v4162_v32, %v2914_v11 }
 0xb16   : > { %v5238_v47 = vadd.f32 %v5176_v49, %v2928_v19 }
 0xb18   : > { %v2960_v23 = vsel %vm481_vm0, %v5238_v47, 0.0 }
 0xb19   : > { %2961 = vadd.xlane.f32.xlu2 %v2960_v23  ;;  %v2953_v20 = vpop.xlane.xlu1 %2952 }
 0xb1a   : > { %v2971_v42 = vmul.f32 %v2953_v20, %v4297_v22 }
 0xb1b   : > { %v2917_v3 = vpop.f32.mrf.mxu0 }
 0xb1c   : > { %v2929_v4 = vadd.f32 %v4163_v54, %v2917_v3  ;;  %v5253_v62 = vsub.f32 %v5210_v34, %v2971_v42 }
 0xb1e   : > { %v5250_v57 = vadd.f32 %v5176_v49, %v2929_v4  ;;  %v2987_v39 = vmul.f32 %v5253_v62, %v5253_v62 }
 0xb20   : > { %v2963_v56 = vsel %vm481_vm0, %v5250_v57, 0.0  ;;  %v2999_v26 = vsel %vm481_vm0, %v2987_v39, 0.0 }
 0xb21   : > { %2997 = vadd.xlane.f32.xlu2 %v2996_v51  ;;  %2964 = vadd.xlane.f32.xlu0 %v2963_v56 }
 0xb22   : > { %v2956_v63 = vpop.xlane.xlu2 %2955 }
 0xb23   : > { %v2920_v27 = vpop.f32.mrf.mxu0  ;;  %v2972_v14 = vmul.f32 %v2956_v63, %v4297_v22 }
 0xb24   : > { %v2930_v16 = vadd.f32 %v4164_v5, %v2920_v27 }
 0xb25   : > { %v5263_v58 = vsub.f32 %v5218_v25, %v2972_v14 }
 0xb26   : > { %v5266_v53 = vadd.f32 %v5176_v49, %v2930_v16  ;;  %v3145_v49 = vld [vmem:[%s5602_s10 + $0x10] sm:$0xff] }
 0xb27   : > { %v2988_v28 = vmul.f32 %v5263_v58, %v5263_v58  ;;  %3188 = vmatpush.msrb.mxu1 %v3145_v49 }
 0xb28   : > { %v2966_v45 = vsel %vm481_vm0, %v5266_v53, 0.0 }
 0xb29   : > { %2967 = vadd.xlane.f32.xlu1 %v2966_v45  ;;  %3000 = vadd.xlane.f32.xlu0 %v2999_v26  ;;  %v3002_v21 = vsel %vm481_vm0, %v2988_v28, 0.0 }
 0xb2a   : > { %3003 = vadd.xlane.f32.xlu2 %v3002_v21  ;;  %3189 = vmatpush.msrb.mxu1 %v3144_v7 }
 0xb2c   : > { %3190 = vmatpush.msrb.mxu1 %v3143_v52 }
 0xb45   : > { %v2995_v30 = vpop.xlane.xlu1 %2994 }
 0xb46   : > { %v3017_v50 = vmul.f32 %v2995_v30, %v4297_v22 }
 0xb48   : > { %v3025_v46 = vadd.f32 1e-05, %v3017_v50 }
 0xb4a   : > { %4125 = vrsqrt.f32 %v3025_v46  ;;  %vm3039_vm12 = vweird.f32 %v3025_v46 }
 0xb4b   : > { %v2959_v41 = vpop.xlane.xlu0 %2958 }
 0xb4c   : > { %v2973_v12 = vmul.f32 %v2959_v41, %v4297_v22 }
 0xb4e   : > { %v5289_v36 = vsub.f32 %v5231_v60, %v2973_v12 }
 0xb50   : > { %v4126_v38 = vpop.eup %4125  ;;  %v2989_v1 = vmul.f32 %v5289_v36, %v5289_v36 }
 0xb51   : > { %v3034_v18 = vmul.f32 %v4126_v38, %v3025_v46  ;;  %vm3040_vm11 = vweird.f32 %v4126_v38 }
 0xb52   : > { %v3005_v0 = vsel %vm481_vm0, %v2989_v1, 0.0  ;;  %vm3041_vm10 = vmor %vm3039_vm12, %vm3040_vm11 }
 0xb53   : > { %v3035_v15 = vmul.f32 %v4126_v38, %v3034_v18  ;;  %3006 = vadd.xlane.f32.xlu1 %v3005_v0 }
 0xb55   : > { %v3036_v17 = vmul.f32 0.5, %v3035_v15 }
 0xb57   : > { %v3037_v35 = vsub.f32 1.5, %v3036_v17 }
 0xb59   : > { %v3038_v2 = vmul.f32 %v4126_v38, %v3037_v35 }
 0xb5b   : > { %v3042_v13 = vsel %vm3041_vm10, %v4126_v38, %v3038_v2 }
 0xb5c   : > { %v3113_v10 = vmul.f32 %v3042_v13, %v5224_v61 }
 0xb5e   : > { %v3124_v59 = vmul.f32 %v5297_v31, %v3113_v10 }
 0xb60   : > { %v3135_v29 = vadd.f32 %v5303_v24, %v3124_v59 }
 0xb62   : > { %3828 = vmatmul.msk.f32.vlgmr.msrb.gmra.mxu1 %vm481_vm0, %v3135_v29 }
 0xb8c   : > { %v2962_v33 = vpop.xlane.xlu2 %2961 }
 0xb8d   : > { %v2974_v8 = vmul.f32 %v2962_v33, %v4297_v22 }
 0xb8f   : > { %v5310_v9 = vsub.f32 %v5238_v47, %v2974_v8 }
 0xb91   : > { %v2990_v61 = vmul.f32 %v5310_v9, %v5310_v9 }
 0xb93   : > { %v3008_v44 = vsel %vm481_vm0, %v2990_v61, 0.0 }
 0xb94   : > { %v2998_v11 = vpop.xlane.xlu2 %2997  ;;  %v2965_v37 = vpop.xlane.xlu0 %2964  ;;  %3009 = vadd.xlane.f32.xlu0 %v3008_v44 }
 0xb95   : > { %v3018_v32 = vmul.f32 %v2998_v11, %v4297_v22  ;;  %v2975_v19 = vmul.f32 %v2965_v37, %v4297_v22 }
 0xb97   : > { %v3026_v23 = vadd.f32 1e-05, %v3018_v32  ;;  %v5318_v20 = vsub.f32 %v5250_v57, %v2975_v19 }
 0xb99   : > { %4127 = vrsqrt.f32 %v3026_v23  ;;  %v2991_v3 = vmul.f32 %v5318_v20, %v5318_v20  ;;  %vm3049_vm14 = vweird.f32 %v3026_v23 }
 0xb9b   : > { %v3011_v42 = vsel %vm481_vm0, %v2991_v3, 0.0 }
 0xb9c   : > { %3012 = vadd.xlane.f32.xlu2 %v3011_v42  ;;  %v3001_v54 = vpop.xlane.xlu0 %3000  ;;  %v2968_v4 = vpop.xlane.xlu1 %2967 }
 0xb9d   : > { %v3019_v43 = vmul.f32 %v3001_v54, %v4297_v22  ;;  %v2976_v51 = vmul.f32 %v2968_v4, %v4297_v22  ;;  %v3004_v56 = vpop.xlane.xlu2 %3003  ;;  %v3574_v4 = vld [vmem:[%s5604_s12 + $0x70] sm:$0xff] }
 0xb9e   : > { %v3020_v5 = vmul.f32 %v3004_v56, %v4297_v22 }
 0xb9f   : > { %v4128_v63 = vpop.eup %4127  ;;  %v3027_v27 = vadd.f32 1e-05, %v3019_v43  ;;  %v5326_v14 = vsub.f32 %v5266_v53, %v2976_v51  ;;  %v5354_v51 = vld [vmem:[%s5603_s11] ss:$0 sm:$0xff] }
 0xba0   : > { %v3044_v16 = vmul.f32 %v4128_v63, %v3026_v23  ;;  %v3028_v39 = vadd.f32 1e-05, %v3020_v5  ;;  %vm3050_vm13 = vweird.f32 %v4128_v63 }
 0xba1   : > { %4129 = vrsqrt.f32 %v3027_v27  ;;  %v2992_v45 = vmul.f32 %v5326_v14, %v5326_v14  ;;  %vm3051_vm15 = vmor %vm3049_vm14, %vm3050_vm13  ;;  %vm3059_vm2 = vweird.f32 %v3027_v27 }
 0xba2   : > { %v3045_v26 = vmul.f32 %v4128_v63, %v3044_v16  ;;  %4131 = vrsqrt.f32 %v3028_v39  ;;  %vm3069_vm5 = vweird.f32 %v3028_v39  ;;  %v3572_v16 = vld [vmem:[%s5604_s12 + $0x60] sm:$0xff] }
 0xba3   : > { %v3014_v28 = vsel %vm481_vm0, %v2992_v45, 0.0  ;;  %v3571_v45 = vld [vmem:[%s5604_s12 + $0x58] sm:$0xff] }
 0xba4   : > { %v3046_v21 = vmul.f32 0.5, %v3045_v26  ;;  %3015 = vadd.xlane.f32.xlu1 %v3014_v28  ;;  %v3570_v28 = vld [vmem:[%s5604_s12 + $0x50] sm:$0xff] }
 0xba6   : > { %v3047_v55 = vsub.f32 1.5, %v3046_v21 }
 0xba7   : > { %v4130_v49 = vpop.eup %4129 }
 0xba8   : > { %v3048_v7 = vmul.f32 %v4128_v63, %v3047_v55  ;;  %v3054_v52 = vmul.f32 %v4130_v49, %v3027_v27  ;;  %v4132_v30 = vpop.eup %4131  ;;  %vm3060_vm1 = vweird.f32 %v4130_v49  ;;  %v3569_v55 = vld [vmem:[%s5604_s12 + $0x48] sm:$0xff] }
 0xba9   : > { %v3064_v41 = vmul.f32 %v4132_v30, %v3028_v39  ;;  %vm3070_vm3 = vweird.f32 %v4132_v30  ;;  %vm3061_vm4 = vmor %vm3059_vm2, %vm3060_vm1 }
 0xbaa   : > { %v3052_v50 = vsel %vm3051_vm15, %v4128_v63, %v3048_v7  ;;  %v3055_v46 = vmul.f32 %v4130_v49, %v3054_v52  ;;  %vm3071_vm6 = vmor %vm3069_vm5, %vm3070_vm3  ;;  %v3573_v63 = vld [vmem:[%s5604_s12 + $0x68] sm:$0xff]  ;;  %v3568_v7 = vld [vmem:[%s5604_s12 + $0x40] sm:$0xff] }
 0xbab   : > { %v3114_v12 = vmul.f32 %v3052_v50, %v5241_v6  ;;  %v3065_v1 = vmul.f32 %v4132_v30, %v3064_v41 }
 0xbac   : > { %v3056_v38 = vmul.f32 0.5, %v3055_v46  ;;  %v3566_v46 = vld [vmem:[%s5604_s12 + $0x30] sm:$0xff] }
 0xbad   : > { %v3125_v18 = vmul.f32 %v5297_v31, %v3114_v12  ;;  %v3066_v15 = vmul.f32 0.5, %v3065_v1  ;;  %v3565_v12 = vld [vmem:[%s5604_s12 + $0x28] sm:$0xff] }
 0xbae   : > { %v3057_v0 = vsub.f32 1.5, %v3056_v38 }
 0xbaf   : > { %v3136_v17 = vadd.f32 %v5303_v24, %v3125_v18  ;;  %v3067_v2 = vsub.f32 1.5, %v3066_v15  ;;  %v3564_v18 = vld [vmem:[%s5604_s12 + $0x20] sm:$0xff]  ;;  %v3563_v15 = vld [vmem:[%s5604_s12 + $0x18] sm:$0xff] }
 0xbb0   : > { %v3058_v35 = vmul.f32 %v4130_v49, %v3057_v0 }
 0xbb1   : > { %3829 = vmatmul.msk.f32.gmra.mxu1 %vm481_vm0, %v3136_v17  ;;  %v3068_v10 = vmul.f32 %v4132_v30, %v3067_v2  ;;  %v3562_v2 = vld [vmem:[%s5604_s12 + $0x10] sm:$0xff] }
 0xbb2   : > { %v3062_v13 = vsel %vm3061_vm4, %v4130_v49, %v3058_v35 }
 0xbb3   : > { %v3115_v6 = vmul.f32 %v3062_v13, %v5253_v62  ;;  %v3072_v59 = vsel %vm3071_vm6, %v4132_v30, %v3068_v10  ;;  %v3567_v30 = vld [vmem:[%s5604_s12 + $0x38] sm:$0xff]  ;;  %v3561_v10 = vld [vmem:[%s5604_s12 + $0x8] sm:$0xff] }
 0xbb4   : > { %v3116_v8 = vmul.f32 %v3072_v59, %v5263_v58  ;;  %v3575_v58 = vld [vmem:[%s5604_s12 + $0x78] sm:$0xff] }
 0xbb5   : > { %v3126_v29 = vmul.f32 %v5297_v31, %v3115_v6  ;;  %3576 = vmatpush.msrb.mxu2 %v3575_v58  ;;  %3852 = vmatpush.msrb.mxu3 %v3575_v58 }
 0xbb6   : > { %v3127_v61 = vmul.f32 %v5297_v31, %v3116_v8 }
 0xbb7   : > { %v3137_v33 = vadd.f32 %v5303_v24, %v3126_v29  ;;  %3577 = vmatpush.msrb.mxu2 %v3574_v4  ;;  %3853 = vmatpush.msrb.mxu3 %v3574_v4  ;;  %v3560_v29 = vld [vmem:[%s5604_s12] sm:$0xff] }
 0xbb8   : > { %v3138_v44 = vadd.f32 %v5303_v24, %v3127_v61 }
 0xbb9   : > { %3830 = vmatmul.msk.f32.gmra.mxu1 %vm481_vm0, %v3137_v33  ;;  %3578 = vmatpush.msrb.mxu2 %v3573_v63 }
 0xbba   : > { %3854 = vmatpush.msrb.mxu3 %v3573_v63 }
 0xbbb   : > { %3579 = vmatpush.msrb.mxu2 %v3572_v16 }
 0xbbc   : > { %3855 = vmatpush.msrb.mxu3 %v3572_v16 }
 0xbbd   : > { %3580 = vmatpush.msrb.mxu2 %v3571_v45 }
 0xbbe   : > { %3856 = vmatpush.msrb.mxu3 %v3571_v45 }
 0xbbf   : > { %3581 = vmatpush.msrb.mxu2 %v3570_v28 }
 0xbc0   : > { %3857 = vmatpush.msrb.mxu3 %v3570_v28 }
 0xbc1   : > { %3831 = vmatmul.msk.f32.gmra.mxu1 %vm481_vm0, %v3138_v44  ;;  %3582 = vmatpush.msrb.mxu2 %v3569_v55 }
 0xbc2   : > { %3858 = vmatpush.msrb.mxu3 %v3569_v55 }
 0xbc3   : > { %3583 = vmatpush.msrb.mxu2 %v3568_v7 }
 0xbc4   : > { %3859 = vmatpush.msrb.mxu3 %v3568_v7 }
 0xbc5   : > { %3584 = vmatpush.msrb.mxu2 %v3567_v30 }
 0xbc6   : > { %v3007_v11 = vpop.xlane.xlu1 %3006  ;;  %3860 = vmatpush.msrb.mxu3 %v3567_v30 }
 0xbc7   : > { %v3021_v37 = vmul.f32 %v3007_v11, %v4297_v22  ;;  %3585 = vmatpush.msrb.mxu2 %v3566_v46 }
 0xbc8   : > { %3861 = vmatpush.msrb.mxu3 %v3566_v46 }
 0xbc9   : > { %v3029_v32 = vadd.f32 1e-05, %v3021_v37  ;;  %3586 = vmatpush.msrb.mxu2 %v3565_v12 }
 0xbca   : > { %3862 = vmatpush.msrb.mxu3 %v3565_v12 }
 0xbcb   : > { %4133 = vrsqrt.f32 %v3029_v32  ;;  %vm3079_vm8 = vweird.f32 %v3029_v32  ;;  %3587 = vmatpush.msrb.mxu2 %v3564_v18 }
 0xbcc   : > { %3863 = vmatpush.msrb.mxu3 %v3564_v18 }
 0xbcd   : > { %3588 = vmatpush.msrb.mxu2 %v3563_v15 }
 0xbce   : > { %3864 = vmatpush.msrb.mxu3 %v3563_v15 }
 0xbcf   : > { %3589 = vmatpush.msrb.mxu2 %v3562_v2 }
 0xbd0   : > { %3865 = vmatpush.msrb.mxu3 %v3562_v2 }
 0xbd1   : > { %v4134_v62 = vpop.eup %4133  ;;  %3590 = vmatpush.msrb.mxu2 %v3561_v10 }
 0xbd2   : > { %v3074_v19 = vmul.f32 %v4134_v62, %v3029_v32  ;;  %vm3080_vm7 = vweird.f32 %v4134_v62  ;;  %3866 = vmatpush.msrb.mxu3 %v3561_v10 }
 0xbd3   : > { %vm3081_vm9 = vmor %vm3079_vm8, %vm3080_vm7  ;;  %3591 = vmatpush.msrb.mxu2 %v3560_v29 }
 0xbd4   : > { %v3075_v23 = vmul.f32 %v4134_v62, %v3074_v19  ;;  %3867 = vmatpush.msrb.mxu3 %v3560_v29 }
 0xbd6   : > { %v3076_v3 = vmul.f32 0.5, %v3075_v23 }
 0xbd8   : > { %v3077_v42 = vsub.f32 1.5, %v3076_v3 }
 0xbda   : > { %v3078_v54 = vmul.f32 %v4134_v62, %v3077_v42 }
 0xbdc   : > { %v3082_v43 = vsel %vm3081_vm9, %v4134_v62, %v3078_v54 }
 0xbdd   : > { %v3117_v56 = vmul.f32 %v3082_v43, %v5289_v36 }
 0xbdf   : > { %v3192_v27 = vpop.f32.mrf.mxu1  ;;  %v3128_v5 = vmul.f32 %v5297_v31, %v3117_v56 }
 0xbe0   : > { %v5365_v39 = vadd.f32 %v5354_v51, %v3192_v27 }
 0xbe1   : > { %v3139_v36 = vadd.f32 %v5303_v24, %v3128_v5 }
 0xbe2   : > { %v3224_v26 = vmul.f32 0.70710677, %v5365_v39 }
 0xbe3   : > { %3832 = vmatmul.msk.f32.gmra.mxu1 %vm481_vm0, %v3139_v36 }
 0xbe4   : > { %v5376_v21 = vclamps-f32 %v3224_v26, 4.0 }
 0xbe6   : > { %v3248_v49 = vmul.f32 %v5376_v21, %v5376_v21 }
 0xbe8   : > { %v3320_v52 = vmul.f32 -1.1791603e-07, %v3248_v49  ;;  %v3256_v1 = vmul.f32 0.00022905065, %v3248_v49 }
 0xbea   : > { %v3328_v50 = vadd.f32 2.3547966e-05, %v3320_v52  ;;  %v3264_v35 = vadd.f32 0.003408291, %v3256_v1  ;;  %v3216_v52 = vmul.f32 0.5, %v5365_v39 }
 0xbec   : > { %v3336_v41 = vmul.f32 %v3328_v50, %v3248_v49  ;;  %v3272_v59 = vmul.f32 %v3264_v35, %v3248_v49 }
 0xbee   : > { %v3344_v38 = vadd.f32 0.0010179626, %v3336_v41  ;;  %v3280_v61 = vadd.f32 0.050955694, %v3272_v59 }
 0xbf0   : > { %v3352_v0 = vmul.f32 %v3344_v38, %v3248_v49  ;;  %v3288_v37 = vmul.f32 %v3280_v61, %v3248_v49 }
 0xbf2   : > { %v3360_v17 = vadd.f32 0.01407047, %v3352_v0  ;;  %v3296_v32 = vadd.f32 0.18520832, %v3288_v37 }
 0xbf4   : > { %v3368_v13 = vmul.f32 %v3360_v17, %v3248_v49  ;;  %v3304_v19 = vmul.f32 %v3296_v32, %v3248_v49 }
 0xbf6   : > { %v3376_v6 = vadd.f32 0.11098505, %v3368_v13  ;;  %v3312_v43 = vadd.f32 1.1283791, %v3304_v19 }
 0xbf8   : > { %v3384_v33 = vmul.f32 %v3376_v6, %v3248_v49  ;;  %v3416_v16 = vmul.f32 %v5376_v21, %v3312_v43 }
 0xbfa   : > { %v3392_v8 = vadd.f32 0.49746925, %v3384_v33 }
 0xbfc   : > { %v3400_v44 = vmul.f32 %v3392_v8, %v3248_v49 }
 0xbfe   : > { %v3408_v11 = vadd.f32 1.0, %v3400_v44 }
 0xc00   : > { %4135 = vrcp.f32 %v3408_v11  ;;  %v3435_v54 = vand.u32 2147483648, %v3408_v11  ;;  %v3433_v63 = vand.u32 2147483647, %v3408_v11  ;;  %vm3429_vm12 = vweird.f32 %v3408_v11 }
 0xc02   : > { %v3436_v5 = vor.u32 1.1754944e-38, %v3435_v54  ;;  %vm3434_vm13 = vcmp.eq.f32.partialorder %v3433_v63, 8.507059e+37 }
 0xc06   : > { %v4136_v62 = vpop.eup %4135 }
 0xc07   : > { %v3425_v23 = vmul.f32 %v4136_v62, %v3408_v11  ;;  %v3010_v3 = vpop.xlane.xlu0 %3009  ;;  %vm3430_vm11 = vweird.f32 %v4136_v62 }
 0xc08   : > { %v3022_v42 = vmul.f32 %v3010_v3, %v4297_v22  ;;  %vm3431_vm10 = vmor %vm3429_vm12, %vm3430_vm11 }
 0xc09   : > { %v3426_v58 = vsub.f32 1.0, %v3425_v23 }
 0xc0a   : > { %v3030_v4 = vadd.f32 1e-05, %v3022_v42 }
 0xc0b   : > { %v3427_v56 = vmul.f32 %v4136_v62, %v3426_v58 }
 0xc0c   : > { %4137 = vrsqrt.f32 %v3030_v4  ;;  %vm3089_vm15 = vweird.f32 %v3030_v4 }
 0xc0d   : > { %v3428_v27 = vadd.f32 %v4136_v62, %v3427_v56 }
 0xc0f   : > { %v3432_v36 = vsel %vm3431_vm10, %v4136_v62, %v3428_v27  ;;  %v3013_v45 = vpop.xlane.xlu2 %3012 }
 0xc10   : > { %v3437_v26 = vsel %vm3434_vm13, %v3436_v5, %v3432_v36  ;;  %v3023_v28 = vmul.f32 %v3013_v45, %v4297_v22 }
 0xc11   : > { %v3438_v55 = vmul.f32 %v3437_v26, %v3416_v16 }
 0xc12   : > { %v4138_v49 = vpop.eup %4137  ;;  %v3031_v7 = vadd.f32 1e-05, %v3023_v28 }
 0xc13   : > { %v3544_v30 = vadd.f32 1.0, %v3438_v55  ;;  %v3084_v50 = vmul.f32 %v4138_v49, %v3030_v4  ;;  %vm3090_vm14 = vweird.f32 %v4138_v49 }
 0xc14   : > { %4139 = vrsqrt.f32 %v3031_v7  ;;  %vm3091_vm1 = vmor %vm3089_vm15, %vm3090_vm14  ;;  %vm3099_vm3 = vweird.f32 %v3031_v7 }
 0xc15   : > { %v3552_v46 = vmul.f32 %v3544_v30, %v3216_v52  ;;  %v3085_v41 = vmul.f32 %v4138_v49, %v3084_v50 }
 0xc17   : > { %v3086_v12 = vmul.f32 0.5, %v3085_v41  ;;  %3592 = vmatmul.f32.vlgmr.msrb.gmra.mxu2 %v3552_v46  ;;  %v3016_v38 = vpop.xlane.xlu1 %3015 }
 0xc18   : > { %v3024_v21 = vmul.f32 %v3016_v38, %v4297_v22 }
 0xc19   : > { %v3087_v1 = vsub.f32 1.5, %v3086_v12 }
 0xc1a   : > { %v4140_v18 = vpop.eup %4139  ;;  %v3032_v0 = vadd.f32 1e-05, %v3024_v21 }
 0xc1b   : > { %v3088_v15 = vmul.f32 %v4138_v49, %v3087_v1  ;;  %v3094_v17 = vmul.f32 %v4140_v18, %v3031_v7  ;;  %vm3100_vm2 = vweird.f32 %v4140_v18 }
 0xc1c   : > { %4141 = vrsqrt.f32 %v3032_v0  ;;  %vm3101_vm4 = vmor %vm3099_vm3, %vm3100_vm2  ;;  %vm3109_vm6 = vweird.f32 %v3032_v0 }
 0xc1d   : > { %v3092_v39 = vsel %vm3091_vm1, %v4138_v49, %v3088_v15  ;;  %v3095_v35 = vmul.f32 %v4140_v18, %v3094_v17 }
 0xc1e   : > { %v3118_v2 = vmul.f32 %v3092_v39, %v5310_v9 }
 0xc1f   : > { %v3096_v13 = vmul.f32 0.5, %v3095_v35 }
 0xc20   : > { %v3129_v10 = vmul.f32 %v5297_v31, %v3118_v2 }
 0xc21   : > { %v3097_v6 = vsub.f32 1.5, %v3096_v13 }
 0xc22   : > { %v4142_v59 = vpop.eup %4141  ;;  %v3140_v22 = vadd.f32 %v5303_v24, %v3129_v10 }
 0xc23   : > { %v3098_v29 = vmul.f32 %v4140_v18, %v3097_v6  ;;  %v3104_v33 = vmul.f32 %v4142_v59, %v3032_v0  ;;  %vm3110_vm5 = vweird.f32 %v4142_v59 }
 0xc24   : > { %3833 = vmatmul.msk.f32.gmra.mxu1 %vm481_vm0, %v3140_v22  ;;  %vm3111_vm7 = vmor %vm3109_vm6, %vm3110_vm5 }
 0xc25   : > { %v3102_v8 = vsel %vm3101_vm4, %v4140_v18, %v3098_v29  ;;  %v3105_v61 = vmul.f32 %v4142_v59, %v3104_v33 }
 0xc26   : > { %v3119_v44 = vmul.f32 %v3102_v8, %v5318_v20 }
 0xc27   : > { %v3106_v11 = vmul.f32 0.5, %v3105_v61 }
 0xc28   : > { %v3130_v9 = vmul.f32 %v5297_v31, %v3119_v44 }
 0xc29   : > { %v3107_v37 = vsub.f32 1.5, %v3106_v11 }
 0xc2a   : > { %v3141_v32 = vadd.f32 %v5303_v24, %v3130_v9 }
 0xc2b   : > { %v3108_v62 = vmul.f32 %v4142_v59, %v3107_v37 }
 0xc2c   : > { %3834 = vmatmul.msk.f32.gmra.mxu1 %vm481_vm0, %v3141_v32 }
 0xc2d   : > { %v3112_v19 = vsel %vm3111_vm7, %v4142_v59, %v3108_v62 }
 0xc2e   : > { %v3120_v23 = vmul.f32 %v3112_v19, %v5326_v14  ;;  %v3195_v3 = vpop.f32.mrf.mxu1 }
 0xc2f   : > { %v5425_v42 = vadd.f32 %v5354_v51, %v3195_v3 }
 0xc30   : > { %v3131_v20 = vmul.f32 %v5297_v31, %v3120_v23 }
 0xc31   : > { %v3225_v58 = vmul.f32 0.70710677, %v5425_v42 }
 0xc32   : > { %v3142_v54 = vadd.f32 %v5303_v24, %v3131_v20 }
 0xc33   : > { %v5430_v4 = vclamps-f32 %v3225_v58, 4.0 }
 0xc34   : > { %3835 = vmatmul.msk.f32.gmra.mxu1 %vm481_vm0, %v3142_v54 }
 0xc35   : > { %v3249_v43 = vmul.f32 %v5430_v4, %v5430_v4 }
 0xc36   : > { %v3198_v56 = vpop.f32.mrf.mxu1 }
 0xc37   : > { %v5436_v14 = vadd.f32 %v5354_v51, %v3198_v56  ;;  %v3321_v63 = vmul.f32 -1.1791603e-07, %v3249_v43  ;;  %v3257_v26 = vmul.f32 0.00022905065, %v3249_v43 }
 0xc39   : > { %v3226_v27 = vmul.f32 0.70710677, %v5436_v14  ;;  %v3329_v5 = vadd.f32 2.3547966e-05, %v3321_v63  ;;  %v3265_v50 = vadd.f32 0.003408291, %v3257_v26 }
 0xc3b   : > { %v5439_v31 = vclamps-f32 %v3226_v27, 4.0  ;;  %v3337_v16 = vmul.f32 %v3329_v5, %v3249_v43  ;;  %v3273_v18 = vmul.f32 %v3265_v50, %v3249_v43 }
 0xc3d   : > { %v5443_v24 = vmul.f32 %v5439_v31, %v5439_v31  ;;  %v3345_v45 = vadd.f32 0.0010179626, %v3337_v16  ;;  %v3281_v13 = vadd.f32 0.050955694, %v3273_v18 }
 0xc3e   : > { %v3201_v36 = vpop.f32.mrf.mxu1 }
 0xc3f   : > { %v5446_v28 = vadd.f32 %v5354_v51, %v3201_v36  ;;  %v3322_v55 = vmul.f32 -1.1791603e-07, %v5443_v24  ;;  %v3353_v49 = vmul.f32 %v3345_v45, %v3249_v43  ;;  %v3258_v0 = vmul.f32 0.00022905065, %v5443_v24 }
 0xc40   : > { %v3289_v61 = vmul.f32 %v3281_v13, %v3249_v43 }
 0xc41   : > { %v3227_v7 = vmul.f32 0.70710677, %v5446_v28  ;;  %v3361_v52 = vadd.f32 0.01407047, %v3353_v49  ;;  %v3330_v30 = vadd.f32 2.3547966e-05, %v3322_v55 }
 0xc42   : > { %v3266_v6 = vadd.f32 0.003408291, %v3258_v0  ;;  %v3297_v62 = vadd.f32 0.18520832, %v3289_v61 }
 0xc43   : > { %v5450_v46 = vclamps-f32 %v3227_v7, 4.0  ;;  %v3369_v41 = vmul.f32 %v3361_v52, %v3249_v43  ;;  %v3338_v12 = vmul.f32 %v3330_v30, %v5443_v24 }
 0xc44   : > { %v3274_v11 = vmul.f32 %v3266_v6, %v5443_v24  ;;  %v3305_v63 = vmul.f32 %v3297_v62, %v3249_v43 }
 0xc45   : > { %v5455_v38 = vmul.f32 %v5450_v46, %v5450_v46  ;;  %v3377_v21 = vadd.f32 0.11098505, %v3369_v41  ;;  %v3346_v1 = vadd.f32 0.0010179626, %v3338_v12 }
 0xc46   : > { %v3282_v3 = vadd.f32 0.050955694, %v3274_v11  ;;  %v3313_v7 = vadd.f32 1.1283791, %v3305_v63 }
 0xc47   : > { %v3385_v15 = vmul.f32 %v3377_v21, %v3249_v43  ;;  %v3354_v17 = vmul.f32 %v3346_v1, %v5443_v24  ;;  %v3323_v39 = vmul.f32 -1.1791603e-07, %v5455_v38  ;;  %v3259_v9 = vmul.f32 0.00022905065, %v5455_v38 }
 0xc48   : > { %v3290_v36 = vmul.f32 %v3282_v3, %v5443_v24  ;;  %v3417_v0 = vmul.f32 %v5430_v4, %v3313_v7 }
 0xc49   : > { %v3393_v35 = vadd.f32 0.49746925, %v3385_v15  ;;  %v3362_v2 = vadd.f32 0.01407047, %v3354_v17  ;;  %v3331_v10 = vadd.f32 2.3547966e-05, %v3323_v39 }
 0xc4a   : > { %v3267_v20 = vadd.f32 0.003408291, %v3259_v9  ;;  %v3298_v50 = vadd.f32 0.18520832, %v3290_v36 }
 0xc4b   : > { %v3401_v59 = vmul.f32 %v3393_v35, %v3249_v43  ;;  %v3370_v22 = vmul.f32 %v3362_v2, %v5443_v24  ;;  %v3339_v29 = vmul.f32 %v3331_v10, %v5455_v38 }
 0xc4c   : > { %v3275_v45 = vmul.f32 %v3267_v20, %v5455_v38  ;;  %v3306_v17 = vmul.f32 %v3298_v50, %v5443_v24 }
 0xc4d   : > { %v3409_v33 = vadd.f32 1.0, %v3401_v59  ;;  %v3378_v8 = vadd.f32 0.11098505, %v3370_v22  ;;  %v3347_v44 = vadd.f32 0.0010179626, %v3339_v29  ;;  %v3217_v29 = vmul.f32 0.5, %v5425_v42 }
 0xc4e   : > { %v3283_v12 = vadd.f32 0.050955694, %v3275_v45  ;;  %v3314_v61 = vadd.f32 1.1283791, %v3306_v17 }
 0xc4f   : > { %4143 = vrcp.f32 %v3409_v33  ;;  %v3386_v37 = vmul.f32 %v3378_v8, %v5443_v24  ;;  %v3355_v32 = vmul.f32 %v3347_v44, %v5455_v38  ;;  %v3450_v55 = vand.u32 2147483648, %v3409_v33 }
 0xc50   : > { %v3448_v30 = vand.u32 2147483647, %v3409_v33  ;;  %vm3444_vm9 = vweird.f32 %v3409_v33  ;;  %v3291_v10 = vmul.f32 %v3283_v12, %v5455_v38 }
 0xc51   : > { %v3394_v19 = vadd.f32 0.49746925, %v3386_v37  ;;  %v3363_v23 = vadd.f32 0.01407047, %v3355_v32  ;;  %v3451_v21 = vor.u32 1.1754944e-38, %v3450_v55 }
 0xc52   : > { %vm3449_vm12 = vcmp.eq.f32.partialorder %v3448_v30, 8.507059e+37  ;;  %v3299_v11 = vadd.f32 0.18520832, %v3291_v10 }
 0xc53   : > { %v3402_v58 = vmul.f32 %v3394_v19, %v5443_v24  ;;  %v3371_v54 = vmul.f32 %v3363_v23, %v5455_v38  ;;  %v3418_v23 = vmul.f32 %v5439_v31, %v3314_v61 }
 0xc54   : > { %v3307_v20 = vmul.f32 %v3299_v11, %v5455_v38 }
 0xc55   : > { %v4144_v56 = vpop.eup %4143  ;;  %v3410_v5 = vadd.f32 1.0, %v3402_v58  ;;  %v3379_v16 = vadd.f32 0.11098505, %v3371_v54 }
 0xc56   : > { %v3440_v27 = vmul.f32 %v4144_v56, %v3409_v33  ;;  %vm3445_vm8 = vweird.f32 %v4144_v56 }
 0xc57   : > { %4145 = vrcp.f32 %v3410_v5  ;;  %v3387_v49 = vmul.f32 %v3379_v16, %v5455_v38  ;;  %vm3446_vm11 = vmor %vm3444_vm9, %vm3445_vm8  ;;  %v3465_v8 = vand.u32 2147483648, %v3410_v5  ;;  %v3463_v44 = vand.u32 2147483647, %v3410_v5 }
 0xc58   : > { %v3441_v26 = vsub.f32 1.0, %v3440_v27  ;;  %vm3459_vm13 = vweird.f32 %v3410_v5 }
 0xc59   : > { %v3395_v41 = vadd.f32 0.49746925, %v3387_v49  ;;  %v3466_v42 = vor.u32 1.1754944e-38, %v3465_v8  ;;  %vm3464_vm15 = vcmp.eq.f32.partialorder %v3463_v44, 8.507059e+37 }
 0xc5a   : > { %v3442_v52 = vmul.f32 %v4144_v56, %v3441_v26  ;;  %v3315_v26 = vadd.f32 1.1283791, %v3307_v20 }
 0xc5b   : > { %v3403_v1 = vmul.f32 %v3395_v41, %v5455_v38 }
 0xc5c   : > { %v3443_v43 = vadd.f32 %v4144_v56, %v3442_v52  ;;  %v3419_v50 = vmul.f32 %v5450_v46, %v3315_v26 }
 0xc5d   : > { %v4146_v18 = vpop.eup %4145  ;;  %v3411_v13 = vadd.f32 1.0, %v3403_v1 }
 0xc5e   : > { %v3447_v15 = vsel %vm3446_vm11, %v4144_v56, %v3443_v43  ;;  %v3455_v2 = vmul.f32 %v4146_v18, %v3410_v5  ;;  %vm3460_vm10 = vweird.f32 %v4146_v18  ;;  %v3218_v5 = vmul.f32 0.5, %v5436_v14 }
 0xc5f   : > { %v3452_v35 = vsel %vm3449_vm12, %v3451_v21, %v3447_v15  ;;  %4147 = vrcp.f32 %v3411_v13  ;;  %vm3461_vm14 = vmor %vm3459_vm13, %vm3460_vm10  ;;  %v3480_v36 = vand.u32 2147483648, %v3411_v13  ;;  %v3478_v49 = vand.u32 2147483647, %v3411_v13 }
 0xc60   : > { %v3204_v39 = vpop.f32.mrf.mxu1  ;;  %v3453_v59 = vmul.f32 %v3452_v35, %v3417_v0  ;;  %v3456_v22 = vsub.f32 1.0, %v3455_v2  ;;  %vm3474_vm2 = vweird.f32 %v3411_v13 }
 0xc61   : > { %v5476_v6 = vadd.f32 %v5354_v51, %v3204_v39  ;;  %v3481_v38 = vor.u32 1.1754944e-38, %v3480_v36  ;;  %vm3479_vm4 = vcmp.eq.f32.partialorder %v3478_v49, 8.507059e+37 }
 0xc62   : > { %v3545_v33 = vadd.f32 1.0, %v3453_v59  ;;  %v3457_v24 = vmul.f32 %v4146_v18, %v3456_v22 }
 0xc63   : > { %v3228_v4 = vmul.f32 0.70710677, %v5476_v6 }
 0xc64   : > { %v3553_v37 = vmul.f32 %v3545_v33, %v3217_v29  ;;  %v3458_v32 = vadd.f32 %v4146_v18, %v3457_v24 }
 0xc65   : > { %v5480_v9 = vclamps-f32 %v3228_v4, 4.0  ;;  %v4148_v19 = vpop.eup %4147 }
 0xc66   : > { %3595 = vmatmul.f32.gmra.mxu2 %v3553_v37  ;;  %v3462_v3 = vsel %vm3461_vm14, %v4146_v18, %v3458_v32  ;;  %v3470_v54 = vmul.f32 %v4148_v19, %v3411_v13  ;;  %vm3475_vm1 = vweird.f32 %v4148_v19  ;;  %v3219_v18 = vmul.f32 0.5, %v5446_v28 }
 0xc67   : > { %v3252_v62 = vmul.f32 %v5480_v9, %v5480_v9  ;;  %v3467_v58 = vsel %vm3464_vm15, %v3466_v42, %v3462_v3  ;;  %vm3476_vm3 = vmor %vm3474_vm2, %vm3475_vm1 }
 0xc68   : > { %v3468_v56 = vmul.f32 %v3467_v58, %v3418_v23  ;;  %v3471_v27 = vsub.f32 1.0, %v3470_v54 }
 0xc69   : > { %v3324_v63 = vmul.f32 -1.1791603e-07, %v3252_v62  ;;  %v3260_v41 = vmul.f32 0.00022905065, %v3252_v62 }
 0xc6a   : > { %v3546_v16 = vadd.f32 1.0, %v3468_v56  ;;  %v3472_v55 = vmul.f32 %v4148_v19, %v3471_v27  ;;  %v5494_v56 = vld [vmem:[%s5605_s13] ss:$0 sm:$0xff] }
 0xc6b   : > { %v3332_v45 = vadd.f32 2.3547966e-05, %v3324_v63  ;;  %v3268_v0 = vadd.f32 0.003408291, %v3260_v41 }
 0xc6c   : > { %v3554_v7 = vmul.f32 %v3546_v16, %v3218_v5  ;;  %v3473_v52 = vadd.f32 %v4148_v19, %v3472_v55 }
 0xc6d   : > { %v3340_v31 = vmul.f32 %v3332_v45, %v3252_v62  ;;  %v3276_v2 = vmul.f32 %v3268_v0, %v3252_v62 }
 0xc6e   : > { %3598 = vmatmul.f32.gmra.mxu2 %v3554_v7  ;;  %v3477_v12 = vsel %vm3476_vm3, %v4148_v19, %v3473_v52 }
 0xc6f   : > { %v3348_v30 = vadd.f32 0.0010179626, %v3340_v31  ;;  %v3482_v14 = vsel %vm3479_vm4, %v3481_v38, %v3477_v12  ;;  %v3284_v59 = vadd.f32 0.050955694, %v3276_v2 }
 0xc70   : > { %v3483_v21 = vmul.f32 %v3482_v14, %v3419_v50 }
 0xc71   : > { %v3356_v43 = vmul.f32 %v3348_v30, %v3252_v62  ;;  %v3292_v29 = vmul.f32 %v3284_v59, %v3252_v62 }
 0xc72   : > { %v3547_v15 = vadd.f32 1.0, %v3483_v21 }
 0xc73   : > { %v3364_v1 = vadd.f32 0.01407047, %v3356_v43  ;;  %v3300_v4 = vadd.f32 0.18520832, %v3292_v29 }
 0xc74   : > { %v3555_v39 = vmul.f32 %v3547_v15, %v3219_v18 }
 0xc75   : > { %v3372_v17 = vmul.f32 %v3364_v1, %v3252_v62  ;;  %v3308_v8 = vmul.f32 %v3300_v4, %v3252_v62 }
 0xc76   : > { %3601 = vmatmul.f32.gmra.mxu2 %v3555_v39 }
 0xc77   : > { %v3380_v35 = vadd.f32 0.11098505, %v3372_v17  ;;  %v3316_v44 = vadd.f32 1.1283791, %v3308_v8 }
 0xc79   : > { %v3388_v13 = vmul.f32 %v3380_v35, %v3252_v62  ;;  %v3420_v19 = vmul.f32 %v5480_v9, %v3316_v44 }
 0xc7b   : > { %v3396_v10 = vadd.f32 0.49746925, %v3388_v13 }
 0xc7d   : > { %v3404_v46 = vmul.f32 %v3396_v10, %v3252_v62  ;;  %v3220_v62 = vmul.f32 0.5, %v5476_v6 }
 0xc7f   : > { %v3412_v22 = vadd.f32 1.0, %v3404_v46 }
 0xc81   : > { %4149 = vrcp.f32 %v3412_v22  ;;  %v3495_v28 = vand.u32 2147483648, %v3412_v22  ;;  %v3493_v37 = vand.u32 2147483647, %v3412_v22  ;;  %vm3489_vm6 = vweird.f32 %v3412_v22 }
 0xc83   : > { %v3496_v42 = vor.u32 1.1754944e-38, %v3495_v28  ;;  %vm3494_vm8 = vcmp.eq.f32.partialorder %v3493_v37, 8.507059e+37 }
 0xc87   : > { %v4150_v33 = vpop.eup %4149 }
 0xc88   : > { %v3485_v61 = vmul.f32 %v4150_v33, %v3412_v22  ;;  %vm3490_vm5 = vweird.f32 %v4150_v33 }
 0xc89   : > { %vm3491_vm7 = vmor %vm3489_vm6, %vm3490_vm5 }
 0xc8a   : > { %v3486_v24 = vsub.f32 1.0, %v3485_v61 }
 0xc8c   : > { %v3487_v11 = vmul.f32 %v4150_v33, %v3486_v24 }
 0xc8e   : > { %v3488_v32 = vadd.f32 %v4150_v33, %v3487_v11 }
 0xc90   : > { %v3492_v23 = vsel %vm3491_vm7, %v4150_v33, %v3488_v32 }
 0xc91   : > { %v3497_v3 = vsel %vm3494_vm8, %v3496_v42, %v3492_v23 }
 0xc92   : > { %v3498_v20 = vmul.f32 %v3497_v3, %v3420_v19 }
 0xc94   : > { %v3548_v58 = vadd.f32 1.0, %v3498_v20 }
 0xc96   : > { %v3556_v54 = vmul.f32 %v3548_v58, %v3220_v62 }
 0xc98   : > { %3604 = vmatmul.f32.gmra.mxu2 %v3556_v54 }
 0xc9a   : > { %v3593_v63 = vpop.f32.mrf.mxu2 }
 0xc9b   : > { %v3617_v27 = vadd.f32 %v3593_v63, %v5183_v40 }
 0xc9d   : > { %v3629_v6 = vadd.f32 %v5494_v56, %v3617_v27 }
 0xc9f   : > { %3637 = vst.msk [vmem:[%s5502_s24] sm:$0xff] %vm481_vm0, %v3629_v6 }
 0xca1   : > { %v3207_v9 = vpop.f32.mrf.mxu1 }
 0xca2   : > { %v5508_v5 = vadd.f32 %v5354_v51, %v3207_v9 }
 0xca4   : > { %v3229_v16 = vmul.f32 0.70710677, %v5508_v5 }
 0xca6   : > { %v5511_v36 = vclamps-f32 %v3229_v16, 4.0 }
 0xca8   : > { %v3253_v40 = vmul.f32 %v5511_v36, %v5511_v36 }
 0xca9   : > { %v3210_v45 = vpop.f32.mrf.mxu1 }
 0xcaa   : > { %v3325_v26 = vmul.f32 -1.1791603e-07, %v3253_v40  ;;  %v5516_v55 = vadd.f32 %v5354_v51, %v3210_v45  ;;  %v3261_v52 = vmul.f32 0.00022905065, %v3253_v40 }
 0xcac   : > { %v3333_v49 = vadd.f32 2.3547966e-05, %v3325_v26  ;;  %v3230_v7 = vmul.f32 0.70710677, %v5516_v55  ;;  %v3269_v43 = vadd.f32 0.003408291, %v3261_v52 }
 0xcae   : > { %v3341_v31 = vmul.f32 %v3333_v49, %v3253_v40  ;;  %v5519_v38 = vclamps-f32 %v3230_v7, 4.0  ;;  %v3277_v17 = vmul.f32 %v3269_v43, %v3253_v40 }
 0xcb0   : > { %v3349_v30 = vadd.f32 0.0010179626, %v3341_v31  ;;  %v5523_v50 = vmul.f32 %v5519_v38, %v5519_v38  ;;  %v3285_v46 = vadd.f32 0.050955694, %v3277_v17 }
 0xcb1   : > { %v3213_v41 = vpop.f32.mrf.mxu1 }
 0xcb2   : > { %v3357_v12 = vmul.f32 %v3349_v30, %v3253_v40  ;;  %v5526_v14 = vadd.f32 %v5354_v51, %v3213_v41  ;;  %v3326_v21 = vmul.f32 -1.1791603e-07, %v5523_v50  ;;  %v3262_v13 = vmul.f32 0.00022905065, %v5523_v50 }
 0xcb3   : > { %v3293_v28 = vmul.f32 %v3285_v46, %v3253_v40 }
 0xcb4   : > { %v3365_v1 = vadd.f32 0.01407047, %v3357_v12  ;;  %v3231_v18 = vmul.f32 0.70710677, %v5526_v14  ;;  %v3334_v0 = vadd.f32 2.3547966e-05, %v3326_v21 }
 0xcb5   : > { %v3270_v33 = vadd.f32 0.003408291, %v3262_v13  ;;  %v3301_v19 = vadd.f32 0.18520832, %v3293_v28 }
 0xcb6   : > { %v3373_v15 = vmul.f32 %v3365_v1, %v3253_v40  ;;  %v5530_v39 = vclamps-f32 %v3231_v18, 4.0  ;;  %v3342_v35 = vmul.f32 %v3334_v0, %v5523_v50 }
 0xcb7   : > { %v3278_v37 = vmul.f32 %v3270_v33, %v5523_v50  ;;  %v3309_v63 = vmul.f32 %v3301_v19, %v3253_v40 }
 0xcb8   : > { %v3381_v2 = vadd.f32 0.11098505, %v3373_v15  ;;  %v5536_v51 = vmul.f32 %v5530_v39, %v5530_v39  ;;  %v3350_v10 = vadd.f32 0.0010179626, %v3342_v35 }
 0xcb9   : > { %v3286_v20 = vadd.f32 0.050955694, %v3278_v37  ;;  %v3317_v31 = vadd.f32 1.1283791, %v3309_v63 }
 0xcba   : > { %v3389_v59 = vmul.f32 %v3381_v2, %v3253_v40  ;;  %v3358_v22 = vmul.f32 %v3350_v10, %v5523_v50  ;;  %v3327_v29 = vmul.f32 -1.1791603e-07, %v5536_v51  ;;  %v3263_v62 = vmul.f32 0.00022905065, %v5536_v51 }
 0xcbb   : > { %v3294_v16 = vmul.f32 %v3286_v20, %v5523_v50  ;;  %v3421_v0 = vmul.f32 %v5511_v36, %v3317_v31 }
 0xcbc   : > { %v3397_v4 = vadd.f32 0.49746925, %v3389_v59  ;;  %v3366_v8 = vadd.f32 0.01407047, %v3358_v22  ;;  %v3335_v24 = vadd.f32 2.3547966e-05, %v3327_v29 }
 0xcbd   : > { %v3271_v26 = vadd.f32 0.003408291, %v3263_v62  ;;  %v3302_v41 = vadd.f32 0.18520832, %v3294_v16 }
 0xcbe   : > { %v3405_v61 = vmul.f32 %v3397_v4, %v3253_v40  ;;  %v3374_v44 = vmul.f32 %v3366_v8, %v5523_v50  ;;  %v3343_v32 = vmul.f32 %v3335_v24, %v5536_v51  ;;  %v3221_v4 = vmul.f32 0.5, %v5508_v5 }
 0xcbf   : > { %v3279_v21 = vmul.f32 %v3271_v26, %v5536_v51  ;;  %v3310_v13 = vmul.f32 %v3302_v41, %v5523_v50 }
 0xcc0   : > { %v3413_v11 = vadd.f32 1.0, %v3405_v61  ;;  %v3382_v42 = vadd.f32 0.11098505, %v3374_v44  ;;  %v3351_v3 = vadd.f32 0.0010179626, %v3343_v32 }
 0xcc1   : > { %v3287_v10 = vadd.f32 0.050955694, %v3279_v21  ;;  %v3318_v36 = vadd.f32 1.1283791, %v3310_v13 }
 0xcc2   : > { %4151 = vrcp.f32 %v3413_v11  ;;  %v3390_v23 = vmul.f32 %v3382_v42, %v5523_v50  ;;  %v3359_v54 = vmul.f32 %v3351_v3, %v5536_v51  ;;  %v3510_v30 = vand.u32 2147483648, %v3413_v11 }
 0xcc3   : > { %v3508_v40 = vand.u32 2147483647, %v3413_v11  ;;  %vm3504_vm11 = vweird.f32 %v3413_v11  ;;  %v3295_v24 = vmul.f32 %v3287_v10, %v5536_v51  ;;  %v3422_v5 = vmul.f32 %v5519_v38, %v3318_v36 }
 0xcc4   : > { %v3398_v58 = vadd.f32 0.49746925, %v3390_v23  ;;  %v3367_v6 = vadd.f32 0.01407047, %v3359_v54  ;;  %v3511_v15 = vor.u32 1.1754944e-38, %v3510_v30  ;;  %v3222_v54 = vmul.f32 0.5, %v5516_v55 }
 0xcc5   : > { %vm3509_vm10 = vcmp.eq.f32.partialorder %v3508_v40, 8.507059e+37  ;;  %v3303_v32 = vadd.f32 0.18520832, %v3295_v24 }
 0xcc6   : > { %v3406_v27 = vmul.f32 %v3398_v58, %v5523_v50  ;;  %v3375_v7 = vmul.f32 %v3367_v6, %v5536_v51 }
 0xcc7   : > { %v3311_v62 = vmul.f32 %v3303_v32, %v5536_v51 }
 0xcc8   : > { %v4152_v9 = vpop.eup %4151  ;;  %v3414_v49 = vadd.f32 1.0, %v3406_v27  ;;  %v3383_v12 = vadd.f32 0.11098505, %v3375_v7 }
 0xcc9   : > { %v3500_v45 = vmul.f32 %v4152_v9, %v3413_v11  ;;  %vm3505_vm9 = vweird.f32 %v4152_v9  ;;  %v3319_v16 = vadd.f32 1.1283791, %v3311_v62 }
 0xcca   : > { %4153 = vrcp.f32 %v3414_v49  ;;  %v3391_v1 = vmul.f32 %v3383_v12, %v5536_v51  ;;  %vm3506_vm12 = vmor %vm3504_vm11, %vm3505_vm9  ;;  %v3525_v28 = vand.u32 2147483648, %v3414_v49  ;;  %v3523_v11 = vand.u32 2147483647, %v3414_v49 }
 0xccb   : > { %v3501_v52 = vsub.f32 1.0, %v3500_v45  ;;  %vm3519_vm14 = vweird.f32 %v3414_v49  ;;  %v3423_v7 = vmul.f32 %v5530_v39, %v3319_v16 }
 0xccc   : > { %v3399_v17 = vadd.f32 0.49746925, %v3391_v1  ;;  %v3526_v42 = vor.u32 1.1754944e-38, %v3525_v28  ;;  %vm3524_vm1 = vcmp.eq.f32.partialorder %v3523_v11, 8.507059e+37 }
 0xccd   : > { %v3502_v43 = vmul.f32 %v4152_v9, %v3501_v52  ;;  %v3223_v52 = vmul.f32 0.5, %v5526_v14 }
 0xcce   : > { %v3407_v22 = vmul.f32 %v3399_v17, %v5536_v51 }
 0xccf   : > { %v3503_v18 = vadd.f32 %v4152_v9, %v3502_v43 }
 0xcd0   : > { %v4154_v35 = vpop.eup %4153  ;;  %v3415_v8 = vadd.f32 1.0, %v3407_v22 }
 0xcd1   : > { %v3507_v2 = vsel %vm3506_vm12, %v4152_v9, %v3503_v18  ;;  %v3515_v46 = vmul.f32 %v4154_v35, %v3414_v49  ;;  %vm3520_vm13 = vweird.f32 %v4154_v35 }
 0xcd2   : > { %v3512_v59 = vsel %vm3509_vm10, %v3511_v15, %v3507_v2  ;;  %4155 = vrcp.f32 %v3415_v8  ;;  %vm3521_vm15 = vmor %vm3519_vm14, %vm3520_vm13  ;;  %v3540_v9 = vand.u32 2147483648, %v3415_v8  ;;  %v3538_v26 = vand.u32 2147483647, %v3415_v8 }
 0xcd3   : > { %v3513_v29 = vmul.f32 %v3512_v59, %v3421_v0  ;;  %v3516_v33 = vsub.f32 1.0, %v3515_v46  ;;  %vm3534_vm3 = vweird.f32 %v3415_v8 }
 0xcd4   : > { %v3541_v49 = vor.u32 1.1754944e-38, %v3540_v9  ;;  %vm3539_vm5 = vcmp.eq.f32.partialorder %v3538_v26, 8.507059e+37 }
 0xcd5   : > { %v3549_v61 = vadd.f32 1.0, %v3513_v29  ;;  %v3517_v44 = vmul.f32 %v4154_v35, %v3516_v33 }
 0xcd7   : > { %v3557_v50 = vmul.f32 %v3549_v61, %v3221_v4  ;;  %v3518_v37 = vadd.f32 %v4154_v35, %v3517_v44 }
 0xcd8   : > { %v4156_v3 = vpop.eup %4155 }
 0xcd9   : > { %3607 = vmatmul.f32.vlgmr.msrb.gmra.mxu3 %v3557_v50  ;;  %v3522_v19 = vsel %vm3521_vm15, %v4154_v35, %v3518_v37  ;;  %v3530_v58 = vmul.f32 %v4156_v3, %v3415_v8  ;;  %vm3535_vm2 = vweird.f32 %v4156_v3 }
 0xcda   : > { %v3527_v23 = vsel %vm3524_vm1, %v3526_v42, %v3522_v19  ;;  %vm3536_vm4 = vmor %vm3534_vm3, %vm3535_vm2 }
 0xcdb   : > { %v3528_v20 = vmul.f32 %v3527_v23, %v3422_v5  ;;  %v3531_v27 = vsub.f32 1.0, %v3530_v58 }
 0xcdd   : > { %v3550_v63 = vadd.f32 1.0, %v3528_v20  ;;  %v3532_v45 = vmul.f32 %v4156_v3, %v3531_v27 }
 0xcdf   : > { %v3558_v6 = vmul.f32 %v3550_v63, %v3222_v54  ;;  %v3533_v38 = vadd.f32 %v4156_v3, %v3532_v45 }
 0xce1   : > { %3610 = vmatmul.f32.gmra.mxu3 %v3558_v6  ;;  %v3537_v51 = vsel %vm3536_vm4, %v4156_v3, %v3533_v38 }
 0xce2   : > { %v3542_v55 = vsel %vm3539_vm5, %v3541_v49, %v3537_v51 }
 0xce3   : > { %v3543_v31 = vmul.f32 %v3542_v55, %v3423_v7 }
 0xce5   : > { %v3551_v30 = vadd.f32 1.0, %v3543_v31 }
 0xce7   : > { %v3559_v43 = vmul.f32 %v3551_v30, %v3223_v52 }
 0xce9   : > { %v3596_v41 = vpop.f32.mrf.mxu2  ;;  %3613 = vmatmul.f32.gmra.mxu3 %v3559_v43 }
 0xcea   : > { %v3618_v12 = vadd.f32 %v3596_v41, %v5191_v48 }
 0xcec   : > { %v3630_v40 = vadd.f32 %v5494_v56, %v3618_v12 }
 0xcee   : > { %3638 = vst.msk [vmem:[%s5502_s24 + $0x8] sm:$0xff] %vm481_vm0, %v3630_v40 }
 0xcf1   : > { %v3599_v39 = vpop.f32.mrf.mxu2 }
 0xcf2   : > { %v3619_v21 = vadd.f32 %v3599_v39, %v5210_v34 }
 0xcf4   : > { %v3631_v1 = vadd.f32 %v5494_v56, %v3619_v21 }
 0xcf6   : > { %3639 = vst.msk [vmem:[%s5502_s24 + $0x10] sm:$0xff] %vm481_vm0, %v3631_v1 }
 0xcf9   : > { %v3602_v14 = vpop.f32.mrf.mxu2 }
 0xcfa   : > { %v3620_v18 = vadd.f32 %v3602_v14, %v5218_v25 }
 0xcfc   : > { %v3632_v48 = vadd.f32 %v5494_v56, %v3620_v18 }
 0xcfe   : > { %3640 = vst.msk [vmem:[%s5502_s24 + $0x18] sm:$0xff] %vm481_vm0, %v3632_v48 }
 0xd1b   : > { %v3605_v0 = vpop.f32.mrf.mxu2 }
 0xd1c   : > { %v3621_v15 = vadd.f32 %v3605_v0, %v5231_v60 }
 0xd1e   : > { %v3633_v17 = vadd.f32 %v5494_v56, %v3621_v15 }
 0xd20   : > { %3641 = vst.msk [vmem:[%s5502_s24 + $0x20] sm:$0xff] %vm481_vm0, %v3633_v17 }
 0xd5c   : > { %v3608_v34 = vpop.f32.mrf.mxu3 }
 0xd5d   : > { %v3622_v35 = vadd.f32 %v3608_v34, %v5238_v47 }
 0xd5f   : > { %v3634_v2 = vadd.f32 %v5494_v56, %v3622_v35 }
 0xd61   : > { %3642 = vst.msk [vmem:[%s5502_s24 + $0x28] sm:$0xff] %vm481_vm0, %v3634_v2 }
 0xd64   : > { %v3611_v25 = vpop.f32.mrf.mxu3 }
 0xd65   : > { %v3623_v13 = vadd.f32 %v3611_v25, %v5250_v57 }
 0xd67   : > { %v3635_v10 = vadd.f32 %v5494_v56, %v3623_v13 }
 0xd69   : > { %3643 = vst.msk [vmem:[%s5502_s24 + $0x30] sm:$0xff] %vm481_vm0, %v3635_v10 }
 0xd6c   : > { %v3614_v59 = vpop.f32.mrf.mxu3 }
 0xd6d   : > { %v3624_v60 = vadd.f32 %v3614_v59, %v5266_v53 }
 0xd6f   : > { %v3636_v46 = vadd.f32 %v5494_v56, %v3624_v60 }
 0xd71   : > { %3644 = vst.msk [vmem:[%s5502_s24 + $0x38] sm:$0xff] %vm481_vm0, %v3636_v46 }
 0xd72 PF: > { %s24_s29 = sadd.s32 1, %s4171_s29  }
 0xd73   : > { %p21_p4 = scmp.ge.s32.totalorder %s24_s29, 4  }
 0xd75   :  { %23 = sbr.rel (!%p21_p4) target bundleno = 1 (0x1), region = 109 }

</bundles_post_ra>
